<compile_context>
chip_gen: v7x
topology: tpu7x:2x2x1
jax: 0.10.0
libtpu: 0.0.40
codegen_flags: <defaults>
</compile_context>

<pallas_src>
import functools
import math

import jax
import jax.numpy as jnp
from jax.experimental import pallas as pl
from jax.experimental.pallas import tpu as pltpu

# ---------------- small synthetic config ----------------
B, S, H = 2, 8, 32          # batch, seq, pretrained hidden_size
MODEL_HEADS = 4             # config.num_attention_heads (divides H)
ADAPTER_SIZE = 16           # args.adapter_size (== adapter encoder hidden size)
ADAPTER_HEADS = 2
ADAPTER_LAYERS = 2          # args.adapter_transformer_layers
INTERMEDIATE = 64
ADAPTER_LIST = (0, 2)       # args.adapter_list
ADAPTER_SKIP_LAYERS = 0     # args.adapter_skip_layers (0 => skip-add disabled)
N_NER = 1
LN_EPS = 1e-5
NUM_HIDDEN_STATES = 4
LANE = 128                  # lane-dense padding for the logits projection / store


# ---------------- host-side weight packing (two lane-padded slabs) ----------------
class _SlabPacker:
    """Packs every 2-D weight (row-stacked, 8-row aligned) and every 1-D param
    (one slab row each) into two (rows, 128) f32 slabs so the kernel has only a
    handful of inputs; each weight is later read via a static ref view."""

    def __init__(self):
        self._w, self._b = [], []
        self._wr, self._br = 0, 0

    def w(self, mat):
        mat = jnp.asarray(mat, jnp.float32)
        din, dout = mat.shape
        assert din % 8 == 0 and dout <= LANE, (din, dout)
        self._w.append(jnp.zeros((din, LANE), jnp.float32).at[:, :dout].set(mat))
        spec = ("w", self._wr, din, dout)
        self._wr += din
        return spec

    def b(self, vec):
        vec = jnp.asarray(vec, jnp.float32).reshape(-1)
        (n,) = vec.shape
        assert n <= LANE, n
        self._b.append(jnp.zeros((LANE,), jnp.float32).at[:n].set(vec))
        spec = ("b", self._br, 1, n)
        self._br += 1
        return spec

    def slabs(self):
        return jnp.concatenate(self._w, axis=0), jnp.stack(self._b, axis=0)


class _Fetch:
    """Reads a packed weight out of the slabs.  Works both on Pallas Refs (kernel)
    and plain jnp arrays (XLA reference): both support static slicing."""

    def __init__(self, w_slab, b_slab, approx):
        self.w_slab, self.b_slab, self.approx = w_slab, b_slab, approx

    def __call__(self, spec):
        kind, row, nrow, ncol = spec
        if kind == "w":
            return self.w_slab[row:row + nrow, :ncol]      # (nrow, ncol)
        return self.b_slab[row:row + 1, :ncol]             # (1, ncol)


# ------------- math helpers (shared by the Pallas kernel and the XLA reference) -------------
def _gelu(x):
    # TODO(synk): HF 'gelu' is erf-based; tanh-approx gelu used for Mosaic-safe transcendentals.
    c = 0.7978845608028654  # sqrt(2/pi)
    return 0.5 * x * (1.0 + jnp.tanh(c * (x + 0.044715 * x * x * x)))


def _layernorm(x, g, b, eps=LN_EPS):
    mean = jnp.mean(x, axis=-1, keepdims=True)
    xc = x - mean
    var = jnp.mean(xc * xc, axis=-1, keepdims=True)
    return xc * jax.lax.rsqrt(var + eps) * g + b


def _softmax_last(s, approx):
    m = jnp.max(s, axis=-1, keepdims=True)
    p = jnp.exp(s - m)
    den = jnp.sum(p, axis=-1, keepdims=True)
    if approx:
        return p * pl.reciprocal(den, approx=True)   # EUP slot; frees VALU divide
    return p / den


def _mm(x, w):
    """(..., din) @ (din, dout): leading dims flattened into one 2-D MXU matmul."""
    din, dout = w.shape
    lead = x.shape[:-1]
    y = jnp.dot(x.reshape(-1, din), w, preferred_element_type=jnp.float32)
    return y.reshape(*lead, dout)


def _lin(x, w, b):
    return _mm(x, w) + b


def _bdot(a, b_, dims):
    return jax.lax.dot_general(a, b_, dims, preferred_element_type=jnp.float32)


def _swap01(x):
    """(a, b, c) -> (b, a, c) built only from size-1 middle slices, unit-dim reshapes
    and a leading-axis concat (patterns that lower cleanly in Mosaic); the lane (last)
    dim is untouched.  Used only a few times per forward on tiny arrays."""
    a, bb, c = x.shape
    parts = [x[:, j:j + 1, :].reshape(a, c)[None, :, :] for j in range(bb)]
    return parts[0] if bb == 1 else jnp.concatenate(parts, axis=0)


def _bert_layer(x3, lp, W):
    """One HF BertLayer on x3: (B, S, A); attends over S; extended mask is all-zero.
    Per-head weights are pre-split host-side -> no lane-offset activation slicing."""
    a = x3.shape[-1]
    hd = a // ADAPTER_HEADS
    scale = 1.0 / math.sqrt(hd)
    attn = None
    for hp in lp["heads"]:                                # unrolled (tiny head count)
        q = _lin(x3, W(hp["q_w"]), W(hp["q_b"]))          # (B, S, hd)
        k = _lin(x3, W(hp["k_w"]), W(hp["k_b"]))
        v = _lin(x3, W(hp["v_w"]), W(hp["v_b"]))
        s = _bdot(q, k, (((2,), (2,)), ((0,), (0,)))) * scale   # (B, S, S)
        p = _softmax_last(s, W.approx)
        c = _bdot(p, v, (((2,), (1,)), ((0,), (0,))))           # (B, S, hd)
        o = _mm(c, W(hp["ao_w"]))                               # (B, S, A): folded concat
        attn = o if attn is None else attn + o
    attn = attn + W(lp["ao_b"])
    attn = _layernorm(attn + x3, W(lp["aln_g"]), W(lp["aln_b"]))      # residual + LN
    inter = _gelu(_lin(attn, W(lp["i_w"]), W(lp["i_b"])))
    out = _lin(inter, W(lp["o_w"]), W(lp["o_b"]))
    return _layernorm(out + attn, W(lp["oln_g"]), W(lp["oln_b"]))


def _adapter(h3, ap, W):
    """Adapter: down_project -> BertEncoder -> up_project + residual. h3: (B, S, H)."""
    x3 = _lin(h3, W(ap["down_w"]), W(ap["down_b"]))
    for lp in ap["layers"]:
        x3 = _bert_layer(x3, lp, W)
    up = _lin(x3, W(ap["up_w"]), W(ap["up_b"]))
    return h3 + up


def _mha_axis0(q_nle, kv_nle, mp, W):
    """nn.MultiheadAttention(batch_first=False) over axis 0 of the original (L=B, N=S, E)
    tensors.  Inputs/outputs are in batch-leading (N, L, E) layout so every contraction is
    a canonical batched dot_general; per-head in/out projections are pre-split host-side."""
    e = q_nle.shape[-1]
    hd = e // MODEL_HEADS
    scale = 1.0 / math.sqrt(hd)
    out = None
    for hp in mp["heads"]:                                # unrolled (tiny head count)
        q = _lin(q_nle, W(hp["q_w"]), W(hp["q_b"]))       # (N, L, hd)
        k = _lin(kv_nle, W(hp["k_w"]), W(hp["k_b"]))      # (N, Lk, hd)
        v = _lin(kv_nle, W(hp["v_w"]), W(hp["v_b"]))
        s = _bdot(q, k, (((2,), (2,)), ((0,), (0,)))) * scale   # (N, L, Lk)
        p = _softmax_last(s, W.approx)
        c = _bdot(p, v, (((2,), (1,)), ((0,), (0,))))           # (N, L, hd)
        o = _mm(c, W(hp["out_w"]))                              # (N, L, E): folded concat
        out = o if out is None else out + o
    return out + W(mp["out_b"])                                 # (N, L, E)


def _forward_math(sequence_output, fusion_inputs, w_slab, b_slab, specs, approx):
    """Full AdapterModel forward; returns lane-padded logits (B, LANE).

    fusion_inputs[0] is (B, S, H); fusion_inputs[i>0] are pre-swapped to (S, B, H)
    since they are only consumed as the query of the axis-0 MHA (batch-leading)."""
    W = _Fetch(w_slab, b_slab, approx)
    hidden_states_last = None
    adapter_hidden_states = []
    count = 0
    for i in range(len(ADAPTER_LIST)):
        if i == 0:
            fusion_state = fusion_inputs[0]                                  # (B, S, H)
        else:
            kv_nle = _swap01(hidden_states_last)                             # (S, B, H)
            out_nle = _mha_axis0(fusion_inputs[i], kv_nle, specs["mha"][i], W)
            fusion_state = _swap01(out_nle)                                  # (B, S, H)
        hidden_states_last = _adapter(fusion_state, specs["adapters"][i], W)
        adapter_hidden_states.append(hidden_states_last)
        count += 1
        if ADAPTER_SKIP_LAYERS >= 1 and count % ADAPTER_SKIP_LAYERS == 0:
            hidden_states_last = (hidden_states_last
                                  + adapter_hidden_states[count // ADAPTER_SKIP_LAYERS])
    # Final fusion MHA (attention[0], exactly as in the PyTorch forward) restricted to
    # the CLS column: the MHA attends over axis 0 (batch) and every sequence position n
    # is an independent MHA "batch" element; only n == 0 feeds out_proj -> exact.
    q_cls = _swap01(sequence_output[:, 0:1, :])            # (1, B, H)
    kv_cls = _swap01(hidden_states_last[:, 0:1, :])        # (1, B, H)
    com0 = _mha_axis0(q_cls, kv_cls, specs["mha"][0], W).reshape(B, H)
    return _lin(com0, W(specs["out_w"]), W(specs["out_b"]))       # (B, LANE) lane-dense


# ---------------- host-side repack: per-head split + slab packing ----------------
def _pack_params(params):
    pk = _SlabPacker()
    hd_a = ADAPTER_SIZE // ADAPTER_HEADS
    hd_m = H // MODEL_HEADS

    adapters = []
    for ap in params["adapters"]:
        layers = []
        for lp in ap["layers"]:
            heads = []
            for h in range(ADAPTER_HEADS):
                c = slice(h * hd_a, (h + 1) * hd_a)
                heads.append(dict(
                    q_w=pk.w(lp["q_w"][:, c]), q_b=pk.b(lp["q_b"][c]),
                    k_w=pk.w(lp["k_w"][:, c]), k_b=pk.b(lp["k_b"][c]),
                    v_w=pk.w(lp["v_w"][:, c]), v_b=pk.b(lp["v_b"][c]),
                    ao_w=pk.w(lp["ao_w"][c, :]),
                ))
            layers.append(dict(
                heads=heads,
                ao_b=pk.b(lp["ao_b"]),
                aln_g=pk.b(lp["aln_g"]), aln_b=pk.b(lp["aln_b"]),
                i_w=pk.w(lp["i_w"]), i_b=pk.b(lp["i_b"]),
                o_w=pk.w(lp["o_w"]), o_b=pk.b(lp["o_b"]),
                oln_g=pk.b(lp["oln_g"]), oln_b=pk.b(lp["oln_b"]),
            ))
        adapters.append(dict(
            down_w=pk.w(ap["down_w"]), down_b=pk.b(ap["down_b"]),
            up_w=pk.w(ap["up_w"]), up_b=pk.b(ap["up_b"]),
            layers=layers,
        ))

    mhas = []
    for mp in params["mha"]:
        in_w, in_b = mp["in_w"], mp["in_b"]    # (H, 3H), (3H,) in x @ W convention
        heads = []
        for h in range(MODEL_HEADS):
            c = slice(h * hd_m, (h + 1) * hd_m)
            heads.append(dict(
                q_w=pk.w(in_w[:, 0 * H:1 * H][:, c]), q_b=pk.b(in_b[0 * H:1 * H][c]),
                k_w=pk.w(in_w[:, 1 * H:2 * H][:, c]), k_b=pk.b(in_b[1 * H:2 * H][c]),
                v_w=pk.w(in_w[:, 2 * H:3 * H][:, c]), v_b=pk.b(in_b[2 * H:3 * H][c]),
                out_w=pk.w(mp["out_w"][c, :]),
            ))
        mhas.append(dict(heads=heads, out_b=pk.b(mp["out_b"])))

    out_w_pad = jnp.zeros((H, LANE), jnp.float32).at[:, :N_NER].set(params["out_w"])
    out_b_pad = jnp.zeros((LANE,), jnp.float32).at[:N_NER].set(params["out_b"])
    specs = dict(adapters=adapters, mha=mhas,
                 out_w=pk.w(out_w_pad), out_b=pk.b(out_b_pad))
    w_slab, b_slab = pk.slabs()
    return specs, w_slab, b_slab


# ---------------- the single fused Pallas kernel ----------------
def _fused_forward_kernel(*refs, specs):
    n_f = len(ADAPTER_LIST)
    seq = refs[0][...]
    fusion_inputs = [refs[1 + i][...] for i in range(n_f)]
    w_ref, b_ref, out_ref = refs[1 + n_f], refs[2 + n_f], refs[3 + n_f]
    out_ref[...] = _forward_math(seq, fusion_inputs, w_ref, b_ref, specs, approx=True)


def _prep_inputs(sequence_output, hidden_states):
    fusion_inputs = []
    for i, idx in enumerate(ADAPTER_LIST):
        hs = hidden_states[idx]
        # i > 0 inputs are only used as the MHA query -> pre-swap to batch-leading
        # (S, B, H) outside the kernel (pure layout plumbing, not compute hoisting).
        fusion_inputs.append(hs if i == 0 else jnp.swapaxes(hs, 0, 1))
    return [sequence_output, *fusion_inputs]


def adapter_model_forward(sequence_output, hidden_states, params):
    """Entire AdapterModel forward as ONE pallas_call (eval mode, returns logits)."""
    specs, w_slab, b_slab = _pack_params(params)
    inputs = [*_prep_inputs(sequence_output, hidden_states), w_slab, b_slab]
    vmem = pl.BlockSpec(memory_space=pltpu.MemorySpace.VMEM)   # whole arrays VMEM-resident
    logits_pad = pl.pallas_call(
        functools.partial(_fused_forward_kernel, specs=specs),
        in_specs=[vmem] * len(inputs),
        out_specs=vmem,
        out_shape=jax.ShapeDtypeStruct((B, LANE), jnp.float32),  # lane-dense store
    )(*inputs)
    return logits_pad[:, :N_NER]


def adapter_model_forward_reference(sequence_output, hidden_states, params):
    """Pure-XLA reference (identical math, exact softmax divide) for correctness."""
    specs, w_slab, b_slab = _pack_params(params)
    prepped = _prep_inputs(sequence_output, hidden_states)
    return _forward_math(prepped[0], prepped[1:], w_slab, b_slab,
                         specs, approx=False)[:, :N_NER]


# ---------------- deterministic parameter init ----------------
def init_params(key):
    ks = iter(jax.random.split(key, 512))

    def nrm(shape, std=0.02):
        return std * jax.random.normal(next(ks), shape, dtype=jnp.float32)

    def zeros(shape):
        return jnp.zeros(shape, jnp.float32)

    def ones(shape):
        return jnp.ones(shape, jnp.float32)

    adapters = []
    for _ in range(len(ADAPTER_LIST)):
        layers = []
        for _ in range(ADAPTER_LAYERS):
            layers.append(dict(
                q_w=nrm((ADAPTER_SIZE, ADAPTER_SIZE)), q_b=zeros((ADAPTER_SIZE,)),
                k_w=nrm((ADAPTER_SIZE, ADAPTER_SIZE)), k_b=zeros((ADAPTER_SIZE,)),
                v_w=nrm((ADAPTER_SIZE, ADAPTER_SIZE)), v_b=zeros((ADAPTER_SIZE,)),
                ao_w=nrm((ADAPTER_SIZE, ADAPTER_SIZE)), ao_b=zeros((ADAPTER_SIZE,)),
                aln_g=ones((ADAPTER_SIZE,)), aln_b=zeros((ADAPTER_SIZE,)),
                i_w=nrm((ADAPTER_SIZE, INTERMEDIATE)), i_b=zeros((INTERMEDIATE,)),
                o_w=nrm((INTERMEDIATE, ADAPTER_SIZE)), o_b=zeros((ADAPTER_SIZE,)),
                oln_g=ones((ADAPTER_SIZE,)), oln_b=zeros((ADAPTER_SIZE,)),
            ))
        adapters.append(dict(
            down_w=nrm((H, ADAPTER_SIZE), std=2e-4), down_b=zeros((ADAPTER_SIZE,)),
            up_w=nrm((ADAPTER_SIZE, H), std=2e-4), up_b=zeros((H,)),
            layers=layers,
        ))

    mhas = []
    for _ in range(len(ADAPTER_LIST)):
        mhas.append(dict(
            in_w=nrm((H, 3 * H)), in_b=zeros((3 * H,)),
            out_w=nrm((H, H)), out_b=zeros((H,)),
        ))

    return dict(adapters=adapters, mha=mhas,
                out_w=nrm((H, N_NER)), out_b=zeros((N_NER,)))


if __name__ == "__main__":
    key = jax.random.PRNGKey(0)
    kp, kx = jax.random.split(key)
    params = init_params(kp)

    xks = jax.random.split(kx, NUM_HIDDEN_STATES + 1)
    sequence_output = jax.random.normal(xks[0], (B, S, H), dtype=jnp.float32)
    hidden_states = tuple(
        jax.random.normal(xks[1 + i], (B, S, H), dtype=jnp.float32)
        for i in range(NUM_HIDDEN_STATES))

    fwd = jax.jit(adapter_model_forward)
    logits = jax.block_until_ready(fwd(sequence_output, hidden_states, params))
    assert logits.shape == (B, N_NER), logits.shape
    assert bool(jnp.all(jnp.isfinite(logits)))

    ref = jax.block_until_ready(
        jax.jit(adapter_model_forward_reference)(sequence_output, hidden_states, params))
    assert bool(jnp.allclose(logits, ref, atol=2e-2, rtol=2e-2)), (logits, ref)

    print("KERNEL_OK")
</pallas_src>

<mosaic_0001>
module attributes {stable_mosaic.version = 11 : i64} {
  func.func @_fused_forward_kernel(%arg0: memref<2x8x32xf32, #tpu.memory_space<vmem>>, %arg1: memref<2x8x32xf32, #tpu.memory_space<vmem>>, %arg2: memref<8x2x32xf32, #tpu.memory_space<vmem>>, %arg3: memref<1728x128xf32, #tpu.memory_space<vmem>>, %arg4: memref<83x128xf32, #tpu.memory_space<vmem>>, %arg5: memref<2x128xf32, #tpu.memory_space<vmem>>) attributes {dimension_semantics = [], scalar_prefetch = 0 : i64, scratch_operands = 0 : i64, tpu.core_type = #tpu.core_type<tc>} {
    %c0 = arith.constant 0 : index
    %c0_0 = arith.constant 0 : index
    %c0_1 = arith.constant 0 : index
    %0 = vector.load %arg0[%c0, %c0_0, %c0_1] : memref<2x8x32xf32, #tpu.memory_space<vmem>>, vector<2x8x32xf32>
    %c0_2 = arith.constant 0 : index
    %c0_3 = arith.constant 0 : index
    %c0_4 = arith.constant 0 : index
    %1 = vector.load %arg1[%c0_2, %c0_3, %c0_4] : memref<2x8x32xf32, #tpu.memory_space<vmem>>, vector<2x8x32xf32>
    %c0_5 = arith.constant 0 : index
    %c0_6 = arith.constant 0 : index
    %c0_7 = arith.constant 0 : index
    %2 = vector.load %arg2[%c0_5, %c0_6, %c0_7] : memref<8x2x32xf32, #tpu.memory_space<vmem>>, vector<8x2x32xf32>
    %c384 = arith.constant 384 : index
    %c0_8 = arith.constant 0 : index
    %3 = vector.load %arg3[%c384, %c0_8] : memref<1728x128xf32, #tpu.memory_space<vmem>>, vector<32x16xf32>
    %c26 = arith.constant 26 : index
    %c0_9 = arith.constant 0 : index
    %4 = vector.load %arg4[%c26, %c0_9] : memref<83x128xf32, #tpu.memory_space<vmem>>, vector<1x16xf32>
    %5 = vector.shape_cast %1 : vector<2x8x32xf32> to vector<16x32xf32>
    %cst = arith.constant dense<0.000000e+00> : vector<16x16xf32>
    %6 = tpu.matmul %5, %3, %cst {dimension_numbers = #tpu.dot_dimension_numbers<[1], [0], [0], [1], [0, 0, 1, 1], [], []>} : vector<16x32xf32>, vector<32x16xf32>, vector<16x16xf32> -> vector<16x16xf32>
    %7 = vector.shape_cast %6 : vector<16x16xf32> to vector<2x8x16xf32>
    %8 = vector.shape_cast %4 : vector<1x16xf32> to vector<1x1x16xf32>
    %9 = vector.broadcast %8 : vector<1x1x16xf32> to vector<2x8x16xf32>
    %10 = arith.addf %7, %9 : vector<2x8x16xf32>
    %c0_10 = arith.constant 0 : index
    %c0_11 = arith.constant 0 : index
    %11 = vector.load %arg3[%c0_10, %c0_11] : memref<1728x128xf32, #tpu.memory_space<vmem>>, vector<16x8xf32>
    %c0_12 = arith.constant 0 : index
    %c0_13 = arith.constant 0 : index
    %12 = vector.load %arg4[%c0_12, %c0_13] : memref<83x128xf32, #tpu.memory_space<vmem>>, vector<1x8xf32>
    %13 = vector.shape_cast %10 : vector<2x8x16xf32> to vector<16x16xf32>
    %cst_14 = arith.constant dense<0.000000e+00> : vector<16x8xf32>
    %14 = tpu.matmul %13, %11, %cst_14 {dimension_numbers = #tpu.dot_dimension_numbers<[1], [0], [0], [1], [0, 0, 1, 1], [], []>} : vector<16x16xf32>, vector<16x8xf32>, vector<16x8xf32> -> vector<16x8xf32>
    %15 = vector.shape_cast %14 : vector<16x8xf32> to vector<2x8x8xf32>
    %16 = vector.shape_cast %12 : vector<1x8xf32> to vector<1x1x8xf32>
    %17 = vector.broadcast %16 : vector<1x1x8xf32> to vector<2x8x8xf32>
    %18 = arith.addf %15, %17 : vector<2x8x8xf32>
    %c16 = arith.constant 16 : index
    %c0_15 = arith.constant 0 : index
    %19 = vector.load %arg3[%c16, %c0_15] : memref<1728x128xf32, #tpu.memory_space<vmem>>, vector<16x8xf32>
    %c1 = arith.constant 1 : index
    %c0_16 = arith.constant 0 : index
    %20 = vector.load %arg4[%c1, %c0_16] : memref<83x128xf32, #tpu.memory_space<vmem>>, vector<1x8xf32>
    %21 = vector.shape_cast %10 : vector<2x8x16xf32> to vector<16x16xf32>
    %cst_17 = arith.constant dense<0.000000e+00> : vector<16x8xf32>
    %22 = tpu.matmul %21, %19, %cst_17 {dimension_numbers = #tpu.dot_dimension_numbers<[1], [0], [0], [1], [0, 0, 1, 1], [], []>} : vector<16x16xf32>, vector<16x8xf32>, vector<16x8xf32> -> vector<16x8xf32>
    %23 = vector.shape_cast %22 : vector<16x8xf32> to vector<2x8x8xf32>
    %24 = vector.shape_cast %20 : vector<1x8xf32> to vector<1x1x8xf32>
    %25 = vector.broadcast %24 : vector<1x1x8xf32> to vector<2x8x8xf32>
    %26 = arith.addf %23, %25 : vector<2x8x8xf32>
    %c32 = arith.constant 32 : index
    %c0_18 = arith.constant 0 : index
    %27 = vector.load %arg3[%c32, %c0_18] : memref<1728x128xf32, #tpu.memory_space<vmem>>, vector<16x8xf32>
    %c2 = arith.constant 2 : index
    %c0_19 = arith.constant 0 : index
    %28 = vector.load %arg4[%c2, %c0_19] : memref<83x128xf32, #tpu.memory_space<vmem>>, vector<1x8xf32>
    %29 = vector.shape_cast %10 : vector<2x8x16xf32> to vector<16x16xf32>
    %cst_20 = arith.constant dense<0.000000e+00> : vector<16x8xf32>
    %30 = tpu.matmul %29, %27, %cst_20 {dimension_numbers = #tpu.dot_dimension_numbers<[1], [0], [0], [1], [0, 0, 1, 1], [], []>} : vector<16x16xf32>, vector<16x8xf32>, vector<16x8xf32> -> vector<16x8xf32>
    %31 = vector.shape_cast %30 : vector<16x8xf32> to vector<2x8x8xf32>
    %32 = vector.shape_cast %28 : vector<1x8xf32> to vector<1x1x8xf32>
    %33 = vector.broadcast %32 : vector<1x1x8xf32> to vector<2x8x8xf32>
    %34 = arith.addf %31, %33 : vector<2x8x8xf32>
    %cst_21 = arith.constant dense<0.000000e+00> : vector<2x8x8xf32>
    %35 = tpu.matmul %18, %26, %cst_21 {dimension_numbers = #tpu.dot_dimension_numbers<[2], [2], [1], [1], [0, 0, 0, 1, 1, 1], [0], [0]>} : vector<2x8x8xf32>, vector<2x8x8xf32>, vector<2x8x8xf32> -> vector<2x8x8xf32>
    %cst_22 = arith.constant 0.353553385 : f32
    %36 = vector.broadcast %cst_22 : f32 to vector<2x8x8xf32>
    %37 = arith.mulf %35, %36 : vector<2x8x8xf32>
    %cst_23 = arith.constant dense<0xFF800000> : vector<2x8xf32>
    %38 = vector.multi_reduction <maximumf>, %37, %cst_23 [2] : vector<2x8x8xf32> to vector<2x8xf32>
    %39 = vector.shape_cast %38 : vector<2x8xf32> to vector<2x8x1xf32>
    %40 = vector.broadcast %39 : vector<2x8x1xf32> to vector<2x8x8xf32>
    %41 = arith.subf %37, %40 : vector<2x8x8xf32>
    %42 = math.exp %41 : vector<2x8x8xf32>
    %cst_24 = arith.constant dense<0.000000e+00> : vector<2x8xf32>
    %43 = vector.multi_reduction <add>, %42, %cst_24 [2] : vector<2x8x8xf32> to vector<2x8xf32>
    %44 = vector.shape_cast %43 : vector<2x8xf32> to vector<2x8x1xf32>
    %45 = tpu.reciprocal %44 {approx = true} : vector<2x8x1xf32> -> vector<2x8x1xf32>
    %46 = vector.broadcast %45 : vector<2x8x1xf32> to vector<2x8x8xf32>
    %47 = arith.mulf %42, %46 : vector<2x8x8xf32>
    %cst_25 = arith.constant dense<0.000000e+00> : vector<2x8x8xf32>
    %48 = tpu.matmul %47, %34, %cst_25 {dimension_numbers = #tpu.dot_dimension_numbers<[2], [1], [1], [2], [0, 0, 0, 1, 1, 2], [0], [0]>} : vector<2x8x8xf32>, vector<2x8x8xf32>, vector<2x8x8xf32> -> vector<2x8x8xf32>
    %c48 = arith.constant 48 : index
    %c0_26 = arith.constant 0 : index
    %49 = vector.load %arg3[%c48, %c0_26] : memref<1728x128xf32, #tpu.memory_space<vmem>>, vector<8x16xf32>
    %50 = vector.shape_cast %48 : vector<2x8x8xf32> to vector<16x8xf32>
    %cst_27 = arith.constant dense<0.000000e+00> : vector<16x16xf32>
    %51 = tpu.matmul %50, %49, %cst_27 {dimension_numbers = #tpu.dot_dimension_numbers<[1], [0], [0], [1], [0, 0, 1, 1], [], []>} : vector<16x8xf32>, vector<8x16xf32>, vector<16x16xf32> -> vector<16x16xf32>
    %52 = vector.shape_cast %51 : vector<16x16xf32> to vector<2x8x16xf32>
    %c56 = arith.constant 56 : index
    %c0_28 = arith.constant 0 : index
    %53 = vector.load %arg3[%c56, %c0_28] : memref<1728x128xf32, #tpu.memory_space<vmem>>, vector<16x8xf32>
    %c3 = arith.constant 3 : index
    %c0_29 = arith.constant 0 : index
    %54 = vector.load %arg4[%c3, %c0_29] : memref<83x128xf32, #tpu.memory_space<vmem>>, vector<1x8xf32>
    %55 = vector.shape_cast %10 : vector<2x8x16xf32> to vector<16x16xf32>
    %cst_30 = arith.constant dense<0.000000e+00> : vector<16x8xf32>
    %56 = tpu.matmul %55, %53, %cst_30 {dimension_numbers = #tpu.dot_dimension_numbers<[1], [0], [0], [1], [0, 0, 1, 1], [], []>} : vector<16x16xf32>, vector<16x8xf32>, vector<16x8xf32> -> vector<16x8xf32>
    %57 = vector.shape_cast %56 : vector<16x8xf32> to vector<2x8x8xf32>
    %58 = vector.shape_cast %54 : vector<1x8xf32> to vector<1x1x8xf32>
    %59 = vector.broadcast %58 : vector<1x1x8xf32> to vector<2x8x8xf32>
    %60 = arith.addf %57, %59 : vector<2x8x8xf32>
    %c72 = arith.constant 72 : index
    %c0_31 = arith.constant 0 : index
    %61 = vector.load %arg3[%c72, %c0_31] : memref<1728x128xf32, #tpu.memory_space<vmem>>, vector<16x8xf32>
    %c4 = arith.constant 4 : index
    %c0_32 = arith.constant 0 : index
    %62 = vector.load %arg4[%c4, %c0_32] : memref<83x128xf32, #tpu.memory_space<vmem>>, vector<1x8xf32>
    %63 = vector.shape_cast %10 : vector<2x8x16xf32> to vector<16x16xf32>
    %cst_33 = arith.constant dense<0.000000e+00> : vector<16x8xf32>
    %64 = tpu.matmul %63, %61, %cst_33 {dimension_numbers = #tpu.dot_dimension_numbers<[1], [0], [0], [1], [0, 0, 1, 1], [], []>} : vector<16x16xf32>, vector<16x8xf32>, vector<16x8xf32> -> vector<16x8xf32>
    %65 = vector.shape_cast %64 : vector<16x8xf32> to vector<2x8x8xf32>
    %66 = vector.shape_cast %62 : vector<1x8xf32> to vector<1x1x8xf32>
    %67 = vector.broadcast %66 : vector<1x1x8xf32> to vector<2x8x8xf32>
    %68 = arith.addf %65, %67 : vector<2x8x8xf32>
    %c88 = arith.constant 88 : index
    %c0_34 = arith.constant 0 : index
    %69 = vector.load %arg3[%c88, %c0_34] : memref<1728x128xf32, #tpu.memory_space<vmem>>, vector<16x8xf32>
    %c5 = arith.constant 5 : index
    %c0_35 = arith.constant 0 : index
    %70 = vector.load %arg4[%c5, %c0_35] : memref<83x128xf32, #tpu.memory_space<vmem>>, vector<1x8xf32>
    %71 = vector.shape_cast %10 : vector<2x8x16xf32> to vector<16x16xf32>
    %cst_36 = arith.constant dense<0.000000e+00> : vector<16x8xf32>
    %72 = tpu.matmul %71, %69, %cst_36 {dimension_numbers = #tpu.dot_dimension_numbers<[1], [0], [0], [1], [0, 0, 1, 1], [], []>} : vector<16x16xf32>, vector<16x8xf32>, vector<16x8xf32> -> vector<16x8xf32>
    %73 = vector.shape_cast %72 : vector<16x8xf32> to vector<2x8x8xf32>
    %74 = vector.shape_cast %70 : vector<1x8xf32> to vector<1x1x8xf32>
    %75 = vector.broadcast %74 : vector<1x1x8xf32> to vector<2x8x8xf32>
    %76 = arith.addf %73, %75 : vector<2x8x8xf32>
    %cst_37 = arith.constant dense<0.000000e+00> : vector<2x8x8xf32>
    %77 = tpu.matmul %60, %68, %cst_37 {dimension_numbers = #tpu.dot_dimension_numbers<[2], [2], [1], [1], [0, 0, 0, 1, 1, 1], [0], [0]>} : vector<2x8x8xf32>, vector<2x8x8xf32>, vector<2x8x8xf32> -> vector<2x8x8xf32>
    %cst_38 = arith.constant 0.353553385 : f32
    %78 = vector.broadcast %cst_38 : f32 to vector<2x8x8xf32>
    %79 = arith.mulf %77, %78 : vector<2x8x8xf32>
    %cst_39 = arith.constant dense<0xFF800000> : vector<2x8xf32>
    %80 = vector.multi_reduction <maximumf>, %79, %cst_39 [2] : vector<2x8x8xf32> to vector<2x8xf32>
    %81 = vector.shape_cast %80 : vector<2x8xf32> to vector<2x8x1xf32>
    %82 = vector.broadcast %81 : vector<2x8x1xf32> to vector<2x8x8xf32>
    %83 = arith.subf %79, %82 : vector<2x8x8xf32>
    %84 = math.exp %83 : vector<2x8x8xf32>
    %cst_40 = arith.constant dense<0.000000e+00> : vector<2x8xf32>
    %85 = vector.multi_reduction <add>, %84, %cst_40 [2] : vector<2x8x8xf32> to vector<2x8xf32>
    %86 = vector.shape_cast %85 : vector<2x8xf32> to vector<2x8x1xf32>
    %87 = tpu.reciprocal %86 {approx = true} : vector<2x8x1xf32> -> vector<2x8x1xf32>
    %88 = vector.broadcast %87 : vector<2x8x1xf32> to vector<2x8x8xf32>
    %89 = arith.mulf %84, %88 : vector<2x8x8xf32>
    %cst_41 = arith.constant dense<0.000000e+00> : vector<2x8x8xf32>
    %90 = tpu.matmul %89, %76, %cst_41 {dimension_numbers = #tpu.dot_dimension_numbers<[2], [1], [1], [2], [0, 0, 0, 1, 1, 2], [0], [0]>} : vector<2x8x8xf32>, vector<2x8x8xf32>, vector<2x8x8xf32> -> vector<2x8x8xf32>
    %c104 = arith.constant 104 : index
    %c0_42 = arith.constant 0 : index
    %91 = vector.load %arg3[%c104, %c0_42] : memref<1728x128xf32, #tpu.memory_space<vmem>>, vector<8x16xf32>
    %92 = vector.shape_cast %90 : vector<2x8x8xf32> to vector<16x8xf32>
    %cst_43 = arith.constant dense<0.000000e+00> : vector<16x16xf32>
    %93 = tpu.matmul %92, %91, %cst_43 {dimension_numbers = #tpu.dot_dimension_numbers<[1], [0], [0], [1], [0, 0, 1, 1], [], []>} : vector<16x8xf32>, vector<8x16xf32>, vector<16x16xf32> -> vector<16x16xf32>
    %94 = vector.shape_cast %93 : vector<16x16xf32> to vector<2x8x16xf32>
    %95 = arith.addf %52, %94 : vector<2x8x16xf32>
    %c6 = arith.constant 6 : index
    %c0_44 = arith.constant 0 : index
    %96 = vector.load %arg4[%c6, %c0_44] : memref<83x128xf32, #tpu.memory_space<vmem>>, vector<1x16xf32>
    %97 = vector.shape_cast %96 : vector<1x16xf32> to vector<1x1x16xf32>
    %98 = vector.broadcast %97 : vector<1x1x16xf32> to vector<2x8x16xf32>
    %99 = arith.addf %95, %98 : vector<2x8x16xf32>
    %100 = arith.addf %99, %10 : vector<2x8x16xf32>
    %c7 = arith.constant 7 : index
    %c0_45 = arith.constant 0 : index
    %101 = vector.load %arg4[%c7, %c0_45] : memref<83x128xf32, #tpu.memory_space<vmem>>, vector<1x16xf32>
    %c8 = arith.constant 8 : index
    %c0_46 = arith.constant 0 : index
    %102 = vector.load %arg4[%c8, %c0_46] : memref<83x128xf32, #tpu.memory_space<vmem>>, vector<1x16xf32>
    %cst_47 = arith.constant dense<0.000000e+00> : vector<2x8xf32>
    %103 = vector.multi_reduction <add>, %100, %cst_47 [2] : vector<2x8x16xf32> to vector<2x8xf32>
    %104 = vector.shape_cast %103 : vector<2x8xf32> to vector<2x8x1xf32>
    %cst_48 = arith.constant 1.600000e+01 : f32
    %105 = vector.broadcast %cst_48 : f32 to vector<2x8x1xf32>
    %106 = arith.divf %104, %105 : vector<2x8x1xf32>
    %107 = vector.broadcast %106 : vector<2x8x1xf32> to vector<2x8x16xf32>
    %108 = arith.subf %100, %107 : vector<2x8x16xf32>
    %109 = arith.mulf %108, %108 : vector<2x8x16xf32>
    %cst_49 = arith.constant dense<0.000000e+00> : vector<2x8xf32>
    %110 = vector.multi_reduction <add>, %109, %cst_49 [2] : vector<2x8x16xf32> to vector<2x8xf32>
    %111 = vector.shape_cast %110 : vector<2x8xf32> to vector<2x8x1xf32>
    %cst_50 = arith.constant 1.600000e+01 : f32
    %112 = vector.broadcast %cst_50 : f32 to vector<2x8x1xf32>
    %113 = arith.divf %111, %112 : vector<2x8x1xf32>
    %cst_51 = arith.constant 9.99999974E-6 : f32
    %114 = vector.broadcast %cst_51 : f32 to vector<2x8x1xf32>
    %115 = arith.addf %113, %114 : vector<2x8x1xf32>
    %116 = math.rsqrt %115 : vector<2x8x1xf32>
    %117 = vector.broadcast %116 : vector<2x8x1xf32> to vector<2x8x16xf32>
    %118 = arith.mulf %108, %117 : vector<2x8x16xf32>
    %119 = vector.shape_cast %101 : vector<1x16xf32> to vector<1x1x16xf32>
    %120 = vector.broadcast %119 : vector<1x1x16xf32> to vector<2x8x16xf32>
    %121 = arith.mulf %118, %120 : vector<2x8x16xf32>
    %122 = vector.shape_cast %102 : vector<1x16xf32> to vector<1x1x16xf32>
    %123 = vector.broadcast %122 : vector<1x1x16xf32> to vector<2x8x16xf32>
    %124 = arith.addf %121, %123 : vector<2x8x16xf32>
    %c112 = arith.constant 112 : index
    %c0_52 = arith.constant 0 : index
    %125 = vector.load %arg3[%c112, %c0_52] : memref<1728x128xf32, #tpu.memory_space<vmem>>, vector<16x64xf32>
    %c9 = arith.constant 9 : index
    %c0_53 = arith.constant 0 : index
    %126 = vector.load %arg4[%c9, %c0_53] : memref<83x128xf32, #tpu.memory_space<vmem>>, vector<1x64xf32>
    %127 = vector.shape_cast %124 : vector<2x8x16xf32> to vector<16x16xf32>
    %cst_54 = arith.constant dense<0.000000e+00> : vector<16x64xf32>
    %128 = tpu.matmul %127, %125, %cst_54 {dimension_numbers = #tpu.dot_dimension_numbers<[1], [0], [0], [1], [0, 0, 1, 1], [], []>} : vector<16x16xf32>, vector<16x64xf32>, vector<16x64xf32> -> vector<16x64xf32>
    %129 = vector.shape_cast %128 : vector<16x64xf32> to vector<2x8x64xf32>
    %130 = vector.shape_cast %126 : vector<1x64xf32> to vector<1x1x64xf32>
    %131 = vector.broadcast %130 : vector<1x1x64xf32> to vector<2x8x64xf32>
    %132 = arith.addf %129, %131 : vector<2x8x64xf32>
    %cst_55 = arith.constant 5.000000e-01 : f32
    %133 = vector.broadcast %cst_55 : f32 to vector<2x8x64xf32>
    %134 = arith.mulf %133, %132 : vector<2x8x64xf32>
    %cst_56 = arith.constant 4.471500e-02 : f32
    %135 = vector.broadcast %cst_56 : f32 to vector<2x8x64xf32>
    %136 = arith.mulf %135, %132 : vector<2x8x64xf32>
    %137 = arith.mulf %136, %132 : vector<2x8x64xf32>
    %138 = arith.mulf %137, %132 : vector<2x8x64xf32>
    %139 = arith.addf %132, %138 : vector<2x8x64xf32>
    %cst_57 = arith.constant 0.797884583 : f32
    %140 = vector.broadcast %cst_57 : f32 to vector<2x8x64xf32>
    %141 = arith.mulf %140, %139 : vector<2x8x64xf32>
    %142 = math.tanh %141 : vector<2x8x64xf32>
    %cst_58 = arith.constant 1.000000e+00 : f32
    %143 = vector.broadcast %cst_58 : f32 to vector<2x8x64xf32>
    %144 = arith.addf %143, %142 : vector<2x8x64xf32>
    %145 = arith.mulf %134, %144 : vector<2x8x64xf32>
    %c128 = arith.constant 128 : index
    %c0_59 = arith.constant 0 : index
    %146 = vector.load %arg3[%c128, %c0_59] : memref<1728x128xf32, #tpu.memory_space<vmem>>, vector<64x16xf32>
    %c10 = arith.constant 10 : index
    %c0_60 = arith.constant 0 : index
    %147 = vector.load %arg4[%c10, %c0_60] : memref<83x128xf32, #tpu.memory_space<vmem>>, vector<1x16xf32>
    %148 = vector.shape_cast %145 : vector<2x8x64xf32> to vector<16x64xf32>
    %cst_61 = arith.constant dense<0.000000e+00> : vector<16x16xf32>
    %149 = tpu.matmul %148, %146, %cst_61 {dimension_numbers = #tpu.dot_dimension_numbers<[1], [0], [0], [1], [0, 0, 1, 1], [], []>} : vector<16x64xf32>, vector<64x16xf32>, vector<16x16xf32> -> vector<16x16xf32>
    %150 = vector.shape_cast %149 : vector<16x16xf32> to vector<2x8x16xf32>
    %151 = vector.shape_cast %147 : vector<1x16xf32> to vector<1x1x16xf32>
    %152 = vector.broadcast %151 : vector<1x1x16xf32> to vector<2x8x16xf32>
    %153 = arith.addf %150, %152 : vector<2x8x16xf32>
    %154 = arith.addf %153, %124 : vector<2x8x16xf32>
    %c11 = arith.constant 11 : index
    %c0_62 = arith.constant 0 : index
    %155 = vector.load %arg4[%c11, %c0_62] : memref<83x128xf32, #tpu.memory_space<vmem>>, vector<1x16xf32>
    %c12 = arith.constant 12 : index
    %c0_63 = arith.constant 0 : index
    %156 = vector.load %arg4[%c12, %c0_63] : memref<83x128xf32, #tpu.memory_space<vmem>>, vector<1x16xf32>
    %cst_64 = arith.constant dense<0.000000e+00> : vector<2x8xf32>
    %157 = vector.multi_reduction <add>, %154, %cst_64 [2] : vector<2x8x16xf32> to vector<2x8xf32>
    %158 = vector.shape_cast %157 : vector<2x8xf32> to vector<2x8x1xf32>
    %cst_65 = arith.constant 1.600000e+01 : f32
    %159 = vector.broadcast %cst_65 : f32 to vector<2x8x1xf32>
    %160 = arith.divf %158, %159 : vector<2x8x1xf32>
    %161 = vector.broadcast %160 : vector<2x8x1xf32> to vector<2x8x16xf32>
    %162 = arith.subf %154, %161 : vector<2x8x16xf32>
    %163 = arith.mulf %162, %162 : vector<2x8x16xf32>
    %cst_66 = arith.constant dense<0.000000e+00> : vector<2x8xf32>
    %164 = vector.multi_reduction <add>, %163, %cst_66 [2] : vector<2x8x16xf32> to vector<2x8xf32>
    %165 = vector.shape_cast %164 : vector<2x8xf32> to vector<2x8x1xf32>
    %cst_67 = arith.constant 1.600000e+01 : f32
    %166 = vector.broadcast %cst_67 : f32 to vector<2x8x1xf32>
    %167 = arith.divf %165, %166 : vector<2x8x1xf32>
    %cst_68 = arith.constant 9.99999974E-6 : f32
    %168 = vector.broadcast %cst_68 : f32 to vector<2x8x1xf32>
    %169 = arith.addf %167, %168 : vector<2x8x1xf32>
    %170 = math.rsqrt %169 : vector<2x8x1xf32>
    %171 = vector.broadcast %170 : vector<2x8x1xf32> to vector<2x8x16xf32>
    %172 = arith.mulf %162, %171 : vector<2x8x16xf32>
    %173 = vector.shape_cast %155 : vector<1x16xf32> to vector<1x1x16xf32>
    %174 = vector.broadcast %173 : vector<1x1x16xf32> to vector<2x8x16xf32>
    %175 = arith.mulf %172, %174 : vector<2x8x16xf32>
    %176 = vector.shape_cast %156 : vector<1x16xf32> to vector<1x1x16xf32>
    %177 = vector.broadcast %176 : vector<1x1x16xf32> to vector<2x8x16xf32>
    %178 = arith.addf %175, %177 : vector<2x8x16xf32>
    %c192 = arith.constant 192 : index
    %c0_69 = arith.constant 0 : index
    %179 = vector.load %arg3[%c192, %c0_69] : memref<1728x128xf32, #tpu.memory_space<vmem>>, vector<16x8xf32>
    %c13 = arith.constant 13 : index
    %c0_70 = arith.constant 0 : index
    %180 = vector.load %arg4[%c13, %c0_70] : memref<83x128xf32, #tpu.memory_space<vmem>>, vector<1x8xf32>
    %181 = vector.shape_cast %178 : vector<2x8x16xf32> to vector<16x16xf32>
    %cst_71 = arith.constant dense<0.000000e+00> : vector<16x8xf32>
    %182 = tpu.matmul %181, %179, %cst_71 {dimension_numbers = #tpu.dot_dimension_numbers<[1], [0], [0], [1], [0, 0, 1, 1], [], []>} : vector<16x16xf32>, vector<16x8xf32>, vector<16x8xf32> -> vector<16x8xf32>
    %183 = vector.shape_cast %182 : vector<16x8xf32> to vector<2x8x8xf32>
    %184 = vector.shape_cast %180 : vector<1x8xf32> to vector<1x1x8xf32>
    %185 = vector.broadcast %184 : vector<1x1x8xf32> to vector<2x8x8xf32>
    %186 = arith.addf %183, %185 : vector<2x8x8xf32>
    %c208 = arith.constant 208 : index
    %c0_72 = arith.constant 0 : index
    %187 = vector.load %arg3[%c208, %c0_72] : memref<1728x128xf32, #tpu.memory_space<vmem>>, vector<16x8xf32>
    %c14 = arith.constant 14 : index
    %c0_73 = arith.constant 0 : index
    %188 = vector.load %arg4[%c14, %c0_73] : memref<83x128xf32, #tpu.memory_space<vmem>>, vector<1x8xf32>
    %189 = vector.shape_cast %178 : vector<2x8x16xf32> to vector<16x16xf32>
    %cst_74 = arith.constant dense<0.000000e+00> : vector<16x8xf32>
    %190 = tpu.matmul %189, %187, %cst_74 {dimension_numbers = #tpu.dot_dimension_numbers<[1], [0], [0], [1], [0, 0, 1, 1], [], []>} : vector<16x16xf32>, vector<16x8xf32>, vector<16x8xf32> -> vector<16x8xf32>
    %191 = vector.shape_cast %190 : vector<16x8xf32> to vector<2x8x8xf32>
    %192 = vector.shape_cast %188 : vector<1x8xf32> to vector<1x1x8xf32>
    %193 = vector.broadcast %192 : vector<1x1x8xf32> to vector<2x8x8xf32>
    %194 = arith.addf %191, %193 : vector<2x8x8xf32>
    %c224 = arith.constant 224 : index
    %c0_75 = arith.constant 0 : index
    %195 = vector.load %arg3[%c224, %c0_75] : memref<1728x128xf32, #tpu.memory_space<vmem>>, vector<16x8xf32>
    %c15 = arith.constant 15 : index
    %c0_76 = arith.constant 0 : index
    %196 = vector.load %arg4[%c15, %c0_76] : memref<83x128xf32, #tpu.memory_space<vmem>>, vector<1x8xf32>
    %197 = vector.shape_cast %178 : vector<2x8x16xf32> to vector<16x16xf32>
    %cst_77 = arith.constant dense<0.000000e+00> : vector<16x8xf32>
    %198 = tpu.matmul %197, %195, %cst_77 {dimension_numbers = #tpu.dot_dimension_numbers<[1], [0], [0], [1], [0, 0, 1, 1], [], []>} : vector<16x16xf32>, vector<16x8xf32>, vector<16x8xf32> -> vector<16x8xf32>
    %199 = vector.shape_cast %198 : vector<16x8xf32> to vector<2x8x8xf32>
    %200 = vector.shape_cast %196 : vector<1x8xf32> to vector<1x1x8xf32>
    %201 = vector.broadcast %200 : vector<1x1x8xf32> to vector<2x8x8xf32>
    %202 = arith.addf %199, %201 : vector<2x8x8xf32>
    %cst_78 = arith.constant dense<0.000000e+00> : vector<2x8x8xf32>
    %203 = tpu.matmul %186, %194, %cst_78 {dimension_numbers = #tpu.dot_dimension_numbers<[2], [2], [1], [1], [0, 0, 0, 1, 1, 1], [0], [0]>} : vector<2x8x8xf32>, vector<2x8x8xf32>, vector<2x8x8xf32> -> vector<2x8x8xf32>
    %cst_79 = arith.constant 0.353553385 : f32
    %204 = vector.broadcast %cst_79 : f32 to vector<2x8x8xf32>
    %205 = arith.mulf %203, %204 : vector<2x8x8xf32>
    %cst_80 = arith.constant dense<0xFF800000> : vector<2x8xf32>
    %206 = vector.multi_reduction <maximumf>, %205, %cst_80 [2] : vector<2x8x8xf32> to vector<2x8xf32>
    %207 = vector.shape_cast %206 : vector<2x8xf32> to vector<2x8x1xf32>
    %208 = vector.broadcast %207 : vector<2x8x1xf32> to vector<2x8x8xf32>
    %209 = arith.subf %205, %208 : vector<2x8x8xf32>
    %210 = math.exp %209 : vector<2x8x8xf32>
    %cst_81 = arith.constant dense<0.000000e+00> : vector<2x8xf32>
    %211 = vector.multi_reduction <add>, %210, %cst_81 [2] : vector<2x8x8xf32> to vector<2x8xf32>
    %212 = vector.shape_cast %211 : vector<2x8xf32> to vector<2x8x1xf32>
    %213 = tpu.reciprocal %212 {approx = true} : vector<2x8x1xf32> -> vector<2x8x1xf32>
    %214 = vector.broadcast %213 : vector<2x8x1xf32> to vector<2x8x8xf32>
    %215 = arith.mulf %210, %214 : vector<2x8x8xf32>
    %cst_82 = arith.constant dense<0.000000e+00> : vector<2x8x8xf32>
    %216 = tpu.matmul %215, %202, %cst_82 {dimension_numbers = #tpu.dot_dimension_numbers<[2], [1], [1], [2], [0, 0, 0, 1, 1, 2], [0], [0]>} : vector<2x8x8xf32>, vector<2x8x8xf32>, vector<2x8x8xf32> -> vector<2x8x8xf32>
    %c240 = arith.constant 240 : index
    %c0_83 = arith.constant 0 : index
    %217 = vector.load %arg3[%c240, %c0_83] : memref<1728x128xf32, #tpu.memory_space<vmem>>, vector<8x16xf32>
    %218 = vector.shape_cast %216 : vector<2x8x8xf32> to vector<16x8xf32>
    %cst_84 = arith.constant dense<0.000000e+00> : vector<16x16xf32>
    %219 = tpu.matmul %218, %217, %cst_84 {dimension_numbers = #tpu.dot_dimension_numbers<[1], [0], [0], [1], [0, 0, 1, 1], [], []>} : vector<16x8xf32>, vector<8x16xf32>, vector<16x16xf32> -> vector<16x16xf32>
    %220 = vector.shape_cast %219 : vector<16x16xf32> to vector<2x8x16xf32>
    %c248 = arith.constant 248 : index
    %c0_85 = arith.constant 0 : index
    %221 = vector.load %arg3[%c248, %c0_85] : memref<1728x128xf32, #tpu.memory_space<vmem>>, vector<16x8xf32>
    %c16_86 = arith.constant 16 : index
    %c0_87 = arith.constant 0 : index
    %222 = vector.load %arg4[%c16_86, %c0_87] : memref<83x128xf32, #tpu.memory_space<vmem>>, vector<1x8xf32>
    %223 = vector.shape_cast %178 : vector<2x8x16xf32> to vector<16x16xf32>
    %cst_88 = arith.constant dense<0.000000e+00> : vector<16x8xf32>
    %224 = tpu.matmul %223, %221, %cst_88 {dimension_numbers = #tpu.dot_dimension_numbers<[1], [0], [0], [1], [0, 0, 1, 1], [], []>} : vector<16x16xf32>, vector<16x8xf32>, vector<16x8xf32> -> vector<16x8xf32>
    %225 = vector.shape_cast %224 : vector<16x8xf32> to vector<2x8x8xf32>
    %226 = vector.shape_cast %222 : vector<1x8xf32> to vector<1x1x8xf32>
    %227 = vector.broadcast %226 : vector<1x1x8xf32> to vector<2x8x8xf32>
    %228 = arith.addf %225, %227 : vector<2x8x8xf32>
    %c264 = arith.constant 264 : index
    %c0_89 = arith.constant 0 : index
    %229 = vector.load %arg3[%c264, %c0_89] : memref<1728x128xf32, #tpu.memory_space<vmem>>, vector<16x8xf32>
    %c17 = arith.constant 17 : index
    %c0_90 = arith.constant 0 : index
    %230 = vector.load %arg4[%c17, %c0_90] : memref<83x128xf32, #tpu.memory_space<vmem>>, vector<1x8xf32>
    %231 = vector.shape_cast %178 : vector<2x8x16xf32> to vector<16x16xf32>
    %cst_91 = arith.constant dense<0.000000e+00> : vector<16x8xf32>
    %232 = tpu.matmul %231, %229, %cst_91 {dimension_numbers = #tpu.dot_dimension_numbers<[1], [0], [0], [1], [0, 0, 1, 1], [], []>} : vector<16x16xf32>, vector<16x8xf32>, vector<16x8xf32> -> vector<16x8xf32>
    %233 = vector.shape_cast %232 : vector<16x8xf32> to vector<2x8x8xf32>
    %234 = vector.shape_cast %230 : vector<1x8xf32> to vector<1x1x8xf32>
    %235 = vector.broadcast %234 : vector<1x1x8xf32> to vector<2x8x8xf32>
    %236 = arith.addf %233, %235 : vector<2x8x8xf32>
    %c280 = arith.constant 280 : index
    %c0_92 = arith.constant 0 : index
    %237 = vector.load %arg3[%c280, %c0_92] : memref<1728x128xf32, #tpu.memory_space<vmem>>, vector<16x8xf32>
    %c18 = arith.constant 18 : index
    %c0_93 = arith.constant 0 : index
    %238 = vector.load %arg4[%c18, %c0_93] : memref<83x128xf32, #tpu.memory_space<vmem>>, vector<1x8xf32>
    %239 = vector.shape_cast %178 : vector<2x8x16xf32> to vector<16x16xf32>
    %cst_94 = arith.constant dense<0.000000e+00> : vector<16x8xf32>
    %240 = tpu.matmul %239, %237, %cst_94 {dimension_numbers = #tpu.dot_dimension_numbers<[1], [0], [0], [1], [0, 0, 1, 1], [], []>} : vector<16x16xf32>, vector<16x8xf32>, vector<16x8xf32> -> vector<16x8xf32>
    %241 = vector.shape_cast %240 : vector<16x8xf32> to vector<2x8x8xf32>
    %242 = vector.shape_cast %238 : vector<1x8xf32> to vector<1x1x8xf32>
    %243 = vector.broadcast %242 : vector<1x1x8xf32> to vector<2x8x8xf32>
    %244 = arith.addf %241, %243 : vector<2x8x8xf32>
    %cst_95 = arith.constant dense<0.000000e+00> : vector<2x8x8xf32>
    %245 = tpu.matmul %228, %236, %cst_95 {dimension_numbers = #tpu.dot_dimension_numbers<[2], [2], [1], [1], [0, 0, 0, 1, 1, 1], [0], [0]>} : vector<2x8x8xf32>, vector<2x8x8xf32>, vector<2x8x8xf32> -> vector<2x8x8xf32>
    %cst_96 = arith.constant 0.353553385 : f32
    %246 = vector.broadcast %cst_96 : f32 to vector<2x8x8xf32>
    %247 = arith.mulf %245, %246 : vector<2x8x8xf32>
    %cst_97 = arith.constant dense<0xFF800000> : vector<2x8xf32>
    %248 = vector.multi_reduction <maximumf>, %247, %cst_97 [2] : vector<2x8x8xf32> to vector<2x8xf32>
    %249 = vector.shape_cast %248 : vector<2x8xf32> to vector<2x8x1xf32>
    %250 = vector.broadcast %249 : vector<2x8x1xf32> to vector<2x8x8xf32>
    %251 = arith.subf %247, %250 : vector<2x8x8xf32>
    %252 = math.exp %251 : vector<2x8x8xf32>
    %cst_98 = arith.constant dense<0.000000e+00> : vector<2x8xf32>
    %253 = vector.multi_reduction <add>, %252, %cst_98 [2] : vector<2x8x8xf32> to vector<2x8xf32>
    %254 = vector.shape_cast %253 : vector<2x8xf32> to vector<2x8x1xf32>
    %255 = tpu.reciprocal %254 {approx = true} : vector<2x8x1xf32> -> vector<2x8x1xf32>
    %256 = vector.broadcast %255 : vector<2x8x1xf32> to vector<2x8x8xf32>
    %257 = arith.mulf %252, %256 : vector<2x8x8xf32>
    %cst_99 = arith.constant dense<0.000000e+00> : vector<2x8x8xf32>
    %258 = tpu.matmul %257, %244, %cst_99 {dimension_numbers = #tpu.dot_dimension_numbers<[2], [1], [1], [2], [0, 0, 0, 1, 1, 2], [0], [0]>} : vector<2x8x8xf32>, vector<2x8x8xf32>, vector<2x8x8xf32> -> vector<2x8x8xf32>
    %c296 = arith.constant 296 : index
    %c0_100 = arith.constant 0 : index
    %259 = vector.load %arg3[%c296, %c0_100] : memref<1728x128xf32, #tpu.memory_space<vmem>>, vector<8x16xf32>
    %260 = vector.shape_cast %258 : vector<2x8x8xf32> to vector<16x8xf32>
    %cst_101 = arith.constant dense<0.000000e+00> : vector<16x16xf32>
    %261 = tpu.matmul %260, %259, %cst_101 {dimension_numbers = #tpu.dot_dimension_numbers<[1], [0], [0], [1], [0, 0, 1, 1], [], []>} : vector<16x8xf32>, vector<8x16xf32>, vector<16x16xf32> -> vector<16x16xf32>
    %262 = vector.shape_cast %261 : vector<16x16xf32> to vector<2x8x16xf32>
    %263 = arith.addf %220, %262 : vector<2x8x16xf32>
    %c19 = arith.constant 19 : index
    %c0_102 = arith.constant 0 : index
    %264 = vector.load %arg4[%c19, %c0_102] : memref<83x128xf32, #tpu.memory_space<vmem>>, vector<1x16xf32>
    %265 = vector.shape_cast %264 : vector<1x16xf32> to vector<1x1x16xf32>
    %266 = vector.broadcast %265 : vector<1x1x16xf32> to vector<2x8x16xf32>
    %267 = arith.addf %263, %266 : vector<2x8x16xf32>
    %268 = arith.addf %267, %178 : vector<2x8x16xf32>
    %c20 = arith.constant 20 : index
    %c0_103 = arith.constant 0 : index
    %269 = vector.load %arg4[%c20, %c0_103] : memref<83x128xf32, #tpu.memory_space<vmem>>, vector<1x16xf32>
    %c21 = arith.constant 21 : index
    %c0_104 = arith.constant 0 : index
    %270 = vector.load %arg4[%c21, %c0_104] : memref<83x128xf32, #tpu.memory_space<vmem>>, vector<1x16xf32>
    %cst_105 = arith.constant dense<0.000000e+00> : vector<2x8xf32>
    %271 = vector.multi_reduction <add>, %268, %cst_105 [2] : vector<2x8x16xf32> to vector<2x8xf32>
    %272 = vector.shape_cast %271 : vector<2x8xf32> to vector<2x8x1xf32>
    %cst_106 = arith.constant 1.600000e+01 : f32
    %273 = vector.broadcast %cst_106 : f32 to vector<2x8x1xf32>
    %274 = arith.divf %272, %273 : vector<2x8x1xf32>
    %275 = vector.broadcast %274 : vector<2x8x1xf32> to vector<2x8x16xf32>
    %276 = arith.subf %268, %275 : vector<2x8x16xf32>
    %277 = arith.mulf %276, %276 : vector<2x8x16xf32>
    %cst_107 = arith.constant dense<0.000000e+00> : vector<2x8xf32>
    %278 = vector.multi_reduction <add>, %277, %cst_107 [2] : vector<2x8x16xf32> to vector<2x8xf32>
    %279 = vector.shape_cast %278 : vector<2x8xf32> to vector<2x8x1xf32>
    %cst_108 = arith.constant 1.600000e+01 : f32
    %280 = vector.broadcast %cst_108 : f32 to vector<2x8x1xf32>
    %281 = arith.divf %279, %280 : vector<2x8x1xf32>
    %cst_109 = arith.constant 9.99999974E-6 : f32
    %282 = vector.broadcast %cst_109 : f32 to vector<2x8x1xf32>
    %283 = arith.addf %281, %282 : vector<2x8x1xf32>
    %284 = math.rsqrt %283 : vector<2x8x1xf32>
    %285 = vector.broadcast %284 : vector<2x8x1xf32> to vector<2x8x16xf32>
    %286 = arith.mulf %276, %285 : vector<2x8x16xf32>
    %287 = vector.shape_cast %269 : vector<1x16xf32> to vector<1x1x16xf32>
    %288 = vector.broadcast %287 : vector<1x1x16xf32> to vector<2x8x16xf32>
    %289 = arith.mulf %286, %288 : vector<2x8x16xf32>
    %290 = vector.shape_cast %270 : vector<1x16xf32> to vector<1x1x16xf32>
    %291 = vector.broadcast %290 : vector<1x1x16xf32> to vector<2x8x16xf32>
    %292 = arith.addf %289, %291 : vector<2x8x16xf32>
    %c304 = arith.constant 304 : index
    %c0_110 = arith.constant 0 : index
    %293 = vector.load %arg3[%c304, %c0_110] : memref<1728x128xf32, #tpu.memory_space<vmem>>, vector<16x64xf32>
    %c22 = arith.constant 22 : index
    %c0_111 = arith.constant 0 : index
    %294 = vector.load %arg4[%c22, %c0_111] : memref<83x128xf32, #tpu.memory_space<vmem>>, vector<1x64xf32>
    %295 = vector.shape_cast %292 : vector<2x8x16xf32> to vector<16x16xf32>
    %cst_112 = arith.constant dense<0.000000e+00> : vector<16x64xf32>
    %296 = tpu.matmul %295, %293, %cst_112 {dimension_numbers = #tpu.dot_dimension_numbers<[1], [0], [0], [1], [0, 0, 1, 1], [], []>} : vector<16x16xf32>, vector<16x64xf32>, vector<16x64xf32> -> vector<16x64xf32>
    %297 = vector.shape_cast %296 : vector<16x64xf32> to vector<2x8x64xf32>
    %298 = vector.shape_cast %294 : vector<1x64xf32> to vector<1x1x64xf32>
    %299 = vector.broadcast %298 : vector<1x1x64xf32> to vector<2x8x64xf32>
    %300 = arith.addf %297, %299 : vector<2x8x64xf32>
    %cst_113 = arith.constant 5.000000e-01 : f32
    %301 = vector.broadcast %cst_113 : f32 to vector<2x8x64xf32>
    %302 = arith.mulf %301, %300 : vector<2x8x64xf32>
    %cst_114 = arith.constant 4.471500e-02 : f32
    %303 = vector.broadcast %cst_114 : f32 to vector<2x8x64xf32>
    %304 = arith.mulf %303, %300 : vector<2x8x64xf32>
    %305 = arith.mulf %304, %300 : vector<2x8x64xf32>
    %306 = arith.mulf %305, %300 : vector<2x8x64xf32>
    %307 = arith.addf %300, %306 : vector<2x8x64xf32>
    %cst_115 = arith.constant 0.797884583 : f32
    %308 = vector.broadcast %cst_115 : f32 to vector<2x8x64xf32>
    %309 = arith.mulf %308, %307 : vector<2x8x64xf32>
    %310 = math.tanh %309 : vector<2x8x64xf32>
    %cst_116 = arith.constant 1.000000e+00 : f32
    %311 = vector.broadcast %cst_116 : f32 to vector<2x8x64xf32>
    %312 = arith.addf %311, %310 : vector<2x8x64xf32>
    %313 = arith.mulf %302, %312 : vector<2x8x64xf32>
    %c320 = arith.constant 320 : index
    %c0_117 = arith.constant 0 : index
    %314 = vector.load %arg3[%c320, %c0_117] : memref<1728x128xf32, #tpu.memory_space<vmem>>, vector<64x16xf32>
    %c23 = arith.constant 23 : index
    %c0_118 = arith.constant 0 : index
    %315 = vector.load %arg4[%c23, %c0_118] : memref<83x128xf32, #tpu.memory_space<vmem>>, vector<1x16xf32>
    %316 = vector.shape_cast %313 : vector<2x8x64xf32> to vector<16x64xf32>
    %cst_119 = arith.constant dense<0.000000e+00> : vector<16x16xf32>
    %317 = tpu.matmul %316, %314, %cst_119 {dimension_numbers = #tpu.dot_dimension_numbers<[1], [0], [0], [1], [0, 0, 1, 1], [], []>} : vector<16x64xf32>, vector<64x16xf32>, vector<16x16xf32> -> vector<16x16xf32>
    %318 = vector.shape_cast %317 : vector<16x16xf32> to vector<2x8x16xf32>
    %319 = vector.shape_cast %315 : vector<1x16xf32> to vector<1x1x16xf32>
    %320 = vector.broadcast %319 : vector<1x1x16xf32> to vector<2x8x16xf32>
    %321 = arith.addf %318, %320 : vector<2x8x16xf32>
    %322 = arith.addf %321, %292 : vector<2x8x16xf32>
    %c24 = arith.constant 24 : index
    %c0_120 = arith.constant 0 : index
    %323 = vector.load %arg4[%c24, %c0_120] : memref<83x128xf32, #tpu.memory_space<vmem>>, vector<1x16xf32>
    %c25 = arith.constant 25 : index
    %c0_121 = arith.constant 0 : index
    %324 = vector.load %arg4[%c25, %c0_121] : memref<83x128xf32, #tpu.memory_space<vmem>>, vector<1x16xf32>
    %cst_122 = arith.constant dense<0.000000e+00> : vector<2x8xf32>
    %325 = vector.multi_reduction <add>, %322, %cst_122 [2] : vector<2x8x16xf32> to vector<2x8xf32>
    %326 = vector.shape_cast %325 : vector<2x8xf32> to vector<2x8x1xf32>
    %cst_123 = arith.constant 1.600000e+01 : f32
    %327 = vector.broadcast %cst_123 : f32 to vector<2x8x1xf32>
    %328 = arith.divf %326, %327 : vector<2x8x1xf32>
    %329 = vector.broadcast %328 : vector<2x8x1xf32> to vector<2x8x16xf32>
    %330 = arith.subf %322, %329 : vector<2x8x16xf32>
    %331 = arith.mulf %330, %330 : vector<2x8x16xf32>
    %cst_124 = arith.constant dense<0.000000e+00> : vector<2x8xf32>
    %332 = vector.multi_reduction <add>, %331, %cst_124 [2] : vector<2x8x16xf32> to vector<2x8xf32>
    %333 = vector.shape_cast %332 : vector<2x8xf32> to vector<2x8x1xf32>
    %cst_125 = arith.constant 1.600000e+01 : f32
    %334 = vector.broadcast %cst_125 : f32 to vector<2x8x1xf32>
    %335 = arith.divf %333, %334 : vector<2x8x1xf32>
    %cst_126 = arith.constant 9.99999974E-6 : f32
    %336 = vector.broadcast %cst_126 : f32 to vector<2x8x1xf32>
    %337 = arith.addf %335, %336 : vector<2x8x1xf32>
    %338 = math.rsqrt %337 : vector<2x8x1xf32>
    %339 = vector.broadcast %338 : vector<2x8x1xf32> to vector<2x8x16xf32>
    %340 = arith.mulf %330, %339 : vector<2x8x16xf32>
    %341 = vector.shape_cast %323 : vector<1x16xf32> to vector<1x1x16xf32>
    %342 = vector.broadcast %341 : vector<1x1x16xf32> to vector<2x8x16xf32>
    %343 = arith.mulf %340, %342 : vector<2x8x16xf32>
    %344 = vector.shape_cast %324 : vector<1x16xf32> to vector<1x1x16xf32>
    %345 = vector.broadcast %344 : vector<1x1x16xf32> to vector<2x8x16xf32>
    %346 = arith.addf %343, %345 : vector<2x8x16xf32>
    %c416 = arith.constant 416 : index
    %c0_127 = arith.constant 0 : index
    %347 = vector.load %arg3[%c416, %c0_127] : memref<1728x128xf32, #tpu.memory_space<vmem>>, vector<16x32xf32>
    %c27 = arith.constant 27 : index
    %c0_128 = arith.constant 0 : index
    %348 = vector.load %arg4[%c27, %c0_128] : memref<83x128xf32, #tpu.memory_space<vmem>>, vector<1x32xf32>
    %349 = vector.shape_cast %346 : vector<2x8x16xf32> to vector<16x16xf32>
    %cst_129 = arith.constant dense<0.000000e+00> : vector<16x32xf32>
    %350 = tpu.matmul %349, %347, %cst_129 {dimension_numbers = #tpu.dot_dimension_numbers<[1], [0], [0], [1], [0, 0, 1, 1], [], []>} : vector<16x16xf32>, vector<16x32xf32>, vector<16x32xf32> -> vector<16x32xf32>
    %351 = vector.shape_cast %350 : vector<16x32xf32> to vector<2x8x32xf32>
    %352 = vector.shape_cast %348 : vector<1x32xf32> to vector<1x1x32xf32>
    %353 = vector.broadcast %352 : vector<1x1x32xf32> to vector<2x8x32xf32>
    %354 = arith.addf %351, %353 : vector<2x8x32xf32>
    %355 = arith.addf %1, %354 : vector<2x8x32xf32>
    %356 = vector.extract_strided_slice %355 {offsets = [0, 0, 0], sizes = [2, 1, 32], strides = [1, 1, 1]} : vector<2x8x32xf32> to vector<2x1x32xf32>
    %357 = vector.shape_cast %356 : vector<2x1x32xf32> to vector<2x32xf32>
    %358 = vector.shape_cast %357 : vector<2x32xf32> to vector<1x2x32xf32>
    %359 = vector.extract_strided_slice %355 {offsets = [0, 1, 0], sizes = [2, 1, 32], strides = [1, 1, 1]} : vector<2x8x32xf32> to vector<2x1x32xf32>
    %360 = vector.shape_cast %359 : vector<2x1x32xf32> to vector<2x32xf32>
    %361 = vector.shape_cast %360 : vector<2x32xf32> to vector<1x2x32xf32>
    %362 = vector.extract_strided_slice %355 {offsets = [0, 2, 0], sizes = [2, 1, 32], strides = [1, 1, 1]} : vector<2x8x32xf32> to vector<2x1x32xf32>
    %363 = vector.shape_cast %362 : vector<2x1x32xf32> to vector<2x32xf32>
    %364 = vector.shape_cast %363 : vector<2x32xf32> to vector<1x2x32xf32>
    %365 = vector.extract_strided_slice %355 {offsets = [0, 3, 0], sizes = [2, 1, 32], strides = [1, 1, 1]} : vector<2x8x32xf32> to vector<2x1x32xf32>
    %366 = vector.shape_cast %365 : vector<2x1x32xf32> to vector<2x32xf32>
    %367 = vector.shape_cast %366 : vector<2x32xf32> to vector<1x2x32xf32>
    %368 = vector.extract_strided_slice %355 {offsets = [0, 4, 0], sizes = [2, 1, 32], strides = [1, 1, 1]} : vector<2x8x32xf32> to vector<2x1x32xf32>
    %369 = vector.shape_cast %368 : vector<2x1x32xf32> to vector<2x32xf32>
    %370 = vector.shape_cast %369 : vector<2x32xf32> to vector<1x2x32xf32>
    %371 = vector.extract_strided_slice %355 {offsets = [0, 5, 0], sizes = [2, 1, 32], strides = [1, 1, 1]} : vector<2x8x32xf32> to vector<2x1x32xf32>
    %372 = vector.shape_cast %371 : vector<2x1x32xf32> to vector<2x32xf32>
    %373 = vector.shape_cast %372 : vector<2x32xf32> to vector<1x2x32xf32>
    %374 = vector.extract_strided_slice %355 {offsets = [0, 6, 0], sizes = [2, 1, 32], strides = [1, 1, 1]} : vector<2x8x32xf32> to vector<2x1x32xf32>
    %375 = vector.shape_cast %374 : vector<2x1x32xf32> to vector<2x32xf32>
    %376 = vector.shape_cast %375 : vector<2x32xf32> to vector<1x2x32xf32>
    %377 = vector.extract_strided_slice %355 {offsets = [0, 7, 0], sizes = [2, 1, 32], strides = [1, 1, 1]} : vector<2x8x32xf32> to vector<2x1x32xf32>
    %378 = vector.shape_cast %377 : vector<2x1x32xf32> to vector<2x32xf32>
    %379 = vector.shape_cast %378 : vector<2x32xf32> to vector<1x2x32xf32>
    %380 = tpu.concatenate %358, %361, %364, %367, %370, %373, %376, %379 in 0 : vector<1x2x32xf32>, vector<1x2x32xf32>, vector<1x2x32xf32>, vector<1x2x32xf32>, vector<1x2x32xf32>, vector<1x2x32xf32>, vector<1x2x32xf32>, vector<1x2x32xf32> -> vector<8x2x32xf32>
    %c1280 = arith.constant 1280 : index
    %c0_130 = arith.constant 0 : index
    %381 = vector.load %arg3[%c1280, %c0_130] : memref<1728x128xf32, #tpu.memory_space<vmem>>, vector<32x8xf32>
    %c69 = arith.constant 69 : index
    %c0_131 = arith.constant 0 : index
    %382 = vector.load %arg4[%c69, %c0_131] : memref<83x128xf32, #tpu.memory_space<vmem>>, vector<1x8xf32>
    %383 = vector.shape_cast %2 : vector<8x2x32xf32> to vector<16x32xf32>
    %cst_132 = arith.constant dense<0.000000e+00> : vector<16x8xf32>
    %384 = tpu.matmul %383, %381, %cst_132 {dimension_numbers = #tpu.dot_dimension_numbers<[1], [0], [0], [1], [0, 0, 1, 1], [], []>} : vector<16x32xf32>, vector<32x8xf32>, vector<16x8xf32> -> vector<16x8xf32>
    %385 = vector.shape_cast %384 : vector<16x8xf32> to vector<8x2x8xf32>
    %386 = vector.shape_cast %382 : vector<1x8xf32> to vector<1x1x8xf32>
    %387 = vector.broadcast %386 : vector<1x1x8xf32> to vector<8x2x8xf32>
    %388 = arith.addf %385, %387 : vector<8x2x8xf32>
    %c1312 = arith.constant 1312 : index
    %c0_133 = arith.constant 0 : index
    %389 = vector.load %arg3[%c1312, %c0_133] : memref<1728x128xf32, #tpu.memory_space<vmem>>, vector<32x8xf32>
    %c70 = arith.constant 70 : index
    %c0_134 = arith.constant 0 : index
    %390 = vector.load %arg4[%c70, %c0_134] : memref<83x128xf32, #tpu.memory_space<vmem>>, vector<1x8xf32>
    %391 = vector.shape_cast %380 : vector<8x2x32xf32> to vector<16x32xf32>
    %cst_135 = arith.constant dense<0.000000e+00> : vector<16x8xf32>
    %392 = tpu.matmul %391, %389, %cst_135 {dimension_numbers = #tpu.dot_dimension_numbers<[1], [0], [0], [1], [0, 0, 1, 1], [], []>} : vector<16x32xf32>, vector<32x8xf32>, vector<16x8xf32> -> vector<16x8xf32>
    %393 = vector.shape_cast %392 : vector<16x8xf32> to vector<8x2x8xf32>
    %394 = vector.shape_cast %390 : vector<1x8xf32> to vector<1x1x8xf32>
    %395 = vector.broadcast %394 : vector<1x1x8xf32> to vector<8x2x8xf32>
    %396 = arith.addf %393, %395 : vector<8x2x8xf32>
    %c1344 = arith.constant 1344 : index
    %c0_136 = arith.constant 0 : index
    %397 = vector.load %arg3[%c1344, %c0_136] : memref<1728x128xf32, #tpu.memory_space<vmem>>, vector<32x8xf32>
    %c71 = arith.constant 71 : index
    %c0_137 = arith.constant 0 : index
    %398 = vector.load %arg4[%c71, %c0_137] : memref<83x128xf32, #tpu.memory_space<vmem>>, vector<1x8xf32>
    %399 = vector.shape_cast %380 : vector<8x2x32xf32> to vector<16x32xf32>
    %cst_138 = arith.constant dense<0.000000e+00> : vector<16x8xf32>
    %400 = tpu.matmul %399, %397, %cst_138 {dimension_numbers = #tpu.dot_dimension_numbers<[1], [0], [0], [1], [0, 0, 1, 1], [], []>} : vector<16x32xf32>, vector<32x8xf32>, vector<16x8xf32> -> vector<16x8xf32>
    %401 = vector.shape_cast %400 : vector<16x8xf32> to vector<8x2x8xf32>
    %402 = vector.shape_cast %398 : vector<1x8xf32> to vector<1x1x8xf32>
    %403 = vector.broadcast %402 : vector<1x1x8xf32> to vector<8x2x8xf32>
    %404 = arith.addf %401, %403 : vector<8x2x8xf32>
    %cst_139 = arith.constant dense<0.000000e+00> : vector<8x2x2xf32>
    %405 = tpu.matmul %388, %396, %cst_139 {dimension_numbers = #tpu.dot_dimension_numbers<[2], [2], [1], [1], [0, 0, 0, 1, 1, 1], [0], [0]>} : vector<8x2x8xf32>, vector<8x2x8xf32>, vector<8x2x2xf32> -> vector<8x2x2xf32>
    %cst_140 = arith.constant 0.353553385 : f32
    %406 = vector.broadcast %cst_140 : f32 to vector<8x2x2xf32>
    %407 = arith.mulf %405, %406 : vector<8x2x2xf32>
    %cst_141 = arith.constant dense<0xFF800000> : vector<8x2xf32>
    %408 = vector.multi_reduction <maximumf>, %407, %cst_141 [2] : vector<8x2x2xf32> to vector<8x2xf32>
    %409 = vector.shape_cast %408 : vector<8x2xf32> to vector<8x2x1xf32>
    %410 = vector.broadcast %409 : vector<8x2x1xf32> to vector<8x2x2xf32>
    %411 = arith.subf %407, %410 : vector<8x2x2xf32>
    %412 = math.exp %411 : vector<8x2x2xf32>
    %cst_142 = arith.constant dense<0.000000e+00> : vector<8x2xf32>
    %413 = vector.multi_reduction <add>, %412, %cst_142 [2] : vector<8x2x2xf32> to vector<8x2xf32>
    %414 = vector.shape_cast %413 : vector<8x2xf32> to vector<8x2x1xf32>
    %415 = tpu.reciprocal %414 {approx = true} : vector<8x2x1xf32> -> vector<8x2x1xf32>
    %416 = vector.broadcast %415 : vector<8x2x1xf32> to vector<8x2x2xf32>
    %417 = arith.mulf %412, %416 : vector<8x2x2xf32>
    %cst_143 = arith.constant dense<0.000000e+00> : vector<8x2x8xf32>
    %418 = tpu.matmul %417, %404, %cst_143 {dimension_numbers = #tpu.dot_dimension_numbers<[2], [1], [1], [2], [0, 0, 0, 1, 1, 2], [0], [0]>} : vector<8x2x2xf32>, vector<8x2x8xf32>, vector<8x2x8xf32> -> vector<8x2x8xf32>
    %c1376 = arith.constant 1376 : index
    %c0_144 = arith.constant 0 : index
    %419 = vector.load %arg3[%c1376, %c0_144] : memref<1728x128xf32, #tpu.memory_space<vmem>>, vector<8x32xf32>
    %420 = vector.shape_cast %418 : vector<8x2x8xf32> to vector<16x8xf32>
    %cst_145 = arith.constant dense<0.000000e+00> : vector<16x32xf32>
    %421 = tpu.matmul %420, %419, %cst_145 {dimension_numbers = #tpu.dot_dimension_numbers<[1], [0], [0], [1], [0, 0, 1, 1], [], []>} : vector<16x8xf32>, vector<8x32xf32>, vector<16x32xf32> -> vector<16x32xf32>
    %422 = vector.shape_cast %421 : vector<16x32xf32> to vector<8x2x32xf32>
    %c1384 = arith.constant 1384 : index
    %c0_146 = arith.constant 0 : index
    %423 = vector.load %arg3[%c1384, %c0_146] : memref<1728x128xf32, #tpu.memory_space<vmem>>, vector<32x8xf32>
    %c72_147 = arith.constant 72 : index
    %c0_148 = arith.constant 0 : index
    %424 = vector.load %arg4[%c72_147, %c0_148] : memref<83x128xf32, #tpu.memory_space<vmem>>, vector<1x8xf32>
    %425 = vector.shape_cast %2 : vector<8x2x32xf32> to vector<16x32xf32>
    %cst_149 = arith.constant dense<0.000000e+00> : vector<16x8xf32>
    %426 = tpu.matmul %425, %423, %cst_149 {dimension_numbers = #tpu.dot_dimension_numbers<[1], [0], [0], [1], [0, 0, 1, 1], [], []>} : vector<16x32xf32>, vector<32x8xf32>, vector<16x8xf32> -> vector<16x8xf32>
    %427 = vector.shape_cast %426 : vector<16x8xf32> to vector<8x2x8xf32>
    %428 = vector.shape_cast %424 : vector<1x8xf32> to vector<1x1x8xf32>
    %429 = vector.broadcast %428 : vector<1x1x8xf32> to vector<8x2x8xf32>
    %430 = arith.addf %427, %429 : vector<8x2x8xf32>
    %c1416 = arith.constant 1416 : index
    %c0_150 = arith.constant 0 : index
    %431 = vector.load %arg3[%c1416, %c0_150] : memref<1728x128xf32, #tpu.memory_space<vmem>>, vector<32x8xf32>
    %c73 = arith.constant 73 : index
    %c0_151 = arith.constant 0 : index
    %432 = vector.load %arg4[%c73, %c0_151] : memref<83x128xf32, #tpu.memory_space<vmem>>, vector<1x8xf32>
    %433 = vector.shape_cast %380 : vector<8x2x32xf32> to vector<16x32xf32>
    %cst_152 = arith.constant dense<0.000000e+00> : vector<16x8xf32>
    %434 = tpu.matmul %433, %431, %cst_152 {dimension_numbers = #tpu.dot_dimension_numbers<[1], [0], [0], [1], [0, 0, 1, 1], [], []>} : vector<16x32xf32>, vector<32x8xf32>, vector<16x8xf32> -> vector<16x8xf32>
    %435 = vector.shape_cast %434 : vector<16x8xf32> to vector<8x2x8xf32>
    %436 = vector.shape_cast %432 : vector<1x8xf32> to vector<1x1x8xf32>
    %437 = vector.broadcast %436 : vector<1x1x8xf32> to vector<8x2x8xf32>
    %438 = arith.addf %435, %437 : vector<8x2x8xf32>
    %c1448 = arith.constant 1448 : index
    %c0_153 = arith.constant 0 : index
    %439 = vector.load %arg3[%c1448, %c0_153] : memref<1728x128xf32, #tpu.memory_space<vmem>>, vector<32x8xf32>
    %c74 = arith.constant 74 : index
    %c0_154 = arith.constant 0 : index
    %440 = vector.load %arg4[%c74, %c0_154] : memref<83x128xf32, #tpu.memory_space<vmem>>, vector<1x8xf32>
    %441 = vector.shape_cast %380 : vector<8x2x32xf32> to vector<16x32xf32>
    %cst_155 = arith.constant dense<0.000000e+00> : vector<16x8xf32>
    %442 = tpu.matmul %441, %439, %cst_155 {dimension_numbers = #tpu.dot_dimension_numbers<[1], [0], [0], [1], [0, 0, 1, 1], [], []>} : vector<16x32xf32>, vector<32x8xf32>, vector<16x8xf32> -> vector<16x8xf32>
    %443 = vector.shape_cast %442 : vector<16x8xf32> to vector<8x2x8xf32>
    %444 = vector.shape_cast %440 : vector<1x8xf32> to vector<1x1x8xf32>
    %445 = vector.broadcast %444 : vector<1x1x8xf32> to vector<8x2x8xf32>
    %446 = arith.addf %443, %445 : vector<8x2x8xf32>
    %cst_156 = arith.constant dense<0.000000e+00> : vector<8x2x2xf32>
    %447 = tpu.matmul %430, %438, %cst_156 {dimension_numbers = #tpu.dot_dimension_numbers<[2], [2], [1], [1], [0, 0, 0, 1, 1, 1], [0], [0]>} : vector<8x2x8xf32>, vector<8x2x8xf32>, vector<8x2x2xf32> -> vector<8x2x2xf32>
    %cst_157 = arith.constant 0.353553385 : f32
    %448 = vector.broadcast %cst_157 : f32 to vector<8x2x2xf32>
    %449 = arith.mulf %447, %448 : vector<8x2x2xf32>
    %cst_158 = arith.constant dense<0xFF800000> : vector<8x2xf32>
    %450 = vector.multi_reduction <maximumf>, %449, %cst_158 [2] : vector<8x2x2xf32> to vector<8x2xf32>
    %451 = vector.shape_cast %450 : vector<8x2xf32> to vector<8x2x1xf32>
    %452 = vector.broadcast %451 : vector<8x2x1xf32> to vector<8x2x2xf32>
    %453 = arith.subf %449, %452 : vector<8x2x2xf32>
    %454 = math.exp %453 : vector<8x2x2xf32>
    %cst_159 = arith.constant dense<0.000000e+00> : vector<8x2xf32>
    %455 = vector.multi_reduction <add>, %454, %cst_159 [2] : vector<8x2x2xf32> to vector<8x2xf32>
    %456 = vector.shape_cast %455 : vector<8x2xf32> to vector<8x2x1xf32>
    %457 = tpu.reciprocal %456 {approx = true} : vector<8x2x1xf32> -> vector<8x2x1xf32>
    %458 = vector.broadcast %457 : vector<8x2x1xf32> to vector<8x2x2xf32>
    %459 = arith.mulf %454, %458 : vector<8x2x2xf32>
    %cst_160 = arith.constant dense<0.000000e+00> : vector<8x2x8xf32>
    %460 = tpu.matmul %459, %446, %cst_160 {dimension_numbers = #tpu.dot_dimension_numbers<[2], [1], [1], [2], [0, 0, 0, 1, 1, 2], [0], [0]>} : vector<8x2x2xf32>, vector<8x2x8xf32>, vector<8x2x8xf32> -> vector<8x2x8xf32>
    %c1480 = arith.constant 1480 : index
    %c0_161 = arith.constant 0 : index
    %461 = vector.load %arg3[%c1480, %c0_161] : memref<1728x128xf32, #tpu.memory_space<vmem>>, vector<8x32xf32>
    %462 = vector.shape_cast %460 : vector<8x2x8xf32> to vector<16x8xf32>
    %cst_162 = arith.constant dense<0.000000e+00> : vector<16x32xf32>
    %463 = tpu.matmul %462, %461, %cst_162 {dimension_numbers = #tpu.dot_dimension_numbers<[1], [0], [0], [1], [0, 0, 1, 1], [], []>} : vector<16x8xf32>, vector<8x32xf32>, vector<16x32xf32> -> vector<16x32xf32>
    %464 = vector.shape_cast %463 : vector<16x32xf32> to vector<8x2x32xf32>
    %465 = arith.addf %422, %464 : vector<8x2x32xf32>
    %c1488 = arith.constant 1488 : index
    %c0_163 = arith.constant 0 : index
    %466 = vector.load %arg3[%c1488, %c0_163] : memref<1728x128xf32, #tpu.memory_space<vmem>>, vector<32x8xf32>
    %c75 = arith.constant 75 : index
    %c0_164 = arith.constant 0 : index
    %467 = vector.load %arg4[%c75, %c0_164] : memref<83x128xf32, #tpu.memory_space<vmem>>, vector<1x8xf32>
    %468 = vector.shape_cast %2 : vector<8x2x32xf32> to vector<16x32xf32>
    %cst_165 = arith.constant dense<0.000000e+00> : vector<16x8xf32>
    %469 = tpu.matmul %468, %466, %cst_165 {dimension_numbers = #tpu.dot_dimension_numbers<[1], [0], [0], [1], [0, 0, 1, 1], [], []>} : vector<16x32xf32>, vector<32x8xf32>, vector<16x8xf32> -> vector<16x8xf32>
    %470 = vector.shape_cast %469 : vector<16x8xf32> to vector<8x2x8xf32>
    %471 = vector.shape_cast %467 : vector<1x8xf32> to vector<1x1x8xf32>
    %472 = vector.broadcast %471 : vector<1x1x8xf32> to vector<8x2x8xf32>
    %473 = arith.addf %470, %472 : vector<8x2x8xf32>
    %c1520 = arith.constant 1520 : index
    %c0_166 = arith.constant 0 : index
    %474 = vector.load %arg3[%c1520, %c0_166] : memref<1728x128xf32, #tpu.memory_space<vmem>>, vector<32x8xf32>
    %c76 = arith.constant 76 : index
    %c0_167 = arith.constant 0 : index
    %475 = vector.load %arg4[%c76, %c0_167] : memref<83x128xf32, #tpu.memory_space<vmem>>, vector<1x8xf32>
    %476 = vector.shape_cast %380 : vector<8x2x32xf32> to vector<16x32xf32>
    %cst_168 = arith.constant dense<0.000000e+00> : vector<16x8xf32>
    %477 = tpu.matmul %476, %474, %cst_168 {dimension_numbers = #tpu.dot_dimension_numbers<[1], [0], [0], [1], [0, 0, 1, 1], [], []>} : vector<16x32xf32>, vector<32x8xf32>, vector<16x8xf32> -> vector<16x8xf32>
    %478 = vector.shape_cast %477 : vector<16x8xf32> to vector<8x2x8xf32>
    %479 = vector.shape_cast %475 : vector<1x8xf32> to vector<1x1x8xf32>
    %480 = vector.broadcast %479 : vector<1x1x8xf32> to vector<8x2x8xf32>
    %481 = arith.addf %478, %480 : vector<8x2x8xf32>
    %c1552 = arith.constant 1552 : index
    %c0_169 = arith.constant 0 : index
    %482 = vector.load %arg3[%c1552, %c0_169] : memref<1728x128xf32, #tpu.memory_space<vmem>>, vector<32x8xf32>
    %c77 = arith.constant 77 : index
    %c0_170 = arith.constant 0 : index
    %483 = vector.load %arg4[%c77, %c0_170] : memref<83x128xf32, #tpu.memory_space<vmem>>, vector<1x8xf32>
    %484 = vector.shape_cast %380 : vector<8x2x32xf32> to vector<16x32xf32>
    %cst_171 = arith.constant dense<0.000000e+00> : vector<16x8xf32>
    %485 = tpu.matmul %484, %482, %cst_171 {dimension_numbers = #tpu.dot_dimension_numbers<[1], [0], [0], [1], [0, 0, 1, 1], [], []>} : vector<16x32xf32>, vector<32x8xf32>, vector<16x8xf32> -> vector<16x8xf32>
    %486 = vector.shape_cast %485 : vector<16x8xf32> to vector<8x2x8xf32>
    %487 = vector.shape_cast %483 : vector<1x8xf32> to vector<1x1x8xf32>
    %488 = vector.broadcast %487 : vector<1x1x8xf32> to vector<8x2x8xf32>
    %489 = arith.addf %486, %488 : vector<8x2x8xf32>
    %cst_172 = arith.constant dense<0.000000e+00> : vector<8x2x2xf32>
    %490 = tpu.matmul %473, %481, %cst_172 {dimension_numbers = #tpu.dot_dimension_numbers<[2], [2], [1], [1], [0, 0, 0, 1, 1, 1], [0], [0]>} : vector<8x2x8xf32>, vector<8x2x8xf32>, vector<8x2x2xf32> -> vector<8x2x2xf32>
    %cst_173 = arith.constant 0.353553385 : f32
    %491 = vector.broadcast %cst_173 : f32 to vector<8x2x2xf32>
    %492 = arith.mulf %490, %491 : vector<8x2x2xf32>
    %cst_174 = arith.constant dense<0xFF800000> : vector<8x2xf32>
    %493 = vector.multi_reduction <maximumf>, %492, %cst_174 [2] : vector<8x2x2xf32> to vector<8x2xf32>
    %494 = vector.shape_cast %493 : vector<8x2xf32> to vector<8x2x1xf32>
    %495 = vector.broadcast %494 : vector<8x2x1xf32> to vector<8x2x2xf32>
    %496 = arith.subf %492, %495 : vector<8x2x2xf32>
    %497 = math.exp %496 : vector<8x2x2xf32>
    %cst_175 = arith.constant dense<0.000000e+00> : vector<8x2xf32>
    %498 = vector.multi_reduction <add>, %497, %cst_175 [2] : vector<8x2x2xf32> to vector<8x2xf32>
    %499 = vector.shape_cast %498 : vector<8x2xf32> to vector<8x2x1xf32>
    %500 = tpu.reciprocal %499 {approx = true} : vector<8x2x1xf32> -> vector<8x2x1xf32>
    %501 = vector.broadcast %500 : vector<8x2x1xf32> to vector<8x2x2xf32>
    %502 = arith.mulf %497, %501 : vector<8x2x2xf32>
    %cst_176 = arith.constant dense<0.000000e+00> : vector<8x2x8xf32>
    %503 = tpu.matmul %502, %489, %cst_176 {dimension_numbers = #tpu.dot_dimension_numbers<[2], [1], [1], [2], [0, 0, 0, 1, 1, 2], [0], [0]>} : vector<8x2x2xf32>, vector<8x2x8xf32>, vector<8x2x8xf32> -> vector<8x2x8xf32>
    %c1584 = arith.constant 1584 : index
    %c0_177 = arith.constant 0 : index
    %504 = vector.load %arg3[%c1584, %c0_177] : memref<1728x128xf32, #tpu.memory_space<vmem>>, vector<8x32xf32>
    %505 = vector.shape_cast %503 : vector<8x2x8xf32> to vector<16x8xf32>
    %cst_178 = arith.constant dense<0.000000e+00> : vector<16x32xf32>
    %506 = tpu.matmul %505, %504, %cst_178 {dimension_numbers = #tpu.dot_dimension_numbers<[1], [0], [0], [1], [0, 0, 1, 1], [], []>} : vector<16x8xf32>, vector<8x32xf32>, vector<16x32xf32> -> vector<16x32xf32>
    %507 = vector.shape_cast %506 : vector<16x32xf32> to vector<8x2x32xf32>
    %508 = arith.addf %465, %507 : vector<8x2x32xf32>
    %c1592 = arith.constant 1592 : index
    %c0_179 = arith.constant 0 : index
    %509 = vector.load %arg3[%c1592, %c0_179] : memref<1728x128xf32, #tpu.memory_space<vmem>>, vector<32x8xf32>
    %c78 = arith.constant 78 : index
    %c0_180 = arith.constant 0 : index
    %510 = vector.load %arg4[%c78, %c0_180] : memref<83x128xf32, #tpu.memory_space<vmem>>, vector<1x8xf32>
    %511 = vector.shape_cast %2 : vector<8x2x32xf32> to vector<16x32xf32>
    %cst_181 = arith.constant dense<0.000000e+00> : vector<16x8xf32>
    %512 = tpu.matmul %511, %509, %cst_181 {dimension_numbers = #tpu.dot_dimension_numbers<[1], [0], [0], [1], [0, 0, 1, 1], [], []>} : vector<16x32xf32>, vector<32x8xf32>, vector<16x8xf32> -> vector<16x8xf32>
    %513 = vector.shape_cast %512 : vector<16x8xf32> to vector<8x2x8xf32>
    %514 = vector.shape_cast %510 : vector<1x8xf32> to vector<1x1x8xf32>
    %515 = vector.broadcast %514 : vector<1x1x8xf32> to vector<8x2x8xf32>
    %516 = arith.addf %513, %515 : vector<8x2x8xf32>
    %c1624 = arith.constant 1624 : index
    %c0_182 = arith.constant 0 : index
    %517 = vector.load %arg3[%c1624, %c0_182] : memref<1728x128xf32, #tpu.memory_space<vmem>>, vector<32x8xf32>
    %c79 = arith.constant 79 : index
    %c0_183 = arith.constant 0 : index
    %518 = vector.load %arg4[%c79, %c0_183] : memref<83x128xf32, #tpu.memory_space<vmem>>, vector<1x8xf32>
    %519 = vector.shape_cast %380 : vector<8x2x32xf32> to vector<16x32xf32>
    %cst_184 = arith.constant dense<0.000000e+00> : vector<16x8xf32>
    %520 = tpu.matmul %519, %517, %cst_184 {dimension_numbers = #tpu.dot_dimension_numbers<[1], [0], [0], [1], [0, 0, 1, 1], [], []>} : vector<16x32xf32>, vector<32x8xf32>, vector<16x8xf32> -> vector<16x8xf32>
    %521 = vector.shape_cast %520 : vector<16x8xf32> to vector<8x2x8xf32>
    %522 = vector.shape_cast %518 : vector<1x8xf32> to vector<1x1x8xf32>
    %523 = vector.broadcast %522 : vector<1x1x8xf32> to vector<8x2x8xf32>
    %524 = arith.addf %521, %523 : vector<8x2x8xf32>
    %c1656 = arith.constant 1656 : index
    %c0_185 = arith.constant 0 : index
    %525 = vector.load %arg3[%c1656, %c0_185] : memref<1728x128xf32, #tpu.memory_space<vmem>>, vector<32x8xf32>
    %c80 = arith.constant 80 : index
    %c0_186 = arith.constant 0 : index
    %526 = vector.load %arg4[%c80, %c0_186] : memref<83x128xf32, #tpu.memory_space<vmem>>, vector<1x8xf32>
    %527 = vector.shape_cast %380 : vector<8x2x32xf32> to vector<16x32xf32>
    %cst_187 = arith.constant dense<0.000000e+00> : vector<16x8xf32>
    %528 = tpu.matmul %527, %525, %cst_187 {dimension_numbers = #tpu.dot_dimension_numbers<[1], [0], [0], [1], [0, 0, 1, 1], [], []>} : vector<16x32xf32>, vector<32x8xf32>, vector<16x8xf32> -> vector<16x8xf32>
    %529 = vector.shape_cast %528 : vector<16x8xf32> to vector<8x2x8xf32>
    %530 = vector.shape_cast %526 : vector<1x8xf32> to vector<1x1x8xf32>
    %531 = vector.broadcast %530 : vector<1x1x8xf32> to vector<8x2x8xf32>
    %532 = arith.addf %529, %531 : vector<8x2x8xf32>
    %cst_188 = arith.constant dense<0.000000e+00> : vector<8x2x2xf32>
    %533 = tpu.matmul %516, %524, %cst_188 {dimension_numbers = #tpu.dot_dimension_numbers<[2], [2], [1], [1], [0, 0, 0, 1, 1, 1], [0], [0]>} : vector<8x2x8xf32>, vector<8x2x8xf32>, vector<8x2x2xf32> -> vector<8x2x2xf32>
    %cst_189 = arith.constant 0.353553385 : f32
    %534 = vector.broadcast %cst_189 : f32 to vector<8x2x2xf32>
    %535 = arith.mulf %533, %534 : vector<8x2x2xf32>
    %cst_190 = arith.constant dense<0xFF800000> : vector<8x2xf32>
    %536 = vector.multi_reduction <maximumf>, %535, %cst_190 [2] : vector<8x2x2xf32> to vector<8x2xf32>
    %537 = vector.shape_cast %536 : vector<8x2xf32> to vector<8x2x1xf32>
    %538 = vector.broadcast %537 : vector<8x2x1xf32> to vector<8x2x2xf32>
    %539 = arith.subf %535, %538 : vector<8x2x2xf32>
    %540 = math.exp %539 : vector<8x2x2xf32>
    %cst_191 = arith.constant dense<0.000000e+00> : vector<8x2xf32>
    %541 = vector.multi_reduction <add>, %540, %cst_191 [2] : vector<8x2x2xf32> to vector<8x2xf32>
    %542 = vector.shape_cast %541 : vector<8x2xf32> to vector<8x2x1xf32>
    %543 = tpu.reciprocal %542 {approx = true} : vector<8x2x1xf32> -> vector<8x2x1xf32>
    %544 = vector.broadcast %543 : vector<8x2x1xf32> to vector<8x2x2xf32>
    %545 = arith.mulf %540, %544 : vector<8x2x2xf32>
    %cst_192 = arith.constant dense<0.000000e+00> : vector<8x2x8xf32>
    %546 = tpu.matmul %545, %532, %cst_192 {dimension_numbers = #tpu.dot_dimension_numbers<[2], [1], [1], [2], [0, 0, 0, 1, 1, 2], [0], [0]>} : vector<8x2x2xf32>, vector<8x2x8xf32>, vector<8x2x8xf32> -> vector<8x2x8xf32>
    %c1688 = arith.constant 1688 : index
    %c0_193 = arith.constant 0 : index
    %547 = vector.load %arg3[%c1688, %c0_193] : memref<1728x128xf32, #tpu.memory_space<vmem>>, vector<8x32xf32>
    %548 = vector.shape_cast %546 : vector<8x2x8xf32> to vector<16x8xf32>
    %cst_194 = arith.constant dense<0.000000e+00> : vector<16x32xf32>
    %549 = tpu.matmul %548, %547, %cst_194 {dimension_numbers = #tpu.dot_dimension_numbers<[1], [0], [0], [1], [0, 0, 1, 1], [], []>} : vector<16x8xf32>, vector<8x32xf32>, vector<16x32xf32> -> vector<16x32xf32>
    %550 = vector.shape_cast %549 : vector<16x32xf32> to vector<8x2x32xf32>
    %551 = arith.addf %508, %550 : vector<8x2x32xf32>
    %c81 = arith.constant 81 : index
    %c0_195 = arith.constant 0 : index
    %552 = vector.load %arg4[%c81, %c0_195] : memref<83x128xf32, #tpu.memory_space<vmem>>, vector<1x32xf32>
    %553 = vector.shape_cast %552 : vector<1x32xf32> to vector<1x1x32xf32>
    %554 = vector.broadcast %553 : vector<1x1x32xf32> to vector<8x2x32xf32>
    %555 = arith.addf %551, %554 : vector<8x2x32xf32>
    %556 = vector.extract_strided_slice %555 {offsets = [0, 0, 0], sizes = [8, 1, 32], strides = [1, 1, 1]} : vector<8x2x32xf32> to vector<8x1x32xf32>
    %557 = vector.shape_cast %556 : vector<8x1x32xf32> to vector<8x32xf32>
    %558 = vector.shape_cast %557 : vector<8x32xf32> to vector<1x8x32xf32>
    %559 = vector.extract_strided_slice %555 {offsets = [0, 1, 0], sizes = [8, 1, 32], strides = [1, 1, 1]} : vector<8x2x32xf32> to vector<8x1x32xf32>
    %560 = vector.shape_cast %559 : vector<8x1x32xf32> to vector<8x32xf32>
    %561 = vector.shape_cast %560 : vector<8x32xf32> to vector<1x8x32xf32>
    %562 = tpu.concatenate %558, %561 in 0 : vector<1x8x32xf32>, vector<1x8x32xf32> -> vector<2x8x32xf32>
    %c816 = arith.constant 816 : index
    %c0_196 = arith.constant 0 : index
    %563 = vector.load %arg3[%c816, %c0_196] : memref<1728x128xf32, #tpu.memory_space<vmem>>, vector<32x16xf32>
    %c54 = arith.constant 54 : index
    %c0_197 = arith.constant 0 : index
    %564 = vector.load %arg4[%c54, %c0_197] : memref<83x128xf32, #tpu.memory_space<vmem>>, vector<1x16xf32>
    %565 = vector.shape_cast %562 : vector<2x8x32xf32> to vector<16x32xf32>
    %cst_198 = arith.constant dense<0.000000e+00> : vector<16x16xf32>
    %566 = tpu.matmul %565, %563, %cst_198 {dimension_numbers = #tpu.dot_dimension_numbers<[1], [0], [0], [1], [0, 0, 1, 1], [], []>} : vector<16x32xf32>, vector<32x16xf32>, vector<16x16xf32> -> vector<16x16xf32>
    %567 = vector.shape_cast %566 : vector<16x16xf32> to vector<2x8x16xf32>
    %568 = vector.shape_cast %564 : vector<1x16xf32> to vector<1x1x16xf32>
    %569 = vector.broadcast %568 : vector<1x1x16xf32> to vector<2x8x16xf32>
    %570 = arith.addf %567, %569 : vector<2x8x16xf32>
    %c432 = arith.constant 432 : index
    %c0_199 = arith.constant 0 : index
    %571 = vector.load %arg3[%c432, %c0_199] : memref<1728x128xf32, #tpu.memory_space<vmem>>, vector<16x8xf32>
    %c28 = arith.constant 28 : index
    %c0_200 = arith.constant 0 : index
    %572 = vector.load %arg4[%c28, %c0_200] : memref<83x128xf32, #tpu.memory_space<vmem>>, vector<1x8xf32>
    %573 = vector.shape_cast %570 : vector<2x8x16xf32> to vector<16x16xf32>
    %cst_201 = arith.constant dense<0.000000e+00> : vector<16x8xf32>
    %574 = tpu.matmul %573, %571, %cst_201 {dimension_numbers = #tpu.dot_dimension_numbers<[1], [0], [0], [1], [0, 0, 1, 1], [], []>} : vector<16x16xf32>, vector<16x8xf32>, vector<16x8xf32> -> vector<16x8xf32>
    %575 = vector.shape_cast %574 : vector<16x8xf32> to vector<2x8x8xf32>
    %576 = vector.shape_cast %572 : vector<1x8xf32> to vector<1x1x8xf32>
    %577 = vector.broadcast %576 : vector<1x1x8xf32> to vector<2x8x8xf32>
    %578 = arith.addf %575, %577 : vector<2x8x8xf32>
    %c448 = arith.constant 448 : index
    %c0_202 = arith.constant 0 : index
    %579 = vector.load %arg3[%c448, %c0_202] : memref<1728x128xf32, #tpu.memory_space<vmem>>, vector<16x8xf32>
    %c29 = arith.constant 29 : index
    %c0_203 = arith.constant 0 : index
    %580 = vector.load %arg4[%c29, %c0_203] : memref<83x128xf32, #tpu.memory_space<vmem>>, vector<1x8xf32>
    %581 = vector.shape_cast %570 : vector<2x8x16xf32> to vector<16x16xf32>
    %cst_204 = arith.constant dense<0.000000e+00> : vector<16x8xf32>
    %582 = tpu.matmul %581, %579, %cst_204 {dimension_numbers = #tpu.dot_dimension_numbers<[1], [0], [0], [1], [0, 0, 1, 1], [], []>} : vector<16x16xf32>, vector<16x8xf32>, vector<16x8xf32> -> vector<16x8xf32>
    %583 = vector.shape_cast %582 : vector<16x8xf32> to vector<2x8x8xf32>
    %584 = vector.shape_cast %580 : vector<1x8xf32> to vector<1x1x8xf32>
    %585 = vector.broadcast %584 : vector<1x1x8xf32> to vector<2x8x8xf32>
    %586 = arith.addf %583, %585 : vector<2x8x8xf32>
    %c464 = arith.constant 464 : index
    %c0_205 = arith.constant 0 : index
    %587 = vector.load %arg3[%c464, %c0_205] : memref<1728x128xf32, #tpu.memory_space<vmem>>, vector<16x8xf32>
    %c30 = arith.constant 30 : index
    %c0_206 = arith.constant 0 : index
    %588 = vector.load %arg4[%c30, %c0_206] : memref<83x128xf32, #tpu.memory_space<vmem>>, vector<1x8xf32>
    %589 = vector.shape_cast %570 : vector<2x8x16xf32> to vector<16x16xf32>
    %cst_207 = arith.constant dense<0.000000e+00> : vector<16x8xf32>
    %590 = tpu.matmul %589, %587, %cst_207 {dimension_numbers = #tpu.dot_dimension_numbers<[1], [0], [0], [1], [0, 0, 1, 1], [], []>} : vector<16x16xf32>, vector<16x8xf32>, vector<16x8xf32> -> vector<16x8xf32>
    %591 = vector.shape_cast %590 : vector<16x8xf32> to vector<2x8x8xf32>
    %592 = vector.shape_cast %588 : vector<1x8xf32> to vector<1x1x8xf32>
    %593 = vector.broadcast %592 : vector<1x1x8xf32> to vector<2x8x8xf32>
    %594 = arith.addf %591, %593 : vector<2x8x8xf32>
    %cst_208 = arith.constant dense<0.000000e+00> : vector<2x8x8xf32>
    %595 = tpu.matmul %578, %586, %cst_208 {dimension_numbers = #tpu.dot_dimension_numbers<[2], [2], [1], [1], [0, 0, 0, 1, 1, 1], [0], [0]>} : vector<2x8x8xf32>, vector<2x8x8xf32>, vector<2x8x8xf32> -> vector<2x8x8xf32>
    %cst_209 = arith.constant 0.353553385 : f32
    %596 = vector.broadcast %cst_209 : f32 to vector<2x8x8xf32>
    %597 = arith.mulf %595, %596 : vector<2x8x8xf32>
    %cst_210 = arith.constant dense<0xFF800000> : vector<2x8xf32>
    %598 = vector.multi_reduction <maximumf>, %597, %cst_210 [2] : vector<2x8x8xf32> to vector<2x8xf32>
    %599 = vector.shape_cast %598 : vector<2x8xf32> to vector<2x8x1xf32>
    %600 = vector.broadcast %599 : vector<2x8x1xf32> to vector<2x8x8xf32>
    %601 = arith.subf %597, %600 : vector<2x8x8xf32>
    %602 = math.exp %601 : vector<2x8x8xf32>
    %cst_211 = arith.constant dense<0.000000e+00> : vector<2x8xf32>
    %603 = vector.multi_reduction <add>, %602, %cst_211 [2] : vector<2x8x8xf32> to vector<2x8xf32>
    %604 = vector.shape_cast %603 : vector<2x8xf32> to vector<2x8x1xf32>
    %605 = tpu.reciprocal %604 {approx = true} : vector<2x8x1xf32> -> vector<2x8x1xf32>
    %606 = vector.broadcast %605 : vector<2x8x1xf32> to vector<2x8x8xf32>
    %607 = arith.mulf %602, %606 : vector<2x8x8xf32>
    %cst_212 = arith.constant dense<0.000000e+00> : vector<2x8x8xf32>
    %608 = tpu.matmul %607, %594, %cst_212 {dimension_numbers = #tpu.dot_dimension_numbers<[2], [1], [1], [2], [0, 0, 0, 1, 1, 2], [0], [0]>} : vector<2x8x8xf32>, vector<2x8x8xf32>, vector<2x8x8xf32> -> vector<2x8x8xf32>
    %c480 = arith.constant 480 : index
    %c0_213 = arith.constant 0 : index
    %609 = vector.load %arg3[%c480, %c0_213] : memref<1728x128xf32, #tpu.memory_space<vmem>>, vector<8x16xf32>
    %610 = vector.shape_cast %608 : vector<2x8x8xf32> to vector<16x8xf32>
    %cst_214 = arith.constant dense<0.000000e+00> : vector<16x16xf32>
    %611 = tpu.matmul %610, %609, %cst_214 {dimension_numbers = #tpu.dot_dimension_numbers<[1], [0], [0], [1], [0, 0, 1, 1], [], []>} : vector<16x8xf32>, vector<8x16xf32>, vector<16x16xf32> -> vector<16x16xf32>
    %612 = vector.shape_cast %611 : vector<16x16xf32> to vector<2x8x16xf32>
    %c488 = arith.constant 488 : index
    %c0_215 = arith.constant 0 : index
    %613 = vector.load %arg3[%c488, %c0_215] : memref<1728x128xf32, #tpu.memory_space<vmem>>, vector<16x8xf32>
    %c31 = arith.constant 31 : index
    %c0_216 = arith.constant 0 : index
    %614 = vector.load %arg4[%c31, %c0_216] : memref<83x128xf32, #tpu.memory_space<vmem>>, vector<1x8xf32>
    %615 = vector.shape_cast %570 : vector<2x8x16xf32> to vector<16x16xf32>
    %cst_217 = arith.constant dense<0.000000e+00> : vector<16x8xf32>
    %616 = tpu.matmul %615, %613, %cst_217 {dimension_numbers = #tpu.dot_dimension_numbers<[1], [0], [0], [1], [0, 0, 1, 1], [], []>} : vector<16x16xf32>, vector<16x8xf32>, vector<16x8xf32> -> vector<16x8xf32>
    %617 = vector.shape_cast %616 : vector<16x8xf32> to vector<2x8x8xf32>
    %618 = vector.shape_cast %614 : vector<1x8xf32> to vector<1x1x8xf32>
    %619 = vector.broadcast %618 : vector<1x1x8xf32> to vector<2x8x8xf32>
    %620 = arith.addf %617, %619 : vector<2x8x8xf32>
    %c504 = arith.constant 504 : index
    %c0_218 = arith.constant 0 : index
    %621 = vector.load %arg3[%c504, %c0_218] : memref<1728x128xf32, #tpu.memory_space<vmem>>, vector<16x8xf32>
    %c32_219 = arith.constant 32 : index
    %c0_220 = arith.constant 0 : index
    %622 = vector.load %arg4[%c32_219, %c0_220] : memref<83x128xf32, #tpu.memory_space<vmem>>, vector<1x8xf32>
    %623 = vector.shape_cast %570 : vector<2x8x16xf32> to vector<16x16xf32>
    %cst_221 = arith.constant dense<0.000000e+00> : vector<16x8xf32>
    %624 = tpu.matmul %623, %621, %cst_221 {dimension_numbers = #tpu.dot_dimension_numbers<[1], [0], [0], [1], [0, 0, 1, 1], [], []>} : vector<16x16xf32>, vector<16x8xf32>, vector<16x8xf32> -> vector<16x8xf32>
    %625 = vector.shape_cast %624 : vector<16x8xf32> to vector<2x8x8xf32>
    %626 = vector.shape_cast %622 : vector<1x8xf32> to vector<1x1x8xf32>
    %627 = vector.broadcast %626 : vector<1x1x8xf32> to vector<2x8x8xf32>
    %628 = arith.addf %625, %627 : vector<2x8x8xf32>
    %c520 = arith.constant 520 : index
    %c0_222 = arith.constant 0 : index
    %629 = vector.load %arg3[%c520, %c0_222] : memref<1728x128xf32, #tpu.memory_space<vmem>>, vector<16x8xf32>
    %c33 = arith.constant 33 : index
    %c0_223 = arith.constant 0 : index
    %630 = vector.load %arg4[%c33, %c0_223] : memref<83x128xf32, #tpu.memory_space<vmem>>, vector<1x8xf32>
    %631 = vector.shape_cast %570 : vector<2x8x16xf32> to vector<16x16xf32>
    %cst_224 = arith.constant dense<0.000000e+00> : vector<16x8xf32>
    %632 = tpu.matmul %631, %629, %cst_224 {dimension_numbers = #tpu.dot_dimension_numbers<[1], [0], [0], [1], [0, 0, 1, 1], [], []>} : vector<16x16xf32>, vector<16x8xf32>, vector<16x8xf32> -> vector<16x8xf32>
    %633 = vector.shape_cast %632 : vector<16x8xf32> to vector<2x8x8xf32>
    %634 = vector.shape_cast %630 : vector<1x8xf32> to vector<1x1x8xf32>
    %635 = vector.broadcast %634 : vector<1x1x8xf32> to vector<2x8x8xf32>
    %636 = arith.addf %633, %635 : vector<2x8x8xf32>
    %cst_225 = arith.constant dense<0.000000e+00> : vector<2x8x8xf32>
    %637 = tpu.matmul %620, %628, %cst_225 {dimension_numbers = #tpu.dot_dimension_numbers<[2], [2], [1], [1], [0, 0, 0, 1, 1, 1], [0], [0]>} : vector<2x8x8xf32>, vector<2x8x8xf32>, vector<2x8x8xf32> -> vector<2x8x8xf32>
    %cst_226 = arith.constant 0.353553385 : f32
    %638 = vector.broadcast %cst_226 : f32 to vector<2x8x8xf32>
    %639 = arith.mulf %637, %638 : vector<2x8x8xf32>
    %cst_227 = arith.constant dense<0xFF800000> : vector<2x8xf32>
    %640 = vector.multi_reduction <maximumf>, %639, %cst_227 [2] : vector<2x8x8xf32> to vector<2x8xf32>
    %641 = vector.shape_cast %640 : vector<2x8xf32> to vector<2x8x1xf32>
    %642 = vector.broadcast %641 : vector<2x8x1xf32> to vector<2x8x8xf32>
    %643 = arith.subf %639, %642 : vector<2x8x8xf32>
    %644 = math.exp %643 : vector<2x8x8xf32>
    %cst_228 = arith.constant dense<0.000000e+00> : vector<2x8xf32>
    %645 = vector.multi_reduction <add>, %644, %cst_228 [2] : vector<2x8x8xf32> to vector<2x8xf32>
    %646 = vector.shape_cast %645 : vector<2x8xf32> to vector<2x8x1xf32>
    %647 = tpu.reciprocal %646 {approx = true} : vector<2x8x1xf32> -> vector<2x8x1xf32>
    %648 = vector.broadcast %647 : vector<2x8x1xf32> to vector<2x8x8xf32>
    %649 = arith.mulf %644, %648 : vector<2x8x8xf32>
    %cst_229 = arith.constant dense<0.000000e+00> : vector<2x8x8xf32>
    %650 = tpu.matmul %649, %636, %cst_229 {dimension_numbers = #tpu.dot_dimension_numbers<[2], [1], [1], [2], [0, 0, 0, 1, 1, 2], [0], [0]>} : vector<2x8x8xf32>, vector<2x8x8xf32>, vector<2x8x8xf32> -> vector<2x8x8xf32>
    %c536 = arith.constant 536 : index
    %c0_230 = arith.constant 0 : index
    %651 = vector.load %arg3[%c536, %c0_230] : memref<1728x128xf32, #tpu.memory_space<vmem>>, vector<8x16xf32>
    %652 = vector.shape_cast %650 : vector<2x8x8xf32> to vector<16x8xf32>
    %cst_231 = arith.constant dense<0.000000e+00> : vector<16x16xf32>
    %653 = tpu.matmul %652, %651, %cst_231 {dimension_numbers = #tpu.dot_dimension_numbers<[1], [0], [0], [1], [0, 0, 1, 1], [], []>} : vector<16x8xf32>, vector<8x16xf32>, vector<16x16xf32> -> vector<16x16xf32>
    %654 = vector.shape_cast %653 : vector<16x16xf32> to vector<2x8x16xf32>
    %655 = arith.addf %612, %654 : vector<2x8x16xf32>
    %c34 = arith.constant 34 : index
    %c0_232 = arith.constant 0 : index
    %656 = vector.load %arg4[%c34, %c0_232] : memref<83x128xf32, #tpu.memory_space<vmem>>, vector<1x16xf32>
    %657 = vector.shape_cast %656 : vector<1x16xf32> to vector<1x1x16xf32>
    %658 = vector.broadcast %657 : vector<1x1x16xf32> to vector<2x8x16xf32>
    %659 = arith.addf %655, %658 : vector<2x8x16xf32>
    %660 = arith.addf %659, %570 : vector<2x8x16xf32>
    %c35 = arith.constant 35 : index
    %c0_233 = arith.constant 0 : index
    %661 = vector.load %arg4[%c35, %c0_233] : memref<83x128xf32, #tpu.memory_space<vmem>>, vector<1x16xf32>
    %c36 = arith.constant 36 : index
    %c0_234 = arith.constant 0 : index
    %662 = vector.load %arg4[%c36, %c0_234] : memref<83x128xf32, #tpu.memory_space<vmem>>, vector<1x16xf32>
    %cst_235 = arith.constant dense<0.000000e+00> : vector<2x8xf32>
    %663 = vector.multi_reduction <add>, %660, %cst_235 [2] : vector<2x8x16xf32> to vector<2x8xf32>
    %664 = vector.shape_cast %663 : vector<2x8xf32> to vector<2x8x1xf32>
    %cst_236 = arith.constant 1.600000e+01 : f32
    %665 = vector.broadcast %cst_236 : f32 to vector<2x8x1xf32>
    %666 = arith.divf %664, %665 : vector<2x8x1xf32>
    %667 = vector.broadcast %666 : vector<2x8x1xf32> to vector<2x8x16xf32>
    %668 = arith.subf %660, %667 : vector<2x8x16xf32>
    %669 = arith.mulf %668, %668 : vector<2x8x16xf32>
    %cst_237 = arith.constant dense<0.000000e+00> : vector<2x8xf32>
    %670 = vector.multi_reduction <add>, %669, %cst_237 [2] : vector<2x8x16xf32> to vector<2x8xf32>
    %671 = vector.shape_cast %670 : vector<2x8xf32> to vector<2x8x1xf32>
    %cst_238 = arith.constant 1.600000e+01 : f32
    %672 = vector.broadcast %cst_238 : f32 to vector<2x8x1xf32>
    %673 = arith.divf %671, %672 : vector<2x8x1xf32>
    %cst_239 = arith.constant 9.99999974E-6 : f32
    %674 = vector.broadcast %cst_239 : f32 to vector<2x8x1xf32>
    %675 = arith.addf %673, %674 : vector<2x8x1xf32>
    %676 = math.rsqrt %675 : vector<2x8x1xf32>
    %677 = vector.broadcast %676 : vector<2x8x1xf32> to vector<2x8x16xf32>
    %678 = arith.mulf %668, %677 : vector<2x8x16xf32>
    %679 = vector.shape_cast %661 : vector<1x16xf32> to vector<1x1x16xf32>
    %680 = vector.broadcast %679 : vector<1x1x16xf32> to vector<2x8x16xf32>
    %681 = arith.mulf %678, %680 : vector<2x8x16xf32>
    %682 = vector.shape_cast %662 : vector<1x16xf32> to vector<1x1x16xf32>
    %683 = vector.broadcast %682 : vector<1x1x16xf32> to vector<2x8x16xf32>
    %684 = arith.addf %681, %683 : vector<2x8x16xf32>
    %c544 = arith.constant 544 : index
    %c0_240 = arith.constant 0 : index
    %685 = vector.load %arg3[%c544, %c0_240] : memref<1728x128xf32, #tpu.memory_space<vmem>>, vector<16x64xf32>
    %c37 = arith.constant 37 : index
    %c0_241 = arith.constant 0 : index
    %686 = vector.load %arg4[%c37, %c0_241] : memref<83x128xf32, #tpu.memory_space<vmem>>, vector<1x64xf32>
    %687 = vector.shape_cast %684 : vector<2x8x16xf32> to vector<16x16xf32>
    %cst_242 = arith.constant dense<0.000000e+00> : vector<16x64xf32>
    %688 = tpu.matmul %687, %685, %cst_242 {dimension_numbers = #tpu.dot_dimension_numbers<[1], [0], [0], [1], [0, 0, 1, 1], [], []>} : vector<16x16xf32>, vector<16x64xf32>, vector<16x64xf32> -> vector<16x64xf32>
    %689 = vector.shape_cast %688 : vector<16x64xf32> to vector<2x8x64xf32>
    %690 = vector.shape_cast %686 : vector<1x64xf32> to vector<1x1x64xf32>
    %691 = vector.broadcast %690 : vector<1x1x64xf32> to vector<2x8x64xf32>
    %692 = arith.addf %689, %691 : vector<2x8x64xf32>
    %cst_243 = arith.constant 5.000000e-01 : f32
    %693 = vector.broadcast %cst_243 : f32 to vector<2x8x64xf32>
    %694 = arith.mulf %693, %692 : vector<2x8x64xf32>
    %cst_244 = arith.constant 4.471500e-02 : f32
    %695 = vector.broadcast %cst_244 : f32 to vector<2x8x64xf32>
    %696 = arith.mulf %695, %692 : vector<2x8x64xf32>
    %697 = arith.mulf %696, %692 : vector<2x8x64xf32>
    %698 = arith.mulf %697, %692 : vector<2x8x64xf32>
    %699 = arith.addf %692, %698 : vector<2x8x64xf32>
    %cst_245 = arith.constant 0.797884583 : f32
    %700 = vector.broadcast %cst_245 : f32 to vector<2x8x64xf32>
    %701 = arith.mulf %700, %699 : vector<2x8x64xf32>
    %702 = math.tanh %701 : vector<2x8x64xf32>
    %cst_246 = arith.constant 1.000000e+00 : f32
    %703 = vector.broadcast %cst_246 : f32 to vector<2x8x64xf32>
    %704 = arith.addf %703, %702 : vector<2x8x64xf32>
    %705 = arith.mulf %694, %704 : vector<2x8x64xf32>
    %c560 = arith.constant 560 : index
    %c0_247 = arith.constant 0 : index
    %706 = vector.load %arg3[%c560, %c0_247] : memref<1728x128xf32, #tpu.memory_space<vmem>>, vector<64x16xf32>
    %c38 = arith.constant 38 : index
    %c0_248 = arith.constant 0 : index
    %707 = vector.load %arg4[%c38, %c0_248] : memref<83x128xf32, #tpu.memory_space<vmem>>, vector<1x16xf32>
    %708 = vector.shape_cast %705 : vector<2x8x64xf32> to vector<16x64xf32>
    %cst_249 = arith.constant dense<0.000000e+00> : vector<16x16xf32>
    %709 = tpu.matmul %708, %706, %cst_249 {dimension_numbers = #tpu.dot_dimension_numbers<[1], [0], [0], [1], [0, 0, 1, 1], [], []>} : vector<16x64xf32>, vector<64x16xf32>, vector<16x16xf32> -> vector<16x16xf32>
    %710 = vector.shape_cast %709 : vector<16x16xf32> to vector<2x8x16xf32>
    %711 = vector.shape_cast %707 : vector<1x16xf32> to vector<1x1x16xf32>
    %712 = vector.broadcast %711 : vector<1x1x16xf32> to vector<2x8x16xf32>
    %713 = arith.addf %710, %712 : vector<2x8x16xf32>
    %714 = arith.addf %713, %684 : vector<2x8x16xf32>
    %c39 = arith.constant 39 : index
    %c0_250 = arith.constant 0 : index
    %715 = vector.load %arg4[%c39, %c0_250] : memref<83x128xf32, #tpu.memory_space<vmem>>, vector<1x16xf32>
    %c40 = arith.constant 40 : index
    %c0_251 = arith.constant 0 : index
    %716 = vector.load %arg4[%c40, %c0_251] : memref<83x128xf32, #tpu.memory_space<vmem>>, vector<1x16xf32>
    %cst_252 = arith.constant dense<0.000000e+00> : vector<2x8xf32>
    %717 = vector.multi_reduction <add>, %714, %cst_252 [2] : vector<2x8x16xf32> to vector<2x8xf32>
    %718 = vector.shape_cast %717 : vector<2x8xf32> to vector<2x8x1xf32>
    %cst_253 = arith.constant 1.600000e+01 : f32
    %719 = vector.broadcast %cst_253 : f32 to vector<2x8x1xf32>
    %720 = arith.divf %718, %719 : vector<2x8x1xf32>
    %721 = vector.broadcast %720 : vector<2x8x1xf32> to vector<2x8x16xf32>
    %722 = arith.subf %714, %721 : vector<2x8x16xf32>
    %723 = arith.mulf %722, %722 : vector<2x8x16xf32>
    %cst_254 = arith.constant dense<0.000000e+00> : vector<2x8xf32>
    %724 = vector.multi_reduction <add>, %723, %cst_254 [2] : vector<2x8x16xf32> to vector<2x8xf32>
    %725 = vector.shape_cast %724 : vector<2x8xf32> to vector<2x8x1xf32>
    %cst_255 = arith.constant 1.600000e+01 : f32
    %726 = vector.broadcast %cst_255 : f32 to vector<2x8x1xf32>
    %727 = arith.divf %725, %726 : vector<2x8x1xf32>
    %cst_256 = arith.constant 9.99999974E-6 : f32
    %728 = vector.broadcast %cst_256 : f32 to vector<2x8x1xf32>
    %729 = arith.addf %727, %728 : vector<2x8x1xf32>
    %730 = math.rsqrt %729 : vector<2x8x1xf32>
    %731 = vector.broadcast %730 : vector<2x8x1xf32> to vector<2x8x16xf32>
    %732 = arith.mulf %722, %731 : vector<2x8x16xf32>
    %733 = vector.shape_cast %715 : vector<1x16xf32> to vector<1x1x16xf32>
    %734 = vector.broadcast %733 : vector<1x1x16xf32> to vector<2x8x16xf32>
    %735 = arith.mulf %732, %734 : vector<2x8x16xf32>
    %736 = vector.shape_cast %716 : vector<1x16xf32> to vector<1x1x16xf32>
    %737 = vector.broadcast %736 : vector<1x1x16xf32> to vector<2x8x16xf32>
    %738 = arith.addf %735, %737 : vector<2x8x16xf32>
    %c624 = arith.constant 624 : index
    %c0_257 = arith.constant 0 : index
    %739 = vector.load %arg3[%c624, %c0_257] : memref<1728x128xf32, #tpu.memory_space<vmem>>, vector<16x8xf32>
    %c41 = arith.constant 41 : index
    %c0_258 = arith.constant 0 : index
    %740 = vector.load %arg4[%c41, %c0_258] : memref<83x128xf32, #tpu.memory_space<vmem>>, vector<1x8xf32>
    %741 = vector.shape_cast %738 : vector<2x8x16xf32> to vector<16x16xf32>
    %cst_259 = arith.constant dense<0.000000e+00> : vector<16x8xf32>
    %742 = tpu.matmul %741, %739, %cst_259 {dimension_numbers = #tpu.dot_dimension_numbers<[1], [0], [0], [1], [0, 0, 1, 1], [], []>} : vector<16x16xf32>, vector<16x8xf32>, vector<16x8xf32> -> vector<16x8xf32>
    %743 = vector.shape_cast %742 : vector<16x8xf32> to vector<2x8x8xf32>
    %744 = vector.shape_cast %740 : vector<1x8xf32> to vector<1x1x8xf32>
    %745 = vector.broadcast %744 : vector<1x1x8xf32> to vector<2x8x8xf32>
    %746 = arith.addf %743, %745 : vector<2x8x8xf32>
    %c640 = arith.constant 640 : index
    %c0_260 = arith.constant 0 : index
    %747 = vector.load %arg3[%c640, %c0_260] : memref<1728x128xf32, #tpu.memory_space<vmem>>, vector<16x8xf32>
    %c42 = arith.constant 42 : index
    %c0_261 = arith.constant 0 : index
    %748 = vector.load %arg4[%c42, %c0_261] : memref<83x128xf32, #tpu.memory_space<vmem>>, vector<1x8xf32>
    %749 = vector.shape_cast %738 : vector<2x8x16xf32> to vector<16x16xf32>
    %cst_262 = arith.constant dense<0.000000e+00> : vector<16x8xf32>
    %750 = tpu.matmul %749, %747, %cst_262 {dimension_numbers = #tpu.dot_dimension_numbers<[1], [0], [0], [1], [0, 0, 1, 1], [], []>} : vector<16x16xf32>, vector<16x8xf32>, vector<16x8xf32> -> vector<16x8xf32>
    %751 = vector.shape_cast %750 : vector<16x8xf32> to vector<2x8x8xf32>
    %752 = vector.shape_cast %748 : vector<1x8xf32> to vector<1x1x8xf32>
    %753 = vector.broadcast %752 : vector<1x1x8xf32> to vector<2x8x8xf32>
    %754 = arith.addf %751, %753 : vector<2x8x8xf32>
    %c656 = arith.constant 656 : index
    %c0_263 = arith.constant 0 : index
    %755 = vector.load %arg3[%c656, %c0_263] : memref<1728x128xf32, #tpu.memory_space<vmem>>, vector<16x8xf32>
    %c43 = arith.constant 43 : index
    %c0_264 = arith.constant 0 : index
    %756 = vector.load %arg4[%c43, %c0_264] : memref<83x128xf32, #tpu.memory_space<vmem>>, vector<1x8xf32>
    %757 = vector.shape_cast %738 : vector<2x8x16xf32> to vector<16x16xf32>
    %cst_265 = arith.constant dense<0.000000e+00> : vector<16x8xf32>
    %758 = tpu.matmul %757, %755, %cst_265 {dimension_numbers = #tpu.dot_dimension_numbers<[1], [0], [0], [1], [0, 0, 1, 1], [], []>} : vector<16x16xf32>, vector<16x8xf32>, vector<16x8xf32> -> vector<16x8xf32>
    %759 = vector.shape_cast %758 : vector<16x8xf32> to vector<2x8x8xf32>
    %760 = vector.shape_cast %756 : vector<1x8xf32> to vector<1x1x8xf32>
    %761 = vector.broadcast %760 : vector<1x1x8xf32> to vector<2x8x8xf32>
    %762 = arith.addf %759, %761 : vector<2x8x8xf32>
    %cst_266 = arith.constant dense<0.000000e+00> : vector<2x8x8xf32>
    %763 = tpu.matmul %746, %754, %cst_266 {dimension_numbers = #tpu.dot_dimension_numbers<[2], [2], [1], [1], [0, 0, 0, 1, 1, 1], [0], [0]>} : vector<2x8x8xf32>, vector<2x8x8xf32>, vector<2x8x8xf32> -> vector<2x8x8xf32>
    %cst_267 = arith.constant 0.353553385 : f32
    %764 = vector.broadcast %cst_267 : f32 to vector<2x8x8xf32>
    %765 = arith.mulf %763, %764 : vector<2x8x8xf32>
    %cst_268 = arith.constant dense<0xFF800000> : vector<2x8xf32>
    %766 = vector.multi_reduction <maximumf>, %765, %cst_268 [2] : vector<2x8x8xf32> to vector<2x8xf32>
    %767 = vector.shape_cast %766 : vector<2x8xf32> to vector<2x8x1xf32>
    %768 = vector.broadcast %767 : vector<2x8x1xf32> to vector<2x8x8xf32>
    %769 = arith.subf %765, %768 : vector<2x8x8xf32>
    %770 = math.exp %769 : vector<2x8x8xf32>
    %cst_269 = arith.constant dense<0.000000e+00> : vector<2x8xf32>
    %771 = vector.multi_reduction <add>, %770, %cst_269 [2] : vector<2x8x8xf32> to vector<2x8xf32>
    %772 = vector.shape_cast %771 : vector<2x8xf32> to vector<2x8x1xf32>
    %773 = tpu.reciprocal %772 {approx = true} : vector<2x8x1xf32> -> vector<2x8x1xf32>
    %774 = vector.broadcast %773 : vector<2x8x1xf32> to vector<2x8x8xf32>
    %775 = arith.mulf %770, %774 : vector<2x8x8xf32>
    %cst_270 = arith.constant dense<0.000000e+00> : vector<2x8x8xf32>
    %776 = tpu.matmul %775, %762, %cst_270 {dimension_numbers = #tpu.dot_dimension_numbers<[2], [1], [1], [2], [0, 0, 0, 1, 1, 2], [0], [0]>} : vector<2x8x8xf32>, vector<2x8x8xf32>, vector<2x8x8xf32> -> vector<2x8x8xf32>
    %c672 = arith.constant 672 : index
    %c0_271 = arith.constant 0 : index
    %777 = vector.load %arg3[%c672, %c0_271] : memref<1728x128xf32, #tpu.memory_space<vmem>>, vector<8x16xf32>
    %778 = vector.shape_cast %776 : vector<2x8x8xf32> to vector<16x8xf32>
    %cst_272 = arith.constant dense<0.000000e+00> : vector<16x16xf32>
    %779 = tpu.matmul %778, %777, %cst_272 {dimension_numbers = #tpu.dot_dimension_numbers<[1], [0], [0], [1], [0, 0, 1, 1], [], []>} : vector<16x8xf32>, vector<8x16xf32>, vector<16x16xf32> -> vector<16x16xf32>
    %780 = vector.shape_cast %779 : vector<16x16xf32> to vector<2x8x16xf32>
    %c680 = arith.constant 680 : index
    %c0_273 = arith.constant 0 : index
    %781 = vector.load %arg3[%c680, %c0_273] : memref<1728x128xf32, #tpu.memory_space<vmem>>, vector<16x8xf32>
    %c44 = arith.constant 44 : index
    %c0_274 = arith.constant 0 : index
    %782 = vector.load %arg4[%c44, %c0_274] : memref<83x128xf32, #tpu.memory_space<vmem>>, vector<1x8xf32>
    %783 = vector.shape_cast %738 : vector<2x8x16xf32> to vector<16x16xf32>
    %cst_275 = arith.constant dense<0.000000e+00> : vector<16x8xf32>
    %784 = tpu.matmul %783, %781, %cst_275 {dimension_numbers = #tpu.dot_dimension_numbers<[1], [0], [0], [1], [0, 0, 1, 1], [], []>} : vector<16x16xf32>, vector<16x8xf32>, vector<16x8xf32> -> vector<16x8xf32>
    %785 = vector.shape_cast %784 : vector<16x8xf32> to vector<2x8x8xf32>
    %786 = vector.shape_cast %782 : vector<1x8xf32> to vector<1x1x8xf32>
    %787 = vector.broadcast %786 : vector<1x1x8xf32> to vector<2x8x8xf32>
    %788 = arith.addf %785, %787 : vector<2x8x8xf32>
    %c696 = arith.constant 696 : index
    %c0_276 = arith.constant 0 : index
    %789 = vector.load %arg3[%c696, %c0_276] : memref<1728x128xf32, #tpu.memory_space<vmem>>, vector<16x8xf32>
    %c45 = arith.constant 45 : index
    %c0_277 = arith.constant 0 : index
    %790 = vector.load %arg4[%c45, %c0_277] : memref<83x128xf32, #tpu.memory_space<vmem>>, vector<1x8xf32>
    %791 = vector.shape_cast %738 : vector<2x8x16xf32> to vector<16x16xf32>
    %cst_278 = arith.constant dense<0.000000e+00> : vector<16x8xf32>
    %792 = tpu.matmul %791, %789, %cst_278 {dimension_numbers = #tpu.dot_dimension_numbers<[1], [0], [0], [1], [0, 0, 1, 1], [], []>} : vector<16x16xf32>, vector<16x8xf32>, vector<16x8xf32> -> vector<16x8xf32>
    %793 = vector.shape_cast %792 : vector<16x8xf32> to vector<2x8x8xf32>
    %794 = vector.shape_cast %790 : vector<1x8xf32> to vector<1x1x8xf32>
    %795 = vector.broadcast %794 : vector<1x1x8xf32> to vector<2x8x8xf32>
    %796 = arith.addf %793, %795 : vector<2x8x8xf32>
    %c712 = arith.constant 712 : index
    %c0_279 = arith.constant 0 : index
    %797 = vector.load %arg3[%c712, %c0_279] : memref<1728x128xf32, #tpu.memory_space<vmem>>, vector<16x8xf32>
    %c46 = arith.constant 46 : index
    %c0_280 = arith.constant 0 : index
    %798 = vector.load %arg4[%c46, %c0_280] : memref<83x128xf32, #tpu.memory_space<vmem>>, vector<1x8xf32>
    %799 = vector.shape_cast %738 : vector<2x8x16xf32> to vector<16x16xf32>
    %cst_281 = arith.constant dense<0.000000e+00> : vector<16x8xf32>
    %800 = tpu.matmul %799, %797, %cst_281 {dimension_numbers = #tpu.dot_dimension_numbers<[1], [0], [0], [1], [0, 0, 1, 1], [], []>} : vector<16x16xf32>, vector<16x8xf32>, vector<16x8xf32> -> vector<16x8xf32>
    %801 = vector.shape_cast %800 : vector<16x8xf32> to vector<2x8x8xf32>
    %802 = vector.shape_cast %798 : vector<1x8xf32> to vector<1x1x8xf32>
    %803 = vector.broadcast %802 : vector<1x1x8xf32> to vector<2x8x8xf32>
    %804 = arith.addf %801, %803 : vector<2x8x8xf32>
    %cst_282 = arith.constant dense<0.000000e+00> : vector<2x8x8xf32>
    %805 = tpu.matmul %788, %796, %cst_282 {dimension_numbers = #tpu.dot_dimension_numbers<[2], [2], [1], [1], [0, 0, 0, 1, 1, 1], [0], [0]>} : vector<2x8x8xf32>, vector<2x8x8xf32>, vector<2x8x8xf32> -> vector<2x8x8xf32>
    %cst_283 = arith.constant 0.353553385 : f32
    %806 = vector.broadcast %cst_283 : f32 to vector<2x8x8xf32>
    %807 = arith.mulf %805, %806 : vector<2x8x8xf32>
    %cst_284 = arith.constant dense<0xFF800000> : vector<2x8xf32>
    %808 = vector.multi_reduction <maximumf>, %807, %cst_284 [2] : vector<2x8x8xf32> to vector<2x8xf32>
    %809 = vector.shape_cast %808 : vector<2x8xf32> to vector<2x8x1xf32>
    %810 = vector.broadcast %809 : vector<2x8x1xf32> to vector<2x8x8xf32>
    %811 = arith.subf %807, %810 : vector<2x8x8xf32>
    %812 = math.exp %811 : vector<2x8x8xf32>
    %cst_285 = arith.constant dense<0.000000e+00> : vector<2x8xf32>
    %813 = vector.multi_reduction <add>, %812, %cst_285 [2] : vector<2x8x8xf32> to vector<2x8xf32>
    %814 = vector.shape_cast %813 : vector<2x8xf32> to vector<2x8x1xf32>
    %815 = tpu.reciprocal %814 {approx = true} : vector<2x8x1xf32> -> vector<2x8x1xf32>
    %816 = vector.broadcast %815 : vector<2x8x1xf32> to vector<2x8x8xf32>
    %817 = arith.mulf %812, %816 : vector<2x8x8xf32>
    %cst_286 = arith.constant dense<0.000000e+00> : vector<2x8x8xf32>
    %818 = tpu.matmul %817, %804, %cst_286 {dimension_numbers = #tpu.dot_dimension_numbers<[2], [1], [1], [2], [0, 0, 0, 1, 1, 2], [0], [0]>} : vector<2x8x8xf32>, vector<2x8x8xf32>, vector<2x8x8xf32> -> vector<2x8x8xf32>
    %c728 = arith.constant 728 : index
    %c0_287 = arith.constant 0 : index
    %819 = vector.load %arg3[%c728, %c0_287] : memref<1728x128xf32, #tpu.memory_space<vmem>>, vector<8x16xf32>
    %820 = vector.shape_cast %818 : vector<2x8x8xf32> to vector<16x8xf32>
    %cst_288 = arith.constant dense<0.000000e+00> : vector<16x16xf32>
    %821 = tpu.matmul %820, %819, %cst_288 {dimension_numbers = #tpu.dot_dimension_numbers<[1], [0], [0], [1], [0, 0, 1, 1], [], []>} : vector<16x8xf32>, vector<8x16xf32>, vector<16x16xf32> -> vector<16x16xf32>
    %822 = vector.shape_cast %821 : vector<16x16xf32> to vector<2x8x16xf32>
    %823 = arith.addf %780, %822 : vector<2x8x16xf32>
    %c47 = arith.constant 47 : index
    %c0_289 = arith.constant 0 : index
    %824 = vector.load %arg4[%c47, %c0_289] : memref<83x128xf32, #tpu.memory_space<vmem>>, vector<1x16xf32>
    %825 = vector.shape_cast %824 : vector<1x16xf32> to vector<1x1x16xf32>
    %826 = vector.broadcast %825 : vector<1x1x16xf32> to vector<2x8x16xf32>
    %827 = arith.addf %823, %826 : vector<2x8x16xf32>
    %828 = arith.addf %827, %738 : vector<2x8x16xf32>
    %c48_290 = arith.constant 48 : index
    %c0_291 = arith.constant 0 : index
    %829 = vector.load %arg4[%c48_290, %c0_291] : memref<83x128xf32, #tpu.memory_space<vmem>>, vector<1x16xf32>
    %c49 = arith.constant 49 : index
    %c0_292 = arith.constant 0 : index
    %830 = vector.load %arg4[%c49, %c0_292] : memref<83x128xf32, #tpu.memory_space<vmem>>, vector<1x16xf32>
    %cst_293 = arith.constant dense<0.000000e+00> : vector<2x8xf32>
    %831 = vector.multi_reduction <add>, %828, %cst_293 [2] : vector<2x8x16xf32> to vector<2x8xf32>
    %832 = vector.shape_cast %831 : vector<2x8xf32> to vector<2x8x1xf32>
    %cst_294 = arith.constant 1.600000e+01 : f32
    %833 = vector.broadcast %cst_294 : f32 to vector<2x8x1xf32>
    %834 = arith.divf %832, %833 : vector<2x8x1xf32>
    %835 = vector.broadcast %834 : vector<2x8x1xf32> to vector<2x8x16xf32>
    %836 = arith.subf %828, %835 : vector<2x8x16xf32>
    %837 = arith.mulf %836, %836 : vector<2x8x16xf32>
    %cst_295 = arith.constant dense<0.000000e+00> : vector<2x8xf32>
    %838 = vector.multi_reduction <add>, %837, %cst_295 [2] : vector<2x8x16xf32> to vector<2x8xf32>
    %839 = vector.shape_cast %838 : vector<2x8xf32> to vector<2x8x1xf32>
    %cst_296 = arith.constant 1.600000e+01 : f32
    %840 = vector.broadcast %cst_296 : f32 to vector<2x8x1xf32>
    %841 = arith.divf %839, %840 : vector<2x8x1xf32>
    %cst_297 = arith.constant 9.99999974E-6 : f32
    %842 = vector.broadcast %cst_297 : f32 to vector<2x8x1xf32>
    %843 = arith.addf %841, %842 : vector<2x8x1xf32>
    %844 = math.rsqrt %843 : vector<2x8x1xf32>
    %845 = vector.broadcast %844 : vector<2x8x1xf32> to vector<2x8x16xf32>
    %846 = arith.mulf %836, %845 : vector<2x8x16xf32>
    %847 = vector.shape_cast %829 : vector<1x16xf32> to vector<1x1x16xf32>
    %848 = vector.broadcast %847 : vector<1x1x16xf32> to vector<2x8x16xf32>
    %849 = arith.mulf %846, %848 : vector<2x8x16xf32>
    %850 = vector.shape_cast %830 : vector<1x16xf32> to vector<1x1x16xf32>
    %851 = vector.broadcast %850 : vector<1x1x16xf32> to vector<2x8x16xf32>
    %852 = arith.addf %849, %851 : vector<2x8x16xf32>
    %c736 = arith.constant 736 : index
    %c0_298 = arith.constant 0 : index
    %853 = vector.load %arg3[%c736, %c0_298] : memref<1728x128xf32, #tpu.memory_space<vmem>>, vector<16x64xf32>
    %c50 = arith.constant 50 : index
    %c0_299 = arith.constant 0 : index
    %854 = vector.load %arg4[%c50, %c0_299] : memref<83x128xf32, #tpu.memory_space<vmem>>, vector<1x64xf32>
    %855 = vector.shape_cast %852 : vector<2x8x16xf32> to vector<16x16xf32>
    %cst_300 = arith.constant dense<0.000000e+00> : vector<16x64xf32>
    %856 = tpu.matmul %855, %853, %cst_300 {dimension_numbers = #tpu.dot_dimension_numbers<[1], [0], [0], [1], [0, 0, 1, 1], [], []>} : vector<16x16xf32>, vector<16x64xf32>, vector<16x64xf32> -> vector<16x64xf32>
    %857 = vector.shape_cast %856 : vector<16x64xf32> to vector<2x8x64xf32>
    %858 = vector.shape_cast %854 : vector<1x64xf32> to vector<1x1x64xf32>
    %859 = vector.broadcast %858 : vector<1x1x64xf32> to vector<2x8x64xf32>
    %860 = arith.addf %857, %859 : vector<2x8x64xf32>
    %cst_301 = arith.constant 5.000000e-01 : f32
    %861 = vector.broadcast %cst_301 : f32 to vector<2x8x64xf32>
    %862 = arith.mulf %861, %860 : vector<2x8x64xf32>
    %cst_302 = arith.constant 4.471500e-02 : f32
    %863 = vector.broadcast %cst_302 : f32 to vector<2x8x64xf32>
    %864 = arith.mulf %863, %860 : vector<2x8x64xf32>
    %865 = arith.mulf %864, %860 : vector<2x8x64xf32>
    %866 = arith.mulf %865, %860 : vector<2x8x64xf32>
    %867 = arith.addf %860, %866 : vector<2x8x64xf32>
    %cst_303 = arith.constant 0.797884583 : f32
    %868 = vector.broadcast %cst_303 : f32 to vector<2x8x64xf32>
    %869 = arith.mulf %868, %867 : vector<2x8x64xf32>
    %870 = math.tanh %869 : vector<2x8x64xf32>
    %cst_304 = arith.constant 1.000000e+00 : f32
    %871 = vector.broadcast %cst_304 : f32 to vector<2x8x64xf32>
    %872 = arith.addf %871, %870 : vector<2x8x64xf32>
    %873 = arith.mulf %862, %872 : vector<2x8x64xf32>
    %c752 = arith.constant 752 : index
    %c0_305 = arith.constant 0 : index
    %874 = vector.load %arg3[%c752, %c0_305] : memref<1728x128xf32, #tpu.memory_space<vmem>>, vector<64x16xf32>
    %c51 = arith.constant 51 : index
    %c0_306 = arith.constant 0 : index
    %875 = vector.load %arg4[%c51, %c0_306] : memref<83x128xf32, #tpu.memory_space<vmem>>, vector<1x16xf32>
    %876 = vector.shape_cast %873 : vector<2x8x64xf32> to vector<16x64xf32>
    %cst_307 = arith.constant dense<0.000000e+00> : vector<16x16xf32>
    %877 = tpu.matmul %876, %874, %cst_307 {dimension_numbers = #tpu.dot_dimension_numbers<[1], [0], [0], [1], [0, 0, 1, 1], [], []>} : vector<16x64xf32>, vector<64x16xf32>, vector<16x16xf32> -> vector<16x16xf32>
    %878 = vector.shape_cast %877 : vector<16x16xf32> to vector<2x8x16xf32>
    %879 = vector.shape_cast %875 : vector<1x16xf32> to vector<1x1x16xf32>
    %880 = vector.broadcast %879 : vector<1x1x16xf32> to vector<2x8x16xf32>
    %881 = arith.addf %878, %880 : vector<2x8x16xf32>
    %882 = arith.addf %881, %852 : vector<2x8x16xf32>
    %c52 = arith.constant 52 : index
    %c0_308 = arith.constant 0 : index
    %883 = vector.load %arg4[%c52, %c0_308] : memref<83x128xf32, #tpu.memory_space<vmem>>, vector<1x16xf32>
    %c53 = arith.constant 53 : index
    %c0_309 = arith.constant 0 : index
    %884 = vector.load %arg4[%c53, %c0_309] : memref<83x128xf32, #tpu.memory_space<vmem>>, vector<1x16xf32>
    %cst_310 = arith.constant dense<0.000000e+00> : vector<2x8xf32>
    %885 = vector.multi_reduction <add>, %882, %cst_310 [2] : vector<2x8x16xf32> to vector<2x8xf32>
    %886 = vector.shape_cast %885 : vector<2x8xf32> to vector<2x8x1xf32>
    %cst_311 = arith.constant 1.600000e+01 : f32
    %887 = vector.broadcast %cst_311 : f32 to vector<2x8x1xf32>
    %888 = arith.divf %886, %887 : vector<2x8x1xf32>
    %889 = vector.broadcast %888 : vector<2x8x1xf32> to vector<2x8x16xf32>
    %890 = arith.subf %882, %889 : vector<2x8x16xf32>
    %891 = arith.mulf %890, %890 : vector<2x8x16xf32>
    %cst_312 = arith.constant dense<0.000000e+00> : vector<2x8xf32>
    %892 = vector.multi_reduction <add>, %891, %cst_312 [2] : vector<2x8x16xf32> to vector<2x8xf32>
    %893 = vector.shape_cast %892 : vector<2x8xf32> to vector<2x8x1xf32>
    %cst_313 = arith.constant 1.600000e+01 : f32
    %894 = vector.broadcast %cst_313 : f32 to vector<2x8x1xf32>
    %895 = arith.divf %893, %894 : vector<2x8x1xf32>
    %cst_314 = arith.constant 9.99999974E-6 : f32
    %896 = vector.broadcast %cst_314 : f32 to vector<2x8x1xf32>
    %897 = arith.addf %895, %896 : vector<2x8x1xf32>
    %898 = math.rsqrt %897 : vector<2x8x1xf32>
    %899 = vector.broadcast %898 : vector<2x8x1xf32> to vector<2x8x16xf32>
    %900 = arith.mulf %890, %899 : vector<2x8x16xf32>
    %901 = vector.shape_cast %883 : vector<1x16xf32> to vector<1x1x16xf32>
    %902 = vector.broadcast %901 : vector<1x1x16xf32> to vector<2x8x16xf32>
    %903 = arith.mulf %900, %902 : vector<2x8x16xf32>
    %904 = vector.shape_cast %884 : vector<1x16xf32> to vector<1x1x16xf32>
    %905 = vector.broadcast %904 : vector<1x1x16xf32> to vector<2x8x16xf32>
    %906 = arith.addf %903, %905 : vector<2x8x16xf32>
    %c848 = arith.constant 848 : index
    %c0_315 = arith.constant 0 : index
    %907 = vector.load %arg3[%c848, %c0_315] : memref<1728x128xf32, #tpu.memory_space<vmem>>, vector<16x32xf32>
    %c55 = arith.constant 55 : index
    %c0_316 = arith.constant 0 : index
    %908 = vector.load %arg4[%c55, %c0_316] : memref<83x128xf32, #tpu.memory_space<vmem>>, vector<1x32xf32>
    %909 = vector.shape_cast %906 : vector<2x8x16xf32> to vector<16x16xf32>
    %cst_317 = arith.constant dense<0.000000e+00> : vector<16x32xf32>
    %910 = tpu.matmul %909, %907, %cst_317 {dimension_numbers = #tpu.dot_dimension_numbers<[1], [0], [0], [1], [0, 0, 1, 1], [], []>} : vector<16x16xf32>, vector<16x32xf32>, vector<16x32xf32> -> vector<16x32xf32>
    %911 = vector.shape_cast %910 : vector<16x32xf32> to vector<2x8x32xf32>
    %912 = vector.shape_cast %908 : vector<1x32xf32> to vector<1x1x32xf32>
    %913 = vector.broadcast %912 : vector<1x1x32xf32> to vector<2x8x32xf32>
    %914 = arith.addf %911, %913 : vector<2x8x32xf32>
    %915 = arith.addf %562, %914 : vector<2x8x32xf32>
    %916 = vector.extract_strided_slice %0 {offsets = [0, 0, 0], sizes = [2, 1, 32], strides = [1, 1, 1]} : vector<2x8x32xf32> to vector<2x1x32xf32>
    %917 = vector.shape_cast %916 : vector<2x1x32xf32> to vector<2x32xf32>
    %918 = vector.shape_cast %917 : vector<2x32xf32> to vector<1x2x32xf32>
    %919 = vector.extract_strided_slice %915 {offsets = [0, 0, 0], sizes = [2, 1, 32], strides = [1, 1, 1]} : vector<2x8x32xf32> to vector<2x1x32xf32>
    %920 = vector.shape_cast %919 : vector<2x1x32xf32> to vector<2x32xf32>
    %921 = vector.shape_cast %920 : vector<2x32xf32> to vector<1x2x32xf32>
    %c864 = arith.constant 864 : index
    %c0_318 = arith.constant 0 : index
    %922 = vector.load %arg3[%c864, %c0_318] : memref<1728x128xf32, #tpu.memory_space<vmem>>, vector<32x8xf32>
    %c56_319 = arith.constant 56 : index
    %c0_320 = arith.constant 0 : index
    %923 = vector.load %arg4[%c56_319, %c0_320] : memref<83x128xf32, #tpu.memory_space<vmem>>, vector<1x8xf32>
    %924 = vector.shape_cast %918 : vector<1x2x32xf32> to vector<2x32xf32>
    %cst_321 = arith.constant dense<0.000000e+00> : vector<2x8xf32>
    %925 = tpu.matmul %924, %922, %cst_321 {dimension_numbers = #tpu.dot_dimension_numbers<[1], [0], [0], [1], [0, 0, 1, 1], [], []>} : vector<2x32xf32>, vector<32x8xf32>, vector<2x8xf32> -> vector<2x8xf32>
    %926 = vector.shape_cast %925 : vector<2x8xf32> to vector<1x2x8xf32>
    %927 = vector.shape_cast %923 : vector<1x8xf32> to vector<1x1x8xf32>
    %928 = vector.broadcast %927 : vector<1x1x8xf32> to vector<1x2x8xf32>
    %929 = arith.addf %926, %928 : vector<1x2x8xf32>
    %c896 = arith.constant 896 : index
    %c0_322 = arith.constant 0 : index
    %930 = vector.load %arg3[%c896, %c0_322] : memref<1728x128xf32, #tpu.memory_space<vmem>>, vector<32x8xf32>
    %c57 = arith.constant 57 : index
    %c0_323 = arith.constant 0 : index
    %931 = vector.load %arg4[%c57, %c0_323] : memref<83x128xf32, #tpu.memory_space<vmem>>, vector<1x8xf32>
    %932 = vector.shape_cast %921 : vector<1x2x32xf32> to vector<2x32xf32>
    %cst_324 = arith.constant dense<0.000000e+00> : vector<2x8xf32>
    %933 = tpu.matmul %932, %930, %cst_324 {dimension_numbers = #tpu.dot_dimension_numbers<[1], [0], [0], [1], [0, 0, 1, 1], [], []>} : vector<2x32xf32>, vector<32x8xf32>, vector<2x8xf32> -> vector<2x8xf32>
    %934 = vector.shape_cast %933 : vector<2x8xf32> to vector<1x2x8xf32>
    %935 = vector.shape_cast %931 : vector<1x8xf32> to vector<1x1x8xf32>
    %936 = vector.broadcast %935 : vector<1x1x8xf32> to vector<1x2x8xf32>
    %937 = arith.addf %934, %936 : vector<1x2x8xf32>
    %c928 = arith.constant 928 : index
    %c0_325 = arith.constant 0 : index
    %938 = vector.load %arg3[%c928, %c0_325] : memref<1728x128xf32, #tpu.memory_space<vmem>>, vector<32x8xf32>
    %c58 = arith.constant 58 : index
    %c0_326 = arith.constant 0 : index
    %939 = vector.load %arg4[%c58, %c0_326] : memref<83x128xf32, #tpu.memory_space<vmem>>, vector<1x8xf32>
    %940 = vector.shape_cast %921 : vector<1x2x32xf32> to vector<2x32xf32>
    %cst_327 = arith.constant dense<0.000000e+00> : vector<2x8xf32>
    %941 = tpu.matmul %940, %938, %cst_327 {dimension_numbers = #tpu.dot_dimension_numbers<[1], [0], [0], [1], [0, 0, 1, 1], [], []>} : vector<2x32xf32>, vector<32x8xf32>, vector<2x8xf32> -> vector<2x8xf32>
    %942 = vector.shape_cast %941 : vector<2x8xf32> to vector<1x2x8xf32>
    %943 = vector.shape_cast %939 : vector<1x8xf32> to vector<1x1x8xf32>
    %944 = vector.broadcast %943 : vector<1x1x8xf32> to vector<1x2x8xf32>
    %945 = arith.addf %942, %944 : vector<1x2x8xf32>
    %cst_328 = arith.constant dense<0.000000e+00> : vector<1x2x2xf32>
    %946 = tpu.matmul %929, %937, %cst_328 {dimension_numbers = #tpu.dot_dimension_numbers<[2], [2], [1], [1], [0, 0, 0, 1, 1, 1], [0], [0]>} : vector<1x2x8xf32>, vector<1x2x8xf32>, vector<1x2x2xf32> -> vector<1x2x2xf32>
    %cst_329 = arith.constant 0.353553385 : f32
    %947 = vector.broadcast %cst_329 : f32 to vector<1x2x2xf32>
    %948 = arith.mulf %946, %947 : vector<1x2x2xf32>
    %cst_330 = arith.constant dense<0xFF800000> : vector<1x2xf32>
    %949 = vector.multi_reduction <maximumf>, %948, %cst_330 [2] : vector<1x2x2xf32> to vector<1x2xf32>
    %950 = vector.shape_cast %949 : vector<1x2xf32> to vector<1x2x1xf32>
    %951 = vector.broadcast %950 : vector<1x2x1xf32> to vector<1x2x2xf32>
    %952 = arith.subf %948, %951 : vector<1x2x2xf32>
    %953 = math.exp %952 : vector<1x2x2xf32>
    %cst_331 = arith.constant dense<0.000000e+00> : vector<1x2xf32>
    %954 = vector.multi_reduction <add>, %953, %cst_331 [2] : vector<1x2x2xf32> to vector<1x2xf32>
    %955 = vector.shape_cast %954 : vector<1x2xf32> to vector<1x2x1xf32>
    %956 = tpu.reciprocal %955 {approx = true} : vector<1x2x1xf32> -> vector<1x2x1xf32>
    %957 = vector.broadcast %956 : vector<1x2x1xf32> to vector<1x2x2xf32>
    %958 = arith.mulf %953, %957 : vector<1x2x2xf32>
    %cst_332 = arith.constant dense<0.000000e+00> : vector<1x2x8xf32>
    %959 = tpu.matmul %958, %945, %cst_332 {dimension_numbers = #tpu.dot_dimension_numbers<[2], [1], [1], [2], [0, 0, 0, 1, 1, 2], [0], [0]>} : vector<1x2x2xf32>, vector<1x2x8xf32>, vector<1x2x8xf32> -> vector<1x2x8xf32>
    %c960 = arith.constant 960 : index
    %c0_333 = arith.constant 0 : index
    %960 = vector.load %arg3[%c960, %c0_333] : memref<1728x128xf32, #tpu.memory_space<vmem>>, vector<8x32xf32>
    %961 = vector.shape_cast %959 : vector<1x2x8xf32> to vector<2x8xf32>
    %cst_334 = arith.constant dense<0.000000e+00> : vector<2x32xf32>
    %962 = tpu.matmul %961, %960, %cst_334 {dimension_numbers = #tpu.dot_dimension_numbers<[1], [0], [0], [1], [0, 0, 1, 1], [], []>} : vector<2x8xf32>, vector<8x32xf32>, vector<2x32xf32> -> vector<2x32xf32>
    %963 = vector.shape_cast %962 : vector<2x32xf32> to vector<1x2x32xf32>
    %c968 = arith.constant 968 : index
    %c0_335 = arith.constant 0 : index
    %964 = vector.load %arg3[%c968, %c0_335] : memref<1728x128xf32, #tpu.memory_space<vmem>>, vector<32x8xf32>
    %c59 = arith.constant 59 : index
    %c0_336 = arith.constant 0 : index
    %965 = vector.load %arg4[%c59, %c0_336] : memref<83x128xf32, #tpu.memory_space<vmem>>, vector<1x8xf32>
    %966 = vector.shape_cast %918 : vector<1x2x32xf32> to vector<2x32xf32>
    %cst_337 = arith.constant dense<0.000000e+00> : vector<2x8xf32>
    %967 = tpu.matmul %966, %964, %cst_337 {dimension_numbers = #tpu.dot_dimension_numbers<[1], [0], [0], [1], [0, 0, 1, 1], [], []>} : vector<2x32xf32>, vector<32x8xf32>, vector<2x8xf32> -> vector<2x8xf32>
    %968 = vector.shape_cast %967 : vector<2x8xf32> to vector<1x2x8xf32>
    %969 = vector.shape_cast %965 : vector<1x8xf32> to vector<1x1x8xf32>
    %970 = vector.broadcast %969 : vector<1x1x8xf32> to vector<1x2x8xf32>
    %971 = arith.addf %968, %970 : vector<1x2x8xf32>
    %c1000 = arith.constant 1000 : index
    %c0_338 = arith.constant 0 : index
    %972 = vector.load %arg3[%c1000, %c0_338] : memref<1728x128xf32, #tpu.memory_space<vmem>>, vector<32x8xf32>
    %c60 = arith.constant 60 : index
    %c0_339 = arith.constant 0 : index
    %973 = vector.load %arg4[%c60, %c0_339] : memref<83x128xf32, #tpu.memory_space<vmem>>, vector<1x8xf32>
    %974 = vector.shape_cast %921 : vector<1x2x32xf32> to vector<2x32xf32>
    %cst_340 = arith.constant dense<0.000000e+00> : vector<2x8xf32>
    %975 = tpu.matmul %974, %972, %cst_340 {dimension_numbers = #tpu.dot_dimension_numbers<[1], [0], [0], [1], [0, 0, 1, 1], [], []>} : vector<2x32xf32>, vector<32x8xf32>, vector<2x8xf32> -> vector<2x8xf32>
    %976 = vector.shape_cast %975 : vector<2x8xf32> to vector<1x2x8xf32>
    %977 = vector.shape_cast %973 : vector<1x8xf32> to vector<1x1x8xf32>
    %978 = vector.broadcast %977 : vector<1x1x8xf32> to vector<1x2x8xf32>
    %979 = arith.addf %976, %978 : vector<1x2x8xf32>
    %c1032 = arith.constant 1032 : index
    %c0_341 = arith.constant 0 : index
    %980 = vector.load %arg3[%c1032, %c0_341] : memref<1728x128xf32, #tpu.memory_space<vmem>>, vector<32x8xf32>
    %c61 = arith.constant 61 : index
    %c0_342 = arith.constant 0 : index
    %981 = vector.load %arg4[%c61, %c0_342] : memref<83x128xf32, #tpu.memory_space<vmem>>, vector<1x8xf32>
    %982 = vector.shape_cast %921 : vector<1x2x32xf32> to vector<2x32xf32>
    %cst_343 = arith.constant dense<0.000000e+00> : vector<2x8xf32>
    %983 = tpu.matmul %982, %980, %cst_343 {dimension_numbers = #tpu.dot_dimension_numbers<[1], [0], [0], [1], [0, 0, 1, 1], [], []>} : vector<2x32xf32>, vector<32x8xf32>, vector<2x8xf32> -> vector<2x8xf32>
    %984 = vector.shape_cast %983 : vector<2x8xf32> to vector<1x2x8xf32>
    %985 = vector.shape_cast %981 : vector<1x8xf32> to vector<1x1x8xf32>
    %986 = vector.broadcast %985 : vector<1x1x8xf32> to vector<1x2x8xf32>
    %987 = arith.addf %984, %986 : vector<1x2x8xf32>
    %cst_344 = arith.constant dense<0.000000e+00> : vector<1x2x2xf32>
    %988 = tpu.matmul %971, %979, %cst_344 {dimension_numbers = #tpu.dot_dimension_numbers<[2], [2], [1], [1], [0, 0, 0, 1, 1, 1], [0], [0]>} : vector<1x2x8xf32>, vector<1x2x8xf32>, vector<1x2x2xf32> -> vector<1x2x2xf32>
    %cst_345 = arith.constant 0.353553385 : f32
    %989 = vector.broadcast %cst_345 : f32 to vector<1x2x2xf32>
    %990 = arith.mulf %988, %989 : vector<1x2x2xf32>
    %cst_346 = arith.constant dense<0xFF800000> : vector<1x2xf32>
    %991 = vector.multi_reduction <maximumf>, %990, %cst_346 [2] : vector<1x2x2xf32> to vector<1x2xf32>
    %992 = vector.shape_cast %991 : vector<1x2xf32> to vector<1x2x1xf32>
    %993 = vector.broadcast %992 : vector<1x2x1xf32> to vector<1x2x2xf32>
    %994 = arith.subf %990, %993 : vector<1x2x2xf32>
    %995 = math.exp %994 : vector<1x2x2xf32>
    %cst_347 = arith.constant dense<0.000000e+00> : vector<1x2xf32>
    %996 = vector.multi_reduction <add>, %995, %cst_347 [2] : vector<1x2x2xf32> to vector<1x2xf32>
    %997 = vector.shape_cast %996 : vector<1x2xf32> to vector<1x2x1xf32>
    %998 = tpu.reciprocal %997 {approx = true} : vector<1x2x1xf32> -> vector<1x2x1xf32>
    %999 = vector.broadcast %998 : vector<1x2x1xf32> to vector<1x2x2xf32>
    %1000 = arith.mulf %995, %999 : vector<1x2x2xf32>
    %cst_348 = arith.constant dense<0.000000e+00> : vector<1x2x8xf32>
    %1001 = tpu.matmul %1000, %987, %cst_348 {dimension_numbers = #tpu.dot_dimension_numbers<[2], [1], [1], [2], [0, 0, 0, 1, 1, 2], [0], [0]>} : vector<1x2x2xf32>, vector<1x2x8xf32>, vector<1x2x8xf32> -> vector<1x2x8xf32>
    %c1064 = arith.constant 1064 : index
    %c0_349 = arith.constant 0 : index
    %1002 = vector.load %arg3[%c1064, %c0_349] : memref<1728x128xf32, #tpu.memory_space<vmem>>, vector<8x32xf32>
    %1003 = vector.shape_cast %1001 : vector<1x2x8xf32> to vector<2x8xf32>
    %cst_350 = arith.constant dense<0.000000e+00> : vector<2x32xf32>
    %1004 = tpu.matmul %1003, %1002, %cst_350 {dimension_numbers = #tpu.dot_dimension_numbers<[1], [0], [0], [1], [0, 0, 1, 1], [], []>} : vector<2x8xf32>, vector<8x32xf32>, vector<2x32xf32> -> vector<2x32xf32>
    %1005 = vector.shape_cast %1004 : vector<2x32xf32> to vector<1x2x32xf32>
    %1006 = arith.addf %963, %1005 : vector<1x2x32xf32>
    %c1072 = arith.constant 1072 : index
    %c0_351 = arith.constant 0 : index
    %1007 = vector.load %arg3[%c1072, %c0_351] : memref<1728x128xf32, #tpu.memory_space<vmem>>, vector<32x8xf32>
    %c62 = arith.constant 62 : index
    %c0_352 = arith.constant 0 : index
    %1008 = vector.load %arg4[%c62, %c0_352] : memref<83x128xf32, #tpu.memory_space<vmem>>, vector<1x8xf32>
    %1009 = vector.shape_cast %918 : vector<1x2x32xf32> to vector<2x32xf32>
    %cst_353 = arith.constant dense<0.000000e+00> : vector<2x8xf32>
    %1010 = tpu.matmul %1009, %1007, %cst_353 {dimension_numbers = #tpu.dot_dimension_numbers<[1], [0], [0], [1], [0, 0, 1, 1], [], []>} : vector<2x32xf32>, vector<32x8xf32>, vector<2x8xf32> -> vector<2x8xf32>
    %1011 = vector.shape_cast %1010 : vector<2x8xf32> to vector<1x2x8xf32>
    %1012 = vector.shape_cast %1008 : vector<1x8xf32> to vector<1x1x8xf32>
    %1013 = vector.broadcast %1012 : vector<1x1x8xf32> to vector<1x2x8xf32>
    %1014 = arith.addf %1011, %1013 : vector<1x2x8xf32>
    %c1104 = arith.constant 1104 : index
    %c0_354 = arith.constant 0 : index
    %1015 = vector.load %arg3[%c1104, %c0_354] : memref<1728x128xf32, #tpu.memory_space<vmem>>, vector<32x8xf32>
    %c63 = arith.constant 63 : index
    %c0_355 = arith.constant 0 : index
    %1016 = vector.load %arg4[%c63, %c0_355] : memref<83x128xf32, #tpu.memory_space<vmem>>, vector<1x8xf32>
    %1017 = vector.shape_cast %921 : vector<1x2x32xf32> to vector<2x32xf32>
    %cst_356 = arith.constant dense<0.000000e+00> : vector<2x8xf32>
    %1018 = tpu.matmul %1017, %1015, %cst_356 {dimension_numbers = #tpu.dot_dimension_numbers<[1], [0], [0], [1], [0, 0, 1, 1], [], []>} : vector<2x32xf32>, vector<32x8xf32>, vector<2x8xf32> -> vector<2x8xf32>
    %1019 = vector.shape_cast %1018 : vector<2x8xf32> to vector<1x2x8xf32>
    %1020 = vector.shape_cast %1016 : vector<1x8xf32> to vector<1x1x8xf32>
    %1021 = vector.broadcast %1020 : vector<1x1x8xf32> to vector<1x2x8xf32>
    %1022 = arith.addf %1019, %1021 : vector<1x2x8xf32>
    %c1136 = arith.constant 1136 : index
    %c0_357 = arith.constant 0 : index
    %1023 = vector.load %arg3[%c1136, %c0_357] : memref<1728x128xf32, #tpu.memory_space<vmem>>, vector<32x8xf32>
    %c64 = arith.constant 64 : index
    %c0_358 = arith.constant 0 : index
    %1024 = vector.load %arg4[%c64, %c0_358] : memref<83x128xf32, #tpu.memory_space<vmem>>, vector<1x8xf32>
    %1025 = vector.shape_cast %921 : vector<1x2x32xf32> to vector<2x32xf32>
    %cst_359 = arith.constant dense<0.000000e+00> : vector<2x8xf32>
    %1026 = tpu.matmul %1025, %1023, %cst_359 {dimension_numbers = #tpu.dot_dimension_numbers<[1], [0], [0], [1], [0, 0, 1, 1], [], []>} : vector<2x32xf32>, vector<32x8xf32>, vector<2x8xf32> -> vector<2x8xf32>
    %1027 = vector.shape_cast %1026 : vector<2x8xf32> to vector<1x2x8xf32>
    %1028 = vector.shape_cast %1024 : vector<1x8xf32> to vector<1x1x8xf32>
    %1029 = vector.broadcast %1028 : vector<1x1x8xf32> to vector<1x2x8xf32>
    %1030 = arith.addf %1027, %1029 : vector<1x2x8xf32>
    %cst_360 = arith.constant dense<0.000000e+00> : vector<1x2x2xf32>
    %1031 = tpu.matmul %1014, %1022, %cst_360 {dimension_numbers = #tpu.dot_dimension_numbers<[2], [2], [1], [1], [0, 0, 0, 1, 1, 1], [0], [0]>} : vector<1x2x8xf32>, vector<1x2x8xf32>, vector<1x2x2xf32> -> vector<1x2x2xf32>
    %cst_361 = arith.constant 0.353553385 : f32
    %1032 = vector.broadcast %cst_361 : f32 to vector<1x2x2xf32>
    %1033 = arith.mulf %1031, %1032 : vector<1x2x2xf32>
    %cst_362 = arith.constant dense<0xFF800000> : vector<1x2xf32>
    %1034 = vector.multi_reduction <maximumf>, %1033, %cst_362 [2] : vector<1x2x2xf32> to vector<1x2xf32>
    %1035 = vector.shape_cast %1034 : vector<1x2xf32> to vector<1x2x1xf32>
    %1036 = vector.broadcast %1035 : vector<1x2x1xf32> to vector<1x2x2xf32>
    %1037 = arith.subf %1033, %1036 : vector<1x2x2xf32>
    %1038 = math.exp %1037 : vector<1x2x2xf32>
    %cst_363 = arith.constant dense<0.000000e+00> : vector<1x2xf32>
    %1039 = vector.multi_reduction <add>, %1038, %cst_363 [2] : vector<1x2x2xf32> to vector<1x2xf32>
    %1040 = vector.shape_cast %1039 : vector<1x2xf32> to vector<1x2x1xf32>
    %1041 = tpu.reciprocal %1040 {approx = true} : vector<1x2x1xf32> -> vector<1x2x1xf32>
    %1042 = vector.broadcast %1041 : vector<1x2x1xf32> to vector<1x2x2xf32>
    %1043 = arith.mulf %1038, %1042 : vector<1x2x2xf32>
    %cst_364 = arith.constant dense<0.000000e+00> : vector<1x2x8xf32>
    %1044 = tpu.matmul %1043, %1030, %cst_364 {dimension_numbers = #tpu.dot_dimension_numbers<[2], [1], [1], [2], [0, 0, 0, 1, 1, 2], [0], [0]>} : vector<1x2x2xf32>, vector<1x2x8xf32>, vector<1x2x8xf32> -> vector<1x2x8xf32>
    %c1168 = arith.constant 1168 : index
    %c0_365 = arith.constant 0 : index
    %1045 = vector.load %arg3[%c1168, %c0_365] : memref<1728x128xf32, #tpu.memory_space<vmem>>, vector<8x32xf32>
    %1046 = vector.shape_cast %1044 : vector<1x2x8xf32> to vector<2x8xf32>
    %cst_366 = arith.constant dense<0.000000e+00> : vector<2x32xf32>
    %1047 = tpu.matmul %1046, %1045, %cst_366 {dimension_numbers = #tpu.dot_dimension_numbers<[1], [0], [0], [1], [0, 0, 1, 1], [], []>} : vector<2x8xf32>, vector<8x32xf32>, vector<2x32xf32> -> vector<2x32xf32>
    %1048 = vector.shape_cast %1047 : vector<2x32xf32> to vector<1x2x32xf32>
    %1049 = arith.addf %1006, %1048 : vector<1x2x32xf32>
    %c1176 = arith.constant 1176 : index
    %c0_367 = arith.constant 0 : index
    %1050 = vector.load %arg3[%c1176, %c0_367] : memref<1728x128xf32, #tpu.memory_space<vmem>>, vector<32x8xf32>
    %c65 = arith.constant 65 : index
    %c0_368 = arith.constant 0 : index
    %1051 = vector.load %arg4[%c65, %c0_368] : memref<83x128xf32, #tpu.memory_space<vmem>>, vector<1x8xf32>
    %1052 = vector.shape_cast %918 : vector<1x2x32xf32> to vector<2x32xf32>
    %cst_369 = arith.constant dense<0.000000e+00> : vector<2x8xf32>
    %1053 = tpu.matmul %1052, %1050, %cst_369 {dimension_numbers = #tpu.dot_dimension_numbers<[1], [0], [0], [1], [0, 0, 1, 1], [], []>} : vector<2x32xf32>, vector<32x8xf32>, vector<2x8xf32> -> vector<2x8xf32>
    %1054 = vector.shape_cast %1053 : vector<2x8xf32> to vector<1x2x8xf32>
    %1055 = vector.shape_cast %1051 : vector<1x8xf32> to vector<1x1x8xf32>
    %1056 = vector.broadcast %1055 : vector<1x1x8xf32> to vector<1x2x8xf32>
    %1057 = arith.addf %1054, %1056 : vector<1x2x8xf32>
    %c1208 = arith.constant 1208 : index
    %c0_370 = arith.constant 0 : index
    %1058 = vector.load %arg3[%c1208, %c0_370] : memref<1728x128xf32, #tpu.memory_space<vmem>>, vector<32x8xf32>
    %c66 = arith.constant 66 : index
    %c0_371 = arith.constant 0 : index
    %1059 = vector.load %arg4[%c66, %c0_371] : memref<83x128xf32, #tpu.memory_space<vmem>>, vector<1x8xf32>
    %1060 = vector.shape_cast %921 : vector<1x2x32xf32> to vector<2x32xf32>
    %cst_372 = arith.constant dense<0.000000e+00> : vector<2x8xf32>
    %1061 = tpu.matmul %1060, %1058, %cst_372 {dimension_numbers = #tpu.dot_dimension_numbers<[1], [0], [0], [1], [0, 0, 1, 1], [], []>} : vector<2x32xf32>, vector<32x8xf32>, vector<2x8xf32> -> vector<2x8xf32>
    %1062 = vector.shape_cast %1061 : vector<2x8xf32> to vector<1x2x8xf32>
    %1063 = vector.shape_cast %1059 : vector<1x8xf32> to vector<1x1x8xf32>
    %1064 = vector.broadcast %1063 : vector<1x1x8xf32> to vector<1x2x8xf32>
    %1065 = arith.addf %1062, %1064 : vector<1x2x8xf32>
    %c1240 = arith.constant 1240 : index
    %c0_373 = arith.constant 0 : index
    %1066 = vector.load %arg3[%c1240, %c0_373] : memref<1728x128xf32, #tpu.memory_space<vmem>>, vector<32x8xf32>
    %c67 = arith.constant 67 : index
    %c0_374 = arith.constant 0 : index
    %1067 = vector.load %arg4[%c67, %c0_374] : memref<83x128xf32, #tpu.memory_space<vmem>>, vector<1x8xf32>
    %1068 = vector.shape_cast %921 : vector<1x2x32xf32> to vector<2x32xf32>
    %cst_375 = arith.constant dense<0.000000e+00> : vector<2x8xf32>
    %1069 = tpu.matmul %1068, %1066, %cst_375 {dimension_numbers = #tpu.dot_dimension_numbers<[1], [0], [0], [1], [0, 0, 1, 1], [], []>} : vector<2x32xf32>, vector<32x8xf32>, vector<2x8xf32> -> vector<2x8xf32>
    %1070 = vector.shape_cast %1069 : vector<2x8xf32> to vector<1x2x8xf32>
    %1071 = vector.shape_cast %1067 : vector<1x8xf32> to vector<1x1x8xf32>
    %1072 = vector.broadcast %1071 : vector<1x1x8xf32> to vector<1x2x8xf32>
    %1073 = arith.addf %1070, %1072 : vector<1x2x8xf32>
    %cst_376 = arith.constant dense<0.000000e+00> : vector<1x2x2xf32>
    %1074 = tpu.matmul %1057, %1065, %cst_376 {dimension_numbers = #tpu.dot_dimension_numbers<[2], [2], [1], [1], [0, 0, 0, 1, 1, 1], [0], [0]>} : vector<1x2x8xf32>, vector<1x2x8xf32>, vector<1x2x2xf32> -> vector<1x2x2xf32>
    %cst_377 = arith.constant 0.353553385 : f32
    %1075 = vector.broadcast %cst_377 : f32 to vector<1x2x2xf32>
    %1076 = arith.mulf %1074, %1075 : vector<1x2x2xf32>
    %cst_378 = arith.constant dense<0xFF800000> : vector<1x2xf32>
    %1077 = vector.multi_reduction <maximumf>, %1076, %cst_378 [2] : vector<1x2x2xf32> to vector<1x2xf32>
    %1078 = vector.shape_cast %1077 : vector<1x2xf32> to vector<1x2x1xf32>
    %1079 = vector.broadcast %1078 : vector<1x2x1xf32> to vector<1x2x2xf32>
    %1080 = arith.subf %1076, %1079 : vector<1x2x2xf32>
    %1081 = math.exp %1080 : vector<1x2x2xf32>
    %cst_379 = arith.constant dense<0.000000e+00> : vector<1x2xf32>
    %1082 = vector.multi_reduction <add>, %1081, %cst_379 [2] : vector<1x2x2xf32> to vector<1x2xf32>
    %1083 = vector.shape_cast %1082 : vector<1x2xf32> to vector<1x2x1xf32>
    %1084 = tpu.reciprocal %1083 {approx = true} : vector<1x2x1xf32> -> vector<1x2x1xf32>
    %1085 = vector.broadcast %1084 : vector<1x2x1xf32> to vector<1x2x2xf32>
    %1086 = arith.mulf %1081, %1085 : vector<1x2x2xf32>
    %cst_380 = arith.constant dense<0.000000e+00> : vector<1x2x8xf32>
    %1087 = tpu.matmul %1086, %1073, %cst_380 {dimension_numbers = #tpu.dot_dimension_numbers<[2], [1], [1], [2], [0, 0, 0, 1, 1, 2], [0], [0]>} : vector<1x2x2xf32>, vector<1x2x8xf32>, vector<1x2x8xf32> -> vector<1x2x8xf32>
    %c1272 = arith.constant 1272 : index
    %c0_381 = arith.constant 0 : index
    %1088 = vector.load %arg3[%c1272, %c0_381] : memref<1728x128xf32, #tpu.memory_space<vmem>>, vector<8x32xf32>
    %1089 = vector.shape_cast %1087 : vector<1x2x8xf32> to vector<2x8xf32>
    %cst_382 = arith.constant dense<0.000000e+00> : vector<2x32xf32>
    %1090 = tpu.matmul %1089, %1088, %cst_382 {dimension_numbers = #tpu.dot_dimension_numbers<[1], [0], [0], [1], [0, 0, 1, 1], [], []>} : vector<2x8xf32>, vector<8x32xf32>, vector<2x32xf32> -> vector<2x32xf32>
    %1091 = vector.shape_cast %1090 : vector<2x32xf32> to vector<1x2x32xf32>
    %1092 = arith.addf %1049, %1091 : vector<1x2x32xf32>
    %c68 = arith.constant 68 : index
    %c0_383 = arith.constant 0 : index
    %1093 = vector.load %arg4[%c68, %c0_383] : memref<83x128xf32, #tpu.memory_space<vmem>>, vector<1x32xf32>
    %1094 = vector.shape_cast %1093 : vector<1x32xf32> to vector<1x1x32xf32>
    %1095 = vector.broadcast %1094 : vector<1x1x32xf32> to vector<1x2x32xf32>
    %1096 = arith.addf %1092, %1095 : vector<1x2x32xf32>
    %1097 = vector.shape_cast %1096 : vector<1x2x32xf32> to vector<2x32xf32>
    %c1696 = arith.constant 1696 : index
    %c0_384 = arith.constant 0 : index
    %1098 = vector.load %arg3[%c1696, %c0_384] : memref<1728x128xf32, #tpu.memory_space<vmem>>, vector<32x128xf32>
    %c82 = arith.constant 82 : index
    %c0_385 = arith.constant 0 : index
    %1099 = vector.load %arg4[%c82, %c0_385] : memref<83x128xf32, #tpu.memory_space<vmem>>, vector<1x128xf32>
    %cst_386 = arith.constant dense<0.000000e+00> : vector<2x128xf32>
    %1100 = tpu.matmul %1097, %1098, %cst_386 {dimension_numbers = #tpu.dot_dimension_numbers<[1], [0], [0], [1], [0, 0, 1, 1], [], []>} : vector<2x32xf32>, vector<32x128xf32>, vector<2x128xf32> -> vector<2x128xf32>
    %1101 = vector.broadcast %1099 : vector<1x128xf32> to vector<2x128xf32>
    %1102 = arith.addf %1100, %1101 : vector<2x128xf32>
    %c0_387 = arith.constant 0 : index
    %c0_388 = arith.constant 0 : index
    %1103 = vector.load %arg5[%c0_387, %c0_388] : memref<2x128xf32, #tpu.memory_space<vmem>>, vector<2x128xf32>
    tpu.vector_store %arg5[%c0_387, %c0_388], %1102 {strides = array<i32>} : memref<2x128xf32, #tpu.memory_space<vmem>>, vector<2x128xf32>,
    return
  }
}

</mosaic_0001>

<bundles_post_ra>
// kernel: adapter_model_forward.1
= control target key start
LH: loop header
LB: loop body
LE: loop exit
PB: predicated region body
PF: predicated region fallthrough
CT: control target
= control target key end

     0   :  { %vm37_vm0 = vcmask 261120   ;;  %vm128_vm1 = vcmask 130048   ;;  %v19514_v22 = vmov 0.0   ;;  %vm19515_vm2 = vmmov 0   ;;  %s21887_s3 = inlined_call_operand.vmem [shape: f32[1728,128], index: 3, kind: input, shape index: {}]   ;;  %s21888_s1 = inlined_call_operand.vmem [shape: f32[2,8,32], index: 1, kind: input, shape index: {}]   ;;  %s21889_s4 = inlined_call_operand.vmem [shape: f32[83,128], index: 4, kind: input, shape index: {}]   ;;  %s21890_s2 = inlined_call_operand.vmem [shape: f32[8,2,32], index: 2, kind: input, shape index: {}]   ;;  %s21891_s0 = inlined_call_operand.vmem [shape: f32[2,8,32], index: 0, kind: input, shape index: {}]   ;;  %s21892_s5 = inlined_call_operand.vmem [shape: f32[2,128], index: 5, kind: output, shape index: {}]  }
   0x1   :  { %v32_v0 = vld [vmem:[%s21887_s3 + $0x180] sm:$0xff]  ;;  %v33_v1 = vld [vmem:[%s21887_s3 + $0x188] sm:$0xff]  ;;  %v34_v2 = vld [vmem:[%s21887_s3 + $0x190] sm:$0xff]  ;;  %vm384_vm3 = vcmask 64512   ;;  %vm1614_vm4 = vcmask 523264   ;;  %vm3654_vm5 = vcmask 1041409  }
   0x2   :  { %v18870_v3 = vpack.c.bf16 %v33_v1, %v32_v0  ;;  %v35_v4 = vld [vmem:[%s21887_s3 + $0x198] sm:$0xff]  ;;  %v22_v5 = vld [vmem:[%s21888_s1] sm:$0xff]  ;;  %v23_v7 = vld [vmem:[%s21888_s1 + $0x8] sm:$0xff]  ;;  %vm3657_vm6 = vcmask 1042434   ;;  %vm3660_vm7 = vcmask 1043459   ;;  %vm3663_vm8 = vcmask 1044484  }
   0x3   :  { %v18874_v6 = vpack.c.bf16 %v35_v4, %v34_v2  ;;  %17695 = vmatprep.mubr.msk.f32.mxu0 %vm37_vm0, %v22_v5  ;;  %v125_v8 = vld [vmem:[%s21887_s3] sm:$0xff]  ;;  %v126_v9 = vld [vmem:[%s21887_s3 + $0x8] sm:$0xff]  ;;  %v216_v11 = vld [vmem:[%s21887_s3 + $0x10] sm:$0xff]  ;;  %vm3666_vm9 = vcmask 1045509   ;;  %vm3669_vm10 = vcmask 1046534   ;;  %vm3672_vm11 = vcmask 1047559  }
   0x4   :  { %18871 = vmatprep.subr.bf16.mxu0 %v18870_v3  ;;  %v18878_v10 = vpack.c.bf16 %v126_v9, %v125_v8  ;;  %v217_v12 = vld [vmem:[%s21887_s3 + $0x18] sm:$0xff]  ;;  %v300_v16 = vld [vmem:[%s21887_s3 + $0x20] sm:$0xff]  ;;  %v301_v17 = vld [vmem:[%s21887_s3 + $0x28] sm:$0xff]  ;;  %vm4668_vm12 = vcmask 1041408   ;;  %vm4575_vm13 = vcmask 9216   ;;  %vm4664_vm14 = vcmask 15360  }
   0x5   :  { %18873 = vmatpush3.bf16.msra.mxu0 %v18870_v3  ;;  %v18882_v13 = vpack.c.bf16 %v217_v12, %v216_v11  ;;  %v16697_v14 = vld [vmem:[%s21889_s4 + $0x1a] ss:$0 sm:$0xff]  ;;  %v18886_v21 = vpack.c.bf16 %v301_v17, %v300_v16  ;;  %v16703_v25 = vld [vmem:[%s21889_s4 + $0x1] ss:$0 sm:$0xff]  ;;  %v16700_v27 = vld [vmem:[%s21889_s4] ss:$0 sm:$0xff] }
   0x6   :  { %18875 = vmatprep.subr.bf16.mxu0 %v18874_v6  ;;  %18879 = vmatprep.subr.bf16.mxu1 %v18878_v10  ;;  %v16706_v31 = vld [vmem:[%s21889_s4 + $0x2] ss:$0 sm:$0xff]  ;;  %v789_v56 = vld [vmem:[%s21887_s3 + $0x38] sm:$0xff]  ;;  %v707_v4 = vld [vmem:[%s21887_s3 + $0x30] sm:$0xff] }
   0x7   :  { %18881 = vmatpush3.bf16.msra.mxu1 %v18878_v10  ;;  %v790_v57 = vld [vmem:[%s21887_s3 + $0x40] sm:$0xff]  ;;  %v957_v63 = vld [vmem:[%s21887_s3 + $0x58] sm:$0xff]  ;;  %v873_v5 = vld [vmem:[%s21887_s3 + $0x48] sm:$0xff] }
   0x8   :  { %18883 = vmatprep.subr.bf16.mxu1 %v18882_v13  ;;  %v18890_v58 = vpack.c.bf16 %v790_v57, %v789_v56  ;;  %v958_v0 = vld [vmem:[%s21887_s3 + $0x60] sm:$0xff] }
   0x9   :  { %18877 = vmatpush3.bf16.msra.mxu0 %v18874_v6  ;;  %v18898_v3 = vpack.c.bf16 %v958_v0, %v957_v63  ;;  %v874_v6 = vld [vmem:[%s21887_s3 + $0x50] sm:$0xff]  ;;  %v16720_v16 = vld [vmem:[%s21889_s4 + $0x4] ss:$0 sm:$0xff] }
   0xa   :  { %17724 = vmatprep.subr.mxu0 %v19514_v22 }
   0xc   :  { %17696 = vmatmul.mubr.msk.f32.vlgmr.msra.gmra.mrb[0].mxu0 %vm37_vm0, %v23_v7  ;;  %v18894_v7 = vpack.c.bf16 %v874_v6, %v873_v5 }
   0xd   :  { %17726 = vmatprep.mubr.msk.f32.mxu0 %vm19515_vm2, %v19514_v22 }
  0xdf   :  { %v17697_v15 = vpop.f32.mrb[0].mxu0 }
  0xe0   :  { %v110_v18 = vpop.f32.mrb[1].mxu0  ;;  %v19591_v20 = vadd.f32 %v17697_v15, %v16697_v14 }
  0xe1   :  { %v19589_v19 = vadd.f32 %v16697_v14, %v110_v18  ;;  %v16717_v18 = vld [vmem:[%s21889_s4 + $0x3] ss:$0 sm:$0xff] }
  0xe3   :  { %17702 = vmatprep.mubr.msk.f32.mxu1 %vm128_vm1, %v19589_v19 }
  0xe4   :  { %17703 = vmatmul.mubr.msk.f32.vlgmr.msra.gmra.mrb[0].mxu1 %vm128_vm1, %v19591_v20 }
  0xe5   :  { %18885 = vmatpush3.bf16.msra.mxu1 %v18882_v13  ;;  %17709 = vmatprep.mubr.msk.f32.mxu1 %vm128_vm1, %v19589_v19 }
  0xe6   :  { %18887 = vmatprep.subr.bf16.mxu1 %v18886_v21 }
  0xe8   :  { %17710 = vmatmul.mubr.msk.f32.vlgmr.msra.gmra.mrb[2].mxu1 %vm128_vm1, %v19591_v20 }
  0xe9   :  { %18889 = vmatpush3.bf16.msra.mxu1 %v18886_v21  ;;  %17716 = vmatprep.mubr.msk.f32.mxu1 %vm128_vm1, %v19589_v19 }
  0xea   :  { %17719 = vmatprep.subr.mxu1 %v19514_v22 }
  0xec   :  { %17717 = vmatmul.mubr.msk.f32.vlgmr.msra.gmra.mrb[4].mxu1 %vm128_vm1, %v19591_v20 }
  0xed   :  { %17721 = vmatprep.mubr.msk.f32.mxu1 %vm19515_vm2, %v19514_v22 }
 0x1b7   :  { %v17704_v23 = vpop.f32.mrb[0].mxu1 }
 0x1b8   :  { %v201_v24 = vpop.f32.mrb[1].mxu1  ;;  %v215_v32 = vadd.f32 %v17704_v23, %v16700_v27 }
 0x1b9   :  { %v214_v34 = vadd.f32 %v16700_v27, %v201_v24  ;;  %v16723_v24 = vld [vmem:[%s21889_s4 + $0x5] ss:$0 sm:$0xff] }
 0x1bb   :  { %v17711_v26 = vpop.f32.mrb[2].mxu1 }
 0x1bc   :  { %v299_v28 = vadd.f32 %v17711_v26, %v16703_v25  ;;  %v285_v29 = vpop.f32.mrb[3].mxu1 }
 0x1bd   :  { %v298_v30 = vadd.f32 %v16703_v25, %v285_v29 }
 0x1be   :  { %17725 = vmatpush3.xpose.msk.msra.mxu0 %vm384_vm3, %v299_v28 }
 0x1bf   :  { %v17718_v33 = vpop.f32.mrb[4].mxu1  ;;  %17720 = vmatpush3.xpose.msk.msra.mxu1 %vm384_vm3, %v298_v30  ;;  %17734 = vmatprep.subr.mxu0 %v19514_v22 }
 0x1c0   :  { %v383_v35 = vadd.f32 %v17718_v33, %v16706_v31  ;;  %v369_v36 = vpop.f32.mrb[5].mxu1  ;;  %17729 = vmatprep.subr.mxu1 %v19514_v22 }
 0x1c1   :  { %v382_v37 = vadd.f32 %v16706_v31, %v369_v36  ;;  %17727 = vmatmul.mubr.msk.f32.vlgmr.msra.gmra.mrb[2].mxu0 %vm384_vm3, %v215_v32 }
 0x1c2   :  { %17722 = vmatmul.mubr.msk.f32.vlgmr.msra.gmra.mrb[6].mxu1 %vm384_vm3, %v214_v34  ;;  %17735 = vmatpush3.msra.mxu0 %v383_v35 }
 0x1c3   :  { %17730 = vmatpush3.msra.mxu1 %v382_v37  ;;  %17731 = vmatprep.mubr.msk.f32.mxu1 %vm19515_vm2, %v19514_v22 }
 0x1c4   :  { %17736 = vmatprep.mubr.msk.f32.mxu0 %vm19515_vm2, %v19514_v22  ;;  %18891 = vmatprep.subr.bf16.mxu0 %v18890_v58 }
 0x1c5   :  { %17739 = vmatprep.subr.mxu1 %v707_v4 }
 0x294   :  { %v533_v38 = vpop.f32.mrb[2].mxu0 }
 0x295   :  { %v457_v39 = vpop.f32.mrb[6].mxu1  ;;  %v17728_v40 = vpop.f32.mrb[3].mxu0  ;;  %v538_v43 = vmul.f32 0.35355338, %v533_v38 }
 0x296   :  { %v537_v41 = vmul.f32 0.35355338, %v457_v39  ;;  %v17723_v42 = vpop.f32.mrb[7].mxu1 }
 0x297   :  { %v542_v45 = vsel %vm384_vm3, %v538_v43, -inf }
 0x298   :  { %v539_v44 = vsel %vm384_vm3, %v537_v41, -inf }
 0x299   :  { %540 = vmax.xlane.f32.xlu0 %v539_v44 }
 0x29d   :  { %543 = vmax.xlane.f32.xlu0 %v542_v45 }
 0x326   :  { %v541_v46 = vpop.xlane.xlu0 %540 }
 0x327   :  { %v545_v47 = vsub.f32 %v537_v41, %v541_v46 }
 0x329   :  { %v547_v48 = vmul.f32 1.442695, %v545_v47 }
 0x32a   :  { %v544_v49 = vpop.xlane.xlu0 %543 }
 0x32b   :  { %19256 = vpow2.f32 %v547_v48  ;;  %v546_v50 = vsub.f32 %v538_v43, %v544_v49  ;;  %v1363_v48 = vld [vmem:[%s21887_s3 + $0x68] sm:$0xff] }
 0x32d   :  { %v549_v51 = vmul.f32 1.442695, %v546_v50 }
 0x32f   :  { %19258 = vpow2.f32 %v549_v51 }
 0x335   :  { %v19257_v52 = vpop.eup %19256 }
 0x336   :  { %v551_v53 = vsel %vm384_vm3, %v19257_v52, 0.0 }
 0x337   :  { %552 = vadd.xlane.f32.xlu1 %v551_v53 }
 0x339   :  { %v19259_v54 = vpop.eup %19258 }
 0x33a   :  { %v554_v55 = vsel %vm384_vm3, %v19259_v54, 0.0 }
 0x33b   :  { %555 = vadd.xlane.f32.xlu1 %v554_v55 }
 0x3c4   :  { %v553_v59 = vpop.xlane.xlu1 %552 }
 0x3c5   :  { %19260 = vrcp.f32 %v553_v59  ;;  %v16732_v59 = vld [vmem:[%s21889_s4 + $0x6] ss:$0 sm:$0xff] }
 0x3c8   :  { %v556_v60 = vpop.xlane.xlu1 %555 }
 0x3c9   :  { %19262 = vrcp.f32 %v556_v60 }
 0x3cf   :  { %v19261_v61 = vpop.eup %19260 }
 0x3d0   :  { %v559_v62 = vmul.f32 %v19261_v61, %v19257_v52 }
 0x3d2   :  { %17732 = vmatmul.mubr.msk.f32.vlgmr.msra.gmra.mrb[8].mxu1 %vm384_vm3, %v559_v62 }
 0x3d3   :  { %v19263_v1 = vpop.eup %19262  ;;  %17740 = vmatpush3.msra.mxu1 %v707_v4 }
 0x3d4   :  { %v560_v2 = vmul.f32 %v19263_v1, %v19259_v54  ;;  %18895 = vmatprep.subr.bf16.mxu1 %v18894_v7 }
 0x3d6   :  { %17737 = vmatmul.mubr.msk.f32.vlgmr.msra.gmra.mrb[4].mxu0 %vm384_vm3, %v560_v2 }
 0x3d7   :  { %18893 = vmatpush3.bf16.msra.mxu0 %v18890_v58  ;;  %17748 = vmatprep.mubr.msk.f32.mxu0 %vm128_vm1, %v19589_v19 }
 0x3d8   :  { %18899 = vmatprep.subr.bf16.mxu0 %v18898_v3 }
 0x3da   :  { %17749 = vmatmul.mubr.msk.f32.vlgmr.msra.gmra.mrb[6].mxu0 %vm128_vm1, %v19591_v20 }
 0x3db   :  { %18901 = vmatpush3.bf16.msra.mxu0 %v18898_v3  ;;  %17762 = vmatprep.mubr.msk.f32.mxu0 %vm128_vm1, %v19589_v19 }
 0x3dc   :  { %17770 = vmatprep.subr.mxu0 %v19514_v22 }
 0x3de   :  { %17763 = vmatmul.mubr.msk.f32.vlgmr.msra.gmra.mrb[8].mxu0 %vm128_vm1, %v19591_v20 }
 0x3df   :  { %17772 = vmatprep.mubr.msk.f32.mxu0 %vm19515_vm2, %v19514_v22 }
 0x4a5   :  { %v630_v8 = vpop.f32.mrb[8].mxu1 }
 0x4a6   :  { %v17733_v9 = vpop.f32.mrb[9].mxu1  ;;  %17741 = vmatprep.mubr.msk.f32.mxu1 %vm384_vm3, %v630_v8 }
 0x4a9   :  { %v703_v10 = vpop.f32.mrb[4].mxu0 }
 0x4aa   :  { %v17738_v11 = vpop.f32.mrb[5].mxu0  ;;  %17742 = vmatmul.mubr.msk.f32.vlgmr.msra.gmra.mrb[10].mxu1 %vm384_vm3, %v703_v10 }
 0x4ab   :  { %18897 = vmatpush3.bf16.msra.mxu1 %v18894_v7  ;;  %17755 = vmatprep.mubr.msk.f32.mxu1 %vm128_vm1, %v19589_v19 }
 0x4ac   :  { %17765 = vmatprep.subr.mxu1 %v19514_v22 }
 0x4ad   :  { %v17750_v12 = vpop.f32.mrb[6].mxu0 }
 0x4ae   :  { %v858_v13 = vpop.f32.mrb[7].mxu0  ;;  %17756 = vmatmul.mubr.msk.f32.vlgmr.msra.gmra.mrb[12].mxu1 %vm128_vm1, %v19591_v20  ;;  %v872_v26 = vadd.f32 %v17750_v12, %v16717_v18 }
 0x4af   :  { %17767 = vmatprep.mubr.msk.f32.mxu1 %vm19515_vm2, %v19514_v22  ;;  %v871_v27 = vadd.f32 %v16717_v18, %v858_v13  ;;  %v1498_v13 = vld [vmem:[%s21887_s3 + $0x78] sm:$0xff] }
 0x4b1   :  { %v17764_v14 = vpop.f32.mrb[8].mxu0 }
 0x4b2   :  { %v1026_v15 = vpop.f32.mrb[9].mxu0  ;;  %v1040_v28 = vadd.f32 %v17764_v14, %v16723_v24 }
 0x4b3   :  { %v1039_v29 = vadd.f32 %v16723_v24, %v1026_v15 }
 0x581   :  { %v17757_v17 = vpop.f32.mrb[12].mxu1 }
 0x582   :  { %v956_v21 = vadd.f32 %v17757_v17, %v16720_v16  ;;  %v942_v23 = vpop.f32.mrb[13].mxu1 }
 0x583   :  { %v955_v25 = vadd.f32 %v16720_v16, %v942_v23 }
 0x584   :  { %17771 = vmatpush3.xpose.msk.msra.mxu0 %vm384_vm3, %v956_v21 }
 0x585   :  { %17766 = vmatpush3.xpose.msk.msra.mxu1 %vm384_vm3, %v955_v25  ;;  %17780 = vmatprep.subr.mxu0 %v19514_v22  ;;  %v16733_v25 = vld [vmem:[%s21889_s4 + $0x7] ss:$0 sm:$0xff] }
 0x586   :  { %17775 = vmatprep.subr.mxu1 %v19514_v22 }
 0x587   :  { %17773 = vmatmul.mubr.msk.f32.vlgmr.msra.gmra.mrb[10].mxu0 %vm384_vm3, %v872_v26 }
 0x588   :  { %17768 = vmatmul.mubr.msk.f32.vlgmr.msra.gmra.mrb[14].mxu1 %vm384_vm3, %v871_v27  ;;  %17781 = vmatpush3.msra.mxu0 %v1040_v28 }
 0x589   :  { %17776 = vmatpush3.msra.mxu1 %v1039_v29  ;;  %17782 = vmatprep.mubr.msk.f32.mxu0 %vm19515_vm2, %v19514_v22  ;;  %v16734_v29 = vld [vmem:[%s21889_s4 + $0x8] ss:$0 sm:$0xff] }
 0x58a   :  { %17777 = vmatprep.mubr.msk.f32.mxu1 %vm19515_vm2, %v19514_v22  ;;  %17785 = vmatprep.subr.mxu1 %v1363_v48 }
 0x65a   :  { %v1189_v30 = vpop.f32.mrb[10].mxu0 }
 0x65b   :  { %v1194_v31 = vmul.f32 0.35355338, %v1189_v30  ;;  %v1113_v32 = vpop.f32.mrb[14].mxu1  ;;  %v17774_v33 = vpop.f32.mrb[11].mxu0 }
 0x65c   :  { %v1193_v34 = vmul.f32 0.35355338, %v1113_v32  ;;  %v17769_v35 = vpop.f32.mrb[15].mxu1 }
 0x65d   :  { %v1198_v36 = vsel %vm384_vm3, %v1194_v31, -inf  ;;  %v1606_v35 = vld [vmem:[%s21887_s3 + $0x88] sm:$0xff] }
 0x65e   :  { %1199 = vmax.xlane.f32.xlu1 %v1198_v36  ;;  %v1195_v37 = vsel %vm384_vm3, %v1193_v34, -inf }
 0x65f   :  { %1196 = vmax.xlane.f32.xlu0 %v1195_v37  ;;  %v1607_v37 = vld [vmem:[%s21887_s3 + $0x90] sm:$0xff] }
 0x6eb   :  { %v1200_v38 = vpop.xlane.xlu1 %1199 }
 0x6ec   :  { %v1202_v39 = vsub.f32 %v1194_v31, %v1200_v38  ;;  %v1197_v40 = vpop.xlane.xlu0 %1196  ;;  %v1608_v38 = vld [vmem:[%s21887_s3 + $0x98] sm:$0xff] }
 0x6ed   :  { %v1201_v41 = vsub.f32 %v1193_v34, %v1197_v40  ;;  %v1605_v34 = vld [vmem:[%s21887_s3 + $0x80] sm:$0xff]  ;;  %v18910_v40 = vpack.c.bf16 %v1608_v38, %v1607_v37  ;;  %v16741_v38 = vld [vmem:[%s21889_s4 + $0xb] ss:$0 sm:$0xff] }
 0x6ee   :  { %v1205_v42 = vmul.f32 1.442695, %v1202_v39  ;;  %v18906_v36 = vpack.c.bf16 %v1606_v35, %v1605_v34  ;;  %v1609_v39 = vld [vmem:[%s21887_s3 + $0xa0] sm:$0xff] }
 0x6ef   :  { %v1203_v43 = vmul.f32 1.442695, %v1201_v41  ;;  %v1610_v41 = vld [vmem:[%s21887_s3 + $0xa8] sm:$0xff] }
 0x6f0   :  { %19264 = vpow2.f32 %v1205_v42  ;;  %v18914_v42 = vpack.c.bf16 %v1610_v41, %v1609_v39 }
 0x6f1   :  { %19266 = vpow2.f32 %v1203_v43  ;;  %v1611_v43 = vld [vmem:[%s21887_s3 + $0xb0] sm:$0xff] }
 0x6fa   :  { %v19265_v44 = vpop.eup %19264 }
 0x6fb   :  { %v19267_v45 = vpop.eup %19266  ;;  %v1210_v46 = vsel %vm384_vm3, %v19265_v44, 0.0 }
 0x6fc   :  { %1211 = vadd.xlane.f32.xlu1 %v1210_v46  ;;  %v1207_v47 = vsel %vm384_vm3, %v19267_v45, 0.0  ;;  %v16737_v46 = vld [vmem:[%s21889_s4 + $0x9] ss:$0 sm:$0xff] }
 0x6fd   :  { %1208 = vadd.xlane.f32.xlu0 %v1207_v47 }
 0x789   :  { %v1212_v49 = vpop.xlane.xlu1 %1211 }
 0x78a   :  { %19268 = vrcp.f32 %v1212_v49  ;;  %v1209_v50 = vpop.xlane.xlu0 %1208 }
 0x78b   :  { %19270 = vrcp.f32 %v1209_v50 }
 0x794   :  { %v19269_v51 = vpop.eup %19268 }
 0x795   :  { %v19271_v52 = vpop.eup %19270  ;;  %v1216_v53 = vmul.f32 %v19269_v51, %v19265_v44  ;;  %v1612_v44 = vld [vmem:[%s21887_s3 + $0xb8] sm:$0xff] }
 0x796   :  { %v1215_v54 = vmul.f32 %v19271_v52, %v19267_v45  ;;  %v18918_v45 = vpack.c.bf16 %v1612_v44, %v1611_v43 }
 0x797   :  { %17783 = vmatmul.mubr.msk.f32.vlgmr.msra.gmra.mrb[12].mxu0 %vm384_vm3, %v1216_v53 }
 0x798   :  { %17778 = vmatmul.mubr.msk.f32.vlgmr.msra.gmra.mrb[16].mxu1 %vm384_vm3, %v1215_v54 }
 0x799   :  { %17786 = vmatpush3.msra.mxu1 %v1363_v48 }
 0x79a   :  { %18907 = vmatprep.subr.bf16.mxu1 %v18906_v36 }
 0x86a   :  { %v1359_v55 = vpop.f32.mrb[12].mxu0 }
 0x86b   :  { %v1286_v56 = vpop.f32.mrb[16].mxu1  ;;  %v17784_v57 = vpop.f32.mrb[13].mxu0 }
 0x86c   :  { %v17779_v58 = vpop.f32.mrb[17].mxu1  ;;  %17787 = vmatprep.mubr.msk.f32.mxu1 %vm384_vm3, %v1286_v56 }
 0x86d   :  { %17788 = vmatmul.mubr.msk.f32.vlgmr.msra.gmra.mrb[10].mxu1 %vm384_vm3, %v1359_v55 }
 0x86e   :  { %18909 = vmatpush3.bf16.msra.mxu1 %v18906_v36 }
 0x86f   :  { %18911 = vmatprep.subr.bf16.mxu1 %v18910_v40 }
 0x872   :  { %18913 = vmatpush3.bf16.msra.mxu1 %v18910_v40 }
 0x873   :  { %18915 = vmatprep.subr.bf16.mxu1 %v18914_v42 }
 0x876   :  { %18917 = vmatpush3.bf16.msra.mxu1 %v18914_v42  ;;  %v16742_v42 = vld [vmem:[%s21889_s4 + $0xc] ss:$0 sm:$0xff] }
 0x877   :  { %18919 = vmatprep.subr.bf16.mxu1 %v18918_v45 }
 0x87a   :  { %18921 = vmatpush3.bf16.msra.mxu1 %v18918_v45  ;;  %v1918_v45 = vld [vmem:[%s21887_s3 + $0xe0] sm:$0xff] }
 0x87b   :  { %17842 = vmatprep.subr.mxu1 %v19514_v22 }
 0x940   :  { %v17789_v60 = vpop.f32.mrb[10].mxu1 }
 0x941   :  { %v1453_v61 = vadd.f32 %v17789_v60, %v16732_v59  ;;  %v1436_v62 = vpop.f32.mrb[11].mxu1 }
 0x942   :  { %v1452_v63 = vadd.f32 %v16732_v59, %v1436_v62 }
 0x943   :  { %v1455_v0 = vadd.f32 %v1453_v61, %v19591_v20 }
 0x944   :  { %v1454_v1 = vadd.f32 %v1452_v63, %v19589_v19  ;;  %v1497_v19 = vld [vmem:[%s21887_s3 + $0x70] sm:$0xff] }
 0x945   :  { %v1461_v2 = vsel %vm128_vm1, %v1455_v0, 0.0  ;;  %v18902_v14 = vpack.c.bf16 %v1498_v13, %v1497_v19 }
 0x946   :  { %1462 = vadd.xlane.f32.xlu1 %v1461_v2  ;;  %v1458_v3 = vsel %vm128_vm1, %v1454_v1, 0.0 }
 0x947   :  { %1459 = vadd.xlane.f32.xlu0 %v1458_v3  ;;  %18903 = vmatprep.subr.bf16.mxu0 %v18902_v14 }
 0x948   :  { %18905 = vmatpush3.bf16.msra.mxu0 %v18902_v14 }
 0x9d3   :  { %v1463_v4 = vpop.xlane.xlu1 %1462 }
 0x9d4   :  { %v1466_v5 = vmul.f32 0.0625, %v1463_v4  ;;  %v1460_v6 = vpop.xlane.xlu0 %1459 }
 0x9d5   :  { %v1465_v7 = vmul.f32 0.0625, %v1460_v6 }
 0x9d6   :  { %v1468_v8 = vsub.f32 %v1455_v0, %v1466_v5  ;;  %v16740_v5 = vld [vmem:[%s21889_s4 + $0xa] ss:$0 sm:$0xff] }
 0x9d7   :  { %v1467_v9 = vsub.f32 %v1454_v1, %v1465_v7 }
 0x9d8   :  { %v1470_v10 = vmul.f32 %v1468_v8, %v1468_v8 }
 0x9d9   :  { %v1469_v11 = vmul.f32 %v1467_v9, %v1467_v9 }
 0x9da   :  { %v1474_v12 = vsel %vm128_vm1, %v1470_v10, 0.0 }
 0x9db   :  { %1475 = vadd.xlane.f32.xlu1 %v1474_v12  ;;  %v1471_v20 = vsel %vm128_vm1, %v1469_v11, 0.0 }
 0x9dc   :  { %1472 = vadd.xlane.f32.xlu0 %v1471_v20 }
 0xa68   :  { %v1476_v15 = vpop.xlane.xlu1 %1475 }
 0xa69   :  { %v1478_v16 = vmul.f32 0.0625, %v1476_v15  ;;  %v1473_v17 = vpop.xlane.xlu0 %1472 }
 0xa6a   :  { %v1477_v18 = vmul.f32 0.0625, %v1473_v17 }
 0xa6b   :  { %v1480_v21 = vadd.f32 1e-05, %v1478_v16 }
 0xa6c   :  { %v1479_v23 = vadd.f32 1e-05, %v1477_v18 }
 0xa6d   :  { %19272 = vrsqrt.f32 %v1480_v21 }
 0xa6e   :  { %19274 = vrsqrt.f32 %v1479_v23 }
 0xa77   :  { %v19273_v24 = vpop.eup %19272 }
 0xa78   :  { %v19275_v26 = vpop.eup %19274  ;;  %v1484_v27 = vmul.f32 %v19273_v24, %v1468_v8 }
 0xa79   :  { %v1483_v28 = vmul.f32 %v19275_v26, %v1467_v9  ;;  %v1745_v26 = vld [vmem:[%s21887_s3 + $0xc8] sm:$0xff] }
 0xa7a   :  { %v1490_v30 = vmul.f32 %v16733_v25, %v1484_v27 }
 0xa7b   :  { %v1489_v31 = vmul.f32 %v16733_v25, %v1483_v28  ;;  %v1744_v25 = vld [vmem:[%s21887_s3 + $0xc0] sm:$0xff]  ;;  %v1834_v28 = vld [vmem:[%s21887_s3 + $0xd0] sm:$0xff] }
 0xa7c   :  { %v1496_v33 = vadd.f32 %v16734_v29, %v1490_v30  ;;  %v18922_v27 = vpack.c.bf16 %v1745_v26, %v1744_v25  ;;  %v2574_v26 = vld [vmem:[%s21887_s3 + $0x118] sm:$0xff] }
 0xa7d   :  { %v1495_v32 = vadd.f32 %v16734_v29, %v1489_v31  ;;  %v1835_v29 = vld [vmem:[%s21887_s3 + $0xd8] sm:$0xff] }
 0xa7e   :  { %18923 = vmatprep.subr.bf16.mxu0 %v18922_v27  ;;  %v18926_v30 = vpack.c.bf16 %v1835_v29, %v1834_v28 }
 0xa7f   :  { %17794 = vmatprep.mubr.msk.f32.mxu0 %vm128_vm1, %v1495_v32 }
 0xa80   :  { %17795 = vmatmul.mubr.msk.f32.vlgmr.msra.gmra.mrb[14].mxu0 %vm128_vm1, %v1496_v33 }
 0xa81   :  { %18925 = vmatpush3.bf16.msra.mxu0 %v18922_v27  ;;  %v2575_v27 = vld [vmem:[%s21887_s3 + $0x120] sm:$0xff] }
 0xa82   :  { %18927 = vmatprep.subr.bf16.mxu0 %v18926_v30 }
 0xb53   :  { %v17796_v47 = vpop.f32.mrb[14].mxu0 }
 0xb54   :  { %v1586_v48 = vadd.f32 %v17796_v47, %v16737_v46  ;;  %v1572_v49 = vpop.f32.mrb[15].mxu0 }
 0xb55   :  { %v1585_v50 = vadd.f32 %v16737_v46, %v1572_v49  ;;  %v1919_v46 = vld [vmem:[%s21887_s3 + $0xe8] sm:$0xff] }
 0xb56   :  { %v1590_v51 = vmul.f32 0.044715, %v1586_v48  ;;  %v1588_v2 = vmul.f32 0.5, %v1586_v48  ;;  %v18930_v49 = vpack.c.bf16 %v1919_v46, %v1918_v45  ;;  %v16762_v46 = vld [vmem:[%s21889_s4 + $0x10] ss:$0 sm:$0xff] }
 0xb57   :  { %v1589_v52 = vmul.f32 0.044715, %v1585_v50  ;;  %v1587_v0 = vmul.f32 0.5, %v1585_v50 }
 0xb58   :  { %v1592_v53 = vmul.f32 %v1590_v51, %v1586_v48 }
 0xb59   :  { %v1591_v54 = vmul.f32 %v1589_v52, %v1585_v50  ;;  %v16748_v52 = vld [vmem:[%s21889_s4 + $0xe] ss:$0 sm:$0xff] }
 0xb5a   :  { %v1594_v55 = vmul.f32 %v1592_v53, %v1586_v48 }
 0xb5b   :  { %v1593_v56 = vmul.f32 %v1591_v54, %v1585_v50  ;;  %v16745_v54 = vld [vmem:[%s21889_s4 + $0xd] ss:$0 sm:$0xff] }
 0xb5c   :  { %v1596_v57 = vadd.f32 %v1594_v55, %v1586_v48 }
 0xb5d   :  { %v1595_v58 = vadd.f32 %v1593_v56, %v1585_v50 }
 0xb5e   :  { %v1598_v59 = vmul.f32 0.7978846, %v1596_v57 }
 0xb5f   :  { %v1597_v60 = vmul.f32 0.7978846, %v1595_v58  ;;  %v16751_v58 = vld [vmem:[%s21889_s4 + $0xf] ss:$0 sm:$0xff] }
 0xb60   :  { %19276 = vtanh.f32 %v1598_v59 }
 0xb61   :  { %19278 = vtanh.f32 %v1597_v60 }
 0xb6a   :  { %v19277_v61 = vpop.eup %19276 }
 0xb6b   :  { %v19279_v62 = vpop.eup %19278  ;;  %v1602_v63 = vadd.f32 1.0, %v19277_v61 }
 0xb6c   :  { %v1601_v1 = vadd.f32 1.0, %v19279_v62 }
 0xb6d   :  { %v1604_v4 = vmul.f32 %v1602_v63, %v1588_v2 }
 0xb6e   :  { %v1603_v3 = vmul.f32 %v1601_v1, %v1587_v0 }
 0xb70   :  { %17813 = vmatprep.mubr.msk.f32.mxu1 %vm1614_vm4, %v1603_v3 }
 0xb71   :  { %17814 = vmatmul.mubr.msk.f32.vlgmr.msra.gmra.mrb[18].mxu1 %vm1614_vm4, %v1604_v4 }
 0xb72   :  { %17844 = vmatprep.mubr.msk.f32.mxu1 %vm19515_vm2, %v19514_v22 }
 0xc44   :  { %v17815_v6 = vpop.f32.mrb[18].mxu1 }
 0xc45   :  { %v1701_v7 = vadd.f32 %v17815_v6, %v16740_v5  ;;  %v1687_v8 = vpop.f32.mrb[19].mxu1 }
 0xc46   :  { %v1700_v9 = vadd.f32 %v16740_v5, %v1687_v8 }
 0xc47   :  { %v1703_v10 = vadd.f32 %v1701_v7, %v1496_v33 }
 0xc48   :  { %v1702_v11 = vadd.f32 %v1700_v9, %v1495_v32 }
 0xc49   :  { %v1709_v12 = vsel %vm128_vm1, %v1703_v10, 0.0 }
 0xc4a   :  { %1710 = vadd.xlane.f32.xlu1 %v1709_v12  ;;  %v1706_v20 = vsel %vm128_vm1, %v1702_v11, 0.0 }
 0xc4b   :  { %1707 = vadd.xlane.f32.xlu0 %v1706_v20 }
 0xcd7   :  { %v1711_v19 = vpop.xlane.xlu1 %1710 }
 0xcd8   :  { %v1713_v13 = vmul.f32 0.0625, %v1711_v19  ;;  %v1708_v14 = vpop.xlane.xlu0 %1707 }
 0xcd9   :  { %v1712_v15 = vmul.f32 0.0625, %v1708_v14 }
 0xcda   :  { %v1715_v16 = vsub.f32 %v1703_v10, %v1713_v13 }
 0xcdb   :  { %v1714_v17 = vsub.f32 %v1702_v11, %v1712_v15 }
 0xcdc   :  { %v1717_v18 = vmul.f32 %v1715_v16, %v1715_v16 }
 0xcdd   :  { %v1716_v21 = vmul.f32 %v1714_v17, %v1714_v17 }
 0xcde   :  { %v1721_v23 = vsel %vm128_vm1, %v1717_v18, 0.0  ;;  %v2407_v18 = vld [vmem:[%s21887_s3 + $0x100] sm:$0xff] }
 0xcdf   :  { %1722 = vadd.xlane.f32.xlu1 %v1721_v23  ;;  %v1718_v24 = vsel %vm128_vm1, %v1716_v21, 0.0  ;;  %v2324_v23 = vld [vmem:[%s21887_s3 + $0xf0] sm:$0xff] }
 0xce0   :  { %1719 = vadd.xlane.f32.xlu0 %v1718_v24 }
 0xd6c   :  { %v1723_v31 = vpop.xlane.xlu1 %1722 }
 0xd6d   :  { %v1725_v32 = vmul.f32 0.0625, %v1723_v31  ;;  %v1720_v33 = vpop.xlane.xlu0 %1719  ;;  %v18942_v31 = vpack.c.bf16 %v2575_v27, %v2574_v26 }
 0xd6e   :  { %v1724_v34 = vmul.f32 0.0625, %v1720_v33  ;;  %v2490_v33 = vld [vmem:[%s21887_s3 + $0x108] sm:$0xff] }
 0xd6f   :  { %v1727_v35 = vadd.f32 1e-05, %v1725_v32 }
 0xd70   :  { %v1726_v36 = vadd.f32 1e-05, %v1724_v34  ;;  %v2491_v34 = vld [vmem:[%s21887_s3 + $0x110] sm:$0xff] }
 0xd71   :  { %19280 = vrsqrt.f32 %v1727_v35  ;;  %v18938_v35 = vpack.c.bf16 %v2491_v34, %v2490_v33 }
 0xd72   :  { %19282 = vrsqrt.f32 %v1726_v36 }
 0xd7b   :  { %v19281_v37 = vpop.eup %19280 }
 0xd7c   :  { %v19283_v39 = vpop.eup %19282  ;;  %v1731_v40 = vmul.f32 %v19281_v37, %v1715_v16 }
 0xd7d   :  { %v1730_v41 = vmul.f32 %v19283_v39, %v1714_v17  ;;  %v2406_v17 = vld [vmem:[%s21887_s3 + $0xf8] sm:$0xff] }
 0xd7e   :  { %v1737_v43 = vmul.f32 %v16741_v38, %v1731_v40  ;;  %v18934_v21 = vpack.c.bf16 %v2407_v18, %v2406_v17 }
 0xd7f   :  { %v1736_v44 = vmul.f32 %v16741_v38, %v1730_v41 }
 0xd80   :  { %v19795_v48 = vadd.f32 %v16742_v42, %v1737_v43 }
 0xd81   :  { %v19793_v47 = vadd.f32 %v16742_v42, %v1736_v44  ;;  %v16765_v44 = vld [vmem:[%s21889_s4 + $0x11] ss:$0 sm:$0xff] }
 0xd83   :  { %17820 = vmatprep.mubr.msk.f32.mxu0 %vm128_vm1, %v19793_v47 }
 0xd84   :  { %17821 = vmatmul.mubr.msk.f32.vlgmr.msra.gmra.mrb[16].mxu0 %vm128_vm1, %v19795_v48 }
 0xd85   :  { %18929 = vmatpush3.bf16.msra.mxu0 %v18926_v30  ;;  %17827 = vmatprep.mubr.msk.f32.mxu0 %vm128_vm1, %v19793_v47 }
 0xd86   :  { %18931 = vmatprep.subr.bf16.mxu0 %v18930_v49 }
 0xd88   :  { %17828 = vmatmul.mubr.msk.f32.vlgmr.msra.gmra.mrb[18].mxu0 %vm128_vm1, %v19795_v48 }
 0xd89   :  { %18933 = vmatpush3.bf16.msra.mxu0 %v18930_v49  ;;  %17834 = vmatprep.mubr.msk.f32.mxu0 %vm128_vm1, %v19793_v47 }
 0xd8a   :  { %17837 = vmatprep.subr.mxu0 %v19514_v22 }
 0xd8c   :  { %17835 = vmatmul.mubr.msk.f32.vlgmr.msra.gmra.mrb[20].mxu0 %vm128_vm1, %v19795_v48 }
 0xd8d   :  { %17839 = vmatprep.mubr.msk.f32.mxu0 %vm19515_vm2, %v19514_v22 }
 0xe57   :  { %v17822_v50 = vpop.f32.mrb[16].mxu0 }
 0xe58   :  { %v1819_v51 = vpop.f32.mrb[17].mxu0  ;;  %v1833_v59 = vadd.f32 %v17822_v50, %v16745_v54 }
 0xe59   :  { %v1832_v61 = vadd.f32 %v16745_v54, %v1819_v51  ;;  %v16768_v51 = vld [vmem:[%s21889_s4 + $0x12] ss:$0 sm:$0xff] }
 0xe5b   :  { %v17829_v53 = vpop.f32.mrb[18].mxu0 }
 0xe5c   :  { %v1917_v55 = vadd.f32 %v17829_v53, %v16748_v52  ;;  %v1903_v56 = vpop.f32.mrb[19].mxu0 }
 0xe5d   :  { %v1916_v57 = vadd.f32 %v16748_v52, %v1903_v56 }
 0xe5e   :  { %17843 = vmatpush3.xpose.msk.msra.mxu1 %vm384_vm3, %v1917_v55 }
 0xe5f   :  { %v17836_v60 = vpop.f32.mrb[20].mxu0  ;;  %17838 = vmatpush3.xpose.msk.msra.mxu0 %vm384_vm3, %v1916_v57  ;;  %17852 = vmatprep.subr.mxu1 %v19514_v22 }
 0xe60   :  { %v2001_v62 = vadd.f32 %v17836_v60, %v16751_v58  ;;  %v1987_v63 = vpop.f32.mrb[21].mxu0  ;;  %17847 = vmatprep.subr.mxu0 %v19514_v22 }
 0xe61   :  { %v2000_v0 = vadd.f32 %v16751_v58, %v1987_v63  ;;  %17845 = vmatmul.mubr.msk.f32.vlgmr.msra.gmra.mrb[20].mxu1 %vm384_vm3, %v1833_v59 }
 0xe62   :  { %17840 = vmatmul.mubr.msk.f32.vlgmr.msra.gmra.mrb[22].mxu0 %vm384_vm3, %v1832_v61  ;;  %17853 = vmatpush3.msra.mxu1 %v2001_v62 }
 0xe63   :  { %17848 = vmatpush3.msra.mxu0 %v2000_v0  ;;  %17854 = vmatprep.mubr.msk.f32.mxu1 %vm19515_vm2, %v19514_v22 }
 0xe64   :  { %17849 = vmatprep.mubr.msk.f32.mxu0 %vm19515_vm2, %v19514_v22  ;;  %18935 = vmatprep.subr.bf16.mxu1 %v18934_v21 }
 0xe65   :  { %17857 = vmatprep.subr.mxu0 %v2324_v23 }
 0xf34   :  { %v2150_v1 = vpop.f32.mrb[20].mxu1 }
 0xf35   :  { %v2155_v2 = vmul.f32 0.35355338, %v2150_v1  ;;  %v2074_v3 = vpop.f32.mrb[22].mxu0  ;;  %v17846_v4 = vpop.f32.mrb[21].mxu1 }
 0xf36   :  { %v2154_v5 = vmul.f32 0.35355338, %v2074_v3  ;;  %v17841_v6 = vpop.f32.mrb[23].mxu0 }
 0xf37   :  { %v2159_v7 = vsel %vm384_vm3, %v2155_v2, -inf }
 0xf38   :  { %2160 = vmax.xlane.f32.xlu1 %v2159_v7  ;;  %v2156_v8 = vsel %vm384_vm3, %v2154_v5, -inf }
 0xf39   :  { %2157 = vmax.xlane.f32.xlu0 %v2156_v8 }
 0xfc5   :  { %v2161_v9 = vpop.xlane.xlu1 %2160 }
 0xfc6   :  { %v2163_v10 = vsub.f32 %v2155_v2, %v2161_v9  ;;  %v2158_v11 = vpop.xlane.xlu0 %2157 }
 0xfc7   :  { %v2162_v12 = vsub.f32 %v2154_v5, %v2158_v11  ;;  %v2980_v11 = vld [vmem:[%s21887_s3 + $0x128] sm:$0xff] }
 0xfc8   :  { %v2166_v20 = vmul.f32 1.442695, %v2163_v10 }
 0xfc9   :  { %v2164_v19 = vmul.f32 1.442695, %v2162_v12 }
 0xfca   :  { %19284 = vpow2.f32 %v2166_v20 }
 0xfcb   :  { %19286 = vpow2.f32 %v2164_v19 }
 0xfd4   :  { %v19285_v13 = vpop.eup %19284 }
 0xfd5   :  { %v19287_v14 = vpop.eup %19286  ;;  %v2171_v15 = vsel %vm384_vm3, %v19285_v13, 0.0 }
 0xfd6   :  { %2172 = vadd.xlane.f32.xlu1 %v2171_v15  ;;  %v2168_v16 = vsel %vm384_vm3, %v19287_v14, 0.0 }
 0xfd7   :  { %2169 = vadd.xlane.f32.xlu0 %v2168_v16 }
0x1063   :  { %v2173_v24 = vpop.xlane.xlu1 %2172 }
0x1064   :  { %19288 = vrcp.f32 %v2173_v24  ;;  %v2170_v25 = vpop.xlane.xlu0 %2169 }
0x1065   :  { %19290 = vrcp.f32 %v2170_v25 }
0x106e   :  { %v19289_v28 = vpop.eup %19288 }
0x106f   :  { %v19291_v29 = vpop.eup %19290  ;;  %v2177_v30 = vmul.f32 %v19289_v28, %v19285_v13 }
0x1070   :  { %v2176_v32 = vmul.f32 %v19291_v29, %v19287_v14 }
0x1071   :  { %17855 = vmatmul.mubr.msk.f32.vlgmr.msra.gmra.mrb[22].mxu1 %vm384_vm3, %v2177_v30 }
0x1072   :  { %17850 = vmatmul.mubr.msk.f32.vlgmr.msra.gmra.mrb[24].mxu0 %vm384_vm3, %v2176_v32  ;;  %18937 = vmatpush3.bf16.msra.mxu1 %v18934_v21 }
0x1073   :  { %17866 = vmatprep.mubr.msk.f32.mxu1 %vm128_vm1, %v19793_v47  ;;  %18943 = vmatprep.subr.bf16.mxu1 %v18942_v31 }
0x1074   :  { %17858 = vmatpush3.msra.mxu0 %v2324_v23  ;;  %v16777_v23 = vld [vmem:[%s21889_s4 + $0x13] ss:$0 sm:$0xff] }
0x1075   :  { %17867 = vmatmul.mubr.msk.f32.vlgmr.msra.gmra.mrb[24].mxu1 %vm128_vm1, %v19795_v48  ;;  %18939 = vmatprep.subr.bf16.mxu0 %v18938_v35 }
0x1076   :  { %18945 = vmatpush3.bf16.msra.mxu1 %v18942_v31  ;;  %17880 = vmatprep.mubr.msk.f32.mxu1 %vm128_vm1, %v19793_v47 }
0x1077   :  { %17888 = vmatprep.subr.mxu1 %v19514_v22 }
0x1079   :  { %17881 = vmatmul.mubr.msk.f32.vlgmr.msra.gmra.mrb[26].mxu1 %vm128_vm1, %v19795_v48 }
0x107a   :  { %17890 = vmatprep.mubr.msk.f32.mxu1 %vm19515_vm2, %v19514_v22 }
0x1144   :  { %v2320_v36 = vpop.f32.mrb[22].mxu1 }
0x1145   :  { %v2247_v37 = vpop.f32.mrb[24].mxu0  ;;  %v17856_v38 = vpop.f32.mrb[23].mxu1 }
0x1146   :  { %v17851_v39 = vpop.f32.mrb[25].mxu0  ;;  %17859 = vmatprep.mubr.msk.f32.mxu0 %vm384_vm3, %v2247_v37 }
0x1147   :  { %17860 = vmatmul.mubr.msk.f32.vlgmr.msra.gmra.mrb[26].mxu0 %vm384_vm3, %v2320_v36 }
0x1148   :  { %v17868_v40 = vpop.f32.mrb[24].mxu1  ;;  %18941 = vmatpush3.bf16.msra.mxu0 %v18938_v35  ;;  %17873 = vmatprep.mubr.msk.f32.mxu0 %vm128_vm1, %v19793_v47 }
0x1149   :  { %v2475_v41 = vpop.f32.mrb[25].mxu1  ;;  %17883 = vmatprep.subr.mxu0 %v19514_v22  ;;  %v2489_v53 = vadd.f32 %v17868_v40, %v16762_v46 }
0x114a   :  { %v2488_v54 = vadd.f32 %v16762_v46, %v2475_v41  ;;  %v3114_v41 = vld [vmem:[%s21887_s3 + $0x138] sm:$0xff] }
0x114b   :  { %17874 = vmatmul.mubr.msk.f32.vlgmr.msra.gmra.mrb[28].mxu0 %vm128_vm1, %v19795_v48 }
0x114c   :  { %v17882_v42 = vpop.f32.mrb[26].mxu1  ;;  %17885 = vmatprep.mubr.msk.f32.mxu0 %vm19515_vm2, %v19514_v22 }
0x114d   :  { %v2643_v43 = vpop.f32.mrb[27].mxu1  ;;  %v2657_v55 = vadd.f32 %v17882_v42, %v16768_v51 }
0x114e   :  { %v2656_v56 = vadd.f32 %v16768_v51, %v2643_v43 }
0x121e   :  { %v17875_v45 = vpop.f32.mrb[28].mxu0 }
0x121f   :  { %v2573_v49 = vadd.f32 %v17875_v45, %v16765_v44  ;;  %v2559_v50 = vpop.f32.mrb[29].mxu0 }
0x1220   :  { %v2572_v52 = vadd.f32 %v16765_v44, %v2559_v50 }
0x1221   :  { %17889 = vmatpush3.xpose.msk.msra.mxu1 %vm384_vm3, %v2573_v49 }
0x1222   :  { %17884 = vmatpush3.xpose.msk.msra.mxu0 %vm384_vm3, %v2572_v52  ;;  %17898 = vmatprep.subr.mxu1 %v19514_v22  ;;  %v16778_v52 = vld [vmem:[%s21889_s4 + $0x14] ss:$0 sm:$0xff] }
0x1223   :  { %17893 = vmatprep.subr.mxu0 %v19514_v22 }
0x1224   :  { %17891 = vmatmul.mubr.msk.f32.vlgmr.msra.gmra.mrb[28].mxu1 %vm384_vm3, %v2489_v53 }
0x1225   :  { %17886 = vmatmul.mubr.msk.f32.vlgmr.msra.gmra.mrb[30].mxu0 %vm384_vm3, %v2488_v54  ;;  %17899 = vmatpush3.msra.mxu1 %v2657_v55 }
0x1226   :  { %17894 = vmatpush3.msra.mxu0 %v2656_v56  ;;  %17900 = vmatprep.mubr.msk.f32.mxu1 %vm19515_vm2, %v19514_v22  ;;  %v16779_v56 = vld [vmem:[%s21889_s4 + $0x15] ss:$0 sm:$0xff] }
0x1227   :  { %17895 = vmatprep.mubr.msk.f32.mxu0 %vm19515_vm2, %v19514_v22  ;;  %17903 = vmatprep.subr.mxu0 %v2980_v11 }
0x12f7   :  { %v2806_v57 = vpop.f32.mrb[28].mxu1 }
0x12f8   :  { %v2811_v58 = vmul.f32 0.35355338, %v2806_v57  ;;  %v2730_v59 = vpop.f32.mrb[30].mxu0  ;;  %v17892_v60 = vpop.f32.mrb[29].mxu1 }
0x12f9   :  { %v2810_v61 = vmul.f32 0.35355338, %v2730_v59  ;;  %v17887_v62 = vpop.f32.mrb[31].mxu0 }
0x12fa   :  { %v2815_v63 = vsel %vm384_vm3, %v2811_v58, -inf  ;;  %v3222_v62 = vld [vmem:[%s21887_s3 + $0x148] sm:$0xff] }
0x12fb   :  { %2816 = vmax.xlane.f32.xlu1 %v2815_v63  ;;  %v2812_v0 = vsel %vm384_vm3, %v2810_v61, -inf }
0x12fc   :  { %2813 = vmax.xlane.f32.xlu0 %v2812_v0  ;;  %v3223_v0 = vld [vmem:[%s21887_s3 + $0x150] sm:$0xff] }
0x1388   :  { %v2817_v1 = vpop.xlane.xlu1 %2816 }
0x1389   :  { %v2819_v2 = vsub.f32 %v2811_v58, %v2817_v1  ;;  %v2814_v3 = vpop.xlane.xlu0 %2813  ;;  %v3224_v1 = vld [vmem:[%s21887_s3 + $0x158] sm:$0xff] }
0x138a   :  { %v2818_v4 = vsub.f32 %v2810_v61, %v2814_v3  ;;  %v3221_v61 = vld [vmem:[%s21887_s3 + $0x140] sm:$0xff] }
0x138b   :  { %v2822_v5 = vmul.f32 1.442695, %v2819_v2  ;;  %v18950_v63 = vpack.c.bf16 %v3222_v62, %v3221_v61  ;;  %v18954_v2 = vpack.c.bf16 %v3224_v1, %v3223_v0  ;;  %v3225_v3 = vld [vmem:[%s21887_s3 + $0x160] sm:$0xff]  ;;  %v16786_v1 = vld [vmem:[%s21889_s4 + $0x18] ss:$0 sm:$0xff] }
0x138c   :  { %v2820_v6 = vmul.f32 1.442695, %v2818_v4  ;;  %v3226_v4 = vld [vmem:[%s21887_s3 + $0x168] sm:$0xff] }
0x138d   :  { %19292 = vpow2.f32 %v2822_v5  ;;  %v18958_v5 = vpack.c.bf16 %v3226_v4, %v3225_v3 }
0x138e   :  { %19294 = vpow2.f32 %v2820_v6  ;;  %v3227_v6 = vld [vmem:[%s21887_s3 + $0x170] sm:$0xff] }
0x1397   :  { %v19293_v7 = vpop.eup %19292 }
0x1398   :  { %v19295_v8 = vpop.eup %19294  ;;  %v2827_v9 = vsel %vm384_vm3, %v19293_v7, 0.0 }
0x1399   :  { %2828 = vadd.xlane.f32.xlu1 %v2827_v9  ;;  %v2824_v10 = vsel %vm384_vm3, %v19295_v8, 0.0  ;;  %v16782_v9 = vld [vmem:[%s21889_s4 + $0x16] ss:$0 sm:$0xff] }
0x139a   :  { %2825 = vadd.xlane.f32.xlu0 %v2824_v10 }
0x1426   :  { %v2829_v12 = vpop.xlane.xlu1 %2828 }
0x1427   :  { %19296 = vrcp.f32 %v2829_v12  ;;  %v2826_v20 = vpop.xlane.xlu0 %2825 }
0x1428   :  { %19298 = vrcp.f32 %v2826_v20 }
0x1431   :  { %v19297_v19 = vpop.eup %19296 }
0x1432   :  { %v19299_v13 = vpop.eup %19298  ;;  %v2833_v14 = vmul.f32 %v19297_v19, %v19293_v7  ;;  %v3228_v7 = vld [vmem:[%s21887_s3 + $0x178] sm:$0xff] }
0x1433   :  { %v2832_v15 = vmul.f32 %v19299_v13, %v19295_v8  ;;  %v18962_v8 = vpack.c.bf16 %v3228_v7, %v3227_v6 }
0x1434   :  { %17901 = vmatmul.mubr.msk.f32.vlgmr.msra.gmra.mrb[30].mxu1 %vm384_vm3, %v2833_v14 }
0x1435   :  { %17896 = vmatmul.mubr.msk.f32.vlgmr.msra.gmra.mrb[32].mxu0 %vm384_vm3, %v2832_v15 }
0x1436   :  { %17904 = vmatpush3.msra.mxu0 %v2980_v11 }
0x1437   :  { %18951 = vmatprep.subr.bf16.mxu0 %v18950_v63 }
0x1507   :  { %v2976_v16 = vpop.f32.mrb[30].mxu1 }
0x1508   :  { %v2903_v17 = vpop.f32.mrb[32].mxu0  ;;  %v17902_v18 = vpop.f32.mrb[31].mxu1 }
0x1509   :  { %v17897_v21 = vpop.f32.mrb[33].mxu0  ;;  %17905 = vmatprep.mubr.msk.f32.mxu0 %vm384_vm3, %v2903_v17 }
0x150a   :  { %17906 = vmatmul.mubr.msk.f32.vlgmr.msra.gmra.mrb[26].mxu0 %vm384_vm3, %v2976_v16 }
0x150b   :  { %18953 = vmatpush3.bf16.msra.mxu0 %v18950_v63 }
0x150c   :  { %18955 = vmatprep.subr.bf16.mxu0 %v18954_v2 }
0x150f   :  { %18957 = vmatpush3.bf16.msra.mxu0 %v18954_v2 }
0x1510   :  { %18959 = vmatprep.subr.bf16.mxu0 %v18958_v5 }
0x1513   :  { %18961 = vmatpush3.bf16.msra.mxu0 %v18958_v5  ;;  %v16787_v5 = vld [vmem:[%s21889_s4 + $0x19] ss:$0 sm:$0xff] }
0x1514   :  { %18963 = vmatprep.subr.bf16.mxu0 %v18962_v8 }
0x1517   :  { %18965 = vmatpush3.bf16.msra.mxu0 %v18962_v8 }
0x15dd   :  { %v17907_v24 = vpop.f32.mrb[26].mxu0 }
0x15de   :  { %v3070_v25 = vadd.f32 %v17907_v24, %v16777_v23  ;;  %v3053_v26 = vpop.f32.mrb[27].mxu0 }
0x15df   :  { %v3069_v27 = vadd.f32 %v16777_v23, %v3053_v26 }
0x15e0   :  { %v3072_v28 = vadd.f32 %v3070_v25, %v19795_v48 }
0x15e1   :  { %v3071_v29 = vadd.f32 %v3069_v27, %v19793_v47  ;;  %v3113_v47 = vld [vmem:[%s21887_s3 + $0x130] sm:$0xff] }
0x15e2   :  { %v3078_v30 = vsel %vm128_vm1, %v3072_v28, 0.0  ;;  %v18946_v42 = vpack.c.bf16 %v3114_v41, %v3113_v47 }
0x15e3   :  { %3079 = vadd.xlane.f32.xlu1 %v3078_v30  ;;  %v3075_v31 = vsel %vm128_vm1, %v3071_v29, 0.0 }
0x15e4   :  { %3076 = vadd.xlane.f32.xlu0 %v3075_v31  ;;  %18947 = vmatprep.subr.bf16.mxu1 %v18946_v42 }
0x15e5   :  { %18949 = vmatpush3.bf16.msra.mxu1 %v18946_v42 }
0x1670   :  { %v3080_v32 = vpop.xlane.xlu1 %3079 }
0x1671   :  { %v3082_v33 = vmul.f32 0.0625, %v3080_v32  ;;  %v3077_v34 = vpop.xlane.xlu0 %3076 }
0x1672   :  { %v3081_v35 = vmul.f32 0.0625, %v3077_v34 }
0x1673   :  { %v3084_v36 = vsub.f32 %v3072_v28, %v3082_v33  ;;  %v16785_v33 = vld [vmem:[%s21889_s4 + $0x17] ss:$0 sm:$0xff] }
0x1674   :  { %v3083_v37 = vsub.f32 %v3071_v29, %v3081_v35 }
0x1675   :  { %v3086_v38 = vmul.f32 %v3084_v36, %v3084_v36 }
0x1676   :  { %v3085_v39 = vmul.f32 %v3083_v37, %v3083_v37 }
0x1677   :  { %v3090_v40 = vsel %vm128_vm1, %v3086_v38, 0.0 }
0x1678   :  { %3091 = vadd.xlane.f32.xlu1 %v3090_v40  ;;  %v3087_v48 = vsel %vm128_vm1, %v3085_v39, 0.0 }
0x1679   :  { %3088 = vadd.xlane.f32.xlu0 %v3087_v48 }
0x1705   :  { %v3092_v43 = vpop.xlane.xlu1 %3091 }
0x1706   :  { %v3094_v44 = vmul.f32 0.0625, %v3092_v43  ;;  %v3089_v45 = vpop.xlane.xlu0 %3088 }
0x1707   :  { %v3093_v46 = vmul.f32 0.0625, %v3089_v45 }
0x1708   :  { %v3096_v49 = vadd.f32 1e-05, %v3094_v44 }
0x1709   :  { %v3095_v50 = vadd.f32 1e-05, %v3093_v46 }
0x170a   :  { %19300 = vrsqrt.f32 %v3096_v49 }
0x170b   :  { %19302 = vrsqrt.f32 %v3095_v50 }
0x1714   :  { %v19301_v51 = vpop.eup %19300 }
0x1715   :  { %v19303_v53 = vpop.eup %19302  ;;  %v3100_v54 = vmul.f32 %v19301_v51, %v3084_v36 }
0x1716   :  { %v3099_v55 = vmul.f32 %v19303_v53, %v3083_v37  ;;  %v3360_v53 = vld [vmem:[%s21887_s3 + $0x1a8] sm:$0xff] }
0x1717   :  { %v3106_v57 = vmul.f32 %v16778_v52, %v3100_v54 }
0x1718   :  { %v3105_v58 = vmul.f32 %v16778_v52, %v3099_v55  ;;  %v3359_v52 = vld [vmem:[%s21887_s3 + $0x1a0] sm:$0xff] }
0x1719   :  { %v3112_v60 = vadd.f32 %v16779_v56, %v3106_v57  ;;  %v18966_v54 = vpack.c.bf16 %v3360_v53, %v3359_v52  ;;  %v3467_v55 = vld [vmem:[%s21887_s3 + $0x500] sm:$0xff] }
0x171a   :  { %v3111_v59 = vadd.f32 %v16779_v56, %v3105_v58  ;;  %v3468_v56 = vld [vmem:[%s21887_s3 + $0x508] sm:$0xff] }
0x171b   :  { %18967 = vmatprep.subr.bf16.mxu1 %v18966_v54  ;;  %v18970_v57 = vpack.c.bf16 %v3468_v56, %v3467_v55  ;;  %v19512_v55 = vld [vmem:[%s21888_s1 + $0x8] sm:$0xff] }
0x171c   :  { %17912 = vmatprep.mubr.msk.f32.mxu1 %vm128_vm1, %v3111_v59 }
0x171d   :  { %17913 = vmatmul.mubr.msk.f32.vlgmr.msra.gmra.mrb[32].mxu1 %vm128_vm1, %v3112_v60 }
0x171e   :  { %18969 = vmatpush3.bf16.msra.mxu1 %v18966_v54 }
0x171f   :  { %18971 = vmatprep.subr.bf16.mxu1 %v18970_v57 }
0x17f0   :  { %v17914_v10 = vpop.f32.mrb[32].mxu1 }
0x17f1   :  { %v3202_v11 = vadd.f32 %v17914_v10, %v16782_v9  ;;  %v3188_v12 = vpop.f32.mrb[33].mxu1  ;;  %v19516_v10 = vmov 1983009808  }
0x17f2   :  { %v3201_v20 = vadd.f32 %v16782_v9, %v3188_v12  ;;  %v3485_v12 = vlaneseq }
0x17f3   :  { %v3206_v19 = vmul.f32 0.044715, %v3202_v11  ;;  %v3204_v30 = vmul.f32 0.5, %v3202_v11 }
0x17f4   :  { %v3205_v13 = vmul.f32 0.044715, %v3201_v20  ;;  %v3203_v28 = vmul.f32 0.5, %v3201_v20 }
0x17f5   :  { %v3208_v14 = vmul.f32 %v3206_v19, %v3202_v11  ;;  %v19987_v19 = vshrl.u32 %v3485_v12, 7 }
0x17f6   :  { %v3207_v15 = vmul.f32 %v3205_v13, %v3201_v20  ;;  %v24_v13 = vld [vmem:[%s21890_s2] sm:$0x3] }
0x17f7   :  { %v3210_v16 = vmul.f32 %v3208_v14, %v3202_v11  ;;  %v25_v14 = vld [vmem:[%s21890_s2 + $0x2] sm:$0x3] }
0x17f8   :  { %v3209_v17 = vmul.f32 %v3207_v15, %v3201_v20  ;;  %v26_v15 = vld [vmem:[%s21890_s2 + $0x4] sm:$0x3] }
0x17f9   :  { %v3212_v18 = vadd.f32 %v3210_v16, %v3202_v11  ;;  %v3483_v11 = vunpack.c.l.s4 %v19516_v10  ;;  %v3469_v16 = vld [vmem:[%s21887_s3 + $0x510] sm:$0xff] }
0x17fa   :  { %v3211_v21 = vadd.f32 %v3209_v17, %v3201_v20  ;;  %v3470_v17 = vld [vmem:[%s21887_s3 + $0x518] sm:$0xff] }
0x17fb   :  { %v3214_v23 = vmul.f32 0.7978846, %v3212_v18  ;;  %v3484_v20 = vunpack.c.0.s8 %v3483_v11  ;;  %v27_v18 = vld [vmem:[%s21890_s2 + $0x6] sm:$0x3] }
0x17fc   :  { %v3213_v24 = vmul.f32 0.7978846, %v3211_v21  ;;  %v3480_v21 = vcombine.low %v24_v13, %v25_v14 }
0x17fd   :  { %19304 = vtanh.f32 %v3214_v23  ;;  %v20008_v23 = vsub.s32 %v3484_v20, %v19987_v19 }
0x17fe   :  { %19306 = vtanh.f32 %v3213_v24  ;;  %v18974_v24 = vpack.c.bf16 %v3470_v17, %v3469_v16 }
0x1807   :  { %v19305_v25 = vpop.eup %19304 }
0x1808   :  { %v19307_v26 = vpop.eup %19306  ;;  %v3218_v27 = vadd.f32 1.0, %v19305_v25  ;;  %v3481_v25 = vcombine.low %v26_v15, %v27_v18 }
0x1809   :  { %v3217_v29 = vadd.f32 1.0, %v19307_v26  ;;  %v28_v26 = vld [vmem:[%s21890_s2 + $0x8] sm:$0x3] }
0x180a   :  { %v3220_v32 = vmul.f32 %v3218_v27, %v3204_v30  ;;  %v29_v27 = vld [vmem:[%s21890_s2 + $0xa] sm:$0x3]  ;;  %v31_v30 = vld [vmem:[%s21890_s2 + $0xe] sm:$0x3] }
0x180b   :  { %v3219_v31 = vmul.f32 %v3217_v29, %v3203_v28  ;;  %v30_v28 = vld [vmem:[%s21890_s2 + $0xc] sm:$0x3]  ;;  %v3488_v29 = vrot.slane %v3480_v21, %v20008_v23 }
0x180d   :  { %17931 = vmatprep.mubr.msk.f32.mxu0 %vm1614_vm4, %v3219_v31  ;;  %v3497_v31 = vcombine.low %v28_v26, %v29_v27 }
0x180e   :  { %17932 = vmatmul.mubr.msk.f32.vlgmr.msra.gmra.mrb[34].mxu0 %vm1614_vm4, %v3220_v32  ;;  %v3495_v32 = vrot.slane %v3481_v25, %v20008_v23 }
0x18e1   :  { %v17933_v34 = vpop.f32.mrb[34].mxu0 }
0x18e2   :  { %v3316_v35 = vadd.f32 %v17933_v34, %v16785_v33  ;;  %v3302_v36 = vpop.f32.mrb[35].mxu0  ;;  %v3505_v34 = vrot.slane %v3497_v31, %v20008_v23 }
0x18e3   :  { %v3315_v37 = vadd.f32 %v16785_v33, %v3302_v36  ;;  %v3498_v33 = vcombine.low %v30_v28, %v31_v30  ;;  %v3650_v36 = vld [vmem:[%s21887_s3 + $0x528] sm:$0xff] }
0x18e4   :  { %v3318_v38 = vadd.f32 %v3316_v35, %v3112_v60  ;;  %v3649_v35 = vld [vmem:[%s21887_s3 + $0x520] sm:$0xff] }
0x18e5   :  { %v3317_v39 = vadd.f32 %v3315_v37, %v3111_v59  ;;  %v3823_v37 = vld [vmem:[%s21887_s3 + $0x540] sm:$0xff] }
0x18e6   :  { %v3324_v40 = vsel %vm128_vm1, %v3318_v38, 0.0 }
0x18e7   :  { %3325 = vadd.xlane.f32.xlu1 %v3324_v40  ;;  %v3321_v48 = vsel %vm128_vm1, %v3317_v39, 0.0  ;;  %v18978_v40 = vpack.c.bf16 %v3650_v36, %v3649_v35 }
0x18e8   :  { %3322 = vadd.xlane.f32.xlu0 %v3321_v48  ;;  %v3824_v48 = vld [vmem:[%s21887_s3 + $0x548] sm:$0xff] }
0x1974   :  { %v3326_v47 = vpop.xlane.xlu1 %3325 }
0x1975   :  { %v3328_v41 = vmul.f32 0.0625, %v3326_v47  ;;  %v3323_v42 = vpop.xlane.xlu0 %3322  ;;  %v3651_v47 = vld [vmem:[%s21887_s3 + $0x530] sm:$0xff] }
0x1976   :  { %v3327_v43 = vmul.f32 0.0625, %v3323_v42  ;;  %v18986_v42 = vpack.c.bf16 %v3824_v48, %v3823_v37  ;;  %v20110_v48 = vld [vmem:[%s21889_s4 + $0x46] ss:$0 sm:$0xff] }
0x1977   :  { %v3330_v44 = vsub.f32 %v3318_v38, %v3328_v41  ;;  %v20034_v38 = vcombine.low %v3488_v29, %v3495_v32  ;;  %v3652_v41 = vld [vmem:[%s21887_s3 + $0x538] sm:$0xff] }
0x1978   :  { %v3329_v45 = vsub.f32 %v3317_v39, %v3327_v43  ;;  %v3512_v39 = vrot.slane %v3498_v33, %v20008_v23  ;;  %v3825_v43 = vld [vmem:[%s21887_s3 + $0x550] sm:$0xff]  ;;  %18987 = vmatprep.subr.bf16.mxu0 %v18986_v42  ;;  %v20103_v33 = vld [vmem:[%s21889_s4 + $0x47] ss:$0 sm:$0xff] }
0x1979   :  { %v3332_v46 = vmul.f32 %v3330_v44, %v3330_v44  ;;  %18989 = vmatpush3.bf16.msra.mxu0 %v18986_v42 }
0x197a   :  { %v3331_v49 = vmul.f32 %v3329_v45, %v3329_v45 }
0x197b   :  { %v3336_v50 = vsel %vm128_vm1, %v3332_v46, 0.0  ;;  %v18982_v46 = vpack.c.bf16 %v3652_v41, %v3651_v47 }
0x197c   :  { %3337 = vadd.xlane.f32.xlu1 %v3336_v50  ;;  %v3333_v51 = vsel %vm128_vm1, %v3331_v49, 0.0  ;;  %v16790_v50 = vld [vmem:[%s21889_s4 + $0x1b] ss:$0 sm:$0xff] }
0x197d   :  { %3334 = vadd.xlane.f32.xlu0 %v3333_v51 }
0x1a09   :  { %v3338_v58 = vpop.xlane.xlu1 %3337 }
0x1a0a   :  { %v3340_v59 = vmul.f32 0.0625, %v3338_v58  ;;  %v3335_v60 = vpop.xlane.xlu0 %3334 }
0x1a0b   :  { %v3339_v61 = vmul.f32 0.0625, %v3335_v60 }
0x1a0c   :  { %v3342_v62 = vadd.f32 1e-05, %v3340_v59 }
0x1a0d   :  { %v3341_v63 = vadd.f32 1e-05, %v3339_v61 }
0x1a0e   :  { %19308 = vrsqrt.f32 %v3342_v62 }
0x1a0f   :  { %19310 = vrsqrt.f32 %v3341_v63 }
0x1a18   :  { %v19309_v0 = vpop.eup %19308 }
0x1a19   :  { %v19311_v2 = vpop.eup %19310  ;;  %v3346_v3 = vmul.f32 %v19309_v0, %v3330_v44  ;;  %v3826_v44 = vld [vmem:[%s21887_s3 + $0x558] sm:$0xff] }
0x1a1a   :  { %v3345_v4 = vmul.f32 %v19311_v2, %v3329_v45  ;;  %v20054_v45 = vcombine.low %v3505_v34, %v3512_v39  ;;  %v18990_v49 = vpack.c.bf16 %v3826_v44, %v3825_v43 }
0x1a1b   :  { %v3352_v6 = vmul.f32 %v16786_v1, %v3346_v3 }
0x1a1c   :  { %v3351_v7 = vmul.f32 %v16786_v1, %v3345_v4  ;;  %18991 = vmatprep.subr.bf16.mxu0 %v18990_v49 }
0x1a1d   :  { %v3358_v9 = vadd.f32 %v16787_v5, %v3352_v6  ;;  %18993 = vmatpush3.bf16.msra.mxu0 %v18990_v49 }
0x1a1e   :  { %v3357_v8 = vadd.f32 %v16787_v5, %v3351_v7  ;;  %17979 = vmatprep.subr.mxu0 %v19514_v22 }
0x1a20   :  { %17938 = vmatprep.mubr.msk.f32.mxu1 %vm128_vm1, %v3357_v8 }
0x1a21   :  { %17939 = vmatmul.mubr.msk.f32.vlgmr.msra.gmra.mrb[34].mxu1 %vm128_vm1, %v3358_v9 }
0x1a22   :  { %18973 = vmatpush3.bf16.msra.mxu1 %v18970_v57  ;;  %17949 = vmatprep.mubr.msk.f32.mxu1 %vm37_vm0, %v20034_v38  ;;  %v19513_v57 = vld [vmem:[%s21888_s1] sm:$0xff] }
0x1a23   :  { %18975 = vmatprep.subr.bf16.mxu1 %v18974_v24 }
0x1a26   :  { %18977 = vmatpush3.bf16.msra.mxu1 %v18974_v24 }
0x1a27   :  { %18979 = vmatprep.subr.bf16.mxu1 %v18978_v40 }
0x1a29   :  { %17950 = vmatmul.mubr.msk.f32.vlgmr.msra.gmra.mrb[36].mxu1 %vm37_vm0, %v20054_v45 }
0x1a2a   :  { %18981 = vmatpush3.bf16.msra.mxu1 %v18978_v40 }
0x1a2b   :  { %18983 = vmatprep.subr.bf16.mxu1 %v18982_v46 }
0x1a2e   :  { %18985 = vmatpush3.bf16.msra.mxu1 %v18982_v46 }
0x1a2f   :  { %17974 = vmatprep.subr.mxu1 %v19514_v22 }
0x1af4   :  { %v17940_v51 = vpop.f32.mrb[34].mxu1 }
0x1af5   :  { %v3448_v52 = vadd.f32 %v17940_v51, %v16790_v50  ;;  %v3434_v53 = vpop.f32.mrb[35].mxu1 }
0x1af6   :  { %v3447_v54 = vadd.f32 %v16790_v50, %v3434_v53 }
0x1af7   :  { %v3450_v56 = vadd.f32 %v19512_v55, %v3448_v52  ;;  %v20121_v52 = vld [vmem:[%s21889_s4 + $0x45] ss:$0 sm:$0xff] }
0x1af8   :  { %v3449_v58 = vadd.f32 %v19513_v57, %v3447_v54 }
0x1af9   :  { %v3466_v59 = vrot.slane %v3450_v56, 7  ;;  %v16800_v60 = vrot.slane %v3450_v56, 11  ;;  %v16795_v62 = vrot.slane %v3450_v56, 6  ;;  %v16802_v4 = vrot.slane %v3450_v56, 10 }
0x1afa   :  { %v16794_v61 = vrot.slane %v3449_v58, 7  ;;  %v3459_v0 = vrot.slane %v3449_v58, 4  ;;  %v16801_v1 = vrot.slane %v3449_v58, 11  ;;  %v16796_v3 = vrot.slane %v3449_v58, 6 }
0x1afb   :  { %v3655_v63 = vsel %vm3654_vm5, %v3466_v59, %v3449_v58  ;;  %v16797_v6 = vrot.slane %v3450_v56, 5  ;;  %v16798_v9 = vrot.slane %v3449_v58, 5  ;;  %v16803_v11 = vrot.slane %v3449_v58, 10 }
0x1afc   :  { %v3658_v2 = vsel %vm3657_vm6, %v16794_v61, %v3655_v63  ;;  %v3675_v7 = vsel %vm3654_vm5, %v16800_v60, %v3459_v0  ;;  %v16799_v20 = vrot.slane %v3450_v56, 4  ;;  %v16804_v14 = vrot.slane %v3450_v56, 9  ;;  %v17951_v27 = vpop.f32.mrb[36].mxu1 }
0x1afd   :  { %v3661_v5 = vsel %vm3660_vm7, %v16795_v62, %v3658_v2  ;;  %v3677_v10 = vsel %vm3657_vm6, %v16801_v1, %v3675_v7  ;;  %v16805_v17 = vrot.slane %v3449_v58, 9  ;;  %v3686_v24 = vrot.slane %v3466_v59, 1  ;;  %v3584_v28 = vpop.f32.mrb[37].mxu1 }
0x1afe   :  { %v3664_v8 = vsel %vm3663_vm8, %v16796_v3, %v3661_v5  ;;  %v3679_v13 = vsel %vm3660_vm7, %v16802_v4, %v3677_v10  ;;  %v3595_v31 = vcombine.high %v3584_v28, %v3584_v28  ;;  %v3602_v32 = vrot.slane %v3584_v28, %v20008_v23 }
0x1aff   :  { %v3667_v12 = vsel %vm3666_vm9, %v16797_v6, %v3664_v8  ;;  %v3681_v16 = vsel %vm3663_vm8, %v16803_v11, %v3679_v13  ;;  %v3612_v61 = vcombine.high %v17951_v27, %v17951_v27  ;;  %v3619_v63 = vrot.slane %v17951_v27, %v20008_v23 }
0x1b00   :  { %v3670_v15 = vsel %vm3669_vm10, %v16798_v9, %v3667_v12  ;;  %v3683_v21 = vsel %vm3666_vm9, %v16804_v14, %v3681_v16  ;;  %v3609_v49 = vrot.slane %v3595_v31, %v20008_v23  ;;  %v3610_v50 = vcombine.high %v3602_v32, %v3602_v32 }
0x1b01   :  { %v20080_v18 = vsel %vm3672_vm11, %v16799_v20, %v3670_v15  ;;  %v3685_v25 = vsel %vm3669_vm10, %v16805_v17, %v3683_v21  ;;  %v3641_v1 = vadd.f32 %v20121_v52, %v3602_v32  ;;  %v3626_v10 = vrot.slane %v3612_v61, %v20008_v23 }
0x1b02   :  { %17960 = vmatprep.mubr.msk.f32.mxu1 %vm37_vm0, %v20080_v18  ;;  %17971 = vmatprep.mubr.msk.f32.mxu0 %vm37_vm0, %v20080_v18  ;;  %v20089_v26 = vsel %vm3672_vm11, %v3686_v24, %v3685_v25  ;;  %v3611_v0 = vcombine.high %v3609_v49, %v3609_v49  ;;  %v3642_v2 = vadd.f32 %v20121_v52, %v3610_v50 }
0x1b03   :  { %17961 = vmatmul.mubr.msk.f32.vlgmr.msra.gmra.mrb[38].mxu1 %vm37_vm0, %v20089_v26  ;;  %17972 = vmatmul.mubr.msk.f32.vlgmr.msra.gmra.mrb[36].mxu0 %vm37_vm0, %v20089_v26  ;;  %v3643_v11 = vadd.f32 %v20121_v52, %v3609_v49  ;;  %v3627_v12 = vcombine.high %v3619_v63, %v3619_v63  ;;  %v3645_v17 = vadd.f32 %v20121_v52, %v3619_v63 }
0x1b04   :  { %17976 = vmatprep.mubr.msk.f32.mxu1 %vm19515_vm2, %v19514_v22  ;;  %17981 = vmatprep.mubr.msk.f32.mxu0 %vm19515_vm2, %v19514_v22  ;;  %v3644_v20 = vadd.f32 %v20121_v52, %v3611_v0  ;;  %v3628_v21 = vcombine.high %v3626_v10, %v3626_v10 }
0x1b05   :  { %v3646_v24 = vadd.f32 %v20121_v52, %v3627_v12 }
0x1bd6   :  { %v17962_v29 = vpop.f32.mrb[38].mxu1  ;;  %v17973_v30 = vpop.f32.mrb[36].mxu0 }
0x1bd7   :  { %v3922_v34 = vcombine.high %v17973_v30, %v17973_v30  ;;  %v3929_v35 = vrot.slane %v17973_v30, %v20008_v23  ;;  %v3758_v36 = vpop.f32.mrb[39].mxu1  ;;  %v3894_v37 = vpop.f32.mrb[37].mxu0  ;;  %v3786_v53 = vcombine.high %v17962_v29, %v17962_v29  ;;  %v3793_v57 = vrot.slane %v17962_v29, %v20008_v23 }
0x1bd8   :  { %v3769_v39 = vcombine.high %v3758_v36, %v3758_v36  ;;  %v3776_v40 = vrot.slane %v3758_v36, %v20008_v23  ;;  %v3905_v41 = vcombine.high %v3894_v37, %v3894_v37  ;;  %v3912_v16 = vrot.slane %v3894_v37, %v20008_v23 }
0x1bd9   :  { %v3936_v47 = vrot.slane %v3922_v34, %v20008_v23  ;;  %v3937_v42 = vcombine.high %v3929_v35, %v3929_v35  ;;  %v20114_v43 = vadd.f32 %v20103_v33, %v3929_v35  ;;  %v3800_v6 = vrot.slane %v3786_v53, %v20008_v23 }
0x1bda   :  { %v3783_v44 = vrot.slane %v3769_v39, %v20008_v23  ;;  %v3784_v46 = vcombine.high %v3776_v40, %v3776_v40  ;;  %v3815_v56 = vadd.f32 %v20110_v48, %v3776_v40  ;;  %v3919_v62 = vrot.slane %v3905_v41, %v20008_v23 }
0x1bdb   :  { %v3938_v51 = vcombine.high %v3936_v47, %v3936_v47  ;;  %v20124_v54 = vadd.f32 %v20103_v33, %v3937_v42  ;;  %v20127_v55 = vadd.f32 %v20103_v33, %v3936_v47  ;;  %v3801_v7 = vcombine.high %v3793_v57, %v3793_v57 }
0x1bdc   :  { %v3785_v59 = vcombine.high %v3783_v44, %v3783_v44  ;;  %v3816_v60 = vadd.f32 %v20110_v48, %v3784_v46  ;;  %17975 = vmatpush3.xpose.msk.msra.mxu1 %vm384_vm3, %v3815_v56  ;;  %v3817_v3 = vadd.f32 %v20110_v48, %v3783_v44  ;;  %v3921_v4 = vcombine.high %v3919_v62, %v3919_v62 }
0x1bdd   :  { %v20132_v58 = vadd.f32 %v20103_v33, %v3938_v51  ;;  %17984 = vmatprep.subr.mxu1 %v19514_v22  ;;  %v20144_v5 = vadd.f32 %v20103_v33, %v3919_v62  ;;  %v3819_v13 = vadd.f32 %v20110_v48, %v3793_v57  ;;  %v3802_v14 = vcombine.high %v3800_v6, %v3800_v6 }
0x1bde   :  { %17980 = vmatpush3.xpose.msk.msra.mxu0 %vm384_vm3, %v3816_v60  ;;  %v3818_v8 = vadd.f32 %v20110_v48, %v3785_v59  ;;  %v20151_v9 = vadd.f32 %v20103_v33, %v3921_v4  ;;  %v3820_v15 = vadd.f32 %v20110_v48, %v3801_v7  ;;  %v3821_v25 = vadd.f32 %v20110_v48, %v3800_v6 }
0x1bdf   :  { %17989 = vmatprep.subr.mxu0 %v19514_v22  ;;  %17977 = vmatmul.mubr.msk.f32.vlgmr.msra.gmra.mrb[40].mxu1 %vm384_vm3, %v3641_v1  ;;  %v3822_v27 = vadd.f32 %v20110_v48, %v3802_v14  ;;  %v3920_v28 = vcombine.high %v3912_v16, %v3912_v16  ;;  %v3647_v29 = vadd.f32 %v20121_v52, %v3626_v10 }
0x1be0   :  { %17985 = vmatpush3.xpose.msk.msra.mxu1 %vm384_vm3, %v3817_v3  ;;  %17986 = vmatprep.mubr.msk.f32.mxu1 %vm19515_vm2, %v19514_v22  ;;  %v3648_v30 = vadd.f32 %v20121_v52, %v3628_v21  ;;  %v3951_v31 = vadd.f32 %v20103_v33, %v3912_v16 }
0x1be1   :  { %17982 = vmatmul.mubr.msk.f32.vlgmr.msra.gmra.mrb[38].mxu0 %vm384_vm3, %v3642_v2  ;;  %17994 = vmatprep.subr.mxu1 %v19514_v22  ;;  %v3952_v32 = vadd.f32 %v20103_v33, %v3920_v28 }
0x1be2   :  { %17990 = vmatpush3.xpose.msk.msra.mxu0 %vm384_vm3, %v3818_v8  ;;  %17991 = vmatprep.mubr.msk.f32.mxu0 %vm19515_vm2, %v19514_v22 }
0x1be3   :  { %17987 = vmatmul.mubr.msk.f32.vlgmr.msra.gmra.mrb[42].mxu1 %vm384_vm3, %v3643_v11  ;;  %17999 = vmatprep.subr.mxu0 %v19514_v22 }
0x1be4   :  { %17995 = vmatpush3.xpose.msk.msra.mxu1 %vm384_vm3, %v3819_v13  ;;  %17996 = vmatprep.mubr.msk.f32.mxu1 %vm19515_vm2, %v19514_v22 }
0x1be5   :  { %17992 = vmatmul.mubr.msk.f32.vlgmr.msra.gmra.mrb[40].mxu0 %vm384_vm3, %v3644_v20  ;;  %18004 = vmatprep.subr.mxu1 %v19514_v22 }
0x1be6   :  { %18000 = vmatpush3.xpose.msk.msra.mxu0 %vm384_vm3, %v3820_v15  ;;  %18001 = vmatprep.mubr.msk.f32.mxu0 %vm19515_vm2, %v19514_v22 }
0x1be7   :  { %17997 = vmatmul.mubr.msk.f32.vlgmr.msra.gmra.mrb[44].mxu1 %vm384_vm3, %v3645_v17  ;;  %18009 = vmatprep.subr.mxu0 %v19514_v22 }
0x1be8   :  { %18005 = vmatpush3.xpose.msk.msra.mxu1 %vm384_vm3, %v3821_v25  ;;  %18006 = vmatprep.mubr.msk.f32.mxu1 %vm19515_vm2, %v19514_v22 }
0x1be9   :  { %18002 = vmatmul.mubr.msk.f32.vlgmr.msra.gmra.mrb[42].mxu0 %vm384_vm3, %v3646_v24  ;;  %18014 = vmatprep.subr.mxu1 %v19514_v22 }
0x1bea   :  { %18010 = vmatpush3.xpose.msk.msra.mxu0 %vm384_vm3, %v3822_v27  ;;  %18011 = vmatprep.mubr.msk.f32.mxu0 %vm19515_vm2, %v19514_v22 }
0x1beb   :  { %18007 = vmatmul.mubr.msk.f32.vlgmr.msra.gmra.mrb[46].mxu1 %vm384_vm3, %v3647_v29  ;;  %18019 = vmatprep.subr.mxu0 %v19514_v22 }
0x1bec   :  { %18015 = vmatpush3.msk.msra.mxu1 %vm4668_vm12, %v3951_v31  ;;  %18016 = vmatprep.mubr.msk.f32.mxu1 %vm19515_vm2, %v19514_v22 }
0x1bed   :  { %18012 = vmatmul.mubr.msk.f32.vlgmr.msra.gmra.mrb[44].mxu0 %vm384_vm3, %v3648_v30  ;;  %18024 = vmatprep.subr.mxu1 %v19514_v22 }
0x1bee   :  { %18020 = vmatpush3.msk.msra.mxu0 %vm4668_vm12, %v3952_v32  ;;  %18021 = vmatprep.mubr.msk.f32.mxu0 %vm19515_vm2, %v19514_v22 }
0x1bef   :  { %18029 = vmatprep.subr.mxu0 %v19514_v22 }
0x1cb2   :  { %v4031_v33 = vpop.f32.mrb[40].mxu1 }
0x1cb3   :  { %v4567_v34 = vmul.f32 0.35355338, %v4031_v33  ;;  %v17978_v35 = vpop.f32.mrb[41].mxu1 }
0x1cb4   :  { %v4107_v36 = vpop.f32.mrb[38].mxu0 }
0x1cb5   :  { %v4568_v37 = vmul.f32 0.35355338, %v4107_v36  ;;  %v17983_v39 = vpop.f32.mrb[39].mxu0  ;;  %v4576_v40 = vsel %vm4575_vm13, %v4567_v34, -inf }
0x1cb6   :  { %4577 = vmax.xlane.f32.xlu0 %v4576_v40  ;;  %v4183_v48 = vpop.f32.mrb[42].mxu1 }
0x1cb7   :  { %v4579_v47 = vsel %vm4575_vm13, %v4568_v37, -inf  ;;  %v4569_v41 = vmul.f32 0.35355338, %v4183_v48  ;;  %v17988_v42 = vpop.f32.mrb[43].mxu1 }
0x1cb8   :  { %4580 = vmax.xlane.f32.xlu1 %v4579_v47  ;;  %v4259_v44 = vpop.f32.mrb[40].mxu0 }
0x1cb9   :  { %v4570_v46 = vmul.f32 0.35355338, %v4259_v44  ;;  %v17993_v49 = vpop.f32.mrb[41].mxu0  ;;  %v4582_v50 = vsel %vm4575_vm13, %v4569_v41, -inf }
0x1cba   :  { %4583 = vmax.xlane.f32.xlu0 %v4582_v50  ;;  %v4335_v51 = vpop.f32.mrb[44].mxu1 }
0x1cbb   :  { %v4585_v52 = vsel %vm4575_vm13, %v4570_v46, -inf  ;;  %v4571_v53 = vmul.f32 0.35355338, %v4335_v51  ;;  %v17998_v56 = vpop.f32.mrb[45].mxu1 }
0x1cbc   :  { %4586 = vmax.xlane.f32.xlu1 %v4585_v52  ;;  %v4411_v57 = vpop.f32.mrb[42].mxu0 }
0x1cbd   :  { %v4572_v59 = vmul.f32 0.35355338, %v4411_v57  ;;  %v18003_v60 = vpop.f32.mrb[43].mxu0  ;;  %v4588_v61 = vsel %vm4575_vm13, %v4571_v53, -inf }
0x1cbe   :  { %4589 = vmax.xlane.f32.xlu0 %v4588_v61  ;;  %v4487_v62 = vpop.f32.mrb[46].mxu1 }
0x1cbf   :  { %v4591_v63 = vsel %vm4575_vm13, %v4572_v59, -inf  ;;  %v4573_v0 = vmul.f32 0.35355338, %v4487_v62  ;;  %v18008_v1 = vpop.f32.mrb[47].mxu1 }
0x1cc0   :  { %4592 = vmax.xlane.f32.xlu1 %v4591_v63  ;;  %v4563_v2 = vpop.f32.mrb[44].mxu0 }
0x1cc1   :  { %v4574_v3 = vmul.f32 0.35355338, %v4563_v2  ;;  %v18013_v4 = vpop.f32.mrb[45].mxu0  ;;  %v4594_v6 = vsel %vm4575_vm13, %v4573_v0, -inf }
0x1cc2   :  { %4595 = vmax.xlane.f32.xlu0 %v4594_v6 }
0x1cc3   :  { %v4597_v7 = vsel %vm4575_vm13, %v4574_v3, -inf }
0x1cc4   :  { %4598 = vmax.xlane.f32.xlu1 %v4597_v7 }
0x1d43   :  { %v4578_v8 = vpop.xlane.xlu0 %4577 }
0x1d44   :  { %v4600_v10 = vsub.f32 %v4567_v34, %v4578_v8 }
0x1d45   :  { %v4581_v11 = vpop.xlane.xlu1 %4580 }
0x1d46   :  { %v4601_v12 = vsub.f32 %v4568_v37, %v4581_v11  ;;  %v4608_v20 = vmul.f32 1.442695, %v4600_v10 }
0x1d47   :  { %v4584_v14 = vpop.xlane.xlu0 %4583 }
0x1d48   :  { %v4610_v13 = vmul.f32 1.442695, %v4601_v12  ;;  %19312 = vpow2.f32 %v4608_v20  ;;  %v4602_v15 = vsub.f32 %v4569_v41, %v4584_v14 }
0x1d49   :  { %v4587_v16 = vpop.xlane.xlu1 %4586 }
0x1d4a   :  { %19314 = vpow2.f32 %v4610_v13  ;;  %v4603_v17 = vsub.f32 %v4570_v46, %v4587_v16  ;;  %v4612_v21 = vmul.f32 1.442695, %v4602_v15 }
0x1d4b   :  { %v4590_v25 = vpop.xlane.xlu0 %4589 }
0x1d4c   :  { %v4614_v24 = vmul.f32 1.442695, %v4603_v17  ;;  %19316 = vpow2.f32 %v4612_v21  ;;  %v4604_v27 = vsub.f32 %v4571_v53, %v4590_v25 }
0x1d4d   :  { %v4593_v28 = vpop.xlane.xlu1 %4592 }
0x1d4e   :  { %19318 = vpow2.f32 %v4614_v24  ;;  %v4605_v29 = vsub.f32 %v4572_v59, %v4593_v28  ;;  %v4616_v30 = vmul.f32 1.442695, %v4604_v27 }
0x1d4f   :  { %v4596_v32 = vpop.xlane.xlu0 %4595 }
0x1d50   :  { %v4618_v31 = vmul.f32 1.442695, %v4605_v29  ;;  %19320 = vpow2.f32 %v4616_v30  ;;  %v4606_v33 = vsub.f32 %v4573_v0, %v4596_v32  ;;  %v5714_v30 = vld [vmem:[%s21887_s3 + $0x5b8] sm:$0xff] }
0x1d51   :  { %v4599_v34 = vpop.xlane.xlu1 %4598 }
0x1d52   :  { %19322 = vpow2.f32 %v4618_v31  ;;  %v4607_v35 = vsub.f32 %v4574_v3, %v4599_v34  ;;  %v19313_v36 = vpop.eup %19312  ;;  %v4620_v37 = vmul.f32 1.442695, %v4606_v33  ;;  %v5715_v31 = vld [vmem:[%s21887_s3 + $0x5c0] sm:$0xff]  ;;  %v5576_v34 = vld [vmem:[%s21887_s3 + $0x588] sm:$0xff] }
0x1d53   :  { %v4624_v48 = vsel %vm4575_vm13, %v19313_v36, 0.0  ;;  %v19014_v32 = vpack.c.bf16 %v5715_v31, %v5714_v30  ;;  %v5274_v33 = vld [vmem:[%s21887_s3 + $0x560] sm:$0xff] }
0x1d54   :  { %v19315_v39 = vpop.eup %19314  ;;  %v4622_v40 = vmul.f32 1.442695, %v4607_v35  ;;  %19324 = vpow2.f32 %v4620_v37  ;;  %4625 = vadd.xlane.f32.xlu0 %v4624_v48  ;;  %v5577_v35 = vld [vmem:[%s21887_s3 + $0x590] sm:$0xff] }
0x1d55   :  { %v4627_v47 = vsel %vm4575_vm13, %v19315_v39, 0.0 }
0x1d56   :  { %19326 = vpow2.f32 %v4622_v40  ;;  %4628 = vadd.xlane.f32.xlu1 %v4627_v47  ;;  %v19317_v41 = vpop.eup %19316 }
0x1d57   :  { %v4630_v44 = vsel %vm4575_vm13, %v19317_v41, 0.0 }
0x1d58   :  { %v19319_v42 = vpop.eup %19318  ;;  %4631 = vadd.xlane.f32.xlu0 %v4630_v44 }
0x1d59   :  { %v4633_v46 = vsel %vm4575_vm13, %v19319_v42, 0.0 }
0x1d5a   :  { %4634 = vadd.xlane.f32.xlu1 %v4633_v46  ;;  %v19321_v49 = vpop.eup %19320 }
0x1d5b   :  { %v4636_v51 = vsel %vm4575_vm13, %v19321_v49, 0.0 }
0x1d5c   :  { %v19323_v50 = vpop.eup %19322  ;;  %4637 = vadd.xlane.f32.xlu0 %v4636_v51 }
0x1d5d   :  { %v4639_v52 = vsel %vm4575_vm13, %v19323_v50, 0.0 }
0x1d5e   :  { %4640 = vadd.xlane.f32.xlu1 %v4639_v52  ;;  %v19325_v53 = vpop.eup %19324 }
0x1d5f   :  { %v4642_v57 = vsel %vm4575_vm13, %v19325_v53, 0.0 }
0x1d60   :  { %v20220_v56 = vpop.eup %19326  ;;  %4643 = vadd.xlane.f32.xlu0 %v4642_v57 }
0x1d61   :  { %v4645_v59 = vsel %vm4575_vm13, %v20220_v56, 0.0 }
0x1d62   :  { %4646 = vadd.xlane.f32.xlu1 %v4645_v59 }
0x1de1   :  { %v4626_v60 = vpop.xlane.xlu0 %4625 }
0x1de2   :  { %19328 = vrcp.f32 %v4626_v60 }
0x1de3   :  { %v4629_v61 = vpop.xlane.xlu1 %4628 }
0x1de4   :  { %19330 = vrcp.f32 %v4629_v61 }
0x1de5   :  { %v4632_v62 = vpop.xlane.xlu0 %4631 }
0x1de6   :  { %19332 = vrcp.f32 %v4632_v62 }
0x1de7   :  { %v4635_v63 = vpop.xlane.xlu1 %4634 }
0x1de8   :  { %19334 = vrcp.f32 %v4635_v63 }
0x1de9   :  { %v4638_v0 = vpop.xlane.xlu0 %4637 }
0x1dea   :  { %19336 = vrcp.f32 %v4638_v0 }
0x1deb   :  { %v4641_v1 = vpop.xlane.xlu1 %4640 }
0x1dec   :  { %19338 = vrcp.f32 %v4641_v1  ;;  %v19329_v2 = vpop.eup %19328 }
0x1ded   :  { %v4656_v4 = vmul.f32 %v19329_v2, %v19313_v36  ;;  %v4644_v6 = vpop.xlane.xlu0 %4643  ;;  %v19002_v36 = vpack.c.bf16 %v5577_v35, %v5576_v34  ;;  %v5578_v2 = vld [vmem:[%s21887_s3 + $0x598] sm:$0xff]  ;;  %v20366_v35 = vld [vmem:[%s21889_s4 + $0x48] ss:$0 sm:$0xff] }
0x1dee   :  { %v19331_v3 = vpop.eup %19330  ;;  %19340 = vrcp.f32 %v4644_v6 }
0x1def   :  { %v4657_v7 = vmul.f32 %v19331_v3, %v19315_v39  ;;  %v4647_v8 = vpop.xlane.xlu1 %4646  ;;  %18017 = vmatmul.mubr.msk.f32.vlgmr.msra.gmra.mrb[48].mxu1 %vm4664_vm14, %v4656_v4  ;;  %v5579_v3 = vld [vmem:[%s21887_s3 + $0x5a0] sm:$0xff] }
0x1df0   :  { %19342 = vrcp.f32 %v4647_v8  ;;  %v19333_v10 = vpop.eup %19332  ;;  %18025 = vmatpush3.msk.msra.mxu1 %vm4668_vm12, %v20144_v5  ;;  %18026 = vmatprep.mubr.msk.f32.mxu1 %vm19515_vm2, %v19514_v22  ;;  %v5440_v5 = vld [vmem:[%s21887_s3 + $0x568] sm:$0xff]  ;;  %v19006_v8 = vpack.c.bf16 %v5579_v3, %v5578_v2 }
0x1df1   :  { %18022 = vmatmul.mubr.msk.f32.vlgmr.msra.gmra.mrb[46].mxu0 %vm4664_vm14, %v4657_v7  ;;  %v4658_v12 = vmul.f32 %v19333_v10, %v19317_v41  ;;  %18034 = vmatprep.subr.mxu1 %v19514_v22 }
0x1df2   :  { %v19335_v11 = vpop.eup %19334  ;;  %18030 = vmatpush3.msk.msra.mxu0 %vm4668_vm12, %v20151_v9  ;;  %18031 = vmatprep.mubr.msk.f32.mxu0 %vm19515_vm2, %v19514_v22  ;;  %v5441_v9 = vld [vmem:[%s21887_s3 + $0x570] sm:$0xff] }
0x1df3   :  { %v4659_v20 = vmul.f32 %v19335_v11, %v19319_v42  ;;  %18027 = vmatmul.mubr.msk.f32.vlgmr.msra.gmra.mrb[50].mxu1 %vm4664_vm14, %v4658_v12  ;;  %18039 = vmatprep.subr.mxu0 %v19514_v22  ;;  %v18994_v17 = vpack.c.bf16 %v5441_v9, %v5440_v5  ;;  %v20328_v12 = vld [vmem:[%s21889_s4 + $0x4a] ss:$0 sm:$0xff] }
0x1df4   :  { %v19337_v13 = vpop.eup %19336  ;;  %18035 = vmatpush3.msk.msra.mxu1 %vm4668_vm12, %v20114_v43  ;;  %18036 = vmatprep.mubr.msk.f32.mxu1 %vm19515_vm2, %v19514_v22  ;;  %v5442_v43 = vld [vmem:[%s21887_s3 + $0x578] sm:$0xff] }
0x1df5   :  { %18032 = vmatmul.mubr.msk.f32.vlgmr.msra.gmra.mrb[48].mxu0 %vm4664_vm14, %v4659_v20  ;;  %v4660_v15 = vmul.f32 %v19337_v13, %v19321_v49  ;;  %18044 = vmatprep.subr.mxu1 %v19514_v22 }
0x1df6   :  { %v19339_v14 = vpop.eup %19338  ;;  %18040 = vmatpush3.msk.msra.mxu0 %vm4668_vm12, %v20124_v54  ;;  %18041 = vmatprep.mubr.msk.f32.mxu0 %vm19515_vm2, %v19514_v22  ;;  %v5443_v54 = vld [vmem:[%s21887_s3 + $0x580] sm:$0xff] }
0x1df7   :  { %v4661_v16 = vmul.f32 %v19339_v14, %v19323_v50  ;;  %18037 = vmatmul.mubr.msk.f32.vlgmr.msra.gmra.mrb[52].mxu1 %vm4664_vm14, %v4660_v15  ;;  %18049 = vmatprep.subr.mxu0 %v19514_v22  ;;  %v18998_v28 = vpack.c.bf16 %v5443_v54, %v5442_v43 }
0x1df8   :  { %v19341_v21 = vpop.eup %19340  ;;  %18045 = vmatpush3.msk.msra.mxu1 %vm4668_vm12, %v20127_v55  ;;  %18046 = vmatprep.mubr.msk.f32.mxu1 %vm19515_vm2, %v19514_v22  ;;  %v5712_v55 = vld [vmem:[%s21887_s3 + $0x5a8] sm:$0xff] }
0x1df9   :  { %18042 = vmatmul.mubr.msk.f32.vlgmr.msra.gmra.mrb[50].mxu0 %vm4664_vm14, %v4661_v16  ;;  %v4662_v25 = vmul.f32 %v19341_v21, %v19325_v53  ;;  %18054 = vmatprep.subr.mxu1 %v5274_v33 }
0x1dfa   :  { %v19343_v24 = vpop.eup %19342  ;;  %18050 = vmatpush3.msk.msra.mxu0 %vm4668_vm12, %v20132_v58  ;;  %18051 = vmatprep.mubr.msk.f32.mxu0 %vm19515_vm2, %v19514_v22  ;;  %v5713_v58 = vld [vmem:[%s21887_s3 + $0x5b0] sm:$0xff] }
0x1dfb   :  { %v4663_v27 = vmul.f32 %v19343_v24, %v20220_v56  ;;  %18995 = vmatprep.subr.bf16.mxu0 %v18994_v17  ;;  %18047 = vmatmul.mubr.msk.f32.vlgmr.msra.gmra.mrb[54].mxu1 %vm4664_vm14, %v4662_v25  ;;  %v19010_v29 = vpack.c.bf16 %v5713_v58, %v5712_v55 }
0x1dfc   :  { %18055 = vmatpush3.msra.mxu1 %v5274_v33  ;;  %v20361_v33 = vld [vmem:[%s21889_s4 + $0x49] ss:$0 sm:$0xff] }
0x1dfd   :  { %18052 = vmatmul.mubr.msk.f32.vlgmr.msra.gmra.mrb[52].mxu0 %vm4664_vm14, %v4663_v27  ;;  %19003 = vmatprep.subr.bf16.mxu1 %v19002_v36 }
0x1dfe   :  { %18997 = vmatpush3.bf16.msra.mxu0 %v18994_v17  ;;  %18067 = vmatprep.mubr.msk.f32.mxu0 %vm37_vm0, %v20034_v38 }
0x1dff   :  { %18999 = vmatprep.subr.bf16.mxu0 %v18998_v28 }
0x1e02   :  { %19001 = vmatpush3.bf16.msra.mxu0 %v18998_v28 }
0x1e03   :  { %19011 = vmatprep.subr.bf16.mxu0 %v19010_v29 }
0x1e05   :  { %18068 = vmatmul.mubr.msk.f32.vlgmr.msra.gmra.mrb[54].mxu0 %vm37_vm0, %v20054_v45 }
0x1e06   :  { %19013 = vmatpush3.bf16.msra.mxu0 %v19010_v29  ;;  %18089 = vmatprep.mubr.msk.f32.mxu0 %vm37_vm0, %v20080_v18 }
0x1e07   :  { %19015 = vmatprep.subr.bf16.mxu0 %v19014_v32 }
0x1e0a   :  { %19017 = vmatpush3.bf16.msra.mxu0 %v19014_v32 }
0x1e0b   :  { %18102 = vmatprep.subr.mxu0 %v19514_v22 }
0x1e0d   :  { %18090 = vmatmul.mubr.msk.f32.vlgmr.msra.gmra.mrb[56].mxu0 %vm37_vm0, %v20089_v26 }
0x1e0e   :  { %18104 = vmatprep.mubr.msk.f32.mxu0 %vm19515_vm2, %v19514_v22 }
0x1ec2   :  { %v4738_v37 = vpop.f32.mrb[48].mxu1 }
0x1ec3   :  { %v18018_v39 = vpop.f32.mrb[49].mxu1 }
0x1ec4   :  { %v4814_v40 = vpop.f32.mrb[46].mxu0 }
0x1ec5   :  { %v5283_v48 = vcombine.low %v4738_v37, %v4814_v40  ;;  %v18023_v47 = vpop.f32.mrb[47].mxu0 }
0x1ec6   :  { %v4890_v41 = vpop.f32.mrb[50].mxu1 }
0x1ec7   :  { %v18028_v42 = vpop.f32.mrb[51].mxu1  ;;  %v5291_v50 = vrot.slane %v5283_v48, %v20008_v23 }
0x1ec8   :  { %v4966_v44 = vpop.f32.mrb[48].mxu0 }
0x1ec9   :  { %v5284_v46 = vcombine.low %v4890_v41, %v4966_v44  ;;  %v18033_v49 = vpop.f32.mrb[49].mxu0 }
0x1eca   :  { %v5042_v52 = vpop.f32.mrb[52].mxu1 }
0x1ecb   :  { %v5298_v51 = vrot.slane %v5284_v46, %v20008_v23  ;;  %v18038_v53 = vpop.f32.mrb[53].mxu1 }
0x1ecc   :  { %v5118_v56 = vpop.f32.mrb[50].mxu0 }
0x1ecd   :  { %v5299_v57 = vcombine.low %v5291_v50, %v5298_v51  ;;  %v5300_v59 = vcombine.low %v5042_v52, %v5118_v56  ;;  %v18043_v60 = vpop.f32.mrb[51].mxu0 }
0x1ece   :  { %v5194_v61 = vpop.f32.mrb[54].mxu1 }
0x1ecf   :  { %18056 = vmatprep.mubr.msk.f32.mxu1 %vm384_vm3, %v5299_v57  ;;  %v18048_v62 = vpop.f32.mrb[55].mxu1  ;;  %v5308_v4 = vrot.slane %v5300_v59, %v20008_v23 }
0x1ed0   :  { %v5270_v63 = vpop.f32.mrb[52].mxu0 }
0x1ed1   :  { %v5301_v0 = vcombine.low %v5194_v61, %v5270_v63  ;;  %v18053_v1 = vpop.f32.mrb[53].mxu0 }
0x1ed3   :  { %v5315_v6 = vrot.slane %v5301_v0, %v20008_v23 }
0x1ed5   :  { %v5316_v7 = vcombine.low %v5308_v4, %v5315_v6 }
0x1ed7   :  { %18057 = vmatmul.mubr.msk.f32.vlgmr.msra.gmra.mrb[56].mxu1 %vm384_vm3, %v5316_v7 }
0x1ed8   :  { %19005 = vmatpush3.bf16.msra.mxu1 %v19002_v36  ;;  %18078 = vmatprep.mubr.msk.f32.mxu1 %vm37_vm0, %v20080_v18  ;;  %v20320_v10 = vpop.f32.mrb[54].mxu0 }
0x1ed9   :  { %19007 = vmatprep.subr.bf16.mxu1 %v19006_v8  ;;  %v5511_v11 = vpop.f32.mrb[55].mxu0  ;;  %v5539_v53 = vcombine.high %v20320_v10, %v20320_v10  ;;  %v5546_v56 = vrot.slane %v20320_v10, %v20008_v23 }
0x1eda   :  { %v5522_v30 = vcombine.high %v5511_v11, %v5511_v11  ;;  %v5529_v32 = vrot.slane %v5511_v11, %v20008_v23 }
0x1edb   :  { %v5553_v0 = vrot.slane %v5539_v53, %v20008_v23  ;;  %v5572_v1 = vadd.f32 %v20366_v35, %v5546_v56  ;;  %v5554_v4 = vcombine.high %v5546_v56, %v5546_v56 }
0x1edc   :  { %19009 = vmatpush3.bf16.msra.mxu1 %v19006_v8  ;;  %v5536_v39 = vrot.slane %v5522_v30, %v20008_v23  ;;  %v5568_v41 = vadd.f32 %v20366_v35, %v5529_v32  ;;  %v5537_v49 = vcombine.high %v5529_v32, %v5529_v32 }
0x1edd   :  { %18092 = vmatprep.subr.mxu1 %v19514_v22  ;;  %v5574_v10 = vadd.f32 %v20366_v35, %v5553_v0 }
0x1ede   :  { %v5570_v50 = vadd.f32 %v20366_v35, %v5536_v39  ;;  %v5538_v60 = vcombine.high %v5536_v39, %v5536_v39  ;;  %v5569_v61 = vadd.f32 %v20366_v35, %v5537_v49 }
0x1edf   :  { %18079 = vmatmul.mubr.msk.f32.vlgmr.msra.gmra.mrb[58].mxu1 %vm37_vm0, %v20089_v26 }
0x1ee0   :  { %v18091_v20 = vpop.f32.mrb[56].mxu0  ;;  %18094 = vmatprep.mubr.msk.f32.mxu1 %vm19515_vm2, %v19514_v22  ;;  %v5571_v6 = vadd.f32 %v20366_v35, %v5538_v60 }
0x1ee1   :  { %v5811_v5 = vcombine.high %v18091_v20, %v18091_v20  ;;  %v5818_v9 = vrot.slane %v18091_v20, %v20008_v23  ;;  %v5783_v13 = vpop.f32.mrb[57].mxu0  ;;  %v5555_v20 = vcombine.high %v5553_v0, %v5553_v0 }
0x1ee2   :  { %v5794_v14 = vcombine.high %v5783_v13, %v5783_v13  ;;  %v5801_v2 = vrot.slane %v5783_v13, %v20008_v23 }
0x1ee3   :  { %v5825_v15 = vrot.slane %v5811_v5, %v20008_v23  ;;  %v5826_v16 = vcombine.high %v5818_v9, %v5818_v9  ;;  %v20335_v17 = vadd.f32 %v20328_v12, %v5818_v9  ;;  %v5573_v5 = vadd.f32 %v20366_v35, %v5554_v4 }
0x1ee4   :  { %v5808_v43 = vrot.slane %v5794_v14, %v20008_v23  ;;  %v5840_v11 = vadd.f32 %v20328_v12, %v5801_v2  ;;  %v5809_v9 = vcombine.high %v5801_v2, %v5801_v2  ;;  %v5575_v14 = vadd.f32 %v20366_v35, %v5555_v20 }
0x1ee5   :  { %v5827_v54 = vcombine.high %v5825_v15, %v5825_v15  ;;  %v20339_v21 = vadd.f32 %v20328_v12, %v5826_v16  ;;  %v20342_v24 = vadd.f32 %v20328_v12, %v5825_v15 }
0x1ee6   :  { %v5810_v25 = vcombine.high %v5808_v43, %v5808_v43  ;;  %v20345_v27 = vadd.f32 %v20328_v12, %v5808_v43  ;;  %v5841_v15 = vadd.f32 %v20328_v12, %v5809_v9 }
0x1ee7   :  { %v20348_v28 = vadd.f32 %v20328_v12, %v5827_v54 }
0x1ee8   :  { %v20351_v55 = vadd.f32 %v20328_v12, %v5810_v25 }
0x1faa   :  { %v20353_v58 = vpop.f32.mrb[56].mxu1 }
0x1fab   :  { %v20355_v29 = vpop.f32.mrb[57].mxu1 }
0x1fb2   :  { %v18080_v31 = vpop.f32.mrb[58].mxu1 }
0x1fb3   :  { %v5647_v34 = vpop.f32.mrb[59].mxu1  ;;  %v5675_v42 = vcombine.high %v18080_v31, %v18080_v31  ;;  %v5682_v44 = vrot.slane %v18080_v31, %v20008_v23 }
0x1fb4   :  { %v5658_v36 = vcombine.high %v5647_v34, %v5647_v34  ;;  %v5665_v37 = vrot.slane %v5647_v34, %v20008_v23 }
0x1fb5   :  { %v5689_v57 = vrot.slane %v5675_v42, %v20008_v23  ;;  %v5708_v59 = vadd.f32 %v20361_v33, %v5682_v44  ;;  %v5690_v62 = vcombine.high %v5682_v44, %v5682_v44 }
0x1fb6   :  { %v5672_v40 = vrot.slane %v5658_v36, %v20008_v23  ;;  %v5673_v48 = vcombine.high %v5665_v37, %v5665_v37  ;;  %v5704_v47 = vadd.f32 %v20361_v33, %v5665_v37 }
0x1fb7   :  { %v5710_v3 = vadd.f32 %v20361_v33, %v5689_v57  ;;  %v5691_v7 = vcombine.high %v5689_v57, %v5689_v57  ;;  %v5709_v8 = vadd.f32 %v20361_v33, %v5690_v62 }
0x1fb8   :  { %v5706_v46 = vadd.f32 %v20361_v33, %v5672_v40  ;;  %18093 = vmatpush3.xpose.msk.msra.mxu1 %vm384_vm3, %v5704_v47  ;;  %v5674_v51 = vcombine.high %v5672_v40, %v5672_v40  ;;  %v5705_v52 = vadd.f32 %v20361_v33, %v5673_v48 }
0x1fb9   :  { %18097 = vmatprep.subr.mxu1 %v19514_v22  ;;  %v5711_v13 = vadd.f32 %v20361_v33, %v5691_v7 }
0x1fba   :  { %18103 = vmatpush3.xpose.msk.msra.mxu0 %vm384_vm3, %v5706_v46  ;;  %v5707_v63 = vadd.f32 %v20361_v33, %v5674_v51 }
0x1fbb   :  { %18095 = vmatmul.mubr.msk.f32.vlgmr.msra.gmra.mrb[60].mxu1 %vm384_vm3, %v5568_v41  ;;  %18112 = vmatprep.subr.mxu0 %v19514_v22 }
0x1fbc   :  { %18098 = vmatpush3.xpose.msk.msra.mxu1 %vm384_vm3, %v5705_v52  ;;  %18099 = vmatprep.mubr.msk.f32.mxu1 %vm19515_vm2, %v19514_v22 }
0x1fbd   :  { %18105 = vmatmul.mubr.msk.f32.vlgmr.msra.gmra.mrb[58].mxu0 %vm384_vm3, %v5570_v50  ;;  %18107 = vmatprep.subr.mxu1 %v19514_v22 }
0x1fbe   :  { %18113 = vmatpush3.xpose.msk.msra.mxu0 %vm384_vm3, %v5708_v59  ;;  %18114 = vmatprep.mubr.msk.f32.mxu0 %vm19515_vm2, %v19514_v22 }
0x1fbf   :  { %18100 = vmatmul.mubr.msk.f32.vlgmr.msra.gmra.mrb[62].mxu1 %vm384_vm3, %v5569_v61  ;;  %18122 = vmatprep.subr.mxu0 %v19514_v22 }
0x1fc0   :  { %18108 = vmatpush3.xpose.msk.msra.mxu1 %vm384_vm3, %v5707_v63  ;;  %18109 = vmatprep.mubr.msk.f32.mxu1 %vm19515_vm2, %v19514_v22 }
0x1fc1   :  { %18115 = vmatmul.mubr.msk.f32.vlgmr.msra.gmra.mrb[60].mxu0 %vm384_vm3, %v5572_v1  ;;  %18117 = vmatprep.subr.mxu1 %v19514_v22 }
0x1fc2   :  { %18123 = vmatpush3.xpose.msk.msra.mxu0 %vm384_vm3, %v5710_v3  ;;  %18124 = vmatprep.mubr.msk.f32.mxu0 %vm19515_vm2, %v19514_v22 }
0x1fc3   :  { %18110 = vmatmul.mubr.msk.f32.vlgmr.msra.gmra.mrb[64].mxu1 %vm384_vm3, %v5571_v6  ;;  %18132 = vmatprep.subr.mxu0 %v19514_v22 }
0x1fc4   :  { %18118 = vmatpush3.xpose.msk.msra.mxu1 %vm384_vm3, %v5709_v8  ;;  %18119 = vmatprep.mubr.msk.f32.mxu1 %vm19515_vm2, %v19514_v22 }
0x1fc5   :  { %18125 = vmatmul.mubr.msk.f32.vlgmr.msra.gmra.mrb[62].mxu0 %vm384_vm3, %v5574_v10  ;;  %18127 = vmatprep.subr.mxu1 %v19514_v22 }
0x1fc6   :  { %18133 = vmatpush3.msk.msra.mxu0 %vm4668_vm12, %v5840_v11  ;;  %18134 = vmatprep.mubr.msk.f32.mxu0 %vm19515_vm2, %v19514_v22 }
0x1fc7   :  { %18120 = vmatmul.mubr.msk.f32.vlgmr.msra.gmra.mrb[66].mxu1 %vm384_vm3, %v5573_v5  ;;  %18142 = vmatprep.subr.mxu0 %v19514_v22 }
0x1fc8   :  { %18128 = vmatpush3.xpose.msk.msra.mxu1 %vm384_vm3, %v5711_v13  ;;  %18129 = vmatprep.mubr.msk.f32.mxu1 %vm19515_vm2, %v19514_v22 }
0x1fc9   :  { %18137 = vmatprep.subr.mxu1 %v19514_v22 }
0x1fcb   :  { %18130 = vmatmul.mubr.msk.f32.vlgmr.msra.gmra.mrb[68].mxu1 %vm384_vm3, %v5575_v14 }
0x1fcc   :  { %18138 = vmatpush3.msk.msra.mxu1 %vm4668_vm12, %v5841_v15  ;;  %18139 = vmatprep.mubr.msk.f32.mxu1 %vm19515_vm2, %v19514_v22 }
0x1fcd   :  { %18147 = vmatprep.subr.mxu1 %v19514_v22 }
0x208e   :  { %v5920_v16 = vpop.f32.mrb[60].mxu1 }
0x208f   :  { %v6456_v43 = vmul.f32 0.35355338, %v5920_v16  ;;  %v18096_v54 = vpop.f32.mrb[61].mxu1 }
0x2090   :  { %v6072_v25 = vpop.f32.mrb[58].mxu0 }
0x2091   :  { %v6458_v30 = vmul.f32 0.35355338, %v6072_v25  ;;  %v18106_v31 = vpop.f32.mrb[59].mxu0  ;;  %v6464_v32 = vsel %vm4575_vm13, %v6456_v43, -inf }
0x2092   :  { %6465 = vmax.xlane.f32.xlu0 %v6464_v32  ;;  %v5996_v33 = vpop.f32.mrb[62].mxu1 }
0x2093   :  { %v6457_v12 = vmul.f32 0.35355338, %v5996_v33  ;;  %v18101_v34 = vpop.f32.mrb[63].mxu1  ;;  %v6470_v40 = vsel %vm4575_vm13, %v6458_v30, -inf }
0x2094   :  { %v6224_v35 = vpop.f32.mrb[60].mxu0 }
0x2095   :  { %v6460_v36 = vmul.f32 0.35355338, %v6224_v35  ;;  %v18116_v37 = vpop.f32.mrb[61].mxu0  ;;  %v6467_v39 = vsel %vm4575_vm13, %v6457_v12, -inf }
0x2096   :  { %6468 = vmax.xlane.f32.xlu1 %v6467_v39  ;;  %6471 = vmax.xlane.f32.xlu0 %v6470_v40  ;;  %v6148_v48 = vpop.f32.mrb[64].mxu1 }
0x2097   :  { %v6459_v47 = vmul.f32 0.35355338, %v6148_v48  ;;  %v18111_v41 = vpop.f32.mrb[65].mxu1  ;;  %v6476_v49 = vsel %vm4575_vm13, %v6460_v36, -inf }
0x2098   :  { %v6376_v42 = vpop.f32.mrb[62].mxu0 }
0x2099   :  { %v6462_v44 = vmul.f32 0.35355338, %v6376_v42  ;;  %v18126_v46 = vpop.f32.mrb[63].mxu0  ;;  %v6473_v50 = vsel %vm4575_vm13, %v6459_v47, -inf }
0x209a   :  { %6477 = vmax.xlane.f32.xlu0 %v6476_v49  ;;  %6474 = vmax.xlane.f32.xlu1 %v6473_v50  ;;  %v6300_v51 = vpop.f32.mrb[66].mxu1 }
0x209b   :  { %v6461_v52 = vmul.f32 0.35355338, %v6300_v51  ;;  %v18121_v53 = vpop.f32.mrb[67].mxu1  ;;  %v6482_v56 = vsel %vm4575_vm13, %v6462_v44, -inf }
0x209d   :  { %v6479_v57 = vsel %vm4575_vm13, %v6461_v52, -inf }
0x209e   :  { %6483 = vmax.xlane.f32.xlu0 %v6482_v56  ;;  %6480 = vmax.xlane.f32.xlu1 %v6479_v57  ;;  %v6452_v59 = vpop.f32.mrb[68].mxu1 }
0x209f   :  { %v6463_v60 = vmul.f32 0.35355338, %v6452_v59  ;;  %v18131_v61 = vpop.f32.mrb[69].mxu1 }
0x20a1   :  { %v6485_v62 = vsel %vm4575_vm13, %v6463_v60, -inf }
0x20a2   :  { %6486 = vmax.xlane.f32.xlu1 %v6485_v62 }
0x211f   :  { %v6466_v63 = vpop.xlane.xlu0 %6465 }
0x2120   :  { %v6488_v0 = vsub.f32 %v6456_v43, %v6466_v63 }
0x2122   :  { %v6496_v1 = vmul.f32 1.442695, %v6488_v0 }
0x2123   :  { %v6469_v2 = vpop.xlane.xlu1 %6468  ;;  %v6472_v3 = vpop.xlane.xlu0 %6471 }
0x2124   :  { %19344 = vpow2.f32 %v6496_v1  ;;  %v6489_v4 = vsub.f32 %v6457_v12, %v6469_v2  ;;  %v6490_v6 = vsub.f32 %v6458_v30, %v6472_v3 }
0x2126   :  { %v6498_v7 = vmul.f32 1.442695, %v6489_v4  ;;  %v6500_v8 = vmul.f32 1.442695, %v6490_v6 }
0x2127   :  { %v6478_v10 = vpop.xlane.xlu0 %6477  ;;  %v6475_v11 = vpop.xlane.xlu1 %6474 }
0x2128   :  { %19346 = vpow2.f32 %v6498_v7  ;;  %v6492_v20 = vsub.f32 %v6460_v36, %v6478_v10  ;;  %v6491_v5 = vsub.f32 %v6459_v47, %v6475_v11 }
0x2129   :  { %19348 = vpow2.f32 %v6500_v8 }
0x212a   :  { %v6504_v9 = vmul.f32 1.442695, %v6492_v20  ;;  %v6502_v13 = vmul.f32 1.442695, %v6491_v5 }
0x212b   :  { %v6484_v14 = vpop.xlane.xlu0 %6483  ;;  %v6481_v15 = vpop.xlane.xlu1 %6480 }
0x212c   :  { %19350 = vpow2.f32 %v6504_v9  ;;  %v6494_v16 = vsub.f32 %v6462_v44, %v6484_v14  ;;  %v6493_v43 = vsub.f32 %v6461_v52, %v6481_v15  ;;  %v7606_v15 = vld [vmem:[%s21887_s3 + $0x610] sm:$0xff] }
0x212d   :  { %19352 = vpow2.f32 %v6502_v13 }
0x212e   :  { %v19345_v54 = vpop.eup %19344  ;;  %v6508_v25 = vmul.f32 1.442695, %v6494_v16  ;;  %v6506_v31 = vmul.f32 1.442695, %v6493_v43  ;;  %v7607_v16 = vld [vmem:[%s21887_s3 + $0x618] sm:$0xff]  ;;  %v7608_v43 = vld [vmem:[%s21887_s3 + $0x620] sm:$0xff] }
0x212f   :  { %v6487_v30 = vpop.xlane.xlu1 %6486  ;;  %v6512_v32 = vsel %vm4575_vm13, %v19345_v54, 0.0 }
0x2130   :  { %19354 = vpow2.f32 %v6508_v25  ;;  %v6495_v33 = vsub.f32 %v6463_v60, %v6487_v30  ;;  %6513 = vadd.xlane.f32.xlu0 %v6512_v32  ;;  %v7470_v30 = vld [vmem:[%s21887_s3 + $0x5f0] sm:$0xff]  ;;  %v7471_v32 = vld [vmem:[%s21887_s3 + $0x5f8] sm:$0xff] }
0x2131   :  { %19356 = vpow2.f32 %v6506_v31  ;;  %v7160_v31 = vld [vmem:[%s21887_s3 + $0x5c8] sm:$0xff] }
0x2132   :  { %v19347_v12 = vpop.eup %19346  ;;  %v6510_v34 = vmul.f32 1.442695, %v6495_v33  ;;  %v19026_v33 = vpack.c.bf16 %v7471_v32, %v7470_v30 }
0x2133   :  { %v19349_v35 = vpop.eup %19348  ;;  %v6515_v36 = vsel %vm4575_vm13, %v19347_v12, 0.0 }
0x2134   :  { %19358 = vpow2.f32 %v6510_v34  ;;  %v6518_v37 = vsel %vm4575_vm13, %v19349_v35, 0.0  ;;  %6516 = vadd.xlane.f32.xlu1 %v6515_v36 }
0x2135   :  { %6519 = vadd.xlane.f32.xlu0 %v6518_v37 }
0x2136   :  { %v19351_v39 = vpop.eup %19350 }
0x2137   :  { %v19353_v40 = vpop.eup %19352  ;;  %v6524_v48 = vsel %vm4575_vm13, %v19351_v39, 0.0 }
0x2138   :  { %v6521_v47 = vsel %vm4575_vm13, %v19353_v40, 0.0 }
0x2139   :  { %6525 = vadd.xlane.f32.xlu0 %v6524_v48  ;;  %6522 = vadd.xlane.f32.xlu1 %v6521_v47 }
0x213a   :  { %v19355_v41 = vpop.eup %19354 }
0x213b   :  { %v19357_v42 = vpop.eup %19356  ;;  %v6530_v44 = vsel %vm4575_vm13, %v19355_v41, 0.0 }
0x213c   :  { %v6527_v46 = vsel %vm4575_vm13, %v19357_v42, 0.0 }
0x213d   :  { %6531 = vadd.xlane.f32.xlu0 %v6530_v44  ;;  %6528 = vadd.xlane.f32.xlu1 %v6527_v46 }
0x213e   :  { %v19359_v49 = vpop.eup %19358 }
0x213f   :  { %v6533_v50 = vsel %vm4575_vm13, %v19359_v49, 0.0 }
0x2141   :  { %6534 = vadd.xlane.f32.xlu1 %v6533_v50 }
0x21bd   :  { %v6514_v51 = vpop.xlane.xlu0 %6513 }
0x21be   :  { %19360 = vrcp.f32 %v6514_v51 }
0x21c1   :  { %v6517_v52 = vpop.xlane.xlu1 %6516 }
0x21c2   :  { %v6520_v53 = vpop.xlane.xlu0 %6519  ;;  %19362 = vrcp.f32 %v6517_v52 }
0x21c3   :  { %19364 = vrcp.f32 %v6520_v53 }
0x21c6   :  { %v6526_v56 = vpop.xlane.xlu0 %6525  ;;  %v6523_v57 = vpop.xlane.xlu1 %6522 }
0x21c7   :  { %19366 = vrcp.f32 %v6526_v56 }
0x21c8   :  { %v19361_v59 = vpop.eup %19360  ;;  %19368 = vrcp.f32 %v6523_v57 }
0x21c9   :  { %v6544_v60 = vmul.f32 %v19361_v59, %v19345_v54  ;;  %v7609_v54 = vld [vmem:[%s21887_s3 + $0x628] sm:$0xff] }
0x21ca   :  { %v6532_v61 = vpop.xlane.xlu0 %6531  ;;  %v6529_v62 = vpop.xlane.xlu1 %6528  ;;  %v19038_v25 = vpack.c.bf16 %v7609_v54, %v7608_v43  ;;  %v5415_v43 = vcombine.high %v20353_v58, %v20353_v58  ;;  %v5398_v54 = vcombine.high %v20355_v29, %v20355_v29 }
0x21cb   :  { %19370 = vrcp.f32 %v6532_v61  ;;  %18135 = vmatmul.mubr.msk.f32.vlgmr.msra.gmra.mrb[64].mxu0 %vm4664_vm14, %v6544_v60 }
0x21cc   :  { %v19363_v63 = vpop.eup %19362  ;;  %19372 = vrcp.f32 %v6529_v62  ;;  %18143 = vmatpush3.msk.msra.mxu0 %vm4668_vm12, %v20345_v27  ;;  %18144 = vmatprep.mubr.msk.f32.mxu0 %vm19515_vm2, %v19514_v22  ;;  %v7472_v62 = vld [vmem:[%s21887_s3 + $0x600] sm:$0xff]  ;;  %v5429_v32 = vrot.slane %v5415_v43, %v20008_v23 }
0x21cd   :  { %v19365_v0 = vpop.eup %19364  ;;  %v6545_v1 = vmul.f32 %v19363_v63, %v19347_v12  ;;  %18152 = vmatprep.subr.mxu0 %v19514_v22  ;;  %v7473_v63 = vld [vmem:[%s21887_s3 + $0x608] sm:$0xff] }
0x21ce   :  { %v6546_v2 = vmul.f32 %v19365_v0, %v19349_v35  ;;  %v6535_v3 = vpop.xlane.xlu1 %6534 }
0x21cf   :  { %19374 = vrcp.f32 %v6535_v3  ;;  %18140 = vmatmul.mubr.msk.f32.vlgmr.msra.gmra.mrb[70].mxu1 %vm4664_vm14, %v6545_v1  ;;  %v19030_v3 = vpack.c.bf16 %v7473_v63, %v7472_v62  ;;  %v20622_v63 = vld [vmem:[%s21889_s4 + $0x4c] ss:$0 sm:$0xff] }
0x21d0   :  { %18145 = vmatmul.mubr.msk.f32.vlgmr.msra.gmra.mrb[66].mxu0 %vm4664_vm14, %v6546_v2  ;;  %18148 = vmatpush3.msk.msra.mxu1 %vm4668_vm12, %v20351_v55  ;;  %v7334_v55 = vld [vmem:[%s21887_s3 + $0x5d0] sm:$0xff] }
0x21d1   :  { %v19367_v4 = vpop.eup %19366  ;;  %18153 = vmatpush3.msk.msra.mxu0 %vm4668_vm12, %v20335_v17  ;;  %18149 = vmatprep.mubr.msk.f32.mxu1 %vm19515_vm2, %v19514_v22  ;;  %v7335_v17 = vld [vmem:[%s21887_s3 + $0x5d8] sm:$0xff] }
0x21d2   :  { %v19369_v27 = vpop.eup %19368  ;;  %v6548_v6 = vmul.f32 %v19367_v4, %v19351_v39  ;;  %18154 = vmatprep.mubr.msk.f32.mxu0 %vm19515_vm2, %v19514_v22  ;;  %18157 = vmatprep.subr.mxu1 %v19514_v22  ;;  %v19018_v5 = vpack.c.bf16 %v7335_v17, %v7334_v55 }
0x21d3   :  { %v6547_v7 = vmul.f32 %v19369_v27, %v19353_v40  ;;  %18162 = vmatprep.subr.mxu0 %v19514_v22 }
0x21d4   :  { %18155 = vmatmul.mubr.msk.f32.vlgmr.msra.gmra.mrb[68].mxu0 %vm4664_vm14, %v6548_v6  ;;  %v20559_v6 = vld [vmem:[%s21889_s4 + $0x4d] ss:$0 sm:$0xff] }
0x21d5   :  { %v19371_v8 = vpop.eup %19370  ;;  %18150 = vmatmul.mubr.msk.f32.vlgmr.msra.gmra.mrb[72].mxu1 %vm4664_vm14, %v6547_v7  ;;  %18163 = vmatpush3.msk.msra.mxu0 %vm4668_vm12, %v20342_v24  ;;  %v7336_v24 = vld [vmem:[%s21887_s3 + $0x5e0] sm:$0xff] }
0x21d6   :  { %v19373_v10 = vpop.eup %19372  ;;  %v6550_v11 = vmul.f32 %v19371_v8, %v19355_v41  ;;  %18158 = vmatpush3.msk.msra.mxu1 %vm4668_vm12, %v20339_v21  ;;  %18159 = vmatprep.mubr.msk.f32.mxu1 %vm19515_vm2, %v19514_v22  ;;  %v7337_v21 = vld [vmem:[%s21887_s3 + $0x5e8] sm:$0xff] }
0x21d7   :  { %v6549_v20 = vmul.f32 %v19373_v10, %v19357_v42  ;;  %18164 = vmatprep.mubr.msk.f32.mxu0 %vm19515_vm2, %v19514_v22  ;;  %18167 = vmatprep.subr.mxu1 %v19514_v22  ;;  %v19022_v14 = vpack.c.bf16 %v7337_v21, %v7336_v24 }
0x21d8   :  { %18165 = vmatmul.mubr.msk.f32.vlgmr.msra.gmra.mrb[70].mxu0 %vm4664_vm14, %v6550_v11  ;;  %18172 = vmatprep.subr.mxu0 %v7160_v31 }
0x21d9   :  { %v19375_v9 = vpop.eup %19374  ;;  %18160 = vmatmul.mubr.msk.f32.vlgmr.msra.gmra.mrb[74].mxu1 %vm4664_vm14, %v6549_v20  ;;  %18173 = vmatpush3.msra.mxu0 %v7160_v31  ;;  %v5405_v31 = vrot.slane %v20355_v29, %v20008_v23 }
0x21da   :  { %v6551_v13 = vmul.f32 %v19375_v9, %v19359_v49  ;;  %18168 = vmatpush3.msk.msra.mxu1 %vm4668_vm12, %v20348_v28  ;;  %18169 = vmatprep.mubr.msk.f32.mxu1 %vm19515_vm2, %v19514_v22  ;;  %v19034_v28 = vpack.c.bf16 %v7607_v16, %v7606_v15 }
0x21db   :  { %19019 = vmatprep.subr.bf16.mxu1 %v19018_v5  ;;  %19027 = vmatprep.subr.bf16.mxu0 %v19026_v33 }
0x21dd   :  { %18170 = vmatmul.mubr.msk.f32.vlgmr.msra.gmra.mrb[76].mxu1 %vm4664_vm14, %v6551_v13 }
0x21de   :  { %19021 = vmatpush3.bf16.msra.mxu1 %v19018_v5  ;;  %18185 = vmatprep.mubr.msk.f32.mxu1 %vm37_vm0, %v20034_v38 }
0x21df   :  { %19023 = vmatprep.subr.bf16.mxu1 %v19022_v14 }
0x21e2   :  { %19025 = vmatpush3.bf16.msra.mxu1 %v19022_v14 }
0x21e3   :  { %19035 = vmatprep.subr.bf16.mxu1 %v19034_v28 }
0x21e5   :  { %18186 = vmatmul.mubr.msk.f32.vlgmr.msra.gmra.mrb[78].mxu1 %vm37_vm0, %v20054_v45 }
0x21e6   :  { %19037 = vmatpush3.bf16.msra.mxu1 %v19034_v28  ;;  %18207 = vmatprep.mubr.msk.f32.mxu1 %vm37_vm0, %v20080_v18 }
0x21e7   :  { %19039 = vmatprep.subr.bf16.mxu1 %v19038_v25 }
0x21ea   :  { %19041 = vmatpush3.bf16.msra.mxu1 %v19038_v25  ;;  %v5422_v25 = vrot.slane %v20353_v58, %v20008_v23 }
0x21eb   :  { %18220 = vmatprep.subr.mxu1 %v19514_v22 }
0x21ed   :  { %18208 = vmatmul.mubr.msk.f32.vlgmr.msra.gmra.mrb[80].mxu1 %vm37_vm0, %v20089_v26 }
0x21ee   :  { %18222 = vmatprep.mubr.msk.f32.mxu1 %vm19515_vm2, %v19514_v22 }
0x229e   :  { %v6624_v12 = vpop.f32.mrb[64].mxu0 }
0x229f   :  { %v18136_v34 = vpop.f32.mrb[65].mxu0 }
0x22a2   :  { %v6700_v35 = vpop.f32.mrb[70].mxu1 }
0x22a3   :  { %v7169_v36 = vcombine.low %v6624_v12, %v6700_v35  ;;  %v6776_v37 = vpop.f32.mrb[66].mxu0  ;;  %v18141_v39 = vpop.f32.mrb[71].mxu1  ;;  %v5412_v35 = vrot.slane %v5398_v54, %v20008_v23 }
0x22a4   :  { %v18146_v40 = vpop.f32.mrb[67].mxu0  ;;  %v5430_v39 = vcombine.high %v5422_v25, %v5422_v25 }
0x22a5   :  { %v7177_v46 = vrot.slane %v7169_v36, %v20008_v23 }
0x22a7   :  { %v6928_v48 = vpop.f32.mrb[68].mxu0 }
0x22a8   :  { %v6852_v47 = vpop.f32.mrb[72].mxu1  ;;  %v18156_v41 = vpop.f32.mrb[69].mxu0 }
0x22a9   :  { %v7170_v42 = vcombine.low %v6776_v37, %v6852_v47  ;;  %v18151_v44 = vpop.f32.mrb[73].mxu1  ;;  %v5413_v47 = vcombine.high %v5405_v31, %v5405_v31 }
0x22aa   :  { %v5431_v44 = vcombine.high %v5429_v32, %v5429_v32 }
0x22ab   :  { %v7184_v49 = vrot.slane %v7170_v42, %v20008_v23  ;;  %v7080_v50 = vpop.f32.mrb[70].mxu0 }
0x22ac   :  { %v7004_v51 = vpop.f32.mrb[74].mxu1  ;;  %v18166_v52 = vpop.f32.mrb[71].mxu0 }
0x22ad   :  { %v7185_v53 = vcombine.low %v7177_v46, %v7184_v49  ;;  %v7186_v56 = vcombine.low %v6928_v48, %v7004_v51  ;;  %v18161_v57 = vpop.f32.mrb[75].mxu1  ;;  %v5414_v51 = vcombine.high %v5412_v35, %v5412_v35 }
0x22af   :  { %18174 = vmatprep.mubr.msk.f32.mxu0 %vm384_vm3, %v7185_v53  ;;  %v7194_v0 = vrot.slane %v7186_v56, %v20008_v23 }
0x22b0   :  { %v7156_v59 = vpop.f32.mrb[76].mxu1 }
0x22b1   :  { %v7187_v60 = vcombine.low %v7080_v50, %v7156_v59  ;;  %v18171_v61 = vpop.f32.mrb[77].mxu1 }
0x22b3   :  { %v7201_v1 = vrot.slane %v7187_v60, %v20008_v23 }
0x22b5   :  { %v7202_v2 = vcombine.low %v7194_v0, %v7201_v1  ;;  %v20627_v1 = vld [vmem:[%s21889_s4 + $0x4b] ss:$0 sm:$0xff] }
0x22b7   :  { %18175 = vmatmul.mubr.msk.f32.vlgmr.msra.gmra.mrb[72].mxu0 %vm384_vm3, %v7202_v2 }
0x22b8   :  { %19029 = vmatpush3.bf16.msra.mxu0 %v19026_v33  ;;  %18196 = vmatprep.mubr.msk.f32.mxu0 %vm37_vm0, %v20080_v18  ;;  %v20551_v4 = vpop.f32.mrb[78].mxu1 }
0x22b9   :  { %19031 = vmatprep.subr.bf16.mxu0 %v19030_v3  ;;  %v7405_v27 = vpop.f32.mrb[79].mxu1 }
0x22ba   :  { %v7416_v57 = vcombine.high %v7405_v27, %v7405_v27  ;;  %v7423_v62 = vrot.slane %v7405_v27, %v20008_v23 }
0x22bc   :  { %19033 = vmatpush3.bf16.msra.mxu0 %v19030_v3 }
0x22bd   :  { %18210 = vmatprep.subr.mxu0 %v19514_v22 }
0x22bf   :  { %18197 = vmatmul.mubr.msk.f32.vlgmr.msra.gmra.mrb[74].mxu0 %vm37_vm0, %v20089_v26 }
0x22c0   :  { %v18209_v7 = vpop.f32.mrb[80].mxu1  ;;  %18212 = vmatprep.mubr.msk.f32.mxu0 %vm19515_vm2, %v19514_v22 }
0x22c1   :  { %v7705_v55 = vcombine.high %v18209_v7, %v18209_v7  ;;  %v7712_v17 = vrot.slane %v18209_v7, %v20008_v23  ;;  %v20564_v8 = vpop.f32.mrb[81].mxu1  ;;  %v7430_v7 = vrot.slane %v7416_v57, %v20008_v23 }
0x22c2   :  { %v7688_v10 = vcombine.high %v20564_v8, %v20564_v8 }
0x22c3   :  { %v7719_v11 = vrot.slane %v7705_v55, %v20008_v23  ;;  %v7720_v20 = vcombine.high %v7712_v17, %v7712_v17  ;;  %v20570_v5 = vadd.f32 %v20559_v6, %v7712_v17 }
0x22c4   :  { %v7702_v24 = vrot.slane %v7688_v10, %v20008_v23  ;;  %v7462_v10 = vadd.f32 %v20627_v1, %v7423_v62 }
0x22c5   :  { %v7721_v21 = vcombine.high %v7719_v11, %v7719_v11  ;;  %v20574_v9 = vadd.f32 %v20559_v6, %v7720_v20  ;;  %v20577_v13 = vadd.f32 %v20559_v6, %v7719_v11 }
0x22c6   :  { %v7704_v14 = vcombine.high %v7702_v24, %v7702_v24  ;;  %v20580_v15 = vadd.f32 %v20559_v6, %v7702_v24 }
0x22c7   :  { %v20583_v16 = vadd.f32 %v20559_v6, %v7721_v21  ;;  %v7431_v21 = vcombine.high %v7423_v62, %v7423_v62 }
0x22c8   :  { %v20586_v28 = vadd.f32 %v20559_v6, %v7704_v14  ;;  %v7464_v14 = vadd.f32 %v20627_v1, %v7430_v7 }
0x238a   :  { %v18176_v30 = vpop.f32.mrb[72].mxu0 }
0x238b   :  { %v7301_v33 = vcombine.high %v18176_v30, %v18176_v30  ;;  %v7308_v12 = vrot.slane %v18176_v30, %v20008_v23  ;;  %v7273_v34 = vpop.f32.mrb[73].mxu0 }
0x238c   :  { %v7284_v36 = vcombine.high %v7273_v34, %v7273_v34  ;;  %v7291_v37 = vrot.slane %v7273_v34, %v20008_v23 }
0x238d   :  { %v7315_v40 = vrot.slane %v7301_v33, %v20008_v23  ;;  %v7316_v48 = vcombine.high %v7308_v12, %v7308_v12  ;;  %v20601_v58 = vadd.f32 %v7308_v12, %v5422_v25  ;;  %v7433_v25 = vcombine.high %v20551_v4, %v20551_v4 }
0x238e   :  { %v7298_v29 = vrot.slane %v7284_v36, %v20008_v23  ;;  %v7299_v41 = vcombine.high %v7291_v37, %v7291_v37  ;;  %v20604_v42 = vadd.f32 %v7291_v37, %v5405_v31  ;;  %v7440_v31 = vrot.slane %v20551_v4, %v20008_v23 }
0x238f   :  { %v7317_v46 = vcombine.high %v7315_v40, %v7315_v40  ;;  %v20606_v49 = vadd.f32 %v7316_v48, %v5430_v39  ;;  %v20608_v50 = vadd.f32 %v7315_v40, %v5429_v32  ;;  %v7432_v33 = vcombine.high %v7430_v7, %v7430_v7 }
0x2390   :  { %v7300_v52 = vcombine.high %v7298_v29, %v7298_v29  ;;  %v20610_v53 = vadd.f32 %v7299_v41, %v5413_v47  ;;  %v20612_v56 = vadd.f32 %v7298_v29, %v5412_v35  ;;  %v7463_v12 = vadd.f32 %v20627_v1, %v7431_v21 }
0x2391   :  { %v20614_v59 = vadd.f32 %v7317_v46, %v5431_v44  ;;  %v7447_v35 = vrot.slane %v7433_v25, %v20008_v23  ;;  %v7466_v36 = vadd.f32 %v20627_v1, %v7440_v31  ;;  %v7695_v37 = vrot.slane %v20564_v8, %v20008_v23 }
0x2392   :  { %v20616_v60 = vadd.f32 %v7300_v52, %v5414_v51  ;;  %v18198_v61 = vpop.f32.mrb[74].mxu0  ;;  %v7448_v40 = vcombine.high %v7440_v31, %v7440_v31  ;;  %v7465_v48 = vadd.f32 %v20627_v1, %v7432_v33 }
0x2393   :  { %v7541_v0 = vpop.f32.mrb[75].mxu0  ;;  %v7569_v11 = vcombine.high %v18198_v61, %v18198_v61  ;;  %v7576_v20 = vrot.slane %v18198_v61, %v20008_v23  ;;  %v7468_v8 = vadd.f32 %v20627_v1, %v7447_v35  ;;  %v7734_v41 = vadd.f32 %v20559_v6, %v7695_v37 }
0x2394   :  { %v7552_v2 = vcombine.high %v7541_v0, %v7541_v0  ;;  %v7559_v3 = vrot.slane %v7541_v0, %v20008_v23  ;;  %v7449_v44 = vcombine.high %v7447_v35, %v7447_v35  ;;  %v7467_v46 = vadd.f32 %v20627_v1, %v7448_v40 }
0x2395   :  { %v7583_v30 = vrot.slane %v7569_v11, %v20008_v23  ;;  %v7602_v32 = vadd.f32 %v20622_v63, %v7576_v20  ;;  %v7584_v4 = vcombine.high %v7576_v20, %v7576_v20  ;;  %v7703_v51 = vcombine.high %v7695_v37, %v7695_v37 }
0x2396   :  { %v7566_v55 = vrot.slane %v7552_v2, %v20008_v23  ;;  %v7567_v17 = vcombine.high %v7559_v3, %v7559_v3  ;;  %v7598_v27 = vadd.f32 %v20622_v63, %v7559_v3  ;;  %v7469_v57 = vadd.f32 %v20627_v1, %v7449_v44 }
0x2397   :  { %v7604_v39 = vadd.f32 %v20622_v63, %v7583_v30  ;;  %v7585_v47 = vcombine.high %v7583_v30, %v7583_v30  ;;  %v7603_v29 = vadd.f32 %v20622_v63, %v7584_v4  ;;  %v7735_v61 = vadd.f32 %v20559_v6, %v7703_v51 }
0x2398   :  { %v7600_v24 = vadd.f32 %v20622_v63, %v7566_v55  ;;  %18211 = vmatpush3.xpose.msk.msra.mxu0 %vm384_vm3, %v7598_v27  ;;  %v7568_v43 = vcombine.high %v7566_v55, %v7566_v55  ;;  %v7599_v54 = vadd.f32 %v20622_v63, %v7567_v17 }
0x2399   :  { %18215 = vmatprep.subr.mxu0 %v19514_v22  ;;  %v7605_v52 = vadd.f32 %v20622_v63, %v7585_v47 }
0x239a   :  { %18221 = vmatpush3.xpose.msk.msra.mxu1 %vm384_vm3, %v7600_v24  ;;  %v7601_v34 = vadd.f32 %v20622_v63, %v7568_v43 }
0x239b   :  { %18213 = vmatmul.mubr.msk.f32.vlgmr.msra.gmra.mrb[76].mxu0 %vm384_vm3, %v7462_v10  ;;  %18230 = vmatprep.subr.mxu1 %v19514_v22 }
0x239c   :  { %18216 = vmatpush3.xpose.msk.msra.mxu0 %vm384_vm3, %v7599_v54  ;;  %18217 = vmatprep.mubr.msk.f32.mxu0 %vm19515_vm2, %v19514_v22 }
0x239d   :  { %18223 = vmatmul.mubr.msk.f32.vlgmr.msra.gmra.mrb[82].mxu1 %vm384_vm3, %v7464_v14  ;;  %18225 = vmatprep.subr.mxu0 %v19514_v22 }
0x239e   :  { %18231 = vmatpush3.xpose.msk.msra.mxu1 %vm384_vm3, %v7602_v32  ;;  %18232 = vmatprep.mubr.msk.f32.mxu1 %vm19515_vm2, %v19514_v22 }
0x239f   :  { %18218 = vmatmul.mubr.msk.f32.vlgmr.msra.gmra.mrb[78].mxu0 %vm384_vm3, %v7463_v12  ;;  %18240 = vmatprep.subr.mxu1 %v19514_v22 }
0x23a0   :  { %18226 = vmatpush3.xpose.msk.msra.mxu0 %vm384_vm3, %v7601_v34  ;;  %18227 = vmatprep.mubr.msk.f32.mxu0 %vm19515_vm2, %v19514_v22 }
0x23a1   :  { %18233 = vmatmul.mubr.msk.f32.vlgmr.msra.gmra.mrb[84].mxu1 %vm384_vm3, %v7466_v36  ;;  %18235 = vmatprep.subr.mxu0 %v19514_v22 }
0x23a2   :  { %18241 = vmatpush3.xpose.msk.msra.mxu1 %vm384_vm3, %v7604_v39  ;;  %18242 = vmatprep.mubr.msk.f32.mxu1 %vm19515_vm2, %v19514_v22 }
0x23a3   :  { %18228 = vmatmul.mubr.msk.f32.vlgmr.msra.gmra.mrb[80].mxu0 %vm384_vm3, %v7465_v48  ;;  %18250 = vmatprep.subr.mxu1 %v19514_v22 }
0x23a4   :  { %18236 = vmatpush3.xpose.msk.msra.mxu0 %vm384_vm3, %v7603_v29  ;;  %18237 = vmatprep.mubr.msk.f32.mxu0 %vm19515_vm2, %v19514_v22 }
0x23a5   :  { %18243 = vmatmul.mubr.msk.f32.vlgmr.msra.gmra.mrb[86].mxu1 %vm384_vm3, %v7468_v8  ;;  %18245 = vmatprep.subr.mxu0 %v19514_v22 }
0x23a6   :  { %18251 = vmatpush3.msk.msra.mxu1 %vm4668_vm12, %v7734_v41  ;;  %18252 = vmatprep.mubr.msk.f32.mxu1 %vm19515_vm2, %v19514_v22 }
0x23a7   :  { %18238 = vmatmul.mubr.msk.f32.vlgmr.msra.gmra.mrb[82].mxu0 %vm384_vm3, %v7467_v46  ;;  %18260 = vmatprep.subr.mxu1 %v19514_v22 }
0x23a8   :  { %18246 = vmatpush3.xpose.msk.msra.mxu0 %vm384_vm3, %v7605_v52  ;;  %18247 = vmatprep.mubr.msk.f32.mxu0 %vm19515_vm2, %v19514_v22 }
0x23a9   :  { %18255 = vmatprep.subr.mxu0 %v19514_v22 }
0x23ab   :  { %18248 = vmatmul.mubr.msk.f32.vlgmr.msra.gmra.mrb[84].mxu0 %vm384_vm3, %v7469_v57 }
0x23ac   :  { %18256 = vmatpush3.msk.msra.mxu0 %vm4668_vm12, %v7735_v61  ;;  %18257 = vmatprep.mubr.msk.f32.mxu0 %vm19515_vm2, %v19514_v22 }
0x23ad   :  { %18265 = vmatprep.subr.mxu0 %v19514_v22 }
0x246e   :  { %v7814_v62 = vpop.f32.mrb[76].mxu0 }
0x246f   :  { %v8350_v63 = vmul.f32 0.35355338, %v7814_v62  ;;  %v18214_v0 = vpop.f32.mrb[77].mxu0 }
0x2470   :  { %v7966_v2 = vpop.f32.mrb[82].mxu1 }
0x2471   :  { %v8352_v3 = vmul.f32 0.35355338, %v7966_v2  ;;  %v18224_v7 = vpop.f32.mrb[83].mxu1  ;;  %v8358_v1 = vsel %vm4575_vm13, %v8350_v63, -inf }
0x2472   :  { %8359 = vmax.xlane.f32.xlu0 %v8358_v1  ;;  %v7890_v55 = vpop.f32.mrb[78].mxu0 }
0x2473   :  { %v8351_v6 = vmul.f32 0.35355338, %v7890_v55  ;;  %v18219_v17 = vpop.f32.mrb[79].mxu0  ;;  %v8364_v24 = vsel %vm4575_vm13, %v8352_v3, -inf }
0x2474   :  { %v8118_v27 = vpop.f32.mrb[84].mxu1 }
0x2475   :  { %v8354_v10 = vmul.f32 0.35355338, %v8118_v27  ;;  %v18234_v11 = vpop.f32.mrb[85].mxu1  ;;  %v8361_v20 = vsel %vm4575_vm13, %v8351_v6, -inf }
0x2476   :  { %8362 = vmax.xlane.f32.xlu1 %v8361_v20  ;;  %8365 = vmax.xlane.f32.xlu0 %v8364_v24  ;;  %v8042_v21 = vpop.f32.mrb[80].mxu0 }
0x2477   :  { %v8353_v14 = vmul.f32 0.35355338, %v8042_v21  ;;  %v18229_v43 = vpop.f32.mrb[81].mxu0  ;;  %v8370_v30 = vsel %vm4575_vm13, %v8354_v10, -inf }
0x2478   :  { %v8270_v54 = vpop.f32.mrb[86].mxu1 }
0x2479   :  { %v8356_v25 = vmul.f32 0.35355338, %v8270_v54  ;;  %v18244_v31 = vpop.f32.mrb[87].mxu1  ;;  %v8367_v32 = vsel %vm4575_vm13, %v8353_v14, -inf }
0x247a   :  { %8371 = vmax.xlane.f32.xlu0 %v8370_v30  ;;  %8368 = vmax.xlane.f32.xlu1 %v8367_v32  ;;  %v8194_v33 = vpop.f32.mrb[82].mxu0 }
0x247b   :  { %v8355_v12 = vmul.f32 0.35355338, %v8194_v33  ;;  %v18239_v4 = vpop.f32.mrb[83].mxu0  ;;  %v8376_v34 = vsel %vm4575_vm13, %v8356_v25, -inf }
0x247d   :  { %v8373_v35 = vsel %vm4575_vm13, %v8355_v12, -inf }
0x247e   :  { %8377 = vmax.xlane.f32.xlu0 %v8376_v34  ;;  %8374 = vmax.xlane.f32.xlu1 %v8373_v35  ;;  %v8346_v36 = vpop.f32.mrb[84].mxu0 }
0x247f   :  { %v8357_v37 = vmul.f32 0.35355338, %v8346_v36  ;;  %v18249_v39 = vpop.f32.mrb[85].mxu0 }
0x2481   :  { %v8379_v40 = vsel %vm4575_vm13, %v8357_v37, -inf }
0x2482   :  { %8380 = vmax.xlane.f32.xlu1 %v8379_v40 }
0x24ff   :  { %v8360_v48 = vpop.xlane.xlu0 %8359 }
0x2500   :  { %v8382_v47 = vsub.f32 %v8350_v63, %v8360_v48 }
0x2502   :  { %v8390_v29 = vmul.f32 1.442695, %v8382_v47 }
0x2503   :  { %v8363_v8 = vpop.xlane.xlu1 %8362  ;;  %v8366_v41 = vpop.xlane.xlu0 %8365 }
0x2504   :  { %19376 = vpow2.f32 %v8390_v29  ;;  %v8383_v44 = vsub.f32 %v8351_v6, %v8363_v8  ;;  %v8384_v46 = vsub.f32 %v8352_v3, %v8366_v41 }
0x2506   :  { %v8392_v51 = vmul.f32 1.442695, %v8383_v44  ;;  %v8394_v52 = vmul.f32 1.442695, %v8384_v46 }
0x2507   :  { %v8372_v57 = vpop.xlane.xlu0 %8371  ;;  %v8369_v61 = vpop.xlane.xlu1 %8368 }
0x2508   :  { %19378 = vpow2.f32 %v8392_v51  ;;  %v8386_v62 = vsub.f32 %v8354_v10, %v8372_v57  ;;  %v8385_v0 = vsub.f32 %v8353_v14, %v8369_v61 }
0x2509   :  { %19380 = vpow2.f32 %v8394_v52 }
0x250a   :  { %v8398_v2 = vmul.f32 1.442695, %v8386_v62  ;;  %v8396_v7 = vmul.f32 1.442695, %v8385_v0 }
0x250b   :  { %v8378_v1 = vpop.xlane.xlu0 %8377  ;;  %v8375_v55 = vpop.xlane.xlu1 %8374 }
0x250c   :  { %19382 = vpow2.f32 %v8398_v2  ;;  %v8388_v63 = vsub.f32 %v8356_v25, %v8378_v1  ;;  %v8387_v17 = vsub.f32 %v8355_v12, %v8375_v55 }
0x250d   :  { %19384 = vpow2.f32 %v8396_v7 }
0x250e   :  { %v19377_v27 = vpop.eup %19376  ;;  %v8402_v11 = vmul.f32 1.442695, %v8388_v63  ;;  %v8400_v6 = vmul.f32 1.442695, %v8387_v17 }
0x250f   :  { %v8381_v3 = vpop.xlane.xlu1 %8380  ;;  %v8406_v20 = vsel %vm4575_vm13, %v19377_v27, 0.0 }
0x2510   :  { %19386 = vpow2.f32 %v8402_v11  ;;  %v8389_v24 = vsub.f32 %v8357_v37, %v8381_v3  ;;  %8407 = vadd.xlane.f32.xlu0 %v8406_v20  ;;  %v9500_v3 = vld [vmem:[%s21887_s3 + $0x678] sm:$0xff]  ;;  %v9501_v20 = vld [vmem:[%s21887_s3 + $0x680] sm:$0xff] }
0x2511   :  { %19388 = vpow2.f32 %v8400_v6 }
0x2512   :  { %v19379_v10 = vpop.eup %19378  ;;  %v8404_v21 = vmul.f32 1.442695, %v8389_v24  ;;  %v9502_v24 = vld [vmem:[%s21887_s3 + $0x688] sm:$0xff] }
0x2513   :  { %v19381_v14 = vpop.eup %19380  ;;  %v8409_v43 = vsel %vm4575_vm13, %v19379_v10, 0.0 }
0x2514   :  { %19390 = vpow2.f32 %v8404_v21  ;;  %v8412_v54 = vsel %vm4575_vm13, %v19381_v14, 0.0  ;;  %8410 = vadd.xlane.f32.xlu1 %v8409_v43 }
0x2515   :  { %8413 = vadd.xlane.f32.xlu0 %v8412_v54 }
0x2516   :  { %v19383_v25 = vpop.eup %19382 }
0x2517   :  { %v19385_v31 = vpop.eup %19384  ;;  %v8418_v30 = vsel %vm4575_vm13, %v19383_v25, 0.0 }
0x2518   :  { %v8415_v32 = vsel %vm4575_vm13, %v19385_v31, 0.0 }
0x2519   :  { %8419 = vadd.xlane.f32.xlu0 %v8418_v30  ;;  %8416 = vadd.xlane.f32.xlu1 %v8415_v32 }
0x251a   :  { %v19387_v33 = vpop.eup %19386 }
0x251b   :  { %v19389_v12 = vpop.eup %19388  ;;  %v8424_v4 = vsel %vm4575_vm13, %v19387_v33, 0.0 }
0x251c   :  { %v8421_v34 = vsel %vm4575_vm13, %v19389_v12, 0.0 }
0x251d   :  { %8425 = vadd.xlane.f32.xlu0 %v8424_v4  ;;  %8422 = vadd.xlane.f32.xlu1 %v8421_v34 }
0x251e   :  { %v19391_v35 = vpop.eup %19390 }
0x251f   :  { %v8427_v36 = vsel %vm4575_vm13, %v19391_v35, 0.0 }
0x2521   :  { %8428 = vadd.xlane.f32.xlu1 %v8427_v36 }
0x259d   :  { %v8408_v37 = vpop.xlane.xlu0 %8407 }
0x259e   :  { %19392 = vrcp.f32 %v8408_v37 }
0x25a1   :  { %v8411_v39 = vpop.xlane.xlu1 %8410 }
0x25a2   :  { %v8414_v40 = vpop.xlane.xlu0 %8413  ;;  %19394 = vrcp.f32 %v8411_v39 }
0x25a3   :  { %19396 = vrcp.f32 %v8414_v40 }
0x25a6   :  { %v8420_v48 = vpop.xlane.xlu0 %8419  ;;  %v8417_v47 = vpop.xlane.xlu1 %8416 }
0x25a7   :  { %19398 = vrcp.f32 %v8420_v48 }
0x25a8   :  { %v19393_v29 = vpop.eup %19392  ;;  %19400 = vrcp.f32 %v8417_v47 }
0x25a9   :  { %v8438_v8 = vmul.f32 %v19393_v29, %v19377_v27 }
0x25aa   :  { %v8426_v41 = vpop.xlane.xlu0 %8425  ;;  %v8423_v44 = vpop.xlane.xlu1 %8422 }
0x25ab   :  { %19402 = vrcp.f32 %v8426_v41  ;;  %18253 = vmatmul.mubr.msk.f32.vlgmr.msra.gmra.mrb[88].mxu1 %vm4664_vm14, %v8438_v8 }
0x25ac   :  { %v19395_v46 = vpop.eup %19394  ;;  %19404 = vrcp.f32 %v8423_v44  ;;  %18261 = vmatpush3.msk.msra.mxu1 %vm4668_vm12, %v20580_v15  ;;  %18262 = vmatprep.mubr.msk.f32.mxu1 %vm19515_vm2, %v19514_v22 }
0x25ad   :  { %v19397_v51 = vpop.eup %19396  ;;  %v8439_v52 = vmul.f32 %v19395_v46, %v19379_v10  ;;  %18270 = vmatprep.subr.mxu1 %v19514_v22  ;;  %v9503_v10 = vld [vmem:[%s21887_s3 + $0x690] sm:$0xff] }
0x25ae   :  { %v8440_v57 = vmul.f32 %v19397_v51, %v19381_v14  ;;  %v8429_v61 = vpop.xlane.xlu1 %8428  ;;  %v19062_v21 = vpack.c.bf16 %v9503_v10, %v9502_v24  ;;  %v9365_v14 = vld [vmem:[%s21887_s3 + $0x660] sm:$0xff] }
0x25af   :  { %19406 = vrcp.f32 %v8429_v61  ;;  %18258 = vmatmul.mubr.msk.f32.vlgmr.msra.gmra.mrb[86].mxu0 %vm4664_vm14, %v8439_v52  ;;  %v9367_v61 = vld [vmem:[%s21887_s3 + $0x670] sm:$0xff] }
0x25b0   :  { %18263 = vmatmul.mubr.msk.f32.vlgmr.msra.gmra.mrb[90].mxu1 %vm4664_vm14, %v8440_v57  ;;  %18266 = vmatpush3.msk.msra.mxu0 %vm4668_vm12, %v20586_v28  ;;  %v9228_v28 = vld [vmem:[%s21887_s3 + $0x638] sm:$0xff]  ;;  %v9366_v57 = vld [vmem:[%s21887_s3 + $0x668] sm:$0xff] }
0x25b1   :  { %v19399_v62 = vpop.eup %19398  ;;  %18271 = vmatpush3.msk.msra.mxu1 %vm4668_vm12, %v20570_v5  ;;  %18267 = vmatprep.mubr.msk.f32.mxu0 %vm19515_vm2, %v19514_v22  ;;  %v9229_v5 = vld [vmem:[%s21887_s3 + $0x640] sm:$0xff] }
0x25b2   :  { %v19401_v15 = vpop.eup %19400  ;;  %v8442_v0 = vmul.f32 %v19399_v62, %v19383_v25  ;;  %18272 = vmatprep.mubr.msk.f32.mxu1 %vm19515_vm2, %v19514_v22  ;;  %18275 = vmatprep.subr.mxu0 %v19514_v22  ;;  %v19042_v17 = vpack.c.bf16 %v9229_v5, %v9228_v28 }
0x25b3   :  { %v8441_v2 = vmul.f32 %v19401_v15, %v19385_v31  ;;  %18280 = vmatprep.subr.mxu1 %v19514_v22 }
0x25b4   :  { %18273 = vmatmul.mubr.msk.f32.vlgmr.msra.gmra.mrb[92].mxu1 %vm4664_vm14, %v8442_v0 }
0x25b5   :  { %v19403_v7 = vpop.eup %19402  ;;  %18268 = vmatmul.mubr.msk.f32.vlgmr.msra.gmra.mrb[88].mxu0 %vm4664_vm14, %v8441_v2  ;;  %18281 = vmatpush3.msk.msra.mxu1 %vm4668_vm12, %v20577_v13  ;;  %v9230_v13 = vld [vmem:[%s21887_s3 + $0x648] sm:$0xff]  ;;  %v19054_v2 = vpack.c.bf16 %v9367_v61, %v9366_v57 }
0x25b6   :  { %v19405_v1 = vpop.eup %19404  ;;  %v8444_v55 = vmul.f32 %v19403_v7, %v19387_v33  ;;  %18276 = vmatpush3.msk.msra.mxu0 %vm4668_vm12, %v20574_v9  ;;  %18277 = vmatprep.mubr.msk.f32.mxu0 %vm19515_vm2, %v19514_v22  ;;  %v9231_v9 = vld [vmem:[%s21887_s3 + $0x650] sm:$0xff] }
0x25b7   :  { %v8443_v63 = vmul.f32 %v19405_v1, %v19389_v12  ;;  %18282 = vmatprep.mubr.msk.f32.mxu1 %vm19515_vm2, %v19514_v22  ;;  %18285 = vmatprep.subr.mxu0 %v19514_v22  ;;  %v19046_v6 = vpack.c.bf16 %v9231_v9, %v9230_v13  ;;  %v20821_v7 = vld [vmem:[%s21889_s4 + $0x50] ss:$0 sm:$0xff] }
0x25b8   :  { %18283 = vmatmul.mubr.msk.f32.vlgmr.msra.gmra.mrb[94].mxu1 %vm4664_vm14, %v8444_v55 }
0x25b9   :  { %v19407_v27 = vpop.eup %19406  ;;  %18278 = vmatmul.mubr.msk.f32.vlgmr.msra.gmra.mrb[90].mxu0 %vm4664_vm14, %v8443_v63 }
0x25ba   :  { %v8445_v11 = vmul.f32 %v19407_v27, %v19391_v35  ;;  %18286 = vmatpush3.msk.msra.mxu0 %vm4668_vm12, %v20583_v16  ;;  %18287 = vmatprep.mubr.msk.f32.mxu0 %vm19515_vm2, %v19514_v22  ;;  %v19058_v16 = vpack.c.bf16 %v9501_v20, %v9500_v3 }
0x25bb   :  { %19043 = vmatprep.subr.bf16.mxu0 %v19042_v17 }
0x25bd   :  { %18288 = vmatmul.mubr.msk.f32.vlgmr.msra.gmra.mrb[92].mxu0 %vm4664_vm14, %v8445_v11 }
0x25be   :  { %19045 = vmatpush3.bf16.msra.mxu0 %v19042_v17  ;;  %18303 = vmatprep.mubr.msk.f32.mxu0 %vm37_vm0, %v20034_v38  ;;  %v9054_v38 = vld [vmem:[%s21887_s3 + $0x630] sm:$0xff] }
0x25bf   :  { %19047 = vmatprep.subr.bf16.mxu0 %v19046_v6  ;;  %18290 = vmatprep.subr.mxu1 %v9054_v38 }
0x25c0   :  { %18291 = vmatpush3.msra.mxu1 %v9054_v38 }
0x25c2   :  { %19049 = vmatpush3.bf16.msra.mxu0 %v19046_v6 }
0x25c3   :  { %19059 = vmatprep.subr.bf16.mxu0 %v19058_v16 }
0x25c5   :  { %18304 = vmatmul.mubr.msk.f32.vlgmr.msra.gmra.mrb[94].mxu0 %vm37_vm0, %v20054_v45  ;;  %v9364_v45 = vld [vmem:[%s21887_s3 + $0x658] sm:$0xff] }
0x25c6   :  { %19061 = vmatpush3.bf16.msra.mxu0 %v19058_v16  ;;  %18325 = vmatprep.mubr.msk.f32.mxu0 %vm37_vm0, %v20080_v18  ;;  %v19050_v43 = vpack.c.bf16 %v9365_v14, %v9364_v45 }
0x25c7   :  { %19063 = vmatprep.subr.bf16.mxu0 %v19062_v21 }
0x25c8   :  { %19051 = vmatprep.subr.bf16.mxu1 %v19050_v43 }
0x25ca   :  { %19065 = vmatpush3.bf16.msra.mxu0 %v19062_v21 }
0x25cb   :  { %18338 = vmatprep.subr.mxu0 %v19514_v22 }
0x25cd   :  { %18326 = vmatmul.mubr.msk.f32.vlgmr.msra.gmra.mrb[96].mxu0 %vm37_vm0, %v20089_v26 }
0x25ce   :  { %18340 = vmatprep.mubr.msk.f32.mxu0 %vm19515_vm2, %v19514_v22 }
0x267e   :  { %v8518_v54 = vpop.f32.mrb[88].mxu1 }
0x267f   :  { %v18254_v25 = vpop.f32.mrb[89].mxu1 }
0x2682   :  { %v8594_v31 = vpop.f32.mrb[86].mxu0 }
0x2683   :  { %v9063_v30 = vcombine.low %v8518_v54, %v8594_v31  ;;  %v8670_v32 = vpop.f32.mrb[90].mxu1  ;;  %v18259_v33 = vpop.f32.mrb[87].mxu0 }
0x2684   :  { %v18264_v12 = vpop.f32.mrb[91].mxu1 }
0x2685   :  { %v9071_v39 = vrot.slane %v9063_v30, %v20008_v23 }
0x2687   :  { %v8822_v4 = vpop.f32.mrb[92].mxu1 }
0x2688   :  { %v8746_v34 = vpop.f32.mrb[88].mxu0  ;;  %v18274_v35 = vpop.f32.mrb[93].mxu1 }
0x2689   :  { %v9064_v36 = vcombine.low %v8670_v32, %v8746_v34  ;;  %v18269_v37 = vpop.f32.mrb[89].mxu0 }
0x268b   :  { %v9078_v40 = vrot.slane %v9064_v36, %v20008_v23  ;;  %v8974_v48 = vpop.f32.mrb[94].mxu1 }
0x268c   :  { %v8898_v47 = vpop.f32.mrb[90].mxu0  ;;  %v18284_v29 = vpop.f32.mrb[95].mxu1 }
0x268d   :  { %v9079_v8 = vcombine.low %v9071_v39, %v9078_v40  ;;  %v9080_v41 = vcombine.low %v8822_v4, %v8898_v47  ;;  %v18279_v44 = vpop.f32.mrb[91].mxu0 }
0x268f   :  { %18292 = vmatprep.mubr.msk.f32.mxu1 %vm384_vm3, %v9079_v8  ;;  %v9088_v62 = vrot.slane %v9080_v41, %v20008_v23 }
0x2690   :  { %v9050_v46 = vpop.f32.mrb[92].mxu0 }
0x2691   :  { %v9081_v51 = vcombine.low %v8974_v48, %v9050_v46  ;;  %v18289_v52 = vpop.f32.mrb[93].mxu0 }
0x2693   :  { %v9095_v15 = vrot.slane %v9081_v51, %v20008_v23 }
0x2695   :  { %v9096_v0 = vcombine.low %v9088_v62, %v9095_v15 }
0x2697   :  { %18293 = vmatmul.mubr.msk.f32.vlgmr.msra.gmra.mrb[96].mxu1 %vm384_vm3, %v9096_v0 }
0x2698   :  { %19053 = vmatpush3.bf16.msra.mxu1 %v19050_v43  ;;  %18314 = vmatprep.mubr.msk.f32.mxu1 %vm37_vm0, %v20080_v18  ;;  %v20813_v28 = vpop.f32.mrb[94].mxu0 }
0x2699   :  { %19055 = vmatprep.subr.bf16.mxu1 %v19054_v2  ;;  %v9299_v5 = vpop.f32.mrb[95].mxu0  ;;  %v9327_v0 = vcombine.high %v20813_v28, %v20813_v28 }
0x269a   :  { %v9310_v39 = vcombine.high %v9299_v5, %v9299_v5 }
0x269c   :  { %19057 = vmatpush3.bf16.msra.mxu1 %v19054_v2  ;;  %v9334_v2 = vrot.slane %v20813_v28, %v20008_v23 }
0x269d   :  { %18328 = vmatprep.subr.mxu1 %v19514_v22 }
0x269f   :  { %18315 = vmatmul.mubr.msk.f32.vlgmr.msra.gmra.mrb[98].mxu1 %vm37_vm0, %v20089_v26 }
0x26a0   :  { %v18327_v1 = vpop.f32.mrb[96].mxu0  ;;  %18330 = vmatprep.mubr.msk.f32.mxu1 %vm19515_vm2, %v19514_v22 }
0x26a1   :  { %v9599_v18 = vcombine.high %v18327_v1, %v18327_v1  ;;  %v9606_v55 = vrot.slane %v18327_v1, %v20008_v23  ;;  %v20826_v63 = vpop.f32.mrb[97].mxu0 }
0x26a2   :  { %v9582_v17 = vcombine.high %v20826_v63, %v20826_v63 }
0x26a3   :  { %v9613_v13 = vrot.slane %v9599_v18, %v20008_v23  ;;  %v9614_v26 = vcombine.high %v9606_v55, %v9606_v55  ;;  %v20832_v9 = vadd.f32 %v20821_v7, %v9606_v55 }
0x26a4   :  { %v9596_v27 = vrot.slane %v9582_v17, %v20008_v23 }
0x26a5   :  { %v9615_v11 = vcombine.high %v9613_v13, %v9613_v13  ;;  %v20836_v6 = vadd.f32 %v20821_v7, %v9614_v26  ;;  %v20839_v3 = vadd.f32 %v20821_v7, %v9613_v13  ;;  %v9341_v13 = vrot.slane %v9327_v0, %v20008_v23 }
0x26a6   :  { %v9598_v20 = vcombine.high %v9596_v27, %v9596_v27  ;;  %v20842_v16 = vadd.f32 %v20821_v7, %v9596_v27  ;;  %v9589_v27 = vrot.slane %v20826_v63, %v20008_v23 }
0x26a7   :  { %v20845_v24 = vadd.f32 %v20821_v7, %v9615_v11 }
0x26a8   :  { %v20848_v10 = vadd.f32 %v20821_v7, %v9598_v20  ;;  %v9342_v20 = vcombine.high %v9334_v2, %v9334_v2 }
0x276a   :  { %v18294_v21 = vpop.f32.mrb[96].mxu1 }
0x276b   :  { %v9195_v38 = vcombine.high %v18294_v21, %v18294_v21  ;;  %v9202_v45 = vrot.slane %v18294_v21, %v20008_v23  ;;  %v9167_v14 = vpop.f32.mrb[97].mxu1 }
0x276c   :  { %v9178_v43 = vcombine.high %v9167_v14, %v9167_v14  ;;  %v9185_v54 = vrot.slane %v9167_v14, %v20008_v23  ;;  %v9628_v14 = vadd.f32 %v20821_v7, %v9589_v27 }
0x276d   :  { %v9209_v25 = vrot.slane %v9195_v38, %v20008_v23  ;;  %v9210_v31 = vcombine.high %v9202_v45, %v9202_v45  ;;  %v20854_v30 = vadd.f32 %v9202_v45, %v20601_v58 }
0x276e   :  { %v9192_v32 = vrot.slane %v9178_v43, %v20008_v23  ;;  %v9193_v33 = vcombine.high %v9185_v54, %v9185_v54  ;;  %v20858_v12 = vadd.f32 %v9185_v54, %v20604_v42  ;;  %v9343_v43 = vcombine.high %v9341_v13, %v9341_v13 }
0x276f   :  { %v9211_v4 = vcombine.high %v9209_v25, %v9209_v25  ;;  %v20861_v34 = vadd.f32 %v9210_v31, %v20606_v49  ;;  %v20864_v35 = vadd.f32 %v9209_v25, %v20608_v50  ;;  %v9317_v49 = vrot.slane %v9299_v5, %v20008_v23  ;;  %v20882_v50 = vld [vmem:[%s21889_s4 + $0x4f] ss:$0 sm:$0xff] }
0x2770   :  { %v9194_v36 = vcombine.high %v9192_v32, %v9192_v32  ;;  %v20867_v37 = vadd.f32 %v9193_v33, %v20610_v53  ;;  %v20870_v58 = vadd.f32 %v9192_v32, %v20612_v56  ;;  %v20887_v56 = vld [vmem:[%s21889_s4 + $0x4e] ss:$0 sm:$0xff]  ;;  %v9597_v25 = vcombine.high %v9589_v27, %v9589_v27 }
0x2771   :  { %v20873_v40 = vadd.f32 %v9211_v4, %v20614_v59  ;;  %v9356_v44 = vadd.f32 %v20887_v56, %v9317_v49  ;;  %v9325_v57 = vcombine.high %v9317_v49, %v9317_v49  ;;  %v9360_v26 = vadd.f32 %v20887_v56, %v9334_v2 }
0x2772   :  { %v20876_v42 = vadd.f32 %v9194_v36, %v20616_v60  ;;  %v18316_v48 = vpop.f32.mrb[98].mxu1  ;;  %v9324_v60 = vrot.slane %v9310_v39, %v20008_v23  ;;  %v9362_v63 = vadd.f32 %v20887_v56, %v9341_v13  ;;  %v9361_v54 = vadd.f32 %v20887_v56, %v9342_v20 }
0x2773   :  { %v9435_v53 = vpop.f32.mrb[99].mxu1  ;;  %v9463_v46 = vcombine.high %v18316_v48, %v18316_v48  ;;  %v9470_v51 = vrot.slane %v18316_v48, %v20008_v23  ;;  %v9357_v55 = vadd.f32 %v20887_v56, %v9325_v57  ;;  %v9363_v32 = vadd.f32 %v20887_v56, %v9343_v43 }
0x2774   :  { %v9446_v47 = vcombine.high %v9435_v53, %v9435_v53  ;;  %v9453_v59 = vrot.slane %v9435_v53, %v20008_v23  ;;  %v9358_v61 = vadd.f32 %v20887_v56, %v9324_v60  ;;  %v9326_v18 = vcombine.high %v9324_v60, %v9324_v60 }
0x2775   :  { %v9477_v5 = vrot.slane %v9463_v46, %v20008_v23  ;;  %v9496_v1 = vadd.f32 %v20882_v50, %v9470_v51  ;;  %v9478_v28 = vcombine.high %v9470_v51, %v9470_v51  ;;  %v9629_v33 = vadd.f32 %v20821_v7, %v9597_v25 }
0x2776   :  { %v9460_v29 = vrot.slane %v9446_v47, %v20008_v23  ;;  %v9461_v8 = vcombine.high %v9453_v59, %v9453_v59  ;;  %v9492_v41 = vadd.f32 %v20882_v50, %v9453_v59  ;;  %v9359_v21 = vadd.f32 %v20887_v56, %v9326_v18 }
0x2777   :  { %v9498_v11 = vadd.f32 %v20882_v50, %v9477_v5  ;;  %v9479_v38 = vcombine.high %v9477_v5, %v9477_v5  ;;  %v9497_v45 = vadd.f32 %v20882_v50, %v9478_v28 }
0x2778   :  { %v9494_v52 = vadd.f32 %v20882_v50, %v9460_v29  ;;  %18329 = vmatpush3.xpose.msk.msra.mxu1 %vm384_vm3, %v9492_v41  ;;  %v9462_v62 = vcombine.high %v9460_v29, %v9460_v29  ;;  %v9493_v15 = vadd.f32 %v20882_v50, %v9461_v8 }
0x2779   :  { %18333 = vmatprep.subr.mxu1 %v19514_v22  ;;  %v9499_v31 = vadd.f32 %v20882_v50, %v9479_v38 }
0x277a   :  { %18339 = vmatpush3.xpose.msk.msra.mxu0 %vm384_vm3, %v9494_v52  ;;  %v9495_v17 = vadd.f32 %v20882_v50, %v9462_v62 }
0x277b   :  { %18331 = vmatmul.mubr.msk.f32.vlgmr.msra.gmra.mrb[100].mxu1 %vm384_vm3, %v9356_v44  ;;  %18348 = vmatprep.subr.mxu0 %v19514_v22 }
0x277c   :  { %18334 = vmatpush3.xpose.msk.msra.mxu1 %vm384_vm3, %v9493_v15  ;;  %18335 = vmatprep.mubr.msk.f32.mxu1 %vm19515_vm2, %v19514_v22 }
0x277d   :  { %18341 = vmatmul.mubr.msk.f32.vlgmr.msra.gmra.mrb[98].mxu0 %vm384_vm3, %v9358_v61  ;;  %18343 = vmatprep.subr.mxu1 %v19514_v22 }
0x277e   :  { %18349 = vmatpush3.xpose.msk.msra.mxu0 %vm384_vm3, %v9496_v1  ;;  %18350 = vmatprep.mubr.msk.f32.mxu0 %vm19515_vm2, %v19514_v22 }
0x277f   :  { %18336 = vmatmul.mubr.msk.f32.vlgmr.msra.gmra.mrb[102].mxu1 %vm384_vm3, %v9357_v55  ;;  %18358 = vmatprep.subr.mxu0 %v19514_v22 }
0x2780   :  { %18344 = vmatpush3.xpose.msk.msra.mxu1 %vm384_vm3, %v9495_v17  ;;  %18345 = vmatprep.mubr.msk.f32.mxu1 %vm19515_vm2, %v19514_v22 }
0x2781   :  { %18351 = vmatmul.mubr.msk.f32.vlgmr.msra.gmra.mrb[100].mxu0 %vm384_vm3, %v9360_v26  ;;  %18353 = vmatprep.subr.mxu1 %v19514_v22 }
0x2782   :  { %18359 = vmatpush3.xpose.msk.msra.mxu0 %vm384_vm3, %v9498_v11  ;;  %18360 = vmatprep.mubr.msk.f32.mxu0 %vm19515_vm2, %v19514_v22 }
0x2783   :  { %18346 = vmatmul.mubr.msk.f32.vlgmr.msra.gmra.mrb[104].mxu1 %vm384_vm3, %v9359_v21  ;;  %18368 = vmatprep.subr.mxu0 %v19514_v22 }
0x2784   :  { %18354 = vmatpush3.xpose.msk.msra.mxu1 %vm384_vm3, %v9497_v45  ;;  %18355 = vmatprep.mubr.msk.f32.mxu1 %vm19515_vm2, %v19514_v22 }
0x2785   :  { %18361 = vmatmul.mubr.msk.f32.vlgmr.msra.gmra.mrb[102].mxu0 %vm384_vm3, %v9362_v63  ;;  %18363 = vmatprep.subr.mxu1 %v19514_v22 }
0x2786   :  { %18369 = vmatpush3.msk.msra.mxu0 %vm4668_vm12, %v9628_v14  ;;  %18370 = vmatprep.mubr.msk.f32.mxu0 %vm19515_vm2, %v19514_v22 }
0x2787   :  { %18356 = vmatmul.mubr.msk.f32.vlgmr.msra.gmra.mrb[106].mxu1 %vm384_vm3, %v9361_v54  ;;  %18378 = vmatprep.subr.mxu0 %v19514_v22 }
0x2788   :  { %18364 = vmatpush3.xpose.msk.msra.mxu1 %vm384_vm3, %v9499_v31  ;;  %18365 = vmatprep.mubr.msk.f32.mxu1 %vm19515_vm2, %v19514_v22 }
0x2789   :  { %18373 = vmatprep.subr.mxu1 %v19514_v22 }
0x278b   :  { %18366 = vmatmul.mubr.msk.f32.vlgmr.msra.gmra.mrb[108].mxu1 %vm384_vm3, %v9363_v32 }
0x278c   :  { %18374 = vmatpush3.msk.msra.mxu1 %vm4668_vm12, %v9629_v33  ;;  %18375 = vmatprep.mubr.msk.f32.mxu1 %vm19515_vm2, %v19514_v22 }
0x278d   :  { %18383 = vmatprep.subr.mxu1 %v19514_v22 }
0x284e   :  { %v9708_v4 = vpop.f32.mrb[100].mxu1 }
0x284f   :  { %v10244_v36 = vmul.f32 0.35355338, %v9708_v4  ;;  %v18332_v39 = vpop.f32.mrb[101].mxu1 }
0x2850   :  { %v9860_v48 = vpop.f32.mrb[98].mxu0 }
0x2851   :  { %v10246_v49 = vmul.f32 0.35355338, %v9860_v48  ;;  %v18342_v50 = vpop.f32.mrb[99].mxu0  ;;  %v10252_v53 = vsel %vm4575_vm13, %v10244_v36, -inf }
0x2852   :  { %10253 = vmax.xlane.f32.xlu0 %v10252_v53  ;;  %v9784_v56 = vpop.f32.mrb[102].mxu1 }
0x2853   :  { %v10245_v7 = vmul.f32 0.35355338, %v9784_v56  ;;  %v18337_v47 = vpop.f32.mrb[103].mxu1  ;;  %v10258_v41 = vsel %vm4575_vm13, %v10246_v49, -inf }
0x2854   :  { %v10012_v59 = vpop.f32.mrb[100].mxu0 }
0x2855   :  { %v10248_v60 = vmul.f32 0.35355338, %v10012_v59  ;;  %v18352_v29 = vpop.f32.mrb[101].mxu0  ;;  %v10255_v8 = vsel %vm4575_vm13, %v10245_v7, -inf }
0x2856   :  { %10256 = vmax.xlane.f32.xlu1 %v10255_v8  ;;  %10259 = vmax.xlane.f32.xlu0 %v10258_v41  ;;  %v9936_v44 = vpop.f32.mrb[104].mxu1 }
0x2857   :  { %v10247_v46 = vmul.f32 0.35355338, %v9936_v44  ;;  %v18347_v51 = vpop.f32.mrb[105].mxu1  ;;  %v10264_v62 = vsel %vm4575_vm13, %v10248_v60, -inf }
0x2858   :  { %v10164_v52 = vpop.f32.mrb[102].mxu0 }
0x2859   :  { %v10250_v57 = vmul.f32 0.35355338, %v10164_v52  ;;  %v18362_v61 = vpop.f32.mrb[103].mxu0  ;;  %v10261_v15 = vsel %vm4575_vm13, %v10247_v46, -inf }
0x285a   :  { %10265 = vmax.xlane.f32.xlu0 %v10264_v62  ;;  %10262 = vmax.xlane.f32.xlu1 %v10261_v15  ;;  %v10088_v0 = vpop.f32.mrb[106].mxu1 }
0x285b   :  { %v10249_v2 = vmul.f32 0.35355338, %v10088_v0  ;;  %v18357_v5 = vpop.f32.mrb[107].mxu1  ;;  %v10270_v1 = vsel %vm4575_vm13, %v10250_v57, -inf }
0x285d   :  { %v10267_v18 = vsel %vm4575_vm13, %v10249_v2, -inf }
0x285e   :  { %10271 = vmax.xlane.f32.xlu0 %v10270_v1  ;;  %10268 = vmax.xlane.f32.xlu1 %v10267_v18  ;;  %v10240_v55 = vpop.f32.mrb[108].mxu1 }
0x285f   :  { %v10251_v28 = vmul.f32 0.35355338, %v10240_v55  ;;  %v18367_v17 = vpop.f32.mrb[109].mxu1 }
0x2861   :  { %v10273_v13 = vsel %vm4575_vm13, %v10251_v28, -inf }
0x2862   :  { %10274 = vmax.xlane.f32.xlu1 %v10273_v13 }
0x28df   :  { %v10254_v26 = vpop.xlane.xlu0 %10253 }
0x28e0   :  { %v10276_v27 = vsub.f32 %v10244_v36, %v10254_v26 }
0x28e2   :  { %v10284_v11 = vmul.f32 1.442695, %v10276_v27 }
0x28e3   :  { %v10257_v20 = vpop.xlane.xlu1 %10256  ;;  %v10260_v21 = vpop.xlane.xlu0 %10259 }
0x28e4   :  { %19408 = vpow2.f32 %v10284_v11  ;;  %v10277_v38 = vsub.f32 %v10245_v7, %v10257_v20  ;;  %v10278_v45 = vsub.f32 %v10246_v49, %v10260_v21 }
0x28e6   :  { %v10286_v63 = vmul.f32 1.442695, %v10277_v38  ;;  %v10288_v14 = vmul.f32 1.442695, %v10278_v45 }
0x28e7   :  { %v10266_v43 = vpop.xlane.xlu0 %10265  ;;  %v10263_v54 = vpop.xlane.xlu1 %10262 }
0x28e8   :  { %19410 = vpow2.f32 %v10286_v63  ;;  %v10280_v25 = vsub.f32 %v10248_v60, %v10266_v43  ;;  %v10279_v31 = vsub.f32 %v10247_v46, %v10263_v54 }
0x28e9   :  { %19412 = vpow2.f32 %v10288_v14 }
0x28ea   :  { %v10292_v32 = vmul.f32 1.442695, %v10280_v25  ;;  %v10290_v33 = vmul.f32 1.442695, %v10279_v31 }
0x28eb   :  { %v10272_v4 = vpop.xlane.xlu0 %10271  ;;  %v10269_v39 = vpop.xlane.xlu1 %10268 }
0x28ec   :  { %19414 = vpow2.f32 %v10292_v32  ;;  %v10282_v36 = vsub.f32 %v10250_v57, %v10272_v4  ;;  %v10281_v48 = vsub.f32 %v10249_v2, %v10269_v39 }
0x28ed   :  { %19416 = vpow2.f32 %v10290_v33 }
0x28ee   :  { %v19409_v50 = vpop.eup %19408  ;;  %v10296_v53 = vmul.f32 1.442695, %v10282_v36  ;;  %v10294_v56 = vmul.f32 1.442695, %v10281_v48 }
0x28ef   :  { %v10275_v49 = vpop.xlane.xlu1 %10274  ;;  %v10300_v7 = vsel %vm4575_vm13, %v19409_v50, 0.0 }
0x28f0   :  { %19418 = vpow2.f32 %v10296_v53  ;;  %v10283_v47 = vsub.f32 %v10251_v28, %v10275_v49  ;;  %10301 = vadd.xlane.f32.xlu0 %v10300_v7 }
0x28f1   :  { %19420 = vpow2.f32 %v10294_v56 }
0x28f2   :  { %v19411_v59 = vpop.eup %19410  ;;  %v10298_v60 = vmul.f32 1.442695, %v10283_v47 }
0x28f3   :  { %v19413_v29 = vpop.eup %19412  ;;  %v10303_v8 = vsel %vm4575_vm13, %v19411_v59, 0.0 }
0x28f4   :  { %19422 = vpow2.f32 %v10298_v60  ;;  %v10306_v41 = vsel %vm4575_vm13, %v19413_v29, 0.0  ;;  %10304 = vadd.xlane.f32.xlu1 %v10303_v8 }
0x28f5   :  { %10307 = vadd.xlane.f32.xlu0 %v10306_v41 }
0x28f6   :  { %v19415_v44 = vpop.eup %19414 }
0x28f7   :  { %v19417_v46 = vpop.eup %19416  ;;  %v10312_v51 = vsel %vm4575_vm13, %v19415_v44, 0.0 }
0x28f8   :  { %v10309_v52 = vsel %vm4575_vm13, %v19417_v46, 0.0 }
0x28f9   :  { %10313 = vadd.xlane.f32.xlu0 %v10312_v51  ;;  %10310 = vadd.xlane.f32.xlu1 %v10309_v52 }
0x28fa   :  { %v19419_v57 = vpop.eup %19418 }
0x28fb   :  { %v19421_v61 = vpop.eup %19420  ;;  %v10318_v62 = vsel %vm4575_vm13, %v19419_v57, 0.0 }
0x28fc   :  { %v10315_v15 = vsel %vm4575_vm13, %v19421_v61, 0.0 }
0x28fd   :  { %10319 = vadd.xlane.f32.xlu0 %v10318_v62  ;;  %10316 = vadd.xlane.f32.xlu1 %v10315_v15 }
0x28fe   :  { %v19423_v0 = vpop.eup %19422 }
0x28ff   :  { %v10321_v2 = vsel %vm4575_vm13, %v19423_v0, 0.0 }
0x2901   :  { %10322 = vadd.xlane.f32.xlu1 %v10321_v2  ;;  %v11161_v2 = vld [vmem:[%s21887_s3 + $0x338] sm:$0xff] }
0x297d   :  { %v10302_v5 = vpop.xlane.xlu0 %10301 }
0x297e   :  { %19424 = vrcp.f32 %v10302_v5 }
0x2981   :  { %v10305_v1 = vpop.xlane.xlu1 %10304 }
0x2982   :  { %v10308_v18 = vpop.xlane.xlu0 %10307  ;;  %19426 = vrcp.f32 %v10305_v1  ;;  %v11162_v1 = vld [vmem:[%s21887_s3 + $0x340] sm:$0xff] }
0x2983   :  { %19428 = vrcp.f32 %v10308_v18  ;;  %v11163_v18 = vld [vmem:[%s21887_s3 + $0x348] sm:$0xff] }
0x2986   :  { %v10314_v55 = vpop.xlane.xlu0 %10313  ;;  %v10311_v28 = vpop.xlane.xlu1 %10310 }
0x2987   :  { %19430 = vrcp.f32 %v10314_v55  ;;  %v19070_v55 = vpack.c.bf16 %v11163_v18, %v11162_v1 }
0x2988   :  { %v19425_v17 = vpop.eup %19424  ;;  %19432 = vrcp.f32 %v10311_v28 }
0x2989   :  { %v10332_v13 = vmul.f32 %v19425_v17, %v19409_v50 }
0x298a   :  { %v10320_v26 = vpop.xlane.xlu0 %10319  ;;  %v10317_v27 = vpop.xlane.xlu1 %10316 }
0x298b   :  { %19434 = vrcp.f32 %v10320_v26  ;;  %18371 = vmatmul.mubr.msk.f32.vlgmr.msra.gmra.mrb[104].mxu0 %vm4664_vm14, %v10332_v13 }
0x298c   :  { %v19427_v11 = vpop.eup %19426  ;;  %19436 = vrcp.f32 %v10317_v27  ;;  %18379 = vmatpush3.msk.msra.mxu0 %vm4668_vm12, %v20842_v16  ;;  %18380 = vmatprep.mubr.msk.f32.mxu0 %vm19515_vm2, %v19514_v22 }
0x298d   :  { %v19429_v20 = vpop.eup %19428  ;;  %v10333_v21 = vmul.f32 %v19427_v11, %v19411_v59  ;;  %18388 = vmatprep.subr.mxu0 %v19514_v22 }
0x298e   :  { %v10334_v38 = vmul.f32 %v19429_v20, %v19413_v29  ;;  %v10323_v45 = vpop.xlane.xlu1 %10322 }
0x298f   :  { %19438 = vrcp.f32 %v10323_v45  ;;  %18376 = vmatmul.mubr.msk.f32.vlgmr.msra.gmra.mrb[110].mxu1 %vm4664_vm14, %v10333_v21  ;;  %v16975_v45 = vld [vmem:[%s21889_s4 + $0x51] ss:$0 sm:$0xff] }
0x2990   :  { %18381 = vmatmul.mubr.msk.f32.vlgmr.msra.gmra.mrb[106].mxu0 %vm4664_vm14, %v10334_v38  ;;  %18384 = vmatpush3.msk.msra.mxu1 %vm4668_vm12, %v20848_v10 }
0x2991   :  { %v19431_v63 = vpop.eup %19430  ;;  %18389 = vmatpush3.msk.msra.mxu0 %vm4668_vm12, %v20832_v9  ;;  %18385 = vmatprep.mubr.msk.f32.mxu1 %vm19515_vm2, %v19514_v22 }
0x2992   :  { %v19433_v16 = vpop.eup %19432  ;;  %v10336_v14 = vmul.f32 %v19431_v63, %v19415_v44  ;;  %18390 = vmatprep.mubr.msk.f32.mxu0 %vm19515_vm2, %v19514_v22  ;;  %18393 = vmatprep.subr.mxu1 %v19514_v22 }
0x2993   :  { %v10335_v43 = vmul.f32 %v19433_v16, %v19417_v46  ;;  %18398 = vmatprep.subr.mxu0 %v19514_v22 }
0x2994   :  { %18391 = vmatmul.mubr.msk.f32.vlgmr.msra.gmra.mrb[108].mxu0 %vm4664_vm14, %v10336_v14 }
0x2995   :  { %v19435_v10 = vpop.eup %19434  ;;  %18386 = vmatmul.mubr.msk.f32.vlgmr.msra.gmra.mrb[112].mxu1 %vm4664_vm14, %v10335_v43  ;;  %18399 = vmatpush3.msk.msra.mxu0 %vm4668_vm12, %v20839_v3 }
0x2996   :  { %v19437_v9 = vpop.eup %19436  ;;  %v10338_v54 = vmul.f32 %v19435_v10, %v19419_v57  ;;  %18394 = vmatpush3.msk.msra.mxu1 %vm4668_vm12, %v20836_v6  ;;  %18395 = vmatprep.mubr.msk.f32.mxu1 %vm19515_vm2, %v19514_v22  ;;  %v10948_v6 = vld [vmem:[%s21887_s3 + $0x698] sm:$0xff] }
0x2997   :  { %v10337_v25 = vmul.f32 %v19437_v9, %v19421_v61  ;;  %18400 = vmatprep.mubr.msk.f32.mxu0 %vm19515_vm2, %v19514_v22  ;;  %18403 = vmatprep.subr.mxu1 %v19514_v22 }
0x2998   :  { %18401 = vmatmul.mubr.msk.f32.vlgmr.msra.gmra.mrb[110].mxu0 %vm4664_vm14, %v10338_v54  ;;  %18408 = vmatprep.subr.mxu0 %v10948_v6 }
0x2999   :  { %v19439_v31 = vpop.eup %19438  ;;  %18396 = vmatmul.mubr.msk.f32.vlgmr.msra.gmra.mrb[114].mxu1 %vm4664_vm14, %v10337_v25  ;;  %18409 = vmatpush3.msra.mxu0 %v10948_v6 }
0x299a   :  { %v10339_v3 = vmul.f32 %v19439_v31, %v19423_v0  ;;  %18404 = vmatpush3.msk.msra.mxu1 %vm4668_vm12, %v20845_v24  ;;  %18405 = vmatprep.mubr.msk.f32.mxu1 %vm19515_vm2, %v19514_v22  ;;  %v11160_v0 = vld [vmem:[%s21887_s3 + $0x330] sm:$0xff] }
0x299b   :  { %v19066_v5 = vpack.c.bf16 %v11161_v2, %v11160_v0 }
0x299d   :  { %18406 = vmatmul.mubr.msk.f32.vlgmr.msra.gmra.mrb[116].mxu1 %vm4664_vm14, %v10339_v3  ;;  %19067 = vmatprep.subr.bf16.mxu1 %v19066_v5 }
0x299e   :  { %19069 = vmatpush3.bf16.msra.mxu1 %v19066_v5 }
0x299f   :  { %19071 = vmatprep.subr.bf16.mxu1 %v19070_v55 }
0x29a2   :  { %19073 = vmatpush3.bf16.msra.mxu1 %v19070_v55 }
0x2a5e   :  { %v10412_v32 = vpop.f32.mrb[104].mxu0 }
0x2a5f   :  { %v18372_v33 = vpop.f32.mrb[105].mxu0 }
0x2a62   :  { %v10488_v4 = vpop.f32.mrb[110].mxu1 }
0x2a63   :  { %v10957_v39 = vcombine.low %v10412_v32, %v10488_v4  ;;  %v10564_v36 = vpop.f32.mrb[106].mxu0  ;;  %v18377_v48 = vpop.f32.mrb[111].mxu1  ;;  %v21053_v32 = vsub.s32 0, %v19987_v19 }
0x2a64   :  { %v18382_v50 = vpop.f32.mrb[107].mxu0 }
0x2a65   :  { %v10965_v47 = vrot.slane %v10957_v39, %v20008_v23 }
0x2a67   :  { %v10716_v53 = vpop.f32.mrb[108].mxu0 }
0x2a68   :  { %v10640_v24 = vpop.f32.mrb[112].mxu1  ;;  %v18392_v56 = vpop.f32.mrb[109].mxu0 }
0x2a69   :  { %v10958_v49 = vcombine.low %v10564_v36, %v10640_v24  ;;  %v18387_v7 = vpop.f32.mrb[113].mxu1 }
0x2a6b   :  { %v10972_v59 = vrot.slane %v10958_v49, %v20008_v23  ;;  %v10868_v60 = vpop.f32.mrb[110].mxu0 }
0x2a6c   :  { %v10792_v29 = vpop.f32.mrb[114].mxu1  ;;  %v18402_v8 = vpop.f32.mrb[111].mxu0 }
0x2a6d   :  { %v10973_v41 = vcombine.low %v10965_v47, %v10972_v59  ;;  %v10974_v44 = vcombine.low %v10716_v53, %v10792_v29  ;;  %v18397_v46 = vpop.f32.mrb[115].mxu1 }
0x2a6f   :  { %18410 = vmatprep.mubr.msk.f32.mxu0 %vm384_vm3, %v10973_v41  ;;  %v10982_v61 = vrot.slane %v10974_v44, %v20008_v23 }
0x2a70   :  { %v10944_v51 = vpop.f32.mrb[116].mxu1 }
0x2a71   :  { %v10975_v52 = vcombine.low %v10868_v60, %v10944_v51  ;;  %v18407_v57 = vpop.f32.mrb[117].mxu1 }
0x2a73   :  { %v10989_v62 = vrot.slane %v10975_v52, %v20008_v23 }
0x2a75   :  { %v10990_v15 = vcombine.low %v10982_v61, %v10989_v62 }
0x2a77   :  { %18411 = vmatmul.mubr.msk.f32.vlgmr.msra.gmra.mrb[112].mxu0 %vm384_vm3, %v10990_v15 }
0x2b4a   :  { %v18412_v28 = vpop.f32.mrb[112].mxu0 }
0x2b4b   :  { %v11089_v17 = vcombine.high %v18412_v28, %v18412_v28  ;;  %v11096_v13 = vrot.slane %v18412_v28, %v20008_v23  ;;  %v11061_v26 = vpop.f32.mrb[113].mxu0 }
0x2b4c   :  { %v11072_v27 = vcombine.high %v11061_v26, %v11061_v26  ;;  %v11079_v11 = vrot.slane %v11061_v26, %v20008_v23 }
0x2b4d   :  { %v11103_v20 = vrot.slane %v11089_v17, %v20008_v23  ;;  %v11104_v21 = vcombine.high %v11096_v13, %v11096_v13  ;;  %v11118_v38 = vadd.f32 %v11096_v13, %v20854_v30 }
0x2b4e   :  { %v11086_v63 = vrot.slane %v11072_v27, %v20008_v23  ;;  %v11087_v16 = vcombine.high %v11079_v11, %v11079_v11  ;;  %v11114_v14 = vadd.f32 %v11079_v11, %v20858_v12 }
0x2b4f   :  { %v11105_v43 = vcombine.high %v11103_v20, %v11103_v20  ;;  %v11119_v10 = vadd.f32 %v11104_v21, %v20861_v34  ;;  %v11120_v9 = vadd.f32 %v11103_v20, %v20864_v35  ;;  %v11131_v6 = vadd.f32 %v16975_v45, %v11118_v38  ;;  %v11328_v21 = vld [vmem:[%s21887_s3 + $0x1b0] sm:$0xff]  ;;  %v11329_v38 = vld [vmem:[%s21887_s3 + $0x1b8] sm:$0xff] }
0x2b50   :  { %v11088_v54 = vcombine.high %v11086_v63, %v11086_v63  ;;  %v11115_v25 = vadd.f32 %v11087_v16, %v20867_v37  ;;  %v11116_v31 = vadd.f32 %v11086_v63, %v20870_v58  ;;  %v21049_v30 = vadd.f32 %v16975_v45, %v11114_v14  ;;  %v11503_v16 = vld [vmem:[%s21887_s3 + $0x1d8] sm:$0xff] }
0x2b51   :  { %v11121_v3 = vadd.f32 %v11105_v43, %v20873_v40  ;;  %v11132_v34 = vadd.f32 %v16975_v45, %v11119_v10  ;;  %v11133_v36 = vadd.f32 %v16975_v45, %v11120_v9  ;;  %v16979_v48 = vrot.slane %v11131_v6, 9  ;;  %v11418_v43 = vld [vmem:[%s21887_s3 + $0x1c0] sm:$0xff]  ;;  %v11419_v10 = vld [vmem:[%s21887_s3 + $0x1c8] sm:$0xff] }
0x2b52   :  { %v11117_v12 = vadd.f32 %v11088_v54, %v20876_v42  ;;  %v11128_v33 = vadd.f32 %v16975_v45, %v11115_v25  ;;  %v11129_v4 = vadd.f32 %v16975_v45, %v11116_v31  ;;  %v11143_v35 = vrot.slane %v21049_v30, 7  ;;  %v16985_v54 = vld [vmem:[%s21889_s4 + $0x36] ss:$0 sm:$0xff] }
0x2b53   :  { %v11134_v37 = vadd.f32 %v16975_v45, %v11121_v3  ;;  %v11168_v19 = vrot.slane %v21049_v30, %v21053_v32  ;;  %v16980_v7 = vrot.slane %v11132_v34, 9  ;;  %v16981_v29 = vrot.slane %v11133_v36, 9 }
0x2b54   :  { %v11130_v39 = vadd.f32 %v16975_v45, %v11117_v12  ;;  %v16976_v58 = vrot.slane %v11128_v33, 9  ;;  %v21057_v50 = vrot.slane %v11143_v35, 2  ;;  %v16977_v53 = vrot.slane %v11129_v4, 9  ;;  %v11502_v45 = vld [vmem:[%s21887_s3 + $0x1d0] sm:$0xff] }
0x2b55   :  { %v11172_v24 = vrot.slane %v11128_v33, %v21053_v32  ;;  %v11176_v42 = vrot.slane %v11129_v4, %v21053_v32  ;;  %v16982_v41 = vrot.slane %v11134_v37, 9  ;;  %v11184_v44 = vrot.slane %v11131_v6, %v21053_v32 }
0x2b56   :  { %v16978_v40 = vrot.slane %v11130_v39, 9  ;;  %v11180_v56 = vrot.slane %v11130_v39, %v21053_v32  ;;  %v11204_v49 = vrot.slane %v16976_v58, %v21053_v32  ;;  %v11200_v47 = vrot.slane %v21057_v50, %v21053_v32  ;;  %v16991_v39 = vld [vmem:[%s21889_s4 + $0x1d] ss:$0 sm:$0xff]  ;;  %v16994_v58 = vld [vmem:[%s21889_s4 + $0x1e] ss:$0 sm:$0xff] }
0x2b57   :  { %v11208_v59 = vrot.slane %v16977_v53, %v21053_v32  ;;  %v11229_v8 = vsel %vm3654_vm5, %v11172_v24, %v11168_v19  ;;  %v11188_v52 = vrot.slane %v11132_v34, %v21053_v32  ;;  %v11216_v57 = vrot.slane %v16979_v48, %v21053_v32 }
0x2b58   :  { %v11212_v60 = vrot.slane %v16978_v40, %v21053_v32  ;;  %v11230_v46 = vsel %vm3657_vm6, %v11176_v42, %v11229_v8  ;;  %v11236_v51 = vsel %vm3654_vm5, %v11204_v49, %v11200_v47  ;;  %v11192_v15 = vrot.slane %v11133_v36, %v21053_v32  ;;  %v16988_v36 = vld [vmem:[%s21889_s4 + $0x1c] ss:$0 sm:$0xff] }
0x2b59   :  { %v11237_v61 = vsel %vm3657_vm6, %v11208_v59, %v11236_v51  ;;  %v11231_v62 = vsel %vm3660_vm7, %v11180_v56, %v11230_v46  ;;  %v11220_v0 = vrot.slane %v16980_v7, %v21053_v32  ;;  %v11224_v1 = vrot.slane %v16981_v29, %v21053_v32 }
0x2b5a   :  { %v11232_v2 = vsel %vm3663_vm8, %v11184_v44, %v11231_v62  ;;  %v11238_v5 = vsel %vm3660_vm7, %v11212_v60, %v11237_v61  ;;  %v11196_v18 = vrot.slane %v11134_v37, %v21053_v32  ;;  %v11228_v13 = vrot.slane %v16982_v41, %v21053_v32 }
0x2b5b   :  { %v11233_v55 = vsel %vm3666_vm9, %v11188_v52, %v11232_v2  ;;  %v11239_v28 = vsel %vm3663_vm8, %v11216_v57, %v11238_v5  ;;  %v19074_v63 = vpack.c.bf16 %v11329_v38, %v11328_v21  ;;  %v19082_v14 = vpack.c.bf16 %v11503_v16, %v11502_v45  ;;  %v11990_v2 = vld [vmem:[%s21887_s3 + $0x1e8] sm:$0xff]  ;;  %v11991_v5 = vld [vmem:[%s21887_s3 + $0x1f0] sm:$0xff]  ;;  %v12074_v38 = vld [vmem:[%s21887_s3 + $0x1f8] sm:$0xff] }
0x2b5c   :  { %v11234_v17 = vsel %vm3669_vm10, %v11192_v15, %v11233_v55  ;;  %v11240_v26 = vsel %vm3666_vm9, %v11220_v0, %v11239_v28  ;;  %v19078_v9 = vpack.c.bf16 %v11419_v10, %v11418_v43  ;;  %v12075_v45 = vld [vmem:[%s21887_s3 + $0x200] sm:$0xff] }
0x2b5d   :  { %v11235_v27 = vsel %vm3672_vm11, %v11196_v18, %v11234_v17  ;;  %v11241_v11 = vsel %vm3669_vm10, %v11224_v1, %v11240_v26  ;;  %19075 = vmatprep.subr.bf16.mxu0 %v19074_v63  ;;  %19083 = vmatprep.subr.bf16.mxu1 %v19082_v14  ;;  %v19086_v1 = vpack.c.bf16 %v11991_v5, %v11990_v2  ;;  %v11908_v18 = vld [vmem:[%s21887_s3 + $0x1e0] sm:$0xff]  ;;  %v12158_v17 = vld [vmem:[%s21887_s3 + $0x208] sm:$0xff] }
0x2b5e   :  { %18421 = vmatprep.mubr.msk.f32.mxu1 %vm37_vm0, %v11235_v27  ;;  %v11242_v20 = vsel %vm3672_vm11, %v11228_v13, %v11241_v11  ;;  %19077 = vmatpush3.bf16.msra.mxu0 %v19074_v63  ;;  %v12159_v13 = vld [vmem:[%s21887_s3 + $0x210] sm:$0xff]  ;;  %v19090_v63 = vpack.c.bf16 %v12075_v45, %v12074_v38 }
0x2b5f   :  { %18422 = vmatmul.mubr.msk.f32.vlgmr.msra.gmra.mrb[118].mxu1 %vm37_vm0, %v11242_v20  ;;  %19079 = vmatprep.subr.bf16.mxu0 %v19078_v9  ;;  %v19094_v20 = vpack.c.bf16 %v12159_v13, %v12158_v17  ;;  %v17020_v13 = vld [vmem:[%s21889_s4 + $0x22] ss:$0 sm:$0xff] }
0x2b60   :  { %19085 = vmatpush3.bf16.msra.mxu1 %v19082_v14 }
0x2b61   :  { %18450 = vmatprep.subr.mxu1 %v19514_v22 }
0x2c32   :  { %v18423_v25 = vpop.f32.mrb[118].mxu1 }
0x2c33   :  { %v11313_v31 = vpop.f32.mrb[119].mxu1  ;;  %v21117_v6 = vadd.f32 %v18423_v25, %v16985_v54 }
0x2c34   :  { %v21115_v3 = vadd.f32 %v16985_v54, %v11313_v31 }
0x2c36   :  { %18428 = vmatprep.mubr.msk.f32.mxu0 %vm128_vm1, %v21115_v3  ;;  %18442 = vmatprep.mubr.msk.f32.mxu1 %vm128_vm1, %v21115_v3 }
0x2c37   :  { %18429 = vmatmul.mubr.msk.f32.vlgmr.msra.gmra.mrb[114].mxu0 %vm128_vm1, %v21117_v6  ;;  %18443 = vmatmul.mubr.msk.f32.vlgmr.msra.gmra.mrb[120].mxu1 %vm128_vm1, %v21117_v6 }
0x2c38   :  { %19081 = vmatpush3.bf16.msra.mxu0 %v19078_v9  ;;  %18435 = vmatprep.mubr.msk.f32.mxu0 %vm128_vm1, %v21115_v3 }
0x2c39   :  { %18445 = vmatprep.subr.mxu0 %v19514_v22  ;;  %18452 = vmatprep.mubr.msk.f32.mxu1 %vm19515_vm2, %v19514_v22 }
0x2c3b   :  { %18436 = vmatmul.mubr.msk.f32.vlgmr.msra.gmra.mrb[116].mxu0 %vm128_vm1, %v21117_v6 }
0x2c3c   :  { %18447 = vmatprep.mubr.msk.f32.mxu0 %vm19515_vm2, %v19514_v22 }
0x2d0a   :  { %v18430_v12 = vpop.f32.mrb[114].mxu0  ;;  %v18444_v33 = vpop.f32.mrb[120].mxu1 }
0x2d0b   :  { %v11403_v4 = vpop.f32.mrb[115].mxu0  ;;  %v11571_v34 = vpop.f32.mrb[121].mxu1  ;;  %v11417_v40 = vadd.f32 %v18430_v12, %v16988_v36  ;;  %v11585_v19 = vadd.f32 %v18444_v33, %v16994_v58  ;;  %v17008_v12 = vld [vmem:[%s21889_s4 + $0x20] ss:$0 sm:$0xff] }
0x2d0c   :  { %v11416_v24 = vadd.f32 %v16988_v36, %v11403_v4  ;;  %v11584_v42 = vadd.f32 %v16994_v58, %v11571_v34  ;;  %v17005_v4 = vld [vmem:[%s21889_s4 + $0x1f] ss:$0 sm:$0xff] }
0x2d0e   :  { %v18437_v35 = vpop.f32.mrb[116].mxu0 }
0x2d0f   :  { %v11501_v37 = vadd.f32 %v18437_v35, %v16991_v39  ;;  %v11487_v48 = vpop.f32.mrb[117].mxu0  ;;  %v17011_v35 = vld [vmem:[%s21889_s4 + $0x21] ss:$0 sm:$0xff] }
0x2d10   :  { %v11500_v53 = vadd.f32 %v16991_v39, %v11487_v48 }
0x2d11   :  { %18451 = vmatpush3.xpose.msk.msra.mxu1 %vm384_vm3, %v11501_v37 }
0x2d12   :  { %18446 = vmatpush3.xpose.msk.msra.mxu0 %vm384_vm3, %v11500_v53  ;;  %18460 = vmatprep.subr.mxu1 %v19514_v22 }
0x2d13   :  { %18455 = vmatprep.subr.mxu0 %v19514_v22 }
0x2d14   :  { %18453 = vmatmul.mubr.msk.f32.vlgmr.msra.gmra.mrb[122].mxu1 %vm384_vm3, %v11417_v40 }
0x2d15   :  { %18448 = vmatmul.mubr.msk.f32.vlgmr.msra.gmra.mrb[118].mxu0 %vm384_vm3, %v11416_v24  ;;  %18461 = vmatpush3.msra.mxu1 %v11585_v19 }
0x2d16   :  { %18456 = vmatpush3.msra.mxu0 %v11584_v42  ;;  %18462 = vmatprep.mubr.msk.f32.mxu1 %vm19515_vm2, %v19514_v22 }
0x2d17   :  { %18457 = vmatprep.mubr.msk.f32.mxu0 %vm19515_vm2, %v19514_v22  ;;  %19087 = vmatprep.subr.bf16.mxu1 %v19086_v1 }
0x2d18   :  { %18465 = vmatprep.subr.mxu0 %v11908_v18 }
0x2de7   :  { %v11734_v56 = vpop.f32.mrb[122].mxu1 }
0x2de8   :  { %v11739_v49 = vmul.f32 0.35355338, %v11734_v56  ;;  %v11658_v7 = vpop.f32.mrb[118].mxu0  ;;  %v18454_v47 = vpop.f32.mrb[123].mxu1 }
0x2de9   :  { %v11738_v59 = vmul.f32 0.35355338, %v11658_v7  ;;  %v18449_v60 = vpop.f32.mrb[119].mxu0 }
0x2dea   :  { %v11743_v29 = vsel %vm384_vm3, %v11739_v49, -inf }
0x2deb   :  { %11744 = vmax.xlane.f32.xlu1 %v11743_v29  ;;  %v11740_v8 = vsel %vm384_vm3, %v11738_v59, -inf }
0x2dec   :  { %11741 = vmax.xlane.f32.xlu0 %v11740_v8 }
0x2e78   :  { %v11745_v41 = vpop.xlane.xlu1 %11744 }
0x2e79   :  { %v11747_v44 = vsub.f32 %v11739_v49, %v11745_v41  ;;  %v11742_v46 = vpop.xlane.xlu0 %11741 }
0x2e7a   :  { %v11746_v51 = vsub.f32 %v11738_v59, %v11742_v46 }
0x2e7b   :  { %v11750_v52 = vmul.f32 1.442695, %v11747_v44 }
0x2e7c   :  { %v11748_v57 = vmul.f32 1.442695, %v11746_v51 }
0x2e7d   :  { %19440 = vpow2.f32 %v11750_v52 }
0x2e7e   :  { %19442 = vpow2.f32 %v11748_v57 }
0x2e87   :  { %v19441_v61 = vpop.eup %19440 }
0x2e88   :  { %v19443_v62 = vpop.eup %19442  ;;  %v11755_v15 = vsel %vm384_vm3, %v19441_v61, 0.0 }
0x2e89   :  { %11756 = vadd.xlane.f32.xlu1 %v11755_v15  ;;  %v11752_v0 = vsel %vm384_vm3, %v19443_v62, 0.0 }
0x2e8a   :  { %11753 = vadd.xlane.f32.xlu0 %v11752_v0 }
0x2f16   :  { %v11757_v55 = vpop.xlane.xlu1 %11756 }
0x2f17   :  { %19444 = vrcp.f32 %v11757_v55  ;;  %v11754_v28 = vpop.xlane.xlu0 %11753 }
0x2f18   :  { %19446 = vrcp.f32 %v11754_v28 }
0x2f21   :  { %v19445_v26 = vpop.eup %19444 }
0x2f22   :  { %v19447_v27 = vpop.eup %19446  ;;  %v11761_v11 = vmul.f32 %v19445_v26, %v19441_v61  ;;  %v12564_v61 = vld [vmem:[%s21887_s3 + $0x218] sm:$0xff] }
0x2f23   :  { %v11760_v21 = vmul.f32 %v19447_v27, %v19443_v62 }
0x2f24   :  { %18463 = vmatmul.mubr.msk.f32.vlgmr.msra.gmra.mrb[124].mxu1 %vm384_vm3, %v11761_v11 }
0x2f25   :  { %18458 = vmatmul.mubr.msk.f32.vlgmr.msra.gmra.mrb[120].mxu0 %vm384_vm3, %v11760_v21  ;;  %19089 = vmatpush3.bf16.msra.mxu1 %v19086_v1 }
0x2f26   :  { %18474 = vmatprep.mubr.msk.f32.mxu1 %vm128_vm1, %v21115_v3  ;;  %19095 = vmatprep.subr.bf16.mxu1 %v19094_v20 }
0x2f27   :  { %18466 = vmatpush3.msra.mxu0 %v11908_v18 }
0x2f28   :  { %18475 = vmatmul.mubr.msk.f32.vlgmr.msra.gmra.mrb[126].mxu1 %vm128_vm1, %v21117_v6  ;;  %19091 = vmatprep.subr.bf16.mxu0 %v19090_v63 }
0x2f29   :  { %19097 = vmatpush3.bf16.msra.mxu1 %v19094_v20  ;;  %18488 = vmatprep.mubr.msk.f32.mxu1 %vm128_vm1, %v21115_v3 }
0x2f2a   :  { %18496 = vmatprep.subr.mxu1 %v19514_v22 }
0x2f2c   :  { %18489 = vmatmul.mubr.msk.f32.vlgmr.msra.gmra.mrb[128].mxu1 %vm128_vm1, %v21117_v6 }
0x2f2d   :  { %18498 = vmatprep.mubr.msk.f32.mxu1 %vm19515_vm2, %v19514_v22 }
0x2ff7   :  { %v11904_v16 = vpop.f32.mrb[124].mxu1 }
0x2ff8   :  { %v11831_v14 = vpop.f32.mrb[120].mxu0  ;;  %v18464_v43 = vpop.f32.mrb[125].mxu1 }
0x2ff9   :  { %v18459_v10 = vpop.f32.mrb[121].mxu0  ;;  %18467 = vmatprep.mubr.msk.f32.mxu0 %vm384_vm3, %v11831_v14 }
0x2ffa   :  { %18468 = vmatmul.mubr.msk.f32.vlgmr.msra.gmra.mrb[122].mxu0 %vm384_vm3, %v11904_v16 }
0x2ffb   :  { %v18476_v9 = vpop.f32.mrb[126].mxu1  ;;  %19093 = vmatpush3.bf16.msra.mxu0 %v19090_v63  ;;  %18481 = vmatprep.mubr.msk.f32.mxu0 %vm128_vm1, %v21115_v3 }
0x2ffc   :  { %v12059_v54 = vpop.f32.mrb[127].mxu1  ;;  %18491 = vmatprep.subr.mxu0 %v19514_v22  ;;  %v12073_v37 = vadd.f32 %v18476_v9, %v17005_v4 }
0x2ffd   :  { %v12072_v48 = vadd.f32 %v17005_v4, %v12059_v54 }
0x2ffe   :  { %18482 = vmatmul.mubr.msk.f32.vlgmr.msra.gmra.mrb[124].mxu0 %vm128_vm1, %v21117_v6 }
0x2fff   :  { %v18490_v25 = vpop.f32.mrb[128].mxu1  ;;  %18493 = vmatprep.mubr.msk.f32.mxu0 %vm19515_vm2, %v19514_v22 }
0x3000   :  { %v12227_v31 = vpop.f32.mrb[129].mxu1  ;;  %v12241_v58 = vadd.f32 %v18490_v25, %v17011_v35 }
0x3001   :  { %v12240_v53 = vadd.f32 %v17011_v35, %v12227_v31 }
0x30d1   :  { %v18483_v33 = vpop.f32.mrb[124].mxu0 }
0x30d2   :  { %v12157_v34 = vadd.f32 %v18483_v33, %v17008_v12  ;;  %v12143_v39 = vpop.f32.mrb[125].mxu0  ;;  %v12698_v33 = vld [vmem:[%s21887_s3 + $0x228] sm:$0xff] }
0x30d3   :  { %v12156_v36 = vadd.f32 %v17008_v12, %v12143_v39 }
0x30d4   :  { %18497 = vmatpush3.xpose.msk.msra.mxu1 %vm384_vm3, %v12157_v34 }
0x30d5   :  { %18492 = vmatpush3.xpose.msk.msra.mxu0 %vm384_vm3, %v12156_v36  ;;  %18506 = vmatprep.subr.mxu1 %v19514_v22 }
0x30d6   :  { %18501 = vmatprep.subr.mxu0 %v19514_v22 }
0x30d7   :  { %18499 = vmatmul.mubr.msk.f32.vlgmr.msra.gmra.mrb[130].mxu1 %vm384_vm3, %v12073_v37 }
0x30d8   :  { %18494 = vmatmul.mubr.msk.f32.vlgmr.msra.gmra.mrb[126].mxu0 %vm384_vm3, %v12072_v48  ;;  %18507 = vmatpush3.msra.mxu1 %v12241_v58 }
0x30d9   :  { %18502 = vmatpush3.msra.mxu0 %v12240_v53  ;;  %18508 = vmatprep.mubr.msk.f32.mxu1 %vm19515_vm2, %v19514_v22  ;;  %v17021_v53 = vld [vmem:[%s21889_s4 + $0x23] ss:$0 sm:$0xff] }
0x30da   :  { %18503 = vmatprep.mubr.msk.f32.mxu0 %vm19515_vm2, %v19514_v22  ;;  %18511 = vmatprep.subr.mxu0 %v12564_v61 }
0x31aa   :  { %v12390_v40 = vpop.f32.mrb[130].mxu1 }
0x31ab   :  { %v12395_v19 = vmul.f32 0.35355338, %v12390_v40  ;;  %v12314_v24 = vpop.f32.mrb[126].mxu0  ;;  %v18500_v42 = vpop.f32.mrb[131].mxu1 }
0x31ac   :  { %v12394_v56 = vmul.f32 0.35355338, %v12314_v24  ;;  %v18495_v49 = vpop.f32.mrb[127].mxu0  ;;  %v17022_v42 = vld [vmem:[%s21889_s4 + $0x24] ss:$0 sm:$0xff] }
0x31ad   :  { %v12399_v7 = vsel %vm384_vm3, %v12395_v19, -inf }
0x31ae   :  { %12400 = vmax.xlane.f32.xlu1 %v12399_v7  ;;  %v12396_v47 = vsel %vm384_vm3, %v12394_v56, -inf }
0x31af   :  { %12397 = vmax.xlane.f32.xlu0 %v12396_v47 }
0x323b   :  { %v12401_v59 = vpop.xlane.xlu1 %12400 }
0x323c   :  { %v12403_v60 = vsub.f32 %v12395_v19, %v12401_v59  ;;  %v12398_v29 = vpop.xlane.xlu0 %12397  ;;  %v12805_v59 = vld [vmem:[%s21887_s3 + $0x230] sm:$0xff] }
0x323d   :  { %v12402_v8 = vsub.f32 %v12394_v56, %v12398_v29  ;;  %v12807_v29 = vld [vmem:[%s21887_s3 + $0x240] sm:$0xff] }
0x323e   :  { %v12406_v41 = vmul.f32 1.442695, %v12403_v60  ;;  %v12806_v60 = vld [vmem:[%s21887_s3 + $0x238] sm:$0xff] }
0x323f   :  { %v12404_v44 = vmul.f32 1.442695, %v12402_v8  ;;  %v19102_v8 = vpack.c.bf16 %v12806_v60, %v12805_v59 }
0x3240   :  { %19448 = vpow2.f32 %v12406_v41  ;;  %v12808_v41 = vld [vmem:[%s21887_s3 + $0x248] sm:$0xff] }
0x3241   :  { %19450 = vpow2.f32 %v12404_v44  ;;  %v19106_v44 = vpack.c.bf16 %v12808_v41, %v12807_v29 }
0x324a   :  { %v19449_v46 = vpop.eup %19448 }
0x324b   :  { %v19451_v51 = vpop.eup %19450  ;;  %v12411_v52 = vsel %vm384_vm3, %v19449_v46, 0.0 }
0x324c   :  { %12412 = vadd.xlane.f32.xlu1 %v12411_v52  ;;  %v12408_v57 = vsel %vm384_vm3, %v19451_v51, 0.0 }
0x324d   :  { %12409 = vadd.xlane.f32.xlu0 %v12408_v57  ;;  %v12811_v57 = vld [vmem:[%s21887_s3 + $0x260] sm:$0xff] }
0x32d9   :  { %v12413_v62 = vpop.xlane.xlu1 %12412 }
0x32da   :  { %19452 = vrcp.f32 %v12413_v62  ;;  %v12410_v15 = vpop.xlane.xlu0 %12409 }
0x32db   :  { %19454 = vrcp.f32 %v12410_v15  ;;  %v17025_v15 = vld [vmem:[%s21889_s4 + $0x25] ss:$0 sm:$0xff] }
0x32e4   :  { %v19453_v0 = vpop.eup %19452 }
0x32e5   :  { %v19455_v2 = vpop.eup %19454  ;;  %v12417_v5 = vmul.f32 %v19453_v0, %v19449_v46  ;;  %v12809_v46 = vld [vmem:[%s21887_s3 + $0x250] sm:$0xff] }
0x32e6   :  { %v12416_v1 = vmul.f32 %v19455_v2, %v19451_v51  ;;  %v12810_v51 = vld [vmem:[%s21887_s3 + $0x258] sm:$0xff] }
0x32e7   :  { %18509 = vmatmul.mubr.msk.f32.vlgmr.msra.gmra.mrb[132].mxu1 %vm384_vm3, %v12417_v5  ;;  %v19110_v52 = vpack.c.bf16 %v12810_v51, %v12809_v46 }
0x32e8   :  { %18504 = vmatmul.mubr.msk.f32.vlgmr.msra.gmra.mrb[128].mxu0 %vm384_vm3, %v12416_v1 }
0x32e9   :  { %18512 = vmatpush3.msra.mxu0 %v12564_v61  ;;  %v12812_v61 = vld [vmem:[%s21887_s3 + $0x268] sm:$0xff] }
0x32ea   :  { %19103 = vmatprep.subr.bf16.mxu0 %v19102_v8  ;;  %v19114_v62 = vpack.c.bf16 %v12812_v61, %v12811_v57 }
0x33ba   :  { %v12560_v18 = vpop.f32.mrb[132].mxu1 }
0x33bb   :  { %v12487_v55 = vpop.f32.mrb[128].mxu0  ;;  %v18510_v28 = vpop.f32.mrb[133].mxu1 }
0x33bc   :  { %v18505_v17 = vpop.f32.mrb[129].mxu0  ;;  %18513 = vmatprep.mubr.msk.f32.mxu0 %vm384_vm3, %v12487_v55 }
0x33bd   :  { %18514 = vmatmul.mubr.msk.f32.vlgmr.msra.gmra.mrb[122].mxu0 %vm384_vm3, %v12560_v18 }
0x33be   :  { %19105 = vmatpush3.bf16.msra.mxu0 %v19102_v8 }
0x33bf   :  { %19107 = vmatprep.subr.bf16.mxu0 %v19106_v44 }
0x33c2   :  { %19109 = vmatpush3.bf16.msra.mxu0 %v19106_v44 }
0x33c3   :  { %19111 = vmatprep.subr.bf16.mxu0 %v19110_v52 }
0x33c6   :  { %19113 = vmatpush3.bf16.msra.mxu0 %v19110_v52  ;;  %v17029_v52 = vld [vmem:[%s21889_s4 + $0x27] ss:$0 sm:$0xff] }
0x33c7   :  { %19115 = vmatprep.subr.bf16.mxu0 %v19114_v62 }
0x33ca   :  { %19117 = vmatpush3.bf16.msra.mxu0 %v19114_v62 }
0x33cb   :  { %18568 = vmatprep.subr.mxu0 %v19514_v22 }
0x3490   :  { %v18515_v26 = vpop.f32.mrb[122].mxu0 }
0x3491   :  { %v12654_v27 = vadd.f32 %v18515_v26, %v17020_v13  ;;  %v12637_v11 = vpop.f32.mrb[123].mxu0 }
0x3492   :  { %v12653_v20 = vadd.f32 %v17020_v13, %v12637_v11 }
0x3493   :  { %v12656_v21 = vadd.f32 %v12654_v27, %v21117_v6 }
0x3494   :  { %v12655_v38 = vadd.f32 %v12653_v20, %v21115_v3  ;;  %v12697_v3 = vld [vmem:[%s21887_s3 + $0x220] sm:$0xff] }
0x3495   :  { %v12662_v45 = vsel %vm128_vm1, %v12656_v21, 0.0  ;;  %v19098_v4 = vpack.c.bf16 %v12698_v33, %v12697_v3 }
0x3496   :  { %12663 = vadd.xlane.f32.xlu1 %v12662_v45  ;;  %v12659_v63 = vsel %vm128_vm1, %v12655_v38, 0.0 }
0x3497   :  { %12660 = vadd.xlane.f32.xlu0 %v12659_v63  ;;  %19099 = vmatprep.subr.bf16.mxu1 %v19098_v4 }
0x3498   :  { %19101 = vmatpush3.bf16.msra.mxu1 %v19098_v4 }
0x3523   :  { %v12664_v16 = vpop.xlane.xlu1 %12663 }
0x3524   :  { %v12666_v14 = vmul.f32 0.0625, %v12664_v16  ;;  %v12661_v43 = vpop.xlane.xlu0 %12660 }
0x3525   :  { %v12665_v10 = vmul.f32 0.0625, %v12661_v43 }
0x3526   :  { %v12668_v9 = vsub.f32 %v12656_v21, %v12666_v14 }
0x3527   :  { %v12667_v54 = vsub.f32 %v12655_v38, %v12665_v10 }
0x3528   :  { %v12670_v25 = vmul.f32 %v12668_v9, %v12668_v9 }
0x3529   :  { %v12669_v31 = vmul.f32 %v12667_v54, %v12667_v54 }
0x352a   :  { %v12674_v12 = vsel %vm128_vm1, %v12670_v25, 0.0 }
0x352b   :  { %12675 = vadd.xlane.f32.xlu1 %v12674_v12  ;;  %v12671_v6 = vsel %vm128_vm1, %v12669_v31, 0.0 }
0x352c   :  { %12672 = vadd.xlane.f32.xlu0 %v12671_v6 }
0x35b8   :  { %v12676_v34 = vpop.xlane.xlu1 %12675 }
0x35b9   :  { %v12678_v39 = vmul.f32 0.0625, %v12676_v34  ;;  %v12673_v35 = vpop.xlane.xlu0 %12672 }
0x35ba   :  { %v12677_v36 = vmul.f32 0.0625, %v12673_v35 }
0x35bb   :  { %v12680_v37 = vadd.f32 1e-05, %v12678_v39 }
0x35bc   :  { %v12679_v48 = vadd.f32 1e-05, %v12677_v36 }
0x35bd   :  { %19456 = vrsqrt.f32 %v12680_v37 }
0x35be   :  { %19458 = vrsqrt.f32 %v12679_v48 }
0x35c7   :  { %v19457_v58 = vpop.eup %19456 }
0x35c8   :  { %v19459_v40 = vpop.eup %19458  ;;  %v12684_v19 = vmul.f32 %v19457_v58, %v12668_v9 }
0x35c9   :  { %v12683_v24 = vmul.f32 %v19459_v40, %v12667_v54  ;;  %v17028_v54 = vld [vmem:[%s21889_s4 + $0x26] ss:$0 sm:$0xff] }
0x35ca   :  { %v12690_v56 = vmul.f32 %v17021_v53, %v12684_v19 }
0x35cb   :  { %v12689_v49 = vmul.f32 %v17021_v53, %v12683_v24 }
0x35cc   :  { %v12696_v47 = vadd.f32 %v17022_v42, %v12690_v56  ;;  %v12944_v56 = vld [vmem:[%s21887_s3 + $0x278] sm:$0xff] }
0x35cd   :  { %v12695_v7 = vadd.f32 %v17022_v42, %v12689_v49  ;;  %v12943_v42 = vld [vmem:[%s21887_s3 + $0x270] sm:$0xff] }
0x35ce   :  { %v19118_v49 = vpack.c.bf16 %v12944_v56, %v12943_v42  ;;  %v13606_v42 = vld [vmem:[%s21887_s3 + $0x2b0] sm:$0xff] }
0x35cf   :  { %18520 = vmatprep.mubr.msk.f32.mxu1 %vm128_vm1, %v12695_v7 }
0x35d0   :  { %18521 = vmatmul.mubr.msk.f32.vlgmr.msra.gmra.mrb[134].mxu1 %vm128_vm1, %v12696_v47  ;;  %19119 = vmatprep.subr.bf16.mxu1 %v19118_v49 }
0x35d1   :  { %19121 = vmatpush3.bf16.msra.mxu1 %v19118_v49  ;;  %v13523_v49 = vld [vmem:[%s21887_s3 + $0x2a0] sm:$0xff] }
0x36a3   :  { %v18522_v0 = vpop.f32.mrb[134].mxu1 }
0x36a4   :  { %v12786_v2 = vadd.f32 %v18522_v0, %v17025_v15  ;;  %v12772_v5 = vpop.f32.mrb[135].mxu1 }
0x36a5   :  { %v12785_v1 = vadd.f32 %v17025_v15, %v12772_v5  ;;  %v17030_v15 = vld [vmem:[%s21889_s4 + $0x28] ss:$0 sm:$0xff]  ;;  %v13117_v5 = vld [vmem:[%s21887_s3 + $0x290] sm:$0xff] }
0x36a6   :  { %v12790_v18 = vmul.f32 0.044715, %v12786_v2  ;;  %v12788_v43 = vmul.f32 0.5, %v12786_v2 }
0x36a7   :  { %v12789_v55 = vmul.f32 0.044715, %v12785_v1  ;;  %v12787_v16 = vmul.f32 0.5, %v12785_v1 }
0x36a8   :  { %v12792_v28 = vmul.f32 %v12790_v18, %v12786_v2 }
0x36a9   :  { %v12791_v17 = vmul.f32 %v12789_v55, %v12785_v1 }
0x36aa   :  { %v12794_v13 = vmul.f32 %v12792_v28, %v12786_v2 }
0x36ab   :  { %v12793_v26 = vmul.f32 %v12791_v17, %v12785_v1 }
0x36ac   :  { %v12796_v27 = vadd.f32 %v12794_v13, %v12786_v2 }
0x36ad   :  { %v12795_v11 = vadd.f32 %v12793_v26, %v12785_v1  ;;  %v13118_v1 = vld [vmem:[%s21887_s3 + $0x298] sm:$0xff]  ;;  %v17036_v26 = vld [vmem:[%s21889_s4 + $0x2a] ss:$0 sm:$0xff] }
0x36ae   :  { %v12798_v20 = vmul.f32 0.7978846, %v12796_v27  ;;  %v19126_v28 = vpack.c.bf16 %v13118_v1, %v13117_v5 }
0x36af   :  { %v12797_v21 = vmul.f32 0.7978846, %v12795_v11  ;;  %v17033_v11 = vld [vmem:[%s21889_s4 + $0x29] ss:$0 sm:$0xff] }
0x36b0   :  { %19460 = vtanh.f32 %v12798_v20 }
0x36b1   :  { %19462 = vtanh.f32 %v12797_v21 }
0x36ba   :  { %v19461_v38 = vpop.eup %19460 }
0x36bb   :  { %v19463_v45 = vpop.eup %19462  ;;  %v12802_v63 = vadd.f32 1.0, %v19461_v38 }
0x36bc   :  { %v12801_v14 = vadd.f32 1.0, %v19463_v45  ;;  %v17039_v45 = vld [vmem:[%s21889_s4 + $0x2b] ss:$0 sm:$0xff] }
0x36bd   :  { %v12804_v9 = vmul.f32 %v12802_v63, %v12788_v43 }
0x36be   :  { %v12803_v10 = vmul.f32 %v12801_v14, %v12787_v16 }
0x36c0   :  { %18539 = vmatprep.mubr.msk.f32.mxu0 %vm1614_vm4, %v12803_v10 }
0x36c1   :  { %18540 = vmatmul.mubr.msk.f32.vlgmr.msra.gmra.mrb[130].mxu0 %vm1614_vm4, %v12804_v9 }
0x36c2   :  { %18570 = vmatprep.mubr.msk.f32.mxu0 %vm19515_vm2, %v19514_v22 }
0x3794   :  { %v18541_v25 = vpop.f32.mrb[130].mxu0 }
0x3795   :  { %v12900_v31 = vadd.f32 %v18541_v25, %v17028_v54  ;;  %v12886_v12 = vpop.f32.mrb[131].mxu0 }
0x3796   :  { %v12899_v6 = vadd.f32 %v17028_v54, %v12886_v12 }
0x3797   :  { %v12902_v3 = vadd.f32 %v12900_v31, %v12696_v47  ;;  %v13034_v47 = vld [vmem:[%s21887_s3 + $0x288] sm:$0xff] }
0x3798   :  { %v12901_v33 = vadd.f32 %v12899_v6, %v12695_v7  ;;  %v13033_v7 = vld [vmem:[%s21887_s3 + $0x280] sm:$0xff] }
0x3799   :  { %v12908_v4 = vsel %vm128_vm1, %v12902_v3, 0.0  ;;  %v19122_v59 = vpack.c.bf16 %v13034_v47, %v13033_v7 }
0x379a   :  { %12909 = vadd.xlane.f32.xlu1 %v12908_v4  ;;  %v12905_v34 = vsel %vm128_vm1, %v12901_v33, 0.0 }
0x379b   :  { %12906 = vadd.xlane.f32.xlu0 %v12905_v34  ;;  %19123 = vmatprep.subr.bf16.mxu1 %v19122_v59 }
0x3827   :  { %v12910_v39 = vpop.xlane.xlu1 %12909 }
0x3828   :  { %v12912_v35 = vmul.f32 0.0625, %v12910_v39  ;;  %v12907_v36 = vpop.xlane.xlu0 %12906 }
0x3829   :  { %v12911_v37 = vmul.f32 0.0625, %v12907_v36 }
0x382a   :  { %v12914_v48 = vsub.f32 %v12902_v3, %v12912_v35 }
0x382b   :  { %v12913_v58 = vsub.f32 %v12901_v33, %v12911_v37 }
0x382c   :  { %v12916_v53 = vmul.f32 %v12914_v48, %v12914_v48 }
0x382d   :  { %v12915_v40 = vmul.f32 %v12913_v58, %v12913_v58 }
0x382e   :  { %v12920_v19 = vsel %vm128_vm1, %v12916_v53, 0.0 }
0x382f   :  { %12921 = vadd.xlane.f32.xlu1 %v12920_v19  ;;  %v12917_v24 = vsel %vm128_vm1, %v12915_v40, 0.0 }
0x3830   :  { %12918 = vadd.xlane.f32.xlu0 %v12917_v24  ;;  %v13605_v24 = vld [vmem:[%s21887_s3 + $0x2a8] sm:$0xff] }
0x3831   :  { %v19130_v56 = vpack.c.bf16 %v13606_v42, %v13605_v24 }
0x38bc   :  { %v12922_v60 = vpop.xlane.xlu1 %12921 }
0x38bd   :  { %v12924_v29 = vmul.f32 0.0625, %v12922_v60  ;;  %v12919_v8 = vpop.xlane.xlu0 %12918  ;;  %v13774_v60 = vld [vmem:[%s21887_s3 + $0x2d0] sm:$0xff] }
0x38be   :  { %v12923_v41 = vmul.f32 0.0625, %v12919_v8 }
0x38bf   :  { %v12926_v44 = vadd.f32 1e-05, %v12924_v29 }
0x38c0   :  { %v12925_v46 = vadd.f32 1e-05, %v12923_v41 }
0x38c1   :  { %19464 = vrsqrt.f32 %v12926_v44 }
0x38c2   :  { %19466 = vrsqrt.f32 %v12925_v46 }
0x38cb   :  { %v19465_v51 = vpop.eup %19464 }
0x38cc   :  { %v19467_v57 = vpop.eup %19466  ;;  %v12930_v61 = vmul.f32 %v19465_v51, %v12914_v48  ;;  %v13689_v51 = vld [vmem:[%s21887_s3 + $0x2b8] sm:$0xff] }
0x38cd   :  { %v12929_v62 = vmul.f32 %v19467_v57, %v12913_v58 }
0x38ce   :  { %v12936_v0 = vmul.f32 %v17029_v52, %v12930_v61 }
0x38cf   :  { %v12935_v2 = vmul.f32 %v17029_v52, %v12929_v62  ;;  %v13690_v52 = vld [vmem:[%s21887_s3 + $0x2c0] sm:$0xff] }
0x38d0   :  { %v21320_v55 = vadd.f32 %v17030_v15, %v12936_v0  ;;  %v19134_v57 = vpack.c.bf16 %v13690_v52, %v13689_v51 }
0x38d1   :  { %v21318_v18 = vadd.f32 %v17030_v15, %v12935_v2 }
0x38d3   :  { %18546 = vmatprep.mubr.msk.f32.mxu1 %vm128_vm1, %v21318_v18 }
0x38d4   :  { %18547 = vmatmul.mubr.msk.f32.vlgmr.msra.gmra.mrb[136].mxu1 %vm128_vm1, %v21320_v55 }
0x38d5   :  { %19125 = vmatpush3.bf16.msra.mxu1 %v19122_v59  ;;  %18553 = vmatprep.mubr.msk.f32.mxu1 %vm128_vm1, %v21318_v18  ;;  %v13773_v59 = vld [vmem:[%s21887_s3 + $0x2c8] sm:$0xff] }
0x38d6   :  { %19127 = vmatprep.subr.bf16.mxu1 %v19126_v28  ;;  %v19138_v44 = vpack.c.bf16 %v13774_v60, %v13773_v59  ;;  %v17065_v60 = vld [vmem:[%s21889_s4 + $0x2f] ss:$0 sm:$0xff] }
0x38d8   :  { %18554 = vmatmul.mubr.msk.f32.vlgmr.msra.gmra.mrb[138].mxu1 %vm128_vm1, %v21320_v55 }
0x38d9   :  { %19129 = vmatpush3.bf16.msra.mxu1 %v19126_v28  ;;  %18560 = vmatprep.mubr.msk.f32.mxu1 %vm128_vm1, %v21318_v18 }
0x38da   :  { %18563 = vmatprep.subr.mxu1 %v19514_v22 }
0x38dc   :  { %18561 = vmatmul.mubr.msk.f32.vlgmr.msra.gmra.mrb[140].mxu1 %vm128_vm1, %v21320_v55 }
0x38dd   :  { %18565 = vmatprep.mubr.msk.f32.mxu1 %vm19515_vm2, %v19514_v22 }
0x39a7   :  { %v18548_v17 = vpop.f32.mrb[136].mxu1 }
0x39a8   :  { %v13018_v13 = vpop.f32.mrb[137].mxu1  ;;  %v13032_v63 = vadd.f32 %v18548_v17, %v17033_v11  ;;  %v17053_v17 = vld [vmem:[%s21889_s4 + $0x2d] ss:$0 sm:$0xff] }
0x39a9   :  { %v13031_v14 = vadd.f32 %v17033_v11, %v13018_v13 }
0x39ab   :  { %v18555_v27 = vpop.f32.mrb[138].mxu1 }
0x39ac   :  { %v13116_v20 = vadd.f32 %v18555_v27, %v17036_v26  ;;  %v13102_v21 = vpop.f32.mrb[139].mxu1 }
0x39ad   :  { %v13115_v38 = vadd.f32 %v17036_v26, %v13102_v21  ;;  %v17050_v26 = vld [vmem:[%s21889_s4 + $0x2c] ss:$0 sm:$0xff] }
0x39ae   :  { %18569 = vmatpush3.xpose.msk.msra.mxu0 %vm384_vm3, %v13116_v20  ;;  %v17056_v20 = vld [vmem:[%s21889_s4 + $0x2e] ss:$0 sm:$0xff] }
0x39af   :  { %v18562_v16 = vpop.f32.mrb[140].mxu1  ;;  %18564 = vmatpush3.xpose.msk.msra.mxu1 %vm384_vm3, %v13115_v38  ;;  %18578 = vmatprep.subr.mxu0 %v19514_v22 }
0x39b0   :  { %v13200_v43 = vadd.f32 %v18562_v16, %v17039_v45  ;;  %v13186_v10 = vpop.f32.mrb[141].mxu1  ;;  %18573 = vmatprep.subr.mxu1 %v19514_v22 }
0x39b1   :  { %v13199_v9 = vadd.f32 %v17039_v45, %v13186_v10  ;;  %18571 = vmatmul.mubr.msk.f32.vlgmr.msra.gmra.mrb[132].mxu0 %vm384_vm3, %v13032_v63 }
0x39b2   :  { %18566 = vmatmul.mubr.msk.f32.vlgmr.msra.gmra.mrb[142].mxu1 %vm384_vm3, %v13031_v14  ;;  %18579 = vmatpush3.msra.mxu0 %v13200_v43 }
0x39b3   :  { %18574 = vmatpush3.msra.mxu1 %v13199_v9  ;;  %18580 = vmatprep.mubr.msk.f32.mxu0 %vm19515_vm2, %v19514_v22 }
0x39b4   :  { %18575 = vmatprep.mubr.msk.f32.mxu1 %vm19515_vm2, %v19514_v22  ;;  %19131 = vmatprep.subr.bf16.mxu0 %v19130_v56 }
0x39b5   :  { %18583 = vmatprep.subr.mxu1 %v13523_v49 }
0x3a84   :  { %v13349_v54 = vpop.f32.mrb[132].mxu0 }
0x3a85   :  { %v13354_v25 = vmul.f32 0.35355338, %v13349_v54  ;;  %v13273_v31 = vpop.f32.mrb[142].mxu1  ;;  %v18572_v12 = vpop.f32.mrb[133].mxu0 }
0x3a86   :  { %v13353_v6 = vmul.f32 0.35355338, %v13273_v31  ;;  %v18567_v3 = vpop.f32.mrb[143].mxu1 }
0x3a87   :  { %v13358_v33 = vsel %vm384_vm3, %v13354_v25, -inf }
0x3a88   :  { %13359 = vmax.xlane.f32.xlu1 %v13358_v33  ;;  %v13355_v4 = vsel %vm384_vm3, %v13353_v6, -inf }
0x3a89   :  { %13356 = vmax.xlane.f32.xlu0 %v13355_v4 }
0x3b15   :  { %v13360_v34 = vpop.xlane.xlu1 %13359 }
0x3b16   :  { %v13362_v39 = vsub.f32 %v13354_v25, %v13360_v34  ;;  %v13357_v35 = vpop.xlane.xlu0 %13356 }
0x3b17   :  { %v13361_v36 = vsub.f32 %v13353_v6, %v13357_v35 }
0x3b18   :  { %v13365_v37 = vmul.f32 1.442695, %v13362_v39 }
0x3b19   :  { %v13363_v48 = vmul.f32 1.442695, %v13361_v36 }
0x3b1a   :  { %19468 = vpow2.f32 %v13365_v37 }
0x3b1b   :  { %19470 = vpow2.f32 %v13363_v48 }
0x3b24   :  { %v19469_v58 = vpop.eup %19468 }
0x3b25   :  { %v19471_v53 = vpop.eup %19470  ;;  %v13370_v40 = vsel %vm384_vm3, %v19469_v58, 0.0 }
0x3b26   :  { %13371 = vadd.xlane.f32.xlu1 %v13370_v40  ;;  %v13367_v19 = vsel %vm384_vm3, %v19471_v53, 0.0 }
0x3b27   :  { %13368 = vadd.xlane.f32.xlu0 %v13367_v19 }
0x3bb3   :  { %v13372_v7 = vpop.xlane.xlu1 %13371 }
0x3bb4   :  { %19472 = vrcp.f32 %v13372_v7  ;;  %v13369_v47 = vpop.xlane.xlu0 %13368 }
0x3bb5   :  { %19474 = vrcp.f32 %v13369_v47 }
0x3bbe   :  { %v19473_v29 = vpop.eup %19472 }
0x3bbf   :  { %v19475_v8 = vpop.eup %19474  ;;  %v13376_v41 = vmul.f32 %v19473_v29, %v19469_v58  ;;  %v14179_v58 = vld [vmem:[%s21887_s3 + $0x2d8] sm:$0xff] }
0x3bc0   :  { %v13375_v46 = vmul.f32 %v19475_v8, %v19471_v53 }
0x3bc1   :  { %18581 = vmatmul.mubr.msk.f32.vlgmr.msra.gmra.mrb[134].mxu0 %vm384_vm3, %v13376_v41 }
0x3bc2   :  { %18576 = vmatmul.mubr.msk.f32.vlgmr.msra.gmra.mrb[144].mxu1 %vm384_vm3, %v13375_v46  ;;  %19133 = vmatpush3.bf16.msra.mxu0 %v19130_v56 }
0x3bc3   :  { %18592 = vmatprep.mubr.msk.f32.mxu0 %vm128_vm1, %v21318_v18  ;;  %19139 = vmatprep.subr.bf16.mxu0 %v19138_v44 }
0x3bc4   :  { %18584 = vmatpush3.msra.mxu1 %v13523_v49 }
0x3bc5   :  { %18593 = vmatmul.mubr.msk.f32.vlgmr.msra.gmra.mrb[136].mxu0 %vm128_vm1, %v21320_v55  ;;  %19135 = vmatprep.subr.bf16.mxu1 %v19134_v57 }
0x3bc6   :  { %19141 = vmatpush3.bf16.msra.mxu0 %v19138_v44  ;;  %18606 = vmatprep.mubr.msk.f32.mxu0 %vm128_vm1, %v21318_v18 }
0x3bc7   :  { %18614 = vmatprep.subr.mxu0 %v19514_v22 }
0x3bc9   :  { %18607 = vmatmul.mubr.msk.f32.vlgmr.msra.gmra.mrb[138].mxu0 %vm128_vm1, %v21320_v55 }
0x3bca   :  { %18616 = vmatprep.mubr.msk.f32.mxu0 %vm19515_vm2, %v19514_v22 }
0x3c94   :  { %v13519_v61 = vpop.f32.mrb[134].mxu0 }
0x3c95   :  { %v13446_v62 = vpop.f32.mrb[144].mxu1  ;;  %v18582_v15 = vpop.f32.mrb[135].mxu0 }
0x3c96   :  { %v18577_v0 = vpop.f32.mrb[145].mxu1  ;;  %18585 = vmatprep.mubr.msk.f32.mxu1 %vm384_vm3, %v13446_v62 }
0x3c97   :  { %18586 = vmatmul.mubr.msk.f32.vlgmr.msra.gmra.mrb[146].mxu1 %vm384_vm3, %v13519_v61 }
0x3c98   :  { %v18594_v2 = vpop.f32.mrb[136].mxu0  ;;  %19137 = vmatpush3.bf16.msra.mxu1 %v19134_v57  ;;  %18599 = vmatprep.mubr.msk.f32.mxu1 %vm128_vm1, %v21318_v18 }
0x3c99   :  { %v13674_v5 = vpop.f32.mrb[137].mxu0  ;;  %18609 = vmatprep.subr.mxu1 %v19514_v22  ;;  %v13688_v38 = vadd.f32 %v18594_v2, %v17050_v26 }
0x3c9a   :  { %v13687_v45 = vadd.f32 %v17050_v26, %v13674_v5 }
0x3c9b   :  { %18600 = vmatmul.mubr.msk.f32.vlgmr.msra.gmra.mrb[148].mxu1 %vm128_vm1, %v21320_v55 }
0x3c9c   :  { %v18608_v1 = vpop.f32.mrb[138].mxu0  ;;  %18611 = vmatprep.mubr.msk.f32.mxu1 %vm19515_vm2, %v19514_v22 }
0x3c9d   :  { %v13842_v28 = vpop.f32.mrb[139].mxu0  ;;  %v13856_v63 = vadd.f32 %v18608_v1, %v17056_v20 }
0x3c9e   :  { %v13855_v16 = vadd.f32 %v17056_v20, %v13842_v28 }
0x3d6e   :  { %v18601_v13 = vpop.f32.mrb[148].mxu1 }
0x3d6f   :  { %v13772_v27 = vadd.f32 %v18601_v13, %v17053_v17  ;;  %v13758_v11 = vpop.f32.mrb[149].mxu1  ;;  %v14313_v13 = vld [vmem:[%s21887_s3 + $0x2e8] sm:$0xff] }
0x3d70   :  { %v13771_v21 = vadd.f32 %v17053_v17, %v13758_v11 }
0x3d71   :  { %18615 = vmatpush3.xpose.msk.msra.mxu0 %vm384_vm3, %v13772_v27 }
0x3d72   :  { %18610 = vmatpush3.xpose.msk.msra.mxu1 %vm384_vm3, %v13771_v21  ;;  %18624 = vmatprep.subr.mxu0 %v19514_v22 }
0x3d73   :  { %18619 = vmatprep.subr.mxu1 %v19514_v22 }
0x3d74   :  { %18617 = vmatmul.mubr.msk.f32.vlgmr.msra.gmra.mrb[140].mxu0 %vm384_vm3, %v13688_v38 }
0x3d75   :  { %18612 = vmatmul.mubr.msk.f32.vlgmr.msra.gmra.mrb[150].mxu1 %vm384_vm3, %v13687_v45  ;;  %18625 = vmatpush3.msra.mxu0 %v13856_v63 }
0x3d76   :  { %18620 = vmatpush3.msra.mxu1 %v13855_v16  ;;  %18626 = vmatprep.mubr.msk.f32.mxu0 %vm19515_vm2, %v19514_v22  ;;  %v17066_v16 = vld [vmem:[%s21889_s4 + $0x30] ss:$0 sm:$0xff] }
0x3d77   :  { %18621 = vmatprep.mubr.msk.f32.mxu1 %vm19515_vm2, %v19514_v22  ;;  %18629 = vmatprep.subr.mxu1 %v14179_v58 }
0x3e47   :  { %v14005_v14 = vpop.f32.mrb[140].mxu0 }
0x3e48   :  { %v14010_v43 = vmul.f32 0.35355338, %v14005_v14  ;;  %v13929_v10 = vpop.f32.mrb[150].mxu1  ;;  %v18618_v9 = vpop.f32.mrb[141].mxu0 }
0x3e49   :  { %v14009_v54 = vmul.f32 0.35355338, %v13929_v10  ;;  %v18613_v25 = vpop.f32.mrb[151].mxu1  ;;  %v17067_v9 = vld [vmem:[%s21889_s4 + $0x31] ss:$0 sm:$0xff] }
0x3e4a   :  { %v14014_v31 = vsel %vm384_vm3, %v14010_v43, -inf }
0x3e4b   :  { %14015 = vmax.xlane.f32.xlu1 %v14014_v31  ;;  %v14011_v12 = vsel %vm384_vm3, %v14009_v54, -inf }
0x3e4c   :  { %14012 = vmax.xlane.f32.xlu0 %v14011_v12 }
0x3ed8   :  { %v14016_v6 = vpop.xlane.xlu1 %14015 }
0x3ed9   :  { %v14018_v3 = vsub.f32 %v14010_v43, %v14016_v6  ;;  %v14013_v33 = vpop.xlane.xlu0 %14012  ;;  %v14420_v6 = vld [vmem:[%s21887_s3 + $0x2f0] sm:$0xff] }
0x3eda   :  { %v14017_v4 = vsub.f32 %v14009_v54, %v14013_v33  ;;  %v14422_v33 = vld [vmem:[%s21887_s3 + $0x300] sm:$0xff] }
0x3edb   :  { %v14021_v34 = vmul.f32 1.442695, %v14018_v3  ;;  %v14421_v3 = vld [vmem:[%s21887_s3 + $0x2f8] sm:$0xff] }
0x3edc   :  { %v14019_v39 = vmul.f32 1.442695, %v14017_v4  ;;  %v19146_v4 = vpack.c.bf16 %v14421_v3, %v14420_v6 }
0x3edd   :  { %19476 = vpow2.f32 %v14021_v34  ;;  %v14423_v34 = vld [vmem:[%s21887_s3 + $0x308] sm:$0xff] }
0x3ede   :  { %19478 = vpow2.f32 %v14019_v39  ;;  %v19150_v39 = vpack.c.bf16 %v14423_v34, %v14422_v33 }
0x3ee7   :  { %v19477_v35 = vpop.eup %19476 }
0x3ee8   :  { %v19479_v36 = vpop.eup %19478  ;;  %v14026_v37 = vsel %vm384_vm3, %v19477_v35, 0.0 }
0x3ee9   :  { %14027 = vadd.xlane.f32.xlu1 %v14026_v37  ;;  %v14023_v48 = vsel %vm384_vm3, %v19479_v36, 0.0 }
0x3eea   :  { %14024 = vadd.xlane.f32.xlu0 %v14023_v48  ;;  %v14426_v48 = vld [vmem:[%s21887_s3 + $0x320] sm:$0xff] }
0x3f76   :  { %v14028_v53 = vpop.xlane.xlu1 %14027 }
0x3f77   :  { %19480 = vrcp.f32 %v14028_v53  ;;  %v14025_v40 = vpop.xlane.xlu0 %14024 }
0x3f78   :  { %19482 = vrcp.f32 %v14025_v40  ;;  %v17070_v40 = vld [vmem:[%s21889_s4 + $0x32] ss:$0 sm:$0xff] }
0x3f81   :  { %v19481_v19 = vpop.eup %19480 }
0x3f82   :  { %v19483_v24 = vpop.eup %19482  ;;  %v14032_v42 = vmul.f32 %v19481_v19, %v19477_v35  ;;  %v14424_v35 = vld [vmem:[%s21887_s3 + $0x310] sm:$0xff] }
0x3f83   :  { %v14031_v56 = vmul.f32 %v19483_v24, %v19479_v36  ;;  %v14425_v36 = vld [vmem:[%s21887_s3 + $0x318] sm:$0xff] }
0x3f84   :  { %18627 = vmatmul.mubr.msk.f32.vlgmr.msra.gmra.mrb[142].mxu0 %vm384_vm3, %v14032_v42  ;;  %v19154_v37 = vpack.c.bf16 %v14425_v36, %v14424_v35  ;;  %v17074_v35 = vld [vmem:[%s21889_s4 + $0x34] ss:$0 sm:$0xff] }
0x3f85   :  { %18622 = vmatmul.mubr.msk.f32.vlgmr.msra.gmra.mrb[152].mxu1 %vm384_vm3, %v14031_v56 }
0x3f86   :  { %18630 = vmatpush3.msra.mxu1 %v14179_v58  ;;  %v14427_v58 = vld [vmem:[%s21887_s3 + $0x328] sm:$0xff] }
0x3f87   :  { %19147 = vmatprep.subr.bf16.mxu1 %v19146_v4  ;;  %v19158_v53 = vpack.c.bf16 %v14427_v58, %v14426_v48  ;;  %v17075_v58 = vld [vmem:[%s21889_s4 + $0x35] ss:$0 sm:$0xff] }
0x4057   :  { %v14175_v49 = vpop.f32.mrb[142].mxu0 }
0x4058   :  { %v14102_v7 = vpop.f32.mrb[152].mxu1  ;;  %v18628_v47 = vpop.f32.mrb[143].mxu0 }
0x4059   :  { %v18623_v59 = vpop.f32.mrb[153].mxu1  ;;  %18631 = vmatprep.mubr.msk.f32.mxu1 %vm384_vm3, %v14102_v7 }
0x405a   :  { %18632 = vmatmul.mubr.msk.f32.vlgmr.msra.gmra.mrb[146].mxu1 %vm384_vm3, %v14175_v49 }
0x405b   :  { %19149 = vmatpush3.bf16.msra.mxu1 %v19146_v4 }
0x405c   :  { %19151 = vmatprep.subr.bf16.mxu1 %v19150_v39 }
0x405f   :  { %19153 = vmatpush3.bf16.msra.mxu1 %v19150_v39 }
0x4060   :  { %19155 = vmatprep.subr.bf16.mxu1 %v19154_v37 }
0x4063   :  { %19157 = vmatpush3.bf16.msra.mxu1 %v19154_v37 }
0x4064   :  { %19159 = vmatprep.subr.bf16.mxu1 %v19158_v53 }
0x4067   :  { %19161 = vmatpush3.bf16.msra.mxu1 %v19158_v53 }
0x412d   :  { %v18633_v29 = vpop.f32.mrb[146].mxu1 }
0x412e   :  { %v14269_v8 = vadd.f32 %v18633_v29, %v17065_v60  ;;  %v14252_v41 = vpop.f32.mrb[147].mxu1 }
0x412f   :  { %v14268_v44 = vadd.f32 %v17065_v60, %v14252_v41 }
0x4130   :  { %v14271_v46 = vadd.f32 %v14269_v8, %v21320_v55 }
0x4131   :  { %v14270_v51 = vadd.f32 %v14268_v44, %v21318_v18  ;;  %v14312_v18 = vld [vmem:[%s21887_s3 + $0x2e0] sm:$0xff] }
0x4132   :  { %v14277_v52 = vsel %vm128_vm1, %v14271_v46, 0.0  ;;  %v19142_v26 = vpack.c.bf16 %v14313_v13, %v14312_v18 }
0x4133   :  { %14278 = vadd.xlane.f32.xlu1 %v14277_v52  ;;  %v14274_v57 = vsel %vm128_vm1, %v14270_v51, 0.0 }
0x4134   :  { %14275 = vadd.xlane.f32.xlu0 %v14274_v57  ;;  %19143 = vmatprep.subr.bf16.mxu0 %v19142_v26 }
0x4135   :  { %19145 = vmatpush3.bf16.msra.mxu0 %v19142_v26 }
0x41c0   :  { %v14279_v61 = vpop.xlane.xlu1 %14278 }
0x41c1   :  { %v14281_v62 = vmul.f32 0.0625, %v14279_v61  ;;  %v14276_v15 = vpop.xlane.xlu0 %14275 }
0x41c2   :  { %v14280_v0 = vmul.f32 0.0625, %v14276_v15 }
0x41c3   :  { %v14283_v2 = vsub.f32 %v14271_v46, %v14281_v62 }
0x41c4   :  { %v14282_v5 = vsub.f32 %v14270_v51, %v14280_v0 }
0x41c5   :  { %v14285_v1 = vmul.f32 %v14283_v2, %v14283_v2 }
0x41c6   :  { %v14284_v28 = vmul.f32 %v14282_v5, %v14282_v5 }
0x41c7   :  { %v14289_v17 = vsel %vm128_vm1, %v14285_v1, 0.0 }
0x41c8   :  { %14290 = vadd.xlane.f32.xlu1 %v14289_v17  ;;  %v14286_v55 = vsel %vm128_vm1, %v14284_v28, 0.0 }
0x41c9   :  { %14287 = vadd.xlane.f32.xlu0 %v14286_v55 }
0x4255   :  { %v14291_v27 = vpop.xlane.xlu1 %14290 }
0x4256   :  { %v14293_v11 = vmul.f32 0.0625, %v14291_v27  ;;  %v14288_v20 = vpop.xlane.xlu0 %14287 }
0x4257   :  { %v14292_v21 = vmul.f32 0.0625, %v14288_v20 }
0x4258   :  { %v14295_v38 = vadd.f32 1e-05, %v14293_v11 }
0x4259   :  { %v14294_v45 = vadd.f32 1e-05, %v14292_v21 }
0x425a   :  { %19484 = vrsqrt.f32 %v14295_v38 }
0x425b   :  { %19486 = vrsqrt.f32 %v14294_v45 }
0x4264   :  { %v19485_v63 = vpop.eup %19484 }
0x4265   :  { %v19487_v14 = vpop.eup %19486  ;;  %v14299_v43 = vmul.f32 %v19485_v63, %v14283_v2 }
0x4266   :  { %v14298_v10 = vmul.f32 %v19487_v14, %v14282_v5  ;;  %v17073_v5 = vld [vmem:[%s21889_s4 + $0x33] ss:$0 sm:$0xff] }
0x4267   :  { %v14305_v54 = vmul.f32 %v17066_v16, %v14299_v43 }
0x4268   :  { %v14304_v25 = vmul.f32 %v17066_v16, %v14298_v10 }
0x4269   :  { %v14311_v12 = vadd.f32 %v17067_v9, %v14305_v54  ;;  %v14559_v54 = vld [vmem:[%s21887_s3 + $0x358] sm:$0xff] }
0x426a   :  { %v14310_v31 = vadd.f32 %v17067_v9, %v14304_v25  ;;  %v14558_v9 = vld [vmem:[%s21887_s3 + $0x350] sm:$0xff] }
0x426b   :  { %v19162_v25 = vpack.c.bf16 %v14559_v54, %v14558_v9 }
0x426c   :  { %18638 = vmatprep.mubr.msk.f32.mxu0 %vm128_vm1, %v14310_v31 }
0x426d   :  { %18639 = vmatmul.mubr.msk.f32.vlgmr.msra.gmra.mrb[144].mxu0 %vm128_vm1, %v14311_v12  ;;  %19163 = vmatprep.subr.bf16.mxu0 %v19162_v25 }
0x426e   :  { %19165 = vmatpush3.bf16.msra.mxu0 %v19162_v25 }
0x4340   :  { %v18640_v19 = vpop.f32.mrb[144].mxu0 }
0x4341   :  { %v14401_v24 = vadd.f32 %v18640_v19, %v17070_v40  ;;  %v14387_v42 = vpop.f32.mrb[145].mxu0  ;;  %v14669_v19 = vld [vmem:[%s21887_s3 + $0x368] sm:$0xff] }
0x4342   :  { %v14400_v56 = vadd.f32 %v17070_v40, %v14387_v42  ;;  %v14668_v40 = vld [vmem:[%s21887_s3 + $0x360] sm:$0xff] }
0x4343   :  { %v14405_v49 = vmul.f32 0.044715, %v14401_v24  ;;  %v14403_v15 = vmul.f32 0.5, %v14401_v24 }
0x4344   :  { %v14404_v7 = vmul.f32 0.044715, %v14400_v56  ;;  %v14402_v61 = vmul.f32 0.5, %v14400_v56 }
0x4345   :  { %v14407_v47 = vmul.f32 %v14405_v49, %v14401_v24 }
0x4346   :  { %v14406_v59 = vmul.f32 %v14404_v7, %v14400_v56  ;;  %v14670_v7 = vld [vmem:[%s21887_s3 + $0x370] sm:$0xff] }
0x4347   :  { %v14409_v60 = vmul.f32 %v14407_v47, %v14401_v24  ;;  %v14671_v47 = vld [vmem:[%s21887_s3 + $0x378] sm:$0xff] }
0x4348   :  { %v14408_v29 = vmul.f32 %v14406_v59, %v14400_v56  ;;  %v19170_v59 = vpack.c.bf16 %v14671_v47, %v14670_v7  ;;  %v15325_v7 = vld [vmem:[%s21887_s3 + $0x408] sm:$0xff]  ;;  %v15326_v47 = vld [vmem:[%s21887_s3 + $0x410] sm:$0xff] }
0x4349   :  { %v14411_v8 = vadd.f32 %v14409_v60, %v14401_v24  ;;  %v21_v60 = vld [vmem:[%s21891_s0 + $0x8] sm:$0xff] }
0x434a   :  { %v14410_v41 = vadd.f32 %v14408_v29, %v14400_v56  ;;  %v19167_v56 = vpack.c.bf16 %v14669_v19, %v14668_v40  ;;  %v14675_v29 = vrot.slane %v21_v60, 7  ;;  %v15327_v60 = vld [vmem:[%s21887_s3 + $0x418] sm:$0xff] }
0x434b   :  { %v14413_v44 = vmul.f32 0.7978846, %v14411_v8  ;;  %v20_v8 = vld [vmem:[%s21891_s0] sm:$0xff] }
0x434c   :  { %v14412_v46 = vmul.f32 0.7978846, %v14410_v41  ;;  %v14754_v41 = vld [vmem:[%s21887_s3 + $0x380] sm:$0xff] }
0x434d   :  { %19488 = vtanh.f32 %v14413_v44  ;;  %v14755_v44 = vld [vmem:[%s21887_s3 + $0x388] sm:$0xff] }
0x434e   :  { %19490 = vtanh.f32 %v14412_v46  ;;  %v21539_v46 = vsel %vm3654_vm5, %v14675_v29, %v20_v8  ;;  %v15328_v29 = vld [vmem:[%s21887_s3 + $0x420] sm:$0xff] }
0x434f   :  { %v19200_v8 = vpack.c.bf16 %v15328_v29, %v15327_v60 }
0x4357   :  { %v19489_v51 = vpop.eup %19488 }
0x4358   :  { %v19491_v52 = vpop.eup %19490  ;;  %v14417_v57 = vadd.f32 1.0, %v19489_v51  ;;  %v19173_v51 = vpack.c.bf16 %v14755_v44, %v14754_v41  ;;  %v15245_v41 = vld [vmem:[%s21887_s3 + $0x3e8] sm:$0xff]  ;;  %v15246_v44 = vld [vmem:[%s21887_s3 + $0x3f0] sm:$0xff] }
0x4359   :  { %v14416_v62 = vadd.f32 1.0, %v19491_v52  ;;  %v14847_v52 = vld [vmem:[%s21887_s3 + $0x3a0] sm:$0xff] }
0x435a   :  { %v14419_v2 = vmul.f32 %v14417_v57, %v14403_v15  ;;  %v14848_v57 = vld [vmem:[%s21887_s3 + $0x3a8] sm:$0xff]  ;;  %v14757_v15 = vld [vmem:[%s21887_s3 + $0x398] sm:$0xff] }
0x435b   :  { %v14418_v0 = vmul.f32 %v14416_v62, %v14402_v61  ;;  %v19179_v61 = vpack.c.bf16 %v14848_v57, %v14847_v52  ;;  %v14756_v62 = vld [vmem:[%s21887_s3 + $0x390] sm:$0xff]  ;;  %v15247_v52 = vld [vmem:[%s21887_s3 + $0x3f8] sm:$0xff]  ;;  %v15248_v57 = vld [vmem:[%s21887_s3 + $0x400] sm:$0xff] }
0x435d   :  { %18657 = vmatprep.mubr.msk.f32.mxu1 %vm1614_vm4, %v14418_v0  ;;  %v14849_v0 = vld [vmem:[%s21887_s3 + $0x3b0] sm:$0xff] }
0x435e   :  { %18658 = vmatmul.mubr.msk.f32.vlgmr.msra.gmra.mrb[154].mxu1 %vm1614_vm4, %v14419_v2  ;;  %v19176_v2 = vpack.c.bf16 %v14757_v15, %v14756_v62  ;;  %v19194_v15 = vpack.c.bf16 %v15248_v57, %v15247_v52  ;;  %v17102_v52 = vld [vmem:[%s21889_s4 + $0x3e] ss:$0 sm:$0xff] }
0x435f   :  { %18697 = vmatprep.mubr.msk.f32.mxu1 %vm19515_vm2, %v19514_v22 }
0x4431   :  { %v18659_v1 = vpop.f32.mrb[154].mxu1 }
0x4432   :  { %v14515_v28 = vadd.f32 %v18659_v1, %v17073_v5  ;;  %v14501_v17 = vpop.f32.mrb[155].mxu1 }
0x4433   :  { %v14514_v55 = vadd.f32 %v17073_v5, %v14501_v17  ;;  %v14850_v5 = vld [vmem:[%s21887_s3 + $0x3b8] sm:$0xff] }
0x4434   :  { %v14517_v18 = vadd.f32 %v14515_v28, %v14311_v12  ;;  %v19182_v1 = vpack.c.bf16 %v14850_v5, %v14849_v0  ;;  %v17078_v28 = vld [vmem:[%s21889_s4 + $0x37] ss:$0 sm:$0xff] }
0x4435   :  { %v14516_v13 = vadd.f32 %v14514_v55, %v14310_v31  ;;  %v19517_v31 = vmov 0.0|0.0  }
0x4436   :  { %v14523_v26 = vsel %vm128_vm1, %v14517_v18, 0.0  ;;  %19166 = vmatprep.subr.bf16.mxu0 %v19517_v31  ;;  %19178 = vmatprep.subr.bf16.mxu1 %v19517_v31 }
0x4437   :  { %14524 = vadd.xlane.f32.xlu1 %v14523_v26  ;;  %v14520_v27 = vsel %vm128_vm1, %v14516_v13, 0.0  ;;  %19180 = vmatpush3.bf16.msra.mxu1 %v19179_v61 }
0x4438   :  { %14521 = vadd.xlane.f32.xlu0 %v14520_v27  ;;  %19181 = vmatprep.subr.bf16.mxu1 %v19517_v31 }
0x443b   :  { %19183 = vmatpush3.bf16.msra.mxu1 %v19182_v1 }
0x443c   :  { %18705 = vmatprep.subr.mxu1 %v19514_v22 }
0x44c4   :  { %v14525_v11 = vpop.xlane.xlu1 %14524 }
0x44c5   :  { %v14527_v20 = vmul.f32 0.0625, %v14525_v11  ;;  %v14522_v21 = vpop.xlane.xlu0 %14521 }
0x44c6   :  { %v14526_v38 = vmul.f32 0.0625, %v14522_v21 }
0x44c7   :  { %v14529_v45 = vsub.f32 %v14517_v18, %v14527_v20 }
0x44c8   :  { %v14528_v63 = vsub.f32 %v14516_v13, %v14526_v38 }
0x44c9   :  { %v14531_v16 = vmul.f32 %v14529_v45, %v14529_v45 }
0x44ca   :  { %v14530_v14 = vmul.f32 %v14528_v63, %v14528_v63 }
0x44cb   :  { %v14535_v43 = vsel %vm128_vm1, %v14531_v16, 0.0 }
0x44cc   :  { %14536 = vadd.xlane.f32.xlu1 %v14535_v43  ;;  %v14532_v10 = vsel %vm128_vm1, %v14530_v14, 0.0  ;;  %v17080_v14 = vld [vmem:[%s21889_s4 + $0x38] ss:$0 sm:$0xff] }
0x44cd   :  { %14533 = vadd.xlane.f32.xlu0 %v14532_v10 }
0x4559   :  { %v14537_v12 = vpop.xlane.xlu1 %14536 }
0x455a   :  { %v14539_v6 = vmul.f32 0.0625, %v14537_v12  ;;  %v14534_v3 = vpop.xlane.xlu0 %14533 }
0x455b   :  { %v14538_v33 = vmul.f32 0.0625, %v14534_v3 }
0x455c   :  { %v14541_v4 = vadd.f32 1e-05, %v14539_v6 }
0x455d   :  { %v14540_v34 = vadd.f32 1e-05, %v14538_v33 }
0x455e   :  { %19492 = vrsqrt.f32 %v14541_v4 }
0x455f   :  { %19494 = vrsqrt.f32 %v14540_v34 }
0x4568   :  { %v19493_v39 = vpop.eup %19492 }
0x4569   :  { %v19495_v36 = vpop.eup %19494  ;;  %v14545_v37 = vmul.f32 %v19493_v39, %v14529_v45 }
0x456a   :  { %v14544_v48 = vmul.f32 %v19495_v36, %v14528_v63 }
0x456b   :  { %v14551_v53 = vmul.f32 %v17074_v35, %v14545_v37  ;;  %v15091_v37 = vld [vmem:[%s21887_s3 + $0x3c0] sm:$0xff] }
0x456c   :  { %v14550_v24 = vmul.f32 %v17074_v35, %v14544_v48 }
0x456d   :  { %v14557_v49 = vadd.f32 %v17075_v58, %v14551_v53  ;;  %v15166_v53 = vld [vmem:[%s21887_s3 + $0x3d0] sm:$0xff] }
0x456e   :  { %v14556_v42 = vadd.f32 %v17075_v58, %v14550_v24  ;;  %v15165_v58 = vld [vmem:[%s21887_s3 + $0x3c8] sm:$0xff] }
0x456f   :  { %v19185_v19 = vpack.c.bf16 %v15166_v53, %v15165_v58  ;;  %v15724_v53 = vld [vmem:[%s21887_s3 + $0x450] sm:$0xff] }
0x4570   :  { %18664 = vmatprep.mubr.msk.f32.mxu0 %vm128_vm1, %v14556_v42  ;;  %v15167_v42 = vld [vmem:[%s21887_s3 + $0x3d8] sm:$0xff] }
0x4571   :  { %18665 = vmatmul.mubr.msk.f32.vlgmr.msra.gmra.mrb[146].mxu0 %vm128_vm1, %v14557_v49 }
0x4572   :  { %19168 = vmatpush3.bf16.msra.mxu0 %v19167_v56  ;;  %18675 = vmatprep.mubr.msk.f32.mxu0 %vm19515_vm2, %v19514_v22  ;;  %v15168_v56 = vld [vmem:[%s21887_s3 + $0x3e0] sm:$0xff] }
0x4573   :  { %19169 = vmatprep.subr.bf16.mxu0 %v19517_v31  ;;  %v19188_v49 = vpack.c.bf16 %v15168_v56, %v15167_v42  ;;  %v15727_v42 = vld [vmem:[%s21887_s3 + $0x468] sm:$0xff] }
0x4576   :  { %19171 = vmatpush3.bf16.msra.mxu0 %v19170_v59  ;;  %v19197_v59 = vpack.c.bf16 %v15326_v47, %v15325_v7 }
0x4577   :  { %19172 = vmatprep.subr.bf16.mxu0 %v19517_v31 }
0x4579   :  { %18676 = vmatmul.mubr.msk.f32.vlgmr.msra.gmra.mrb[148].mxu0 %vm37_vm0, %v21539_v46 }
0x457a   :  { %19174 = vmatpush3.bf16.msra.mxu0 %v19173_v51  ;;  %18686 = vmatprep.mubr.msk.f32.mxu0 %vm19515_vm2, %v19514_v22  ;;  %v19191_v51 = vpack.c.bf16 %v15246_v44, %v15245_v41 }
0x457b   :  { %19175 = vmatprep.subr.bf16.mxu0 %v19517_v31 }
0x457e   :  { %19177 = vmatpush3.bf16.msra.mxu0 %v19176_v2 }
0x457f   :  { %18700 = vmatprep.subr.mxu0 %v19514_v22 }
0x4644   :  { %v18666_v17 = vpop.f32.mrb[146].mxu0 }
0x4645   :  { %v14647_v55 = vadd.f32 %v18666_v17, %v17078_v28  ;;  %v14633_v18 = vpop.f32.mrb[147].mxu0 }
0x4646   :  { %v14646_v13 = vadd.f32 %v17078_v28, %v14633_v18  ;;  %v17091_v18 = vld [vmem:[%s21889_s4 + $0x3b] ss:$0 sm:$0xff] }
0x4647   :  { %v14663_v26 = vrot.slane %v14647_v55, %v20008_v23  ;;  %v17093_v55 = vld [vmem:[%s21889_s4 + $0x3c] ss:$0 sm:$0xff] }
0x4648   :  { %v14656_v27 = vrot.slane %v14646_v13, %v20008_v23 }
0x4649   :  { %v14667_v11 = vadd.f32 %v14663_v26, %v21057_v50  ;;  %v17084_v50 = vld [vmem:[%s21889_s4 + $0x3a] ss:$0 sm:$0xff] }
0x464a   :  { %v14666_v20 = vadd.f32 %v14656_v27, %v21049_v30 }
0x464b   :  { %v14768_v21 = vrot.slane %v14667_v11, %v21053_v32 }
0x464c   :  { %v14764_v38 = vrot.slane %v14666_v20, %v21053_v32  ;;  %v14745_v23 = vpop.f32.mrb[148].mxu0  ;;  %v17082_v32 = vld [vmem:[%s21889_s4 + $0x39] ss:$0 sm:$0xff]  ;;  %v17095_v20 = vld [vmem:[%s21889_s4 + $0x3d] ss:$0 sm:$0xff] }
0x464d   :  { %v18677_v30 = vpop.f32.mrb[149].mxu0  ;;  %v14753_v25 = vadd.f32 %v17080_v14, %v14745_v23 }
0x464e   :  { %v21577_v45 = vsel %vm3654_vm5, %v14768_v21, %v14764_v38 }
0x464f   :  { %18687 = vmatmul.mubr.msk.f32.vlgmr.msra.gmra.mrb[150].mxu0 %vm37_vm0, %v21577_v45  ;;  %18698 = vmatmul.mubr.msk.f32.vlgmr.msra.gmra.mrb[156].mxu1 %vm37_vm0, %v21577_v45 }
0x4650   :  { %18702 = vmatprep.mubr.msk.f32.mxu0 %vm19515_vm2, %v19514_v22  ;;  %18707 = vmatprep.mubr.msk.f32.mxu1 %vm19515_vm2, %v19514_v22 }
0x4722   :  { %v14838_v63 = vpop.f32.mrb[150].mxu0  ;;  %v14918_v16 = vpop.f32.mrb[156].mxu1 }
0x4723   :  { %v14846_v43 = vadd.f32 %v17082_v32, %v14838_v63  ;;  %v14926_v10 = vadd.f32 %v17084_v50, %v14918_v16  ;;  %v18688_v9 = vpop.f32.mrb[151].mxu0  ;;  %v18699_v54 = vpop.f32.mrb[157].mxu1 }
0x4724   :  { %v15644_v54 = vld [vmem:[%s21887_s3 + $0x430] sm:$0xff] }
0x4725   :  { %18701 = vmatpush3.xpose.msk.msra.mxu0 %vm384_vm3, %v14846_v43  ;;  %18706 = vmatpush3.msk.msra.mxu1 %vm4668_vm12, %v14926_v10  ;;  %v15569_v10 = vld [vmem:[%s21887_s3 + $0x428] sm:$0xff] }
0x4726   :  { %19184 = vmatprep.subr.bf16.mxu1 %v19517_v31  ;;  %18710 = vmatprep.subr.mxu0 %v19514_v22 }
0x4728   :  { %18703 = vmatmul.mubr.msk.f32.vlgmr.msra.gmra.mrb[152].mxu0 %vm384_vm3, %v14753_v25  ;;  %v15645_v25 = vld [vmem:[%s21887_s3 + $0x438] sm:$0xff] }
0x4729   :  { %18712 = vmatprep.mubr.msk.f32.mxu0 %vm19515_vm2, %v19514_v22  ;;  %18711 = vmatpush3.msra.mxu0 %v15091_v37  ;;  %v15806_v37 = vld [vmem:[%s21887_s3 + $0x480] sm:$0xff] }
0x472a   :  { %19190 = vmatprep.subr.bf16.mxu0 %v19517_v31 }
0x47fb   :  { %v14999_v12 = vpop.f32.mrb[152].mxu0 }
0x47fc   :  { %v15003_v6 = vmul.f32 0.35355338, %v14999_v12  ;;  %v18704_v3 = vpop.f32.mrb[153].mxu0 }
0x47fe   :  { %v15004_v33 = vsel %vm4575_vm13, %v15003_v6, -inf }
0x47ff   :  { %15005 = vmax.xlane.f32.xlu0 %v15004_v33  ;;  %v15646_v33 = vld [vmem:[%s21887_s3 + $0x440] sm:$0xff] }
0x488c   :  { %v15006_v4 = vpop.xlane.xlu0 %15005 }
0x488d   :  { %v15007_v34 = vsub.f32 %v15003_v6, %v15006_v4  ;;  %v19203_v6 = vpack.c.bf16 %v15645_v25, %v15644_v54  ;;  %v15647_v4 = vld [vmem:[%s21887_s3 + $0x448] sm:$0xff]  ;;  %v16286_v54 = vld [vmem:[%s21887_s3 + $0x4f0] sm:$0xff] }
0x488f   :  { %v15008_v39 = vmul.f32 1.442695, %v15007_v34  ;;  %v19206_v34 = vpack.c.bf16 %v15647_v4, %v15646_v33  ;;  %v16206_v33 = vld [vmem:[%s21887_s3 + $0x4d0] sm:$0xff] }
0x4891   :  { %19496 = vpow2.f32 %v15008_v39  ;;  %v15804_v39 = vld [vmem:[%s21887_s3 + $0x470] sm:$0xff] }
0x489b   :  { %v19497_v35 = vpop.eup %19496 }
0x489c   :  { %v15010_v36 = vsel %vm4575_vm13, %v19497_v35, 0.0 }
0x489d   :  { %15011 = vadd.xlane.f32.xlu1 %v15010_v36 }
0x492a   :  { %v15012_v48 = vpop.xlane.xlu1 %15011 }
0x492b   :  { %19498 = vrcp.f32 %v15012_v48  ;;  %v15807_v48 = vld [vmem:[%s21887_s3 + $0x488] sm:$0xff] }
0x492c   :  { %v19218_v58 = vpack.c.bf16 %v15807_v48, %v15806_v37 }
0x4935   :  { %v19499_v40 = vpop.eup %19498 }
0x4936   :  { %v15014_v24 = vmul.f32 %v19499_v40, %v19497_v35  ;;  %v15805_v35 = vld [vmem:[%s21887_s3 + $0x478] sm:$0xff] }
0x4937   :  { %v19215_v36 = vpack.c.bf16 %v15805_v35, %v15804_v39  ;;  %v15725_v40 = vld [vmem:[%s21887_s3 + $0x458] sm:$0xff] }
0x4938   :  { %18708 = vmatmul.mubr.msk.f32.vlgmr.msra.gmra.mrb[158].mxu1 %vm4664_vm14, %v15014_v24  ;;  %v15726_v24 = vld [vmem:[%s21887_s3 + $0x460] sm:$0xff] }
0x4939   :  { %19186 = vmatpush3.bf16.msra.mxu1 %v19185_v19  ;;  %18723 = vmatprep.mubr.msk.f32.mxu1 %vm19515_vm2, %v19514_v22  ;;  %v19209_v19 = vpack.c.bf16 %v15725_v40, %v15724_v53  ;;  %v19212_v7 = vpack.c.bf16 %v15727_v42, %v15726_v24  ;;  %v17113_v24 = vld [vmem:[%s21889_s4 + $0x41] ss:$0 sm:$0xff] }
0x493a   :  { %19187 = vmatprep.subr.bf16.mxu1 %v19517_v31 }
0x493d   :  { %19189 = vmatpush3.bf16.msra.mxu1 %v19188_v49 }
0x493e   :  { %19196 = vmatprep.subr.bf16.mxu1 %v19517_v31 }
0x4940   :  { %18724 = vmatmul.mubr.msk.f32.vlgmr.msra.gmra.mrb[160].mxu1 %vm37_vm0, %v21539_v46 }
0x4941   :  { %19198 = vmatpush3.bf16.msra.mxu1 %v19197_v59  ;;  %18745 = vmatprep.mubr.msk.f32.mxu1 %vm19515_vm2, %v19514_v22 }
0x4942   :  { %19199 = vmatprep.subr.bf16.mxu1 %v19517_v31 }
0x4945   :  { %19201 = vmatpush3.bf16.msra.mxu1 %v19200_v8 }
0x4946   :  { %18758 = vmatprep.subr.mxu1 %v19514_v22 }
0x4948   :  { %18746 = vmatmul.mubr.msk.f32.vlgmr.msra.gmra.mrb[162].mxu1 %vm37_vm0, %v21577_v45 }
0x4949   :  { %18760 = vmatprep.mubr.msk.f32.mxu1 %vm19515_vm2, %v19514_v22  ;;  %18759 = vmatpush3.msra.mxu1 %v15569_v10 }
0x494a   :  { %19208 = vmatprep.subr.bf16.mxu1 %v19517_v31 }
0x4a0b   :  { %v15087_v61 = vpop.f32.mrb[158].mxu1 }
0x4a0c   :  { %v18709_v62 = vpop.f32.mrb[159].mxu1  ;;  %18713 = vmatmul.mubr.msk.f32.vlgmr.msra.gmra.mrb[154].mxu0 %vm384_vm3, %v15087_v61 }
0x4a0d   :  { %19192 = vmatpush3.bf16.msra.mxu0 %v19191_v51  ;;  %18734 = vmatprep.mubr.msk.f32.mxu0 %vm19515_vm2, %v19514_v22  ;;  %v17104_v51 = vld [vmem:[%s21889_s4 + $0x3f] ss:$0 sm:$0xff] }
0x4a0e   :  { %19193 = vmatprep.subr.bf16.mxu0 %v19517_v31 }
0x4a11   :  { %19195 = vmatpush3.bf16.msra.mxu0 %v19194_v15 }
0x4a12   :  { %18748 = vmatprep.subr.mxu0 %v19514_v22 }
0x4a13   :  { %v15236_v0 = vpop.f32.mrb[160].mxu1 }
0x4a14   :  { %18735 = vmatmul.mubr.msk.f32.vlgmr.msra.gmra.mrb[156].mxu0 %vm37_vm0, %v21577_v45  ;;  %v18725_v2 = vpop.f32.mrb[161].mxu1  ;;  %v15244_v11 = vadd.f32 %v17091_v18, %v15236_v0  ;;  %v17106_v0 = vld [vmem:[%s21889_s4 + $0x40] ss:$0 sm:$0xff] }
0x4a15   :  { %18750 = vmatprep.mubr.msk.f32.mxu0 %vm19515_vm2, %v19514_v22 }
0x4a1b   :  { %v15396_v5 = vpop.f32.mrb[162].mxu1 }
0x4a1c   :  { %v18747_v1 = vpop.f32.mrb[163].mxu1  ;;  %v15404_v21 = vadd.f32 %v17095_v20, %v15396_v5 }
0x4adf   :  { %v21669_v28 = vpop.f32.mrb[154].mxu0 }
0x4ae0   :  { %v18714_v17 = vpop.f32.mrb[155].mxu0 }
0x4ae7   :  { %v15316_v13 = vpop.f32.mrb[156].mxu0 }
0x4ae8   :  { %v15324_v26 = vadd.f32 %v17093_v55, %v15316_v13  ;;  %v18736_v27 = vpop.f32.mrb[157].mxu0 }
0x4aea   :  { %18749 = vmatpush3.xpose.msk.msra.mxu0 %vm384_vm3, %v15324_v26 }
0x4aeb   :  { %18753 = vmatprep.subr.mxu0 %v19514_v22 }
0x4aed   :  { %18751 = vmatmul.mubr.msk.f32.vlgmr.msra.gmra.mrb[158].mxu0 %vm384_vm3, %v15244_v11  ;;  %v16048_v11 = vld [vmem:[%s21887_s3 + $0x490] sm:$0xff] }
0x4aee   :  { %18754 = vmatpush3.msk.msra.mxu0 %vm4668_vm12, %v15404_v21  ;;  %18755 = vmatprep.mubr.msk.f32.mxu0 %vm19515_vm2, %v19514_v22  ;;  %v16123_v21 = vld [vmem:[%s21887_s3 + $0x498] sm:$0xff] }
0x4aef   :  { %19202 = vmatprep.subr.bf16.mxu0 %v19517_v31 }
0x4bc0   :  { %v15477_v38 = vpop.f32.mrb[158].mxu0 }
0x4bc1   :  { %v15481_v23 = vmul.f32 0.35355338, %v15477_v38  ;;  %v18752_v30 = vpop.f32.mrb[159].mxu0  ;;  %v16124_v38 = vld [vmem:[%s21887_s3 + $0x4a0] sm:$0xff] }
0x4bc2   :  { %v19221_v30 = vpack.c.bf16 %v16124_v38, %v16123_v21 }
0x4bc3   :  { %v15482_v32 = vsel %vm4575_vm13, %v15481_v23, -inf }
0x4bc4   :  { %15483 = vmax.xlane.f32.xlu0 %v15482_v32 }
0x4c51   :  { %v15484_v50 = vpop.xlane.xlu0 %15483 }
0x4c52   :  { %v15485_v63 = vsub.f32 %v15481_v23, %v15484_v50  ;;  %v16125_v50 = vld [vmem:[%s21887_s3 + $0x4a8] sm:$0xff] }
0x4c54   :  { %v15486_v16 = vmul.f32 1.442695, %v15485_v63  ;;  %v16126_v63 = vld [vmem:[%s21887_s3 + $0x4b0] sm:$0xff] }
0x4c56   :  { %19500 = vpow2.f32 %v15486_v16  ;;  %v19224_v16 = vpack.c.bf16 %v16126_v63, %v16125_v50 }
0x4c60   :  { %v19501_v14 = vpop.eup %19500 }
0x4c61   :  { %v15488_v43 = vsel %vm4575_vm13, %v19501_v14, 0.0 }
0x4c62   :  { %15489 = vadd.xlane.f32.xlu1 %v15488_v43  ;;  %v16284_v43 = vld [vmem:[%s21887_s3 + $0x4e0] sm:$0xff] }
0x4cef   :  { %v15490_v9 = vpop.xlane.xlu1 %15489 }
0x4cf0   :  { %19502 = vrcp.f32 %v15490_v9  ;;  %v16285_v9 = vld [vmem:[%s21887_s3 + $0x4e8] sm:$0xff] }
0x4cf1   :  { %v19236_v25 = vpack.c.bf16 %v16286_v54, %v16285_v9 }
0x4cfa   :  { %v19503_v12 = vpop.eup %19502 }
0x4cfb   :  { %v15492_v3 = vmul.f32 %v19503_v12, %v19501_v14  ;;  %v16283_v14 = vld [vmem:[%s21887_s3 + $0x4d8] sm:$0xff]  ;;  %v16204_v12 = vld [vmem:[%s21887_s3 + $0x4c0] sm:$0xff] }
0x4cfc   :  { %v19233_v10 = vpack.c.bf16 %v16284_v43, %v16283_v14 }
0x4cfd   :  { %18756 = vmatmul.mubr.msk.f32.vlgmr.msra.gmra.mrb[160].mxu0 %vm4664_vm14, %v15492_v3  ;;  %v16205_v3 = vld [vmem:[%s21887_s3 + $0x4c8] sm:$0xff] }
0x4cfe   :  { %19204 = vmatpush3.bf16.msra.mxu0 %v19203_v6  ;;  %18771 = vmatprep.mubr.msk.f32.mxu0 %vm19515_vm2, %v19514_v22  ;;  %v19230_v39 = vpack.c.bf16 %v16206_v33, %v16205_v3 }
0x4cff   :  { %19205 = vmatprep.subr.bf16.mxu0 %v19517_v31 }
0x4d02   :  { %19207 = vmatpush3.bf16.msra.mxu0 %v19206_v34 }
0x4d03   :  { %19214 = vmatprep.subr.bf16.mxu0 %v19517_v31 }
0x4d05   :  { %18772 = vmatmul.mubr.msk.f32.vlgmr.msra.gmra.mrb[162].mxu0 %vm37_vm0, %v21539_v46 }
0x4d06   :  { %19216 = vmatpush3.bf16.msra.mxu0 %v19215_v36  ;;  %18793 = vmatprep.mubr.msk.f32.mxu0 %vm19515_vm2, %v19514_v22 }
0x4d07   :  { %19217 = vmatprep.subr.bf16.mxu0 %v19517_v31 }
0x4d0a   :  { %19219 = vmatpush3.bf16.msra.mxu0 %v19218_v58 }
0x4d0b   :  { %18806 = vmatprep.subr.mxu0 %v19514_v22 }
0x4d0d   :  { %18794 = vmatmul.mubr.msk.f32.vlgmr.msra.gmra.mrb[164].mxu0 %vm37_vm0, %v21577_v45 }
0x4d0e   :  { %18808 = vmatprep.mubr.msk.f32.mxu0 %vm19515_vm2, %v19514_v22  ;;  %18807 = vmatpush3.msra.mxu0 %v16048_v11 }
0x4d0f   :  { %19226 = vmatprep.subr.bf16.mxu0 %v19517_v31 }
0x4dd0   :  { %v15565_v56 = vpop.f32.mrb[160].mxu0 }
0x4dd1   :  { %v18757_v49 = vpop.f32.mrb[161].mxu0  ;;  %18761 = vmatmul.mubr.msk.f32.vlgmr.msra.gmra.mrb[164].mxu1 %vm384_vm3, %v15565_v56 }
0x4dd2   :  { %19210 = vmatpush3.bf16.msra.mxu1 %v19209_v19  ;;  %18782 = vmatprep.mubr.msk.f32.mxu1 %vm19515_vm2, %v19514_v22  ;;  %v17115_v19 = vld [vmem:[%s21889_s4 + $0x42] ss:$0 sm:$0xff] }
0x4dd3   :  { %19211 = vmatprep.subr.bf16.mxu1 %v19517_v31 }
0x4dd6   :  { %19213 = vmatpush3.bf16.msra.mxu1 %v19212_v7  ;;  %v17117_v7 = vld [vmem:[%s21889_s4 + $0x43] ss:$0 sm:$0xff] }
0x4dd7   :  { %18796 = vmatprep.subr.mxu1 %v19514_v22 }
0x4dd8   :  { %v15715_v47 = vpop.f32.mrb[162].mxu0 }
0x4dd9   :  { %18783 = vmatmul.mubr.msk.f32.vlgmr.msra.gmra.mrb[166].mxu1 %vm37_vm0, %v21577_v45  ;;  %v18773_v59 = vpop.f32.mrb[163].mxu0  ;;  %v15723_v15 = vadd.f32 %v17102_v52, %v15715_v47 }
0x4dda   :  { %18798 = vmatprep.mubr.msk.f32.mxu1 %vm19515_vm2, %v19514_v22 }
0x4de0   :  { %v15875_v60 = vpop.f32.mrb[164].mxu0 }
0x4de1   :  { %v18795_v29 = vpop.f32.mrb[165].mxu0  ;;  %v15883_v2 = vadd.f32 %v17106_v0, %v15875_v60 }
0x4ea4   :  { %v15639_v8 = vpop.f32.mrb[164].mxu1 }
0x4ea5   :  { %v21754_v41 = vadd.f32 %v15639_v8, %v21669_v28  ;;  %v18762_v44 = vpop.f32.mrb[165].mxu1 }
0x4eac   :  { %v15795_v57 = vpop.f32.mrb[166].mxu1 }
0x4ead   :  { %v15803_v61 = vadd.f32 %v17104_v51, %v15795_v57  ;;  %v18784_v62 = vpop.f32.mrb[167].mxu1 }
0x4eaf   :  { %18797 = vmatpush3.xpose.msk.msra.mxu1 %vm384_vm3, %v15803_v61  ;;  %v16527_v61 = vld [vmem:[%s21887_s3 + $0x4f8] sm:$0xff] }
0x4eb0   :  { %18801 = vmatprep.subr.mxu1 %v19514_v22 }
0x4eb2   :  { %18799 = vmatmul.mubr.msk.f32.vlgmr.msra.gmra.mrb[168].mxu1 %vm384_vm3, %v15723_v15 }
0x4eb3   :  { %18802 = vmatpush3.msk.msra.mxu1 %vm4668_vm12, %v15883_v2  ;;  %18803 = vmatprep.mubr.msk.f32.mxu1 %vm19515_vm2, %v19514_v22  ;;  %v16608_v2 = vld [vmem:[%s21887_s3 + $0x6a0] sm:$0xff] }
0x4eb4   :  { %19220 = vmatprep.subr.bf16.mxu1 %v19517_v31 }
0x4f85   :  { %v15956_v5 = vpop.f32.mrb[168].mxu1 }
0x4f86   :  { %v15960_v1 = vmul.f32 0.35355338, %v15956_v5  ;;  %v18800_v28 = vpop.f32.mrb[169].mxu1  ;;  %v16609_v5 = vld [vmem:[%s21887_s3 + $0x6a8] sm:$0xff] }
0x4f88   :  { %v15961_v17 = vsel %vm4575_vm13, %v15960_v1, -inf }
0x4f89   :  { %15962 = vmax.xlane.f32.xlu0 %v15961_v17 }
0x5016   :  { %v15963_v55 = vpop.xlane.xlu0 %15962 }
0x5017   :  { %v15964_v18 = vsub.f32 %v15960_v1, %v15963_v55  ;;  %v19239_v1 = vpack.c.bf16 %v16609_v5, %v16608_v2  ;;  %v16611_v55 = vld [vmem:[%s21887_s3 + $0x6b8] sm:$0xff] }
0x5019   :  { %v15965_v13 = vmul.f32 1.442695, %v15964_v18 }
0x501b   :  { %19504 = vpow2.f32 %v15965_v13 }
0x5025   :  { %v19505_v26 = vpop.eup %19504 }
0x5026   :  { %v15967_v27 = vsel %vm4575_vm13, %v19505_v26, 0.0 }
0x5027   :  { %15968 = vadd.xlane.f32.xlu1 %v15967_v27 }
0x50b4   :  { %v15969_v20 = vpop.xlane.xlu1 %15968 }
0x50b5   :  { %19506 = vrcp.f32 %v15969_v20  ;;  %v17124_v20 = vld [vmem:[%s21889_s4 + $0x52] ss:$0 sm:$0xff] }
0x50bf   :  { %v19507_v23 = vpop.eup %19506 }
0x50c0   :  { %v15971_v32 = vmul.f32 %v19507_v23, %v19505_v26  ;;  %v17123_v26 = vld [vmem:[%s21889_s4 + $0x44] ss:$0 sm:$0xff] }
0x50c2   :  { %18804 = vmatmul.mubr.msk.f32.vlgmr.msra.gmra.mrb[170].mxu1 %vm4664_vm14, %v15971_v32 }
0x50c3   :  { %19222 = vmatpush3.bf16.msra.mxu1 %v19221_v30  ;;  %18819 = vmatprep.mubr.msk.f32.mxu1 %vm19515_vm2, %v19514_v22 }
0x50c4   :  { %19223 = vmatprep.subr.bf16.mxu1 %v19517_v31 }
0x50c7   :  { %19225 = vmatpush3.bf16.msra.mxu1 %v19224_v16 }
0x50c8   :  { %19232 = vmatprep.subr.bf16.mxu1 %v19517_v31 }
0x50ca   :  { %18820 = vmatmul.mubr.msk.f32.vlgmr.msra.gmra.mrb[172].mxu1 %vm37_vm0, %v21539_v46  ;;  %v16203_v46 = vld [vmem:[%s21887_s3 + $0x4b8] sm:$0xff] }
0x50cb   :  { %19234 = vmatpush3.bf16.msra.mxu1 %v19233_v10  ;;  %18841 = vmatprep.mubr.msk.f32.mxu1 %vm19515_vm2, %v19514_v22  ;;  %v19227_v6 = vpack.c.bf16 %v16204_v12, %v16203_v46 }
0x50cc   :  { %19235 = vmatprep.subr.bf16.mxu1 %v19517_v31 }
0x50cf   :  { %19237 = vmatpush3.bf16.msra.mxu1 %v19236_v25 }
0x50d0   :  { %18854 = vmatprep.subr.mxu1 %v19514_v22 }
0x50d2   :  { %18842 = vmatmul.mubr.msk.f32.vlgmr.msra.gmra.mrb[174].mxu1 %vm37_vm0, %v21577_v45 }
0x50d3   :  { %18856 = vmatprep.mubr.msk.f32.mxu1 %vm19515_vm2, %v19514_v22  ;;  %18855 = vmatpush3.msra.mxu1 %v16527_v61 }
0x5195   :  { %v16044_v4 = vpop.f32.mrb[170].mxu1 }
0x5196   :  { %v18805_v34 = vpop.f32.mrb[171].mxu1  ;;  %18809 = vmatmul.mubr.msk.f32.vlgmr.msra.gmra.mrb[166].mxu0 %vm384_vm3, %v16044_v4 }
0x5197   :  { %19228 = vmatpush3.bf16.msra.mxu0 %v19227_v6  ;;  %18830 = vmatprep.mubr.msk.f32.mxu0 %vm19515_vm2, %v19514_v22 }
0x5198   :  { %19229 = vmatprep.subr.bf16.mxu0 %v19517_v31 }
0x519b   :  { %19231 = vmatpush3.bf16.msra.mxu0 %v19230_v39 }
0x519c   :  { %18844 = vmatprep.subr.mxu0 %v19514_v22 }
0x519d   :  { %v16194_v35 = vpop.f32.mrb[172].mxu1 }
0x519e   :  { %18831 = vmatmul.mubr.msk.f32.vlgmr.msra.gmra.mrb[168].mxu0 %vm37_vm0, %v21577_v45  ;;  %v18821_v36 = vpop.f32.mrb[173].mxu1  ;;  %v16202_v49 = vadd.f32 %v17113_v24, %v16194_v35 }
0x519f   :  { %18846 = vmatprep.mubr.msk.f32.mxu0 %vm19515_vm2, %v19514_v22 }
0x51a5   :  { %v16354_v37 = vpop.f32.mrb[174].mxu1 }
0x51a6   :  { %v18843_v48 = vpop.f32.mrb[175].mxu1  ;;  %v16362_v47 = vadd.f32 %v17117_v7, %v16354_v37 }
0x5269   :  { %v16118_v58 = vpop.f32.mrb[166].mxu0 }
0x526a   :  { %v16122_v53 = vadd.f32 %v16118_v58, %v21754_v41  ;;  %v18810_v40 = vpop.f32.mrb[167].mxu0 }
0x5271   :  { %v16274_v42 = vpop.f32.mrb[168].mxu0 }
0x5272   :  { %v16282_v45 = vadd.f32 %v17115_v19, %v16274_v42  ;;  %v18832_v56 = vpop.f32.mrb[169].mxu0 }
0x5274   :  { %18845 = vmatpush3.xpose.msk.msra.mxu0 %vm384_vm3, %v16282_v45 }
0x5275   :  { %18849 = vmatprep.subr.mxu0 %v19514_v22 }
0x5277   :  { %18847 = vmatmul.mubr.msk.f32.vlgmr.msra.gmra.mrb[170].mxu0 %vm384_vm3, %v16202_v49 }
0x5278   :  { %18850 = vmatpush3.msk.msra.mxu0 %vm4668_vm12, %v16362_v47  ;;  %18851 = vmatprep.mubr.msk.f32.mxu0 %vm19515_vm2, %v19514_v22 }
0x5279   :  { %19238 = vmatprep.subr.bf16.mxu0 %v19517_v31 }
0x534a   :  { %v16435_v59 = vpop.f32.mrb[170].mxu0 }
0x534b   :  { %v16439_v60 = vmul.f32 0.35355338, %v16435_v59  ;;  %v18848_v29 = vpop.f32.mrb[171].mxu0 }
0x534d   :  { %v16440_v8 = vsel %vm4575_vm13, %v16439_v60, -inf }
0x534e   :  { %16441 = vmax.xlane.f32.xlu0 %v16440_v8 }
0x53db   :  { %v16442_v41 = vpop.xlane.xlu0 %16441 }
0x53dc   :  { %v16443_v44 = vsub.f32 %v16439_v60, %v16442_v41 }
0x53de   :  { %v16444_v51 = vmul.f32 1.442695, %v16443_v44 }
0x53e0   :  { %19508 = vpow2.f32 %v16444_v51 }
0x53ea   :  { %v19509_v52 = vpop.eup %19508 }
0x53eb   :  { %v16446_v57 = vsel %vm4575_vm13, %v19509_v52, 0.0 }
0x53ec   :  { %16447 = vadd.xlane.f32.xlu1 %v16446_v57 }
0x5479   :  { %v16448_v62 = vpop.xlane.xlu1 %16447 }
0x547a   :  { %19510 = vrcp.f32 %v16448_v62 }
0x5484   :  { %v19511_v15 = vpop.eup %19510 }
0x5485   :  { %v16450_v0 = vmul.f32 %v19511_v15, %v19509_v52 }
0x5487   :  { %18852 = vmatmul.mubr.msk.f32.vlgmr.msra.gmra.mrb[172].mxu0 %vm4664_vm14, %v16450_v0 }
0x5488   :  { %18867 = vmatprep.mubr.msk.f32.mxu0 %vm19515_vm2, %v19514_v22  ;;  %19240 = vmatpush3.bf16.msra.mxu0 %v19239_v1  ;;  %v16610_v22 = vld [vmem:[%s21887_s3 + $0x6b0] sm:$0xff] }
0x5489   :  { %19241 = vmatprep.subr.bf16.mxu0 %v19517_v31  ;;  %v19242_v18 = vpack.c.bf16 %v16611_v55, %v16610_v22 }
0x548c   :  { %19243 = vmatpush3.bf16.msra.mxu0 %v19242_v18 }
0x555a   :  { %v16523_v28 = vpop.f32.mrb[172].mxu0 }
0x555b   :  { %v18853_v17 = vpop.f32.mrb[173].mxu0  ;;  %18857 = vmatmul.mubr.msk.f32.vlgmr.msra.gmra.mrb[176].mxu1 %vm384_vm3, %v16523_v28 }
0x562e   :  { %v16597_v13 = vpop.f32.mrb[176].mxu1 }
0x562f   :  { %v16601_v31 = vadd.f32 %v16597_v13, %v16122_v53  ;;  %v18858_v27 = vpop.f32.mrb[177].mxu1 }
0x5631   :  { %v16607_v11 = vadd.f32 %v17123_v26, %v16601_v31 }
0x5633   :  { %18868 = vmatmul.mubr.msk.f32.vlgmr.msra.gmra.mrb[174].mxu0 %vm37_vm0, %v16607_v11 }
0x5706   :  { %v16686_v21 = vpop.f32.mrb[174].mxu0 }
0x5707   :  { %v16687_v38 = vadd.f32 %v17124_v20, %v16686_v21  ;;  %v18869_v23 = vpop.f32.mrb[175].mxu0 }
0x5709   :  { %16690 = vst [vmem:[%s21892_s5] sm:$0x3] %v16687_v38 }

</bundles_post_ra>
